<compile_context>
chip_gen: v6e
topology: v6e:2x2x1
jax: 0.10.0
libtpu: 0.0.40
codegen_flags: <defaults>
</compile_context>

<pallas_src>
import functools

import jax
import jax.numpy as jnp
import numpy as np
from jax import lax
from jax.experimental import pallas as pl
from jax.experimental.pallas import tpu as pltpu

LRELU_SLOPE = 0.2
BN_EPS = 1e-5

_COMPILER_PARAMS = pltpu.CompilerParams(
    dimension_semantics=("parallel",),
    vmem_limit_bytes=32 << 20,
)


# ----------------------------------------------------------------------------
# Pallas kernels
# ----------------------------------------------------------------------------

def _gemm_bias_lrelu_kernel(x_ref, w_ref, b_ref, o_ref):
    """Single-step full-K GEMM + bias + LeakyReLU(0.2)."""
    y = jnp.dot(x_ref[...], w_ref[...], preferred_element_type=jnp.float32)
    y = y + b_ref[...]
    o_ref[...] = jnp.where(y >= 0.0, y, LRELU_SLOPE * y)


def _gemm_bias_lrelu_bn_kernel(m_real, x_ref, w_ref, b_ref, g_ref, be_ref, o_ref):
    """Full-K GEMM + bias + LeakyReLU + fused training-mode BatchNorm.

    BatchNorm stats are per-channel over the GEMM rows (rows = N*H*W), so a
    channel-tiled grid still sees complete columns.  Variance is two-pass
    (mean first, then E[(y-mean)^2]) to avoid the E[x^2]-E[x]^2 cancellation.
    `m_real` is the number of valid rows (rows >= m_real are zero padding).
    """
    y = jnp.dot(x_ref[...], w_ref[...], preferred_element_type=jnp.float32)
    y = y + b_ref[...]
    y = jnp.where(y >= 0.0, y, LRELU_SLOPE * y)

    m_pad = y.shape[0]
    inv_m = jnp.float32(1.0 / m_real)
    if m_real == m_pad:
        mean = jnp.sum(y, axis=0, keepdims=True) * inv_m
        d = y - mean
        var = jnp.sum(d * d, axis=0, keepdims=True) * inv_m
    else:
        row = lax.broadcasted_iota(jnp.int32, y.shape, 0)
        valid = row < m_real
        mean = jnp.sum(jnp.where(valid, y, 0.0), axis=0, keepdims=True) * inv_m
        d = jnp.where(valid, y - mean, 0.0)
        var = jnp.sum(d * d, axis=0, keepdims=True) * inv_m

    scale = g_ref[...] * lax.rsqrt(var + BN_EPS)
    o_ref[...] = (y - mean) * scale + be_ref[...]


# ----------------------------------------------------------------------------
# pallas_call wrappers
# ----------------------------------------------------------------------------

def _pad_rows(x, mult=8):
    m = x.shape[0]
    mp = ((m + mult - 1) // mult) * mult
    if mp == m:
        return x, m
    return jnp.pad(x, ((0, mp - m), (0, 0))), m


def gemm_bias_lrelu(x, w, b):
    """LeakyReLU_0.2(x @ w + b).  x:(M,K)  w:(K,N)  b:(N,).  Full-K, row-tiled."""
    xp, m = _pad_rows(x)
    mp, k = xp.shape
    n = w.shape[1]

    # Keep a >=2-wide parallel row grid when M is large enough (megacore).
    tm = mp
    for cand in (256, 128):
        if mp % cand == 0 and mp // cand >= 2:
            tm = cand
            break

    out = pl.pallas_call(
        _gemm_bias_lrelu_kernel,
        out_shape=jax.ShapeDtypeStruct((mp, n), jnp.float32),
        grid_spec=pltpu.PrefetchScalarGridSpec(
            num_scalar_prefetch=0,
            grid=(mp // tm,),
            in_specs=[
                pl.BlockSpec((tm, k), lambda i: (i, 0)),
                pl.BlockSpec((k, n), lambda i: (0, 0)),
                pl.BlockSpec((1, n), lambda i: (0, 0)),
            ],
            out_specs=pl.BlockSpec((tm, n), lambda i: (i, 0)),
        ),
        compiler_params=_COMPILER_PARAMS,
    )(xp, w, b.reshape(1, -1))
    return out[:m] if mp != m else out


def gemm_bias_lrelu_bn(x, w, b, gamma, beta):
    """LeakyReLU_0.2(x @ w + b), then training-mode BatchNorm, all in one kernel."""
    xp, m = _pad_rows(x)
    mp, k = xp.shape
    n = w.shape[1]

    # Channel-tile only when it gives a useful 2-wide parallel axis (layers 4/5).
    if n >= 256 and (n // 2) % 128 == 0:
        tn = n // 2
    else:
        tn = n

    kernel = functools.partial(_gemm_bias_lrelu_bn_kernel, m)
    out = pl.pallas_call(
        kernel,
        out_shape=jax.ShapeDtypeStruct((mp, n), jnp.float32),
        grid_spec=pltpu.PrefetchScalarGridSpec(
            num_scalar_prefetch=0,
            grid=(n // tn,),
            in_specs=[
                pl.BlockSpec((mp, k), lambda j: (0, 0)),
                pl.BlockSpec((k, tn), lambda j: (0, j)),
                pl.BlockSpec((1, tn), lambda j: (0, j)),
                pl.BlockSpec((1, tn), lambda j: (0, j)),
                pl.BlockSpec((1, tn), lambda j: (0, j)),
            ],
            out_specs=pl.BlockSpec((mp, tn), lambda j: (0, j)),
        ),
        compiler_params=_COMPILER_PARAMS,
    )(xp, w, b.reshape(1, -1), gamma.reshape(1, -1), beta.reshape(1, -1))
    return out[:m] if mp != m else out


# ----------------------------------------------------------------------------
# Conv glue: im2col (pure-JAX data layout) + Pallas GEMM
# ----------------------------------------------------------------------------

def _im2col(x_nhwc, k=4, s=2, p=1):
    n, h, w, c = x_nhwc.shape
    ho = (h + 2 * p - k) // s + 1
    wo = (w + 2 * p - k) // s + 1
    xp = jnp.pad(x_nhwc, ((0, 0), (p, p), (p, p), (0, 0)))
    cols = []
    for di in range(k):
        for dj in range(k):
            cols.append(xp[:, di:di + s * ho:s, dj:dj + s * wo:s, :])
    patches = jnp.stack(cols, axis=3)                       # (N, Ho, Wo, k*k, C)
    return patches.reshape(n * ho * wo, k * k * c), (n, ho, wo)


def prepare_gemm_params(params):
    """Reshape OIHW conv weights to (kh*kw*Cin, Cout) GEMM matrices ONCE."""
    gp = {}
    for i in range(1, 6):
        w = params[f"w{i}"]
        # (Cout,Cin,kh,kw) -> (kh,kw,Cin,Cout) -> (kh*kw*Cin, Cout); matches im2col order.
        gp[f"w{i}"] = jnp.transpose(w, (2, 3, 1, 0)).reshape(-1, w.shape[0])
        gp[f"b{i}"] = params[f"b{i}"]
        if i >= 2:
            gp[f"g{i}"] = params[f"g{i}"]
            gp[f"be{i}"] = params[f"be{i}"]
    return gp


# ----------------------------------------------------------------------------
# Encoder forward
# ----------------------------------------------------------------------------

def encoder_forward(x_nchw, gp):
    x = jnp.transpose(x_nchw, (0, 2, 3, 1))                 # NCHW -> NHWC

    # layer 1: conv1 + LeakyReLU (no BN)
    patches, (n, ho, wo) = _im2col(x)
    y = gemm_bias_lrelu(patches, gp["w1"], gp["b1"])
    x = y.reshape(n, ho, wo, -1)

    # layers 2..5: conv + LeakyReLU + BatchNorm, fully fused per layer
    for i in (2, 3, 4, 5):
        patches, (n, ho, wo) = _im2col(x)
        y = gemm_bias_lrelu_bn(patches, gp[f"w{i}"], gp[f"b{i}"],
                               gp[f"g{i}"], gp[f"be{i}"])
        x = y.reshape(n, ho, wo, -1)

    return jnp.transpose(x, (0, 3, 1, 2))                   # NHWC -> NCHW


# ----------------------------------------------------------------------------
# Pure-JAX reference (for correctness check)
# ----------------------------------------------------------------------------

def reference_forward(x_nchw, params):
    def conv(x, w, b):
        y = lax.conv_general_dilated(
            x, w, (2, 2), ((1, 1), (1, 1)),
            dimension_numbers=("NCHW", "OIHW", "NCHW"),
            precision=lax.Precision.HIGHEST)
        return y + b[None, :, None, None]

    def lrelu(x):
        return jnp.where(x >= 0, x, LRELU_SLOPE * x)

    def bn(x, g, be, eps=BN_EPS):
        mean = x.mean(axis=(0, 2, 3), keepdims=True)
        var = x.var(axis=(0, 2, 3), keepdims=True)
        return ((x - mean) / jnp.sqrt(var + eps)) * g[None, :, None, None] \
            + be[None, :, None, None]

    x = lrelu(conv(x_nchw, params["w1"], params["b1"]))
    for i in (2, 3, 4, 5):
        x = bn(lrelu(conv(x, params[f"w{i}"], params[f"b{i}"])),
               params[f"g{i}"], params[f"be{i}"])
    return x


# ----------------------------------------------------------------------------
# Parameter init (deterministic, synthetic)
# ----------------------------------------------------------------------------

def init_params(key):
    c_in = [3, 64, 64, 128, 256]   # conv2 in_channels fixed to 64 (see NOTE above)
    c_out = [64, 64, 128, 256, 512]
    keys = jax.random.split(key, 32)
    params, ki = {}, 0
    for i in range(5):
        params[f"w{i+1}"] = 0.05 * jax.random.normal(
            keys[ki], (c_out[i], c_in[i], 4, 4), jnp.float32); ki += 1
        params[f"b{i+1}"] = 0.05 * jax.random.normal(
            keys[ki], (c_out[i],), jnp.float32); ki += 1
        if i >= 1:
            params[f"g{i+1}"] = 1.0 + 0.1 * jax.random.normal(
                keys[ki], (c_out[i],), jnp.float32); ki += 1
            params[f"be{i+1}"] = 0.1 * jax.random.normal(
                keys[ki], (c_out[i],), jnp.float32); ki += 1
    return params


if __name__ == "__main__":
    root = jax.random.PRNGKey(0)
    k_x, k_p = jax.random.split(root)

    # 32x32 input so the 5 stride-2 convs yield a (2, 512, 1, 1) code.
    x = jax.random.normal(k_x, (2, 3, 32, 32), jnp.float32)
    params = init_params(k_p)

    gemm_params = prepare_gemm_params(params)   # one-time weight reshape, off the jit path

    out = jax.jit(encoder_forward)(x, gemm_params)
    out = jax.block_until_ready(out)

    assert out.shape == (2, 512, 1, 1), out.shape

    ref = jax.block_until_ready(jax.jit(reference_forward)(x, params))
    np.testing.assert_allclose(np.asarray(out), np.asarray(ref),
                               rtol=2e-2, atol=2e-2)

    print("KERNEL_OK")
</pallas_src>

<mosaic_0001>
module attributes {stable_mosaic.version = 11 : i64} {
  func.func @_gemm_bias_lrelu_kernel(%arg0: i32, %arg1: memref<256x48xf32, #tpu.memory_space<vmem>>, %arg2: memref<48x64xf32, #tpu.memory_space<vmem>>, %arg3: memref<1x64xf32, #tpu.memory_space<vmem>>, %arg4: memref<256x64xf32, #tpu.memory_space<vmem>>) attributes {dimension_semantics = [#tpu.dimension_semantics<parallel>], iteration_bounds = array<i64: 2>, scalar_prefetch = 0 : i64, scratch_operands = 0 : i64, tpu.core_type = #tpu.core_type<tc>, window_params = [{transform_indices = @transform_0, window_bounds = array<i64: 256, 48>}, {pipeline_mode = #tpu.pipeline_mode<synchronous>, transform_indices = @transform_1, window_bounds = array<i64: 48, 64>}, {pipeline_mode = #tpu.pipeline_mode<synchronous>, transform_indices = @transform_2, window_bounds = array<i64: 1, 64>}, {transform_indices = @transform_3, window_bounds = array<i64: 256, 64>}]} {
    %c0 = arith.constant 0 : index
    %c0_0 = arith.constant 0 : index
    %0 = vector.load %arg1[%c0, %c0_0] : memref<256x48xf32, #tpu.memory_space<vmem>>, vector<256x48xf32>
    %c0_1 = arith.constant 0 : index
    %c0_2 = arith.constant 0 : index
    %1 = vector.load %arg2[%c0_1, %c0_2] : memref<48x64xf32, #tpu.memory_space<vmem>>, vector<48x64xf32>
    %cst = arith.constant dense<0.000000e+00> : vector<256x64xf32>
    %2 = tpu.matmul %0, %1, %cst {dimension_numbers = #tpu.dot_dimension_numbers<[1], [0], [0], [1], [0, 0, 1, 1], [], []>} : vector<256x48xf32>, vector<48x64xf32>, vector<256x64xf32> -> vector<256x64xf32>
    %c0_3 = arith.constant 0 : index
    %c0_4 = arith.constant 0 : index
    %3 = vector.load %arg3[%c0_3, %c0_4] : memref<1x64xf32, #tpu.memory_space<vmem>>, vector<1x64xf32>
    %4 = vector.broadcast %3 : vector<1x64xf32> to vector<256x64xf32>
    %5 = arith.addf %2, %4 : vector<256x64xf32>
    %cst_5 = arith.constant 0.000000e+00 : f32
    %6 = vector.broadcast %cst_5 : f32 to vector<256x64xf32>
    %7 = arith.cmpf oge, %5, %6 : vector<256x64xf32>
    %cst_6 = arith.constant 2.000000e-01 : f32
    %8 = vector.broadcast %cst_6 : f32 to vector<256x64xf32>
    %9 = arith.mulf %8, %5 : vector<256x64xf32>
    %10 = arith.select %7, %5, %9 : vector<256x64xi1>, vector<256x64xf32>
    %c0_7 = arith.constant 0 : index
    %c0_8 = arith.constant 0 : index
    %11 = vector.load %arg4[%c0_7, %c0_8] : memref<256x64xf32, #tpu.memory_space<vmem>>, vector<256x64xf32>
    tpu.vector_store %arg4[%c0_7, %c0_8], %10 {strides = array<i32>} : memref<256x64xf32, #tpu.memory_space<vmem>>, vector<256x64xf32>,
    return
  }
  func.func @transform_0(%arg0: i32) -> (i32, i32) {
    %c0_i32 = arith.constant 0 : i32
    %c0_i32_0 = arith.constant 0 : i32
    return %arg0, %c0_i32 : i32, i32
  }
  func.func @transform_1(%arg0: i32) -> (i32, i32) {
    %c0_i32 = arith.constant 0 : i32
    %c0_i32_0 = arith.constant 0 : i32
    %c0_i32_1 = arith.constant 0 : i32
    return %c0_i32, %c0_i32_0 : i32, i32
  }
  func.func @transform_2(%arg0: i32) -> (i32, i32) {
    %c0_i32 = arith.constant 0 : i32
    %c0_i32_0 = arith.constant 0 : i32
    %c0_i32_1 = arith.constant 0 : i32
    return %c0_i32, %c0_i32_0 : i32, i32
  }
  func.func @transform_3(%arg0: i32) -> (i32, i32) {
    %c0_i32 = arith.constant 0 : i32
    %c0_i32_0 = arith.constant 0 : i32
    return %arg0, %c0_i32 : i32, i32
  }
}

module attributes {stable_mosaic.version = 11 : i64} {
  func.func @_gemm_bias_lrelu_bn_kernel(%arg0: i32, %arg1: memref<128x1024xf32, #tpu.memory_space<vmem>>, %arg2: memref<1024x64xf32, #tpu.memory_space<vmem>>, %arg3: memref<1x64xf32, #tpu.memory_space<vmem>>, %arg4: memref<1x64xf32, #tpu.memory_space<vmem>>, %arg5: memref<1x64xf32, #tpu.memory_space<vmem>>, %arg6: memref<128x64xf32, #tpu.memory_space<vmem>>) attributes {dimension_semantics = [#tpu.dimension_semantics<parallel>], iteration_bounds = array<i64: 1>, scalar_prefetch = 0 : i64, scratch_operands = 0 : i64, tpu.core_type = #tpu.core_type<tc>, window_params = [{pipeline_mode = #tpu.pipeline_mode<synchronous>, transform_indices = @transform_0, window_bounds = array<i64: 128, 1024>}, {transform_indices = @transform_1, window_bounds = array<i64: 1024, 64>}, {transform_indices = @transform_2, window_bounds = array<i64: 1, 64>}, {transform_indices = @transform_3, window_bounds = array<i64: 1, 64>}, {transform_indices = @transform_4, window_bounds = array<i64: 1, 64>}, {transform_indices = @transform_5, window_bounds = array<i64: 128, 64>}]} {
    %c0 = arith.constant 0 : index
    %c0_0 = arith.constant 0 : index
    %0 = vector.load %arg1[%c0, %c0_0] : memref<128x1024xf32, #tpu.memory_space<vmem>>, vector<128x1024xf32>
    %c0_1 = arith.constant 0 : index
    %c0_2 = arith.constant 0 : index
    %1 = vector.load %arg2[%c0_1, %c0_2] : memref<1024x64xf32, #tpu.memory_space<vmem>>, vector<1024x64xf32>
    %cst = arith.constant dense<0.000000e+00> : vector<128x64xf32>
    %2 = tpu.matmul %0, %1, %cst {dimension_numbers = #tpu.dot_dimension_numbers<[1], [0], [0], [1], [0, 0, 1, 1], [], []>} : vector<128x1024xf32>, vector<1024x64xf32>, vector<128x64xf32> -> vector<128x64xf32>
    %c0_3 = arith.constant 0 : index
    %c0_4 = arith.constant 0 : index
    %3 = vector.load %arg3[%c0_3, %c0_4] : memref<1x64xf32, #tpu.memory_space<vmem>>, vector<1x64xf32>
    %4 = vector.broadcast %3 : vector<1x64xf32> to vector<128x64xf32>
    %5 = arith.addf %2, %4 : vector<128x64xf32>
    %cst_5 = arith.constant 0.000000e+00 : f32
    %6 = vector.broadcast %cst_5 : f32 to vector<128x64xf32>
    %7 = arith.cmpf oge, %5, %6 : vector<128x64xf32>
    %cst_6 = arith.constant 2.000000e-01 : f32
    %8 = vector.broadcast %cst_6 : f32 to vector<128x64xf32>
    %9 = arith.mulf %8, %5 : vector<128x64xf32>
    %10 = arith.select %7, %5, %9 : vector<128x64xi1>, vector<128x64xf32>
    %cst_7 = arith.constant dense<0.000000e+00> : vector<64xf32>
    %11 = vector.multi_reduction <add>, %10, %cst_7 [0] : vector<128x64xf32> to vector<64xf32>
    %12 = vector.shape_cast %11 : vector<64xf32> to vector<1x64xf32>
    %cst_8 = arith.constant 7.812500e-03 : f32
    %13 = vector.broadcast %cst_8 : f32 to vector<1x64xf32>
    %14 = arith.mulf %12, %13 : vector<1x64xf32>
    %15 = vector.broadcast %14 : vector<1x64xf32> to vector<128x64xf32>
    %16 = arith.subf %10, %15 : vector<128x64xf32>
    %17 = arith.mulf %16, %16 : vector<128x64xf32>
    %cst_9 = arith.constant dense<0.000000e+00> : vector<64xf32>
    %18 = vector.multi_reduction <add>, %17, %cst_9 [0] : vector<128x64xf32> to vector<64xf32>
    %19 = vector.shape_cast %18 : vector<64xf32> to vector<1x64xf32>
    %cst_10 = arith.constant 7.812500e-03 : f32
    %20 = vector.broadcast %cst_10 : f32 to vector<1x64xf32>
    %21 = arith.mulf %19, %20 : vector<1x64xf32>
    %c0_11 = arith.constant 0 : index
    %c0_12 = arith.constant 0 : index
    %22 = vector.load %arg4[%c0_11, %c0_12] : memref<1x64xf32, #tpu.memory_space<vmem>>, vector<1x64xf32>
    %cst_13 = arith.constant 9.99999974E-6 : f32
    %23 = vector.broadcast %cst_13 : f32 to vector<1x64xf32>
    %24 = arith.addf %21, %23 : vector<1x64xf32>
    %25 = math.rsqrt %24 : vector<1x64xf32>
    %26 = arith.mulf %22, %25 : vector<1x64xf32>
    %27 = vector.broadcast %14 : vector<1x64xf32> to vector<128x64xf32>
    %28 = arith.subf %10, %27 : vector<128x64xf32>
    %29 = vector.broadcast %26 : vector<1x64xf32> to vector<128x64xf32>
    %30 = arith.mulf %28, %29 : vector<128x64xf32>
    %c0_14 = arith.constant 0 : index
    %c0_15 = arith.constant 0 : index
    %31 = vector.load %arg5[%c0_14, %c0_15] : memref<1x64xf32, #tpu.memory_space<vmem>>, vector<1x64xf32>
    %32 = vector.broadcast %31 : vector<1x64xf32> to vector<128x64xf32>
    %33 = arith.addf %30, %32 : vector<128x64xf32>
    %c0_16 = arith.constant 0 : index
    %c0_17 = arith.constant 0 : index
    %34 = vector.load %arg6[%c0_16, %c0_17] : memref<128x64xf32, #tpu.memory_space<vmem>>, vector<128x64xf32>
    tpu.vector_store %arg6[%c0_16, %c0_17], %33 {strides = array<i32>} : memref<128x64xf32, #tpu.memory_space<vmem>>, vector<128x64xf32>,
    return
  }
  func.func @transform_0(%arg0: i32) -> (i32, i32) {
    %c0_i32 = arith.constant 0 : i32
    %c0_i32_0 = arith.constant 0 : i32
    %c0_i32_1 = arith.constant 0 : i32
    return %c0_i32, %c0_i32_0 : i32, i32
  }
  func.func @transform_1(%arg0: i32) -> (i32, i32) {
    %c0_i32 = arith.constant 0 : i32
    %c0_i32_0 = arith.constant 0 : i32
    return %c0_i32, %arg0 : i32, i32
  }
  func.func @transform_2(%arg0: i32) -> (i32, i32) {
    %c0_i32 = arith.constant 0 : i32
    %c0_i32_0 = arith.constant 0 : i32
    return %c0_i32, %arg0 : i32, i32
  }
  func.func @transform_3(%arg0: i32) -> (i32, i32) {
    %c0_i32 = arith.constant 0 : i32
    %c0_i32_0 = arith.constant 0 : i32
    return %c0_i32, %arg0 : i32, i32
  }
  func.func @transform_4(%arg0: i32) -> (i32, i32) {
    %c0_i32 = arith.constant 0 : i32
    %c0_i32_0 = arith.constant 0 : i32
    return %c0_i32, %arg0 : i32, i32
  }
  func.func @transform_5(%arg0: i32) -> (i32, i32) {
    %c0_i32 = arith.constant 0 : i32
    %c0_i32_0 = arith.constant 0 : i32
    return %c0_i32, %arg0 : i32, i32
  }
}

module attributes {stable_mosaic.version = 11 : i64} {
  func.func @_gemm_bias_lrelu_bn_kernel(%arg0: i32, %arg1: memref<32x1024xf32, #tpu.memory_space<vmem>>, %arg2: memref<1024x128xf32, #tpu.memory_space<vmem>>, %arg3: memref<1x128xf32, #tpu.memory_space<vmem>>, %arg4: memref<1x128xf32, #tpu.memory_space<vmem>>, %arg5: memref<1x128xf32, #tpu.memory_space<vmem>>, %arg6: memref<32x128xf32, #tpu.memory_space<vmem>>) attributes {dimension_semantics = [#tpu.dimension_semantics<parallel>], iteration_bounds = array<i64: 1>, scalar_prefetch = 0 : i64, scratch_operands = 0 : i64, tpu.core_type = #tpu.core_type<tc>, window_params = [{pipeline_mode = #tpu.pipeline_mode<synchronous>, transform_indices = @transform_0, window_bounds = array<i64: 32, 1024>}, {transform_indices = @transform_1, window_bounds = array<i64: 1024, 128>}, {transform_indices = @transform_2, window_bounds = array<i64: 1, 128>}, {transform_indices = @transform_3, window_bounds = array<i64: 1, 128>}, {transform_indices = @transform_4, window_bounds = array<i64: 1, 128>}, {transform_indices = @transform_5, window_bounds = array<i64: 32, 128>}]} {
    %c0 = arith.constant 0 : index
    %c0_0 = arith.constant 0 : index
    %0 = vector.load %arg1[%c0, %c0_0] : memref<32x1024xf32, #tpu.memory_space<vmem>>, vector<32x1024xf32>
    %c0_1 = arith.constant 0 : index
    %c0_2 = arith.constant 0 : index
    %1 = vector.load %arg2[%c0_1, %c0_2] : memref<1024x128xf32, #tpu.memory_space<vmem>>, vector<1024x128xf32>
    %cst = arith.constant dense<0.000000e+00> : vector<32x128xf32>
    %2 = tpu.matmul %0, %1, %cst {dimension_numbers = #tpu.dot_dimension_numbers<[1], [0], [0], [1], [0, 0, 1, 1], [], []>} : vector<32x1024xf32>, vector<1024x128xf32>, vector<32x128xf32> -> vector<32x128xf32>
    %c0_3 = arith.constant 0 : index
    %c0_4 = arith.constant 0 : index
    %3 = vector.load %arg3[%c0_3, %c0_4] : memref<1x128xf32, #tpu.memory_space<vmem>>, vector<1x128xf32>
    %4 = vector.broadcast %3 : vector<1x128xf32> to vector<32x128xf32>
    %5 = arith.addf %2, %4 : vector<32x128xf32>
    %cst_5 = arith.constant 0.000000e+00 : f32
    %6 = vector.broadcast %cst_5 : f32 to vector<32x128xf32>
    %7 = arith.cmpf oge, %5, %6 : vector<32x128xf32>
    %cst_6 = arith.constant 2.000000e-01 : f32
    %8 = vector.broadcast %cst_6 : f32 to vector<32x128xf32>
    %9 = arith.mulf %8, %5 : vector<32x128xf32>
    %10 = arith.select %7, %5, %9 : vector<32x128xi1>, vector<32x128xf32>
    %cst_7 = arith.constant dense<0.000000e+00> : vector<128xf32>
    %11 = vector.multi_reduction <add>, %10, %cst_7 [0] : vector<32x128xf32> to vector<128xf32>
    %12 = vector.shape_cast %11 : vector<128xf32> to vector<1x128xf32>
    %cst_8 = arith.constant 3.125000e-02 : f32
    %13 = vector.broadcast %cst_8 : f32 to vector<1x128xf32>
    %14 = arith.mulf %12, %13 : vector<1x128xf32>
    %15 = vector.broadcast %14 : vector<1x128xf32> to vector<32x128xf32>
    %16 = arith.subf %10, %15 : vector<32x128xf32>
    %17 = arith.mulf %16, %16 : vector<32x128xf32>
    %cst_9 = arith.constant dense<0.000000e+00> : vector<128xf32>
    %18 = vector.multi_reduction <add>, %17, %cst_9 [0] : vector<32x128xf32> to vector<128xf32>
    %19 = vector.shape_cast %18 : vector<128xf32> to vector<1x128xf32>
    %cst_10 = arith.constant 3.125000e-02 : f32
    %20 = vector.broadcast %cst_10 : f32 to vector<1x128xf32>
    %21 = arith.mulf %19, %20 : vector<1x128xf32>
    %c0_11 = arith.constant 0 : index
    %c0_12 = arith.constant 0 : index
    %22 = vector.load %arg4[%c0_11, %c0_12] : memref<1x128xf32, #tpu.memory_space<vmem>>, vector<1x128xf32>
    %cst_13 = arith.constant 9.99999974E-6 : f32
    %23 = vector.broadcast %cst_13 : f32 to vector<1x128xf32>
    %24 = arith.addf %21, %23 : vector<1x128xf32>
    %25 = math.rsqrt %24 : vector<1x128xf32>
    %26 = arith.mulf %22, %25 : vector<1x128xf32>
    %27 = vector.broadcast %14 : vector<1x128xf32> to vector<32x128xf32>
    %28 = arith.subf %10, %27 : vector<32x128xf32>
    %29 = vector.broadcast %26 : vector<1x128xf32> to vector<32x128xf32>
    %30 = arith.mulf %28, %29 : vector<32x128xf32>
    %c0_14 = arith.constant 0 : index
    %c0_15 = arith.constant 0 : index
    %31 = vector.load %arg5[%c0_14, %c0_15] : memref<1x128xf32, #tpu.memory_space<vmem>>, vector<1x128xf32>
    %32 = vector.broadcast %31 : vector<1x128xf32> to vector<32x128xf32>
    %33 = arith.addf %30, %32 : vector<32x128xf32>
    %c0_16 = arith.constant 0 : index
    %c0_17 = arith.constant 0 : index
    %34 = vector.load %arg6[%c0_16, %c0_17] : memref<32x128xf32, #tpu.memory_space<vmem>>, vector<32x128xf32>
    tpu.vector_store %arg6[%c0_16, %c0_17], %33 {strides = array<i32>} : memref<32x128xf32, #tpu.memory_space<vmem>>, vector<32x128xf32>,
    return
  }
  func.func @transform_0(%arg0: i32) -> (i32, i32) {
    %c0_i32 = arith.constant 0 : i32
    %c0_i32_0 = arith.constant 0 : i32
    %c0_i32_1 = arith.constant 0 : i32
    return %c0_i32, %c0_i32_0 : i32, i32
  }
  func.func @transform_1(%arg0: i32) -> (i32, i32) {
    %c0_i32 = arith.constant 0 : i32
    %c0_i32_0 = arith.constant 0 : i32
    return %c0_i32, %arg0 : i32, i32
  }
  func.func @transform_2(%arg0: i32) -> (i32, i32) {
    %c0_i32 = arith.constant 0 : i32
    %c0_i32_0 = arith.constant 0 : i32
    return %c0_i32, %arg0 : i32, i32
  }
  func.func @transform_3(%arg0: i32) -> (i32, i32) {
    %c0_i32 = arith.constant 0 : i32
    %c0_i32_0 = arith.constant 0 : i32
    return %c0_i32, %arg0 : i32, i32
  }
  func.func @transform_4(%arg0: i32) -> (i32, i32) {
    %c0_i32 = arith.constant 0 : i32
    %c0_i32_0 = arith.constant 0 : i32
    return %c0_i32, %arg0 : i32, i32
  }
  func.func @transform_5(%arg0: i32) -> (i32, i32) {
    %c0_i32 = arith.constant 0 : i32
    %c0_i32_0 = arith.constant 0 : i32
    return %c0_i32, %arg0 : i32, i32
  }
}

module attributes {stable_mosaic.version = 11 : i64} {
  func.func @_gemm_bias_lrelu_bn_kernel(%arg0: i32, %arg1: memref<8x2048xf32, #tpu.memory_space<vmem>>, %arg2: memref<2048x128xf32, #tpu.memory_space<vmem>>, %arg3: memref<1x128xf32, #tpu.memory_space<vmem>>, %arg4: memref<1x128xf32, #tpu.memory_space<vmem>>, %arg5: memref<1x128xf32, #tpu.memory_space<vmem>>, %arg6: memref<8x128xf32, #tpu.memory_space<vmem>>) attributes {dimension_semantics = [#tpu.dimension_semantics<parallel>], iteration_bounds = array<i64: 2>, scalar_prefetch = 0 : i64, scratch_operands = 0 : i64, tpu.core_type = #tpu.core_type<tc>, window_params = [{pipeline_mode = #tpu.pipeline_mode<synchronous>, transform_indices = @transform_0, window_bounds = array<i64: 8, 2048>}, {transform_indices = @transform_1, window_bounds = array<i64: 2048, 128>}, {transform_indices = @transform_2, window_bounds = array<i64: 1, 128>}, {transform_indices = @transform_3, window_bounds = array<i64: 1, 128>}, {transform_indices = @transform_4, window_bounds = array<i64: 1, 128>}, {transform_indices = @transform_5, window_bounds = array<i64: 8, 128>}]} {
    %c0 = arith.constant 0 : index
    %c0_0 = arith.constant 0 : index
    %0 = vector.load %arg1[%c0, %c0_0] : memref<8x2048xf32, #tpu.memory_space<vmem>>, vector<8x2048xf32>
    %c0_1 = arith.constant 0 : index
    %c0_2 = arith.constant 0 : index
    %1 = vector.load %arg2[%c0_1, %c0_2] : memref<2048x128xf32, #tpu.memory_space<vmem>>, vector<2048x128xf32>
    %cst = arith.constant dense<0.000000e+00> : vector<8x128xf32>
    %2 = tpu.matmul %0, %1, %cst {dimension_numbers = #tpu.dot_dimension_numbers<[1], [0], [0], [1], [0, 0, 1, 1], [], []>} : vector<8x2048xf32>, vector<2048x128xf32>, vector<8x128xf32> -> vector<8x128xf32>
    %c0_3 = arith.constant 0 : index
    %c0_4 = arith.constant 0 : index
    %3 = vector.load %arg3[%c0_3, %c0_4] : memref<1x128xf32, #tpu.memory_space<vmem>>, vector<1x128xf32>
    %4 = vector.broadcast %3 : vector<1x128xf32> to vector<8x128xf32>
    %5 = arith.addf %2, %4 : vector<8x128xf32>
    %cst_5 = arith.constant 0.000000e+00 : f32
    %6 = vector.broadcast %cst_5 : f32 to vector<8x128xf32>
    %7 = arith.cmpf oge, %5, %6 : vector<8x128xf32>
    %cst_6 = arith.constant 2.000000e-01 : f32
    %8 = vector.broadcast %cst_6 : f32 to vector<8x128xf32>
    %9 = arith.mulf %8, %5 : vector<8x128xf32>
    %10 = arith.select %7, %5, %9 : vector<8x128xi1>, vector<8x128xf32>
    %cst_7 = arith.constant dense<0.000000e+00> : vector<128xf32>
    %11 = vector.multi_reduction <add>, %10, %cst_7 [0] : vector<8x128xf32> to vector<128xf32>
    %12 = vector.shape_cast %11 : vector<128xf32> to vector<1x128xf32>
    %cst_8 = arith.constant 1.250000e-01 : f32
    %13 = vector.broadcast %cst_8 : f32 to vector<1x128xf32>
    %14 = arith.mulf %12, %13 : vector<1x128xf32>
    %15 = vector.broadcast %14 : vector<1x128xf32> to vector<8x128xf32>
    %16 = arith.subf %10, %15 : vector<8x128xf32>
    %17 = arith.mulf %16, %16 : vector<8x128xf32>
    %cst_9 = arith.constant dense<0.000000e+00> : vector<128xf32>
    %18 = vector.multi_reduction <add>, %17, %cst_9 [0] : vector<8x128xf32> to vector<128xf32>
    %19 = vector.shape_cast %18 : vector<128xf32> to vector<1x128xf32>
    %cst_10 = arith.constant 1.250000e-01 : f32
    %20 = vector.broadcast %cst_10 : f32 to vector<1x128xf32>
    %21 = arith.mulf %19, %20 : vector<1x128xf32>
    %c0_11 = arith.constant 0 : index
    %c0_12 = arith.constant 0 : index
    %22 = vector.load %arg4[%c0_11, %c0_12] : memref<1x128xf32, #tpu.memory_space<vmem>>, vector<1x128xf32>
    %cst_13 = arith.constant 9.99999974E-6 : f32
    %23 = vector.broadcast %cst_13 : f32 to vector<1x128xf32>
    %24 = arith.addf %21, %23 : vector<1x128xf32>
    %25 = math.rsqrt %24 : vector<1x128xf32>
    %26 = arith.mulf %22, %25 : vector<1x128xf32>
    %27 = vector.broadcast %14 : vector<1x128xf32> to vector<8x128xf32>
    %28 = arith.subf %10, %27 : vector<8x128xf32>
    %29 = vector.broadcast %26 : vector<1x128xf32> to vector<8x128xf32>
    %30 = arith.mulf %28, %29 : vector<8x128xf32>
    %c0_14 = arith.constant 0 : index
    %c0_15 = arith.constant 0 : index
    %31 = vector.load %arg5[%c0_14, %c0_15] : memref<1x128xf32, #tpu.memory_space<vmem>>, vector<1x128xf32>
    %32 = vector.broadcast %31 : vector<1x128xf32> to vector<8x128xf32>
    %33 = arith.addf %30, %32 : vector<8x128xf32>
    %c0_16 = arith.constant 0 : index
    %c0_17 = arith.constant 0 : index
    %34 = vector.load %arg6[%c0_16, %c0_17] : memref<8x128xf32, #tpu.memory_space<vmem>>, vector<8x128xf32>
    tpu.vector_store %arg6[%c0_16, %c0_17], %33 {strides = array<i32>} : memref<8x128xf32, #tpu.memory_space<vmem>>, vector<8x128xf32>,
    return
  }
  func.func @transform_0(%arg0: i32) -> (i32, i32) {
    %c0_i32 = arith.constant 0 : i32
    %c0_i32_0 = arith.constant 0 : i32
    %c0_i32_1 = arith.constant 0 : i32
    return %c0_i32, %c0_i32_0 : i32, i32
  }
  func.func @transform_1(%arg0: i32) -> (i32, i32) {
    %c0_i32 = arith.constant 0 : i32
    %c0_i32_0 = arith.constant 0 : i32
    return %c0_i32, %arg0 : i32, i32
  }
  func.func @transform_2(%arg0: i32) -> (i32, i32) {
    %c0_i32 = arith.constant 0 : i32
    %c0_i32_0 = arith.constant 0 : i32
    return %c0_i32, %arg0 : i32, i32
  }
  func.func @transform_3(%arg0: i32) -> (i32, i32) {
    %c0_i32 = arith.constant 0 : i32
    %c0_i32_0 = arith.constant 0 : i32
    return %c0_i32, %arg0 : i32, i32
  }
  func.func @transform_4(%arg0: i32) -> (i32, i32) {
    %c0_i32 = arith.constant 0 : i32
    %c0_i32_0 = arith.constant 0 : i32
    return %c0_i32, %arg0 : i32, i32
  }
  func.func @transform_5(%arg0: i32) -> (i32, i32) {
    %c0_i32 = arith.constant 0 : i32
    %c0_i32_0 = arith.constant 0 : i32
    return %c0_i32, %arg0 : i32, i32
  }
}

module attributes {stable_mosaic.version = 11 : i64} {
  func.func @_gemm_bias_lrelu_bn_kernel(%arg0: i32, %arg1: memref<8x4096xf32, #tpu.memory_space<vmem>>, %arg2: memref<4096x256xf32, #tpu.memory_space<vmem>>, %arg3: memref<1x256xf32, #tpu.memory_space<vmem>>, %arg4: memref<1x256xf32, #tpu.memory_space<vmem>>, %arg5: memref<1x256xf32, #tpu.memory_space<vmem>>, %arg6: memref<8x256xf32, #tpu.memory_space<vmem>>) attributes {dimension_semantics = [#tpu.dimension_semantics<parallel>], iteration_bounds = array<i64: 2>, scalar_prefetch = 0 : i64, scratch_operands = 0 : i64, tpu.core_type = #tpu.core_type<tc>, window_params = [{pipeline_mode = #tpu.pipeline_mode<synchronous>, transform_indices = @transform_0, window_bounds = array<i64: 8, 4096>}, {transform_indices = @transform_1, window_bounds = array<i64: 4096, 256>}, {transform_indices = @transform_2, window_bounds = array<i64: 1, 256>}, {transform_indices = @transform_3, window_bounds = array<i64: 1, 256>}, {transform_indices = @transform_4, window_bounds = array<i64: 1, 256>}, {transform_indices = @transform_5, window_bounds = array<i64: 8, 256>}]} {
    %c0 = arith.constant 0 : index
    %c0_0 = arith.constant 0 : index
    %0 = vector.load %arg1[%c0, %c0_0] : memref<8x4096xf32, #tpu.memory_space<vmem>>, vector<8x4096xf32>
    %c0_1 = arith.constant 0 : index
    %c0_2 = arith.constant 0 : index
    %1 = vector.load %arg2[%c0_1, %c0_2] : memref<4096x256xf32, #tpu.memory_space<vmem>>, vector<4096x256xf32>
    %cst = arith.constant dense<0.000000e+00> : vector<8x256xf32>
    %2 = tpu.matmul %0, %1, %cst {dimension_numbers = #tpu.dot_dimension_numbers<[1], [0], [0], [1], [0, 0, 1, 1], [], []>} : vector<8x4096xf32>, vector<4096x256xf32>, vector<8x256xf32> -> vector<8x256xf32>
    %c0_3 = arith.constant 0 : index
    %c0_4 = arith.constant 0 : index
    %3 = vector.load %arg3[%c0_3, %c0_4] : memref<1x256xf32, #tpu.memory_space<vmem>>, vector<1x256xf32>
    %4 = vector.broadcast %3 : vector<1x256xf32> to vector<8x256xf32>
    %5 = arith.addf %2, %4 : vector<8x256xf32>
    %cst_5 = arith.constant 0.000000e+00 : f32
    %6 = vector.broadcast %cst_5 : f32 to vector<8x256xf32>
    %7 = arith.cmpf oge, %5, %6 : vector<8x256xf32>
    %cst_6 = arith.constant 2.000000e-01 : f32
    %8 = vector.broadcast %cst_6 : f32 to vector<8x256xf32>
    %9 = arith.mulf %8, %5 : vector<8x256xf32>
    %10 = arith.select %7, %5, %9 : vector<8x256xi1>, vector<8x256xf32>
    %11 = tpu.iota {dimensions = array<i32: 0>} : vector<8x256xi32>
    %c2_i32 = arith.constant 2 : i32
    %12 = vector.broadcast %c2_i32 : i32 to vector<8x256xi32>
    %13 = arith.cmpi slt, %11, %12 : vector<8x256xi32>
    %cst_7 = arith.constant 0.000000e+00 : f32
    %14 = vector.broadcast %cst_7 : f32 to vector<8x256xf32>
    %15 = arith.select %13, %10, %14 : vector<8x256xi1>, vector<8x256xf32>
    %cst_8 = arith.constant dense<0.000000e+00> : vector<256xf32>
    %16 = vector.multi_reduction <add>, %15, %cst_8 [0] : vector<8x256xf32> to vector<256xf32>
    %17 = vector.shape_cast %16 : vector<256xf32> to vector<1x256xf32>
    %cst_9 = arith.constant 5.000000e-01 : f32
    %18 = vector.broadcast %cst_9 : f32 to vector<1x256xf32>
    %19 = arith.mulf %17, %18 : vector<1x256xf32>
    %20 = vector.broadcast %19 : vector<1x256xf32> to vector<8x256xf32>
    %21 = arith.subf %10, %20 : vector<8x256xf32>
    %cst_10 = arith.constant 0.000000e+00 : f32
    %22 = vector.broadcast %cst_10 : f32 to vector<8x256xf32>
    %23 = arith.select %13, %21, %22 : vector<8x256xi1>, vector<8x256xf32>
    %24 = arith.mulf %23, %23 : vector<8x256xf32>
    %cst_11 = arith.constant dense<0.000000e+00> : vector<256xf32>
    %25 = vector.multi_reduction <add>, %24, %cst_11 [0] : vector<8x256xf32> to vector<256xf32>
    %26 = vector.shape_cast %25 : vector<256xf32> to vector<1x256xf32>
    %cst_12 = arith.constant 5.000000e-01 : f32
    %27 = vector.broadcast %cst_12 : f32 to vector<1x256xf32>
    %28 = arith.mulf %26, %27 : vector<1x256xf32>
    %c0_13 = arith.constant 0 : index
    %c0_14 = arith.constant 0 : index
    %29 = vector.load %arg4[%c0_13, %c0_14] : memref<1x256xf32, #tpu.memory_space<vmem>>, vector<1x256xf32>
    %cst_15 = arith.constant 9.99999974E-6 : f32
    %30 = vector.broadcast %cst_15 : f32 to vector<1x256xf32>
    %31 = arith.addf %28, %30 : vector<1x256xf32>
    %32 = math.rsqrt %31 : vector<1x256xf32>
    %33 = arith.mulf %29, %32 : vector<1x256xf32>
    %34 = vector.broadcast %19 : vector<1x256xf32> to vector<8x256xf32>
    %35 = arith.subf %10, %34 : vector<8x256xf32>
    %36 = vector.broadcast %33 : vector<1x256xf32> to vector<8x256xf32>
    %37 = arith.mulf %35, %36 : vector<8x256xf32>
    %c0_16 = arith.constant 0 : index
    %c0_17 = arith.constant 0 : index
    %38 = vector.load %arg5[%c0_16, %c0_17] : memref<1x256xf32, #tpu.memory_space<vmem>>, vector<1x256xf32>
    %39 = vector.broadcast %38 : vector<1x256xf32> to vector<8x256xf32>
    %40 = arith.addf %37, %39 : vector<8x256xf32>
    %c0_18 = arith.constant 0 : index
    %c0_19 = arith.constant 0 : index
    %41 = vector.load %arg6[%c0_18, %c0_19] : memref<8x256xf32, #tpu.memory_space<vmem>>, vector<8x256xf32>
    tpu.vector_store %arg6[%c0_18, %c0_19], %40 {strides = array<i32>} : memref<8x256xf32, #tpu.memory_space<vmem>>, vector<8x256xf32>,
    return
  }
  func.func @transform_0(%arg0: i32) -> (i32, i32) {
    %c0_i32 = arith.constant 0 : i32
    %c0_i32_0 = arith.constant 0 : i32
    %c0_i32_1 = arith.constant 0 : i32
    return %c0_i32, %c0_i32_0 : i32, i32
  }
  func.func @transform_1(%arg0: i32) -> (i32, i32) {
    %c0_i32 = arith.constant 0 : i32
    %c0_i32_0 = arith.constant 0 : i32
    return %c0_i32, %arg0 : i32, i32
  }
  func.func @transform_2(%arg0: i32) -> (i32, i32) {
    %c0_i32 = arith.constant 0 : i32
    %c0_i32_0 = arith.constant 0 : i32
    return %c0_i32, %arg0 : i32, i32
  }
  func.func @transform_3(%arg0: i32) -> (i32, i32) {
    %c0_i32 = arith.constant 0 : i32
    %c0_i32_0 = arith.constant 0 : i32
    return %c0_i32, %arg0 : i32, i32
  }
  func.func @transform_4(%arg0: i32) -> (i32, i32) {
    %c0_i32 = arith.constant 0 : i32
    %c0_i32_0 = arith.constant 0 : i32
    return %c0_i32, %arg0 : i32, i32
  }
  func.func @transform_5(%arg0: i32) -> (i32, i32) {
    %c0_i32 = arith.constant 0 : i32
    %c0_i32_0 = arith.constant 0 : i32
    return %c0_i32, %arg0 : i32, i32
  }
}

</mosaic_0001>

<bundles_post_ra>
// kernel: encoder_forward.5
= control target key start
LH: loop header
LB: loop body
LE: loop exit
PB: predicated region body
PF: predicated region fallthrough
CT: control target
= control target key end

     0   :  { %8 = vsyncpa [#allocation3], 0  ;;  %s1295_s0 = inlined_call_operand.vmem [shape: f32[512,48], index: 0, kind: input, shape index: {}]   ;;  %s1296_s1 = inlined_call_operand.hbm [shape: f32[48,64], index: 1, kind: input, shape index: {}]   ;;  %s1297_s2 = inlined_call_operand.hbm [shape: f32[1,64], index: 2, kind: input, shape index: {}]   ;;  %s1298_s3 = inlined_call_operand.vmem [shape: f32[512,64], index: 3, kind: output, shape index: {}]  }
   0x1   :  { %9 = vsyncpa [#allocation5], 0  ;;  %s1057_s12 = smov 0  }
   0x2 LB: > { %s776_s13 = sadd.s32 4294967295, %s1031_s12   ;;  %p778_p0 = scmp.ge.s32.totalorder %s1031_s12, 1  ;;  %s1031_s12 = sphi %s1057_s12, %s15_s12  }
   0x3   : > { %p114_p1 = scmp.lt.s32.totalorder %s1031_s12, 3  ;;  %s1033_s14 = smov [#allocation2]  }
   0x4   : > { %s126_s15 = sshll.u32 %s1033_s14, 4  ;;  %p1071_p3 = scmp.eq.s32.totalorder %s776_s13, 0  ;;  %s127_s15 = int_to_ptr.vmem [resolvable:$true] %s126_s15 }
   0x5   : > { %p1065_p2 = pnand %p778_p0, %p114_p1  ;;  %s1034_s18 = smov [#allocation4]  }
   0x6   : > { %s140_s19 = sshll.u32 %s1034_s18, 4  ;;  %s976_s21 = scalar_lea.vmem %s127_s15, 768  ;;  %s141_s19 = int_to_ptr.vmem [resolvable:$true] %s140_s19 }
   0x7   : > { %p942_p4 = pneg %p1065_p2  ;;  %p977_p7 = scmp.ne.s32.totalorder %s127_s15, %s976_s21 }
   0x8   : > { %p984_p10 = scmp.lt.s32.totalorder %s127_s15, %s127_s15  ;;  %p985_p11 = scmp.lt.s32.totalorder %s976_s21, %s976_s21 }
   0x9   : > { %p1079_p5 = pnand %p1071_p3, %p942_p4 }
   0xa   : > { %p986_p12 = por %p985_p11, %p984_p10 }
   0xb   : > { %p967_p6 = pneg %p1079_p5 }
   0xd   : > { %p979_p8 = pnand %p977_p7, %p967_p6 }
   0xf   : > { %p980_p9 = pneg %p979_p8 }
  0x11   : > { %p987_p13 = pnand %p986_p12, %p980_p9 }
  0x13   : > { %990 = shalt.err (!%p987_p13)
}
  0x14   : > { %s1035_s22 = smov 128   ;;  %s1036_s23 = smov 8  }
  0x15   : > { %945 = dma.hbm_to_vmem [thread:$0]  (!%p1079_p5), %s1296_s1, 768, %s127_s15, [#allocation3], %s1035_s22, %s1035_s22, %s1036_s23  }
  0x16   : > { %s1002_s26 = scalar_lea.vmem %s141_s19, 16  ;;  %s1009_s27 = scalar_lea.vmem %s141_s19, 32 }
  0x17   : > { %p1003_p0 = scmp.ne.s32.totalorder %s141_s19, %s1002_s26  ;;  %p1010_p7 = scmp.lt.s32.totalorder %s141_s19, %s141_s19 }
  0x18   : > { %p1011_p8 = scmp.lt.s32.totalorder %s1009_s27, %s1002_s26 }
  0x19   : > { %p1005_p1 = pnand %p1003_p0, %p967_p6 }
  0x1a   : > { %p1012_p9 = por %p1011_p8, %p1010_p7 }
  0x1b   : > { %p1006_p4 = pneg %p1005_p1 }
  0x1d   : > { %p1013_p10 = pnand %p1012_p9, %p1006_p4 }
  0x1f   : > { %1016 = shalt.err (!%p1013_p10)
}
  0x20   : > { %948 = dma.hbm_to_vmem [thread:$0]  (!%p1079_p5), %s1297_s2, 16, %s141_s19, [#allocation5]  }
  0x21   : > { %162 = sbr.rel (%p1065_p2) target bundleno = 285 (0x11d), region = 32 }
  0x26   : > { %1022 = dma.done.wait (%p1071_p3), [#allocation3], 768  }
  0x27   : > { %1024 = vsyncadd (%p1071_p3), [#allocation3], 4294966528 }
  0x28   : > { %1026 = dma.done.wait (%p1071_p3), [#allocation5], 16  }
  0x29   : > { %1028 = vsyncadd (%p1071_p3), [#allocation5], 4294967280  ;;  %s785_s30 = sshll.u32 %s776_s13, 5  ;;  %v239_v0 = vld [vmem:[#allocation2 + $0x28] sm:$0xff]  ;;  %v238_v1 = vld [vmem:[#allocation2 + $0x20] sm:$0xff]  ;;  %vm247_vm0 = vcmask 392192  }
  0x2a   : > { %p191_p6 = scmp.lt.s32.totalorder %s785_s30, 63  ;;  %862 = vmatprep.subr.mxu0 %v239_v0  ;;  %922 = vmatprep.subr.mxu1 %v239_v0  ;;  %v237_v2 = vld [vmem:[#allocation2 + $0x18] sm:$0xff]  ;;  %v236_v3 = vld [vmem:[#allocation2 + $0x10] sm:$0xff]  ;;  %v235_v4 = vld [vmem:[#allocation2 + $0x8] sm:$0xff]  ;;  %vm665_vm1 = vcmask 523264  }
  0x2b   : > { %863 = vmatpush3.msra.mxu0 %v239_v0  ;;  %928 = vmatpush3.msra.mxu1 %v239_v0  ;;  %v234_v5 = vld [vmem:[#allocation2] sm:$0xff]  ;;  %v1187_v38 = vld [vmem:[#allocation4] ss:$0 sm:$0xff] }
  0x2c   : > { %s1303_s30 = smov (!%p191_p6, %s785_s30), 63  ;;  %864 = vmatprep.subr.mxu0 %v238_v1  ;;  %923 = vmatprep.subr.mxu1 %v238_v1 }
  0x2d   : > { %865 = vmatpush3.msra.mxu0 %v238_v1  ;;  %929 = vmatpush3.msra.mxu1 %v238_v1  ;;  %s786_s4 = sshll.u32 %s1303_s30, 3 }
  0x2e   : > { %866 = vmatprep.subr.mxu0 %v237_v2  ;;  %924 = vmatprep.subr.mxu1 %v237_v2  ;;  %s1121_s7 = scalar_lea.vmem %s1295_s0, %s786_s4  ;;  %s1196_s10 = scalar_lea.vmem %s1298_s3, %s786_s4 }
  0x2f   : > { %867 = vmatpush3.msra.mxu0 %v237_v2  ;;  %930 = vmatpush3.msra.mxu1 %v237_v2  ;;  %v202_v6 = vld [vmem:[%s1121_s7] sm:$0xff]  ;;  %v203_v8 = vld [vmem:[%s1121_s7 + $0x8] sm:$0xff]  ;;  %v204_v10 = vld [vmem:[%s1121_s7 + $0x10] sm:$0xff] }
  0x30   : > { %868 = vmatprep.subr.mxu0 %v236_v3  ;;  %925 = vmatprep.subr.mxu1 %v236_v3  ;;  %v218_v7 = vld [vmem:[%s1121_s7 + $0x80] sm:$0xff]  ;;  %v219_v9 = vld [vmem:[%s1121_s7 + $0x88] sm:$0xff]  ;;  %v220_v11 = vld [vmem:[%s1121_s7 + $0x90] sm:$0xff] }
  0x31   : > { %869 = vmatpush3.msra.mxu0 %v236_v3  ;;  %931 = vmatpush3.msra.mxu1 %v236_v3  ;;  %v205_v12 = vld [vmem:[%s1121_s7 + $0x18] sm:$0xff]  ;;  %v206_v14 = vld [vmem:[%s1121_s7 + $0x20] sm:$0xff]  ;;  %v207_v16 = vld [vmem:[%s1121_s7 + $0x28] sm:$0xff] }
  0x32   : > { %870 = vmatprep.subr.mxu0 %v235_v4  ;;  %926 = vmatprep.subr.mxu1 %v235_v4  ;;  %v221_v13 = vld [vmem:[%s1121_s7 + $0x98] sm:$0xff]  ;;  %v222_v15 = vld [vmem:[%s1121_s7 + $0xa0] sm:$0xff]  ;;  %v223_v17 = vld [vmem:[%s1121_s7 + $0xa8] sm:$0xff] }
  0x33   : > { %871 = vmatpush3.msra.mxu0 %v235_v4  ;;  %932 = vmatpush3.msra.mxu1 %v235_v4  ;;  %v208_v18 = vld [vmem:[%s1121_s7 + $0x30] sm:$0xff]  ;;  %v209_v20 = vld [vmem:[%s1121_s7 + $0x38] sm:$0xff]  ;;  %v210_v22 = vld [vmem:[%s1121_s7 + $0x40] sm:$0xff] }
  0x34   : > { %872 = vmatprep.subr.mxu0 %v234_v5  ;;  %927 = vmatprep.subr.mxu1 %v234_v5  ;;  %v224_v19 = vld [vmem:[%s1121_s7 + $0xb0] sm:$0xff]  ;;  %v225_v21 = vld [vmem:[%s1121_s7 + $0xb8] sm:$0xff]  ;;  %v226_v23 = vld [vmem:[%s1121_s7 + $0xc0] sm:$0xff] }
  0x35   : > { %873 = vmatpush3.msra.mxu0 %v234_v5  ;;  %933 = vmatpush3.msra.mxu1 %v234_v5  ;;  %v211_v24 = vld [vmem:[%s1121_s7 + $0x48] sm:$0xff]  ;;  %v212_v26 = vld [vmem:[%s1121_s7 + $0x50] sm:$0xff]  ;;  %v213_v28 = vld [vmem:[%s1121_s7 + $0x58] sm:$0xff] }
  0x36   : > { %874 = vmatprep.mubr.msk.f32.mxu0 %vm247_vm0, %v202_v6  ;;  %898 = vmatprep.mubr.msk.f32.mxu1 %vm247_vm0, %v218_v7  ;;  %v227_v25 = vld [vmem:[%s1121_s7 + $0xc8] sm:$0xff]  ;;  %v228_v27 = vld [vmem:[%s1121_s7 + $0xd0] sm:$0xff]  ;;  %v229_v29 = vld [vmem:[%s1121_s7 + $0xd8] sm:$0xff] }
  0x37   : > { %875 = vmatmul.mubr.msk.f32.vlgmr.msra.gmra.mxu0 %vm247_vm0, %v203_v8  ;;  %899 = vmatmul.mubr.msk.f32.vlgmr.msra.gmra.mxu1 %vm247_vm0, %v219_v9  ;;  %v214_v30 = vld [vmem:[%s1121_s7 + $0x60] sm:$0xff]  ;;  %v215_v32 = vld [vmem:[%s1121_s7 + $0x68] sm:$0xff]  ;;  %v216_v34 = vld [vmem:[%s1121_s7 + $0x70] sm:$0xff] }
  0x38   : > { %877 = vmatprep.mubr.msk.f32.mxu0 %vm247_vm0, %v204_v10  ;;  %901 = vmatprep.mubr.msk.f32.mxu1 %vm247_vm0, %v220_v11  ;;  %v230_v31 = vld [vmem:[%s1121_s7 + $0xe0] sm:$0xff]  ;;  %v231_v33 = vld [vmem:[%s1121_s7 + $0xe8] sm:$0xff]  ;;  %v232_v35 = vld [vmem:[%s1121_s7 + $0xf0] sm:$0xff] }
  0x39   : > { %v217_v36 = vld [vmem:[%s1121_s7 + $0x78] sm:$0xff] }
  0x3a   : > { %v233_v37 = vld [vmem:[%s1121_s7 + $0xf8] sm:$0xff] }
  0x3b   : > { %878 = vmatmul.mubr.msk.f32.gmra.mxu0 %vm247_vm0, %v205_v12  ;;  %902 = vmatmul.mubr.msk.f32.gmra.mxu1 %vm247_vm0, %v221_v13 }
  0x3c   : > { %880 = vmatprep.mubr.msk.f32.mxu0 %vm247_vm0, %v206_v14  ;;  %904 = vmatprep.mubr.msk.f32.mxu1 %vm247_vm0, %v222_v15 }
  0x3f   : > { %881 = vmatmul.mubr.msk.f32.gmra.mxu0 %vm247_vm0, %v207_v16  ;;  %905 = vmatmul.mubr.msk.f32.gmra.mxu1 %vm247_vm0, %v223_v17 }
  0x40   : > { %883 = vmatprep.mubr.msk.f32.mxu0 %vm247_vm0, %v208_v18  ;;  %907 = vmatprep.mubr.msk.f32.mxu1 %vm247_vm0, %v224_v19 }
  0x43   : > { %884 = vmatmul.mubr.msk.f32.gmra.mxu0 %vm247_vm0, %v209_v20  ;;  %908 = vmatmul.mubr.msk.f32.gmra.mxu1 %vm247_vm0, %v225_v21 }
  0x44   : > { %886 = vmatprep.mubr.msk.f32.mxu0 %vm247_vm0, %v210_v22  ;;  %910 = vmatprep.mubr.msk.f32.mxu1 %vm247_vm0, %v226_v23 }
  0x47   : > { %887 = vmatmul.mubr.msk.f32.gmra.mxu0 %vm247_vm0, %v211_v24  ;;  %911 = vmatmul.mubr.msk.f32.gmra.mxu1 %vm247_vm0, %v227_v25 }
  0x48   : > { %889 = vmatprep.mubr.msk.f32.mxu0 %vm247_vm0, %v212_v26  ;;  %913 = vmatprep.mubr.msk.f32.mxu1 %vm247_vm0, %v228_v27 }
  0x4b   : > { %890 = vmatmul.mubr.msk.f32.gmra.mxu0 %vm247_vm0, %v213_v28  ;;  %914 = vmatmul.mubr.msk.f32.gmra.mxu1 %vm247_vm0, %v229_v29 }
  0x4c   : > { %892 = vmatprep.mubr.msk.f32.mxu0 %vm247_vm0, %v214_v30  ;;  %916 = vmatprep.mubr.msk.f32.mxu1 %vm247_vm0, %v230_v31 }
  0x4f   : > { %893 = vmatmul.mubr.msk.f32.gmra.mxu0 %vm247_vm0, %v215_v32  ;;  %917 = vmatmul.mubr.msk.f32.gmra.mxu1 %vm247_vm0, %v231_v33 }
  0x50   : > { %895 = vmatprep.mubr.msk.f32.mxu0 %vm247_vm0, %v216_v34  ;;  %919 = vmatprep.mubr.msk.f32.mxu1 %vm247_vm0, %v232_v35 }
  0x53   : > { %896 = vmatmul.mubr.msk.f32.gmra.mxu0 %vm247_vm0, %v217_v36  ;;  %920 = vmatmul.mubr.msk.f32.gmra.mxu1 %vm247_vm0, %v233_v37 }
  0xf7   : > { %v876_v39 = vpop.f32.mrf.mxu0  ;;  %v900_v40 = vpop.f32.mrf.mxu1 }
  0xf8   : > { %v416_v41 = vadd.f32 %v876_v39, %v1187_v38  ;;  %v496_v42 = vadd.f32 %v900_v40, %v1187_v38 }
  0xf9   : > { %v410_v43 = vpop.f32.mrf.mxu0  ;;  %v490_v44 = vpop.f32.mrf.mxu1 }
  0xfa   : > { %vm570_vm2 = vcmp.ge.f32.partialorder %v416_v41, 0.0  ;;  %v602_v45 = vmul.f32 0.2, %v416_v41  ;;  %vm586_vm3 = vcmp.ge.f32.partialorder %v496_v42, 0.0  ;;  %v618_v46 = vmul.f32 0.2, %v496_v42 }
  0xfb   : > { %v411_v47 = vadd.f32 %v1187_v38, %v410_v43  ;;  %v491_v48 = vadd.f32 %v1187_v38, %v490_v44  ;;  %v879_v49 = vpop.f32.mrf.mxu0  ;;  %v903_v50 = vpop.f32.mrf.mxu1 }
  0xfc   : > { %v634_v51 = vsel %vm570_vm2, %v416_v41, %v602_v45  ;;  %v650_v52 = vsel %vm586_vm3, %v496_v42, %v618_v46  ;;  %v426_v53 = vadd.f32 %v879_v49, %v1187_v38  ;;  %v506_v54 = vadd.f32 %v903_v50, %v1187_v38 }
  0xfd   : > { %667 = vst.msk [vmem:[%s1196_s10 + $0x8] sm:$0xff] %vm665_vm1, %v634_v51  ;;  %683 = vst.msk [vmem:[%s1196_s10 + $0x88] sm:$0xff] %vm665_vm1, %v650_v52  ;;  %vm569_vm4 = vcmp.ge.f32.partialorder %v411_v47, 0.0  ;;  %v601_v55 = vmul.f32 0.2, %v411_v47  ;;  %vm585_vm5 = vcmp.ge.f32.partialorder %v491_v48, 0.0  ;;  %v420_v57 = vpop.f32.mrf.mxu0  ;;  %v500_v58 = vpop.f32.mrf.mxu1 }
  0xfe   : > { %v617_v56 = vmul.f32 0.2, %v491_v48  ;;  %vm572_vm6 = vcmp.ge.f32.partialorder %v426_v53, 0.0  ;;  %v604_v59 = vmul.f32 0.2, %v426_v53  ;;  %vm588_vm7 = vcmp.ge.f32.partialorder %v506_v54, 0.0 }
  0xff   : > { %v620_v60 = vmul.f32 0.2, %v506_v54  ;;  %v633_v61 = vsel %vm569_vm4, %v411_v47, %v601_v55  ;;  %v421_v63 = vadd.f32 %v1187_v38, %v420_v57  ;;  %v501_v0 = vadd.f32 %v1187_v38, %v500_v58  ;;  %v882_v1 = vpop.f32.mrf.mxu0  ;;  %v906_v2 = vpop.f32.mrf.mxu1 }
 0x100   : > { %v649_v62 = vsel %vm585_vm5, %v491_v48, %v617_v56  ;;  %666 = vst.msk [vmem:[%s1196_s10] sm:$0xff] %vm665_vm1, %v633_v61  ;;  %v636_v3 = vsel %vm572_vm6, %v426_v53, %v604_v59  ;;  %v436_v5 = vadd.f32 %v882_v1, %v1187_v38  ;;  %v516_v6 = vadd.f32 %v906_v2, %v1187_v38 }
 0x101   : > { %682 = vst.msk [vmem:[%s1196_s10 + $0x80] sm:$0xff] %vm665_vm1, %v649_v62  ;;  %v652_v4 = vsel %vm588_vm7, %v506_v54, %v620_v60  ;;  %669 = vst.msk [vmem:[%s1196_s10 + $0x18] sm:$0xff] %vm665_vm1, %v636_v3  ;;  %vm571_vm8 = vcmp.ge.f32.partialorder %v421_v63, 0.0  ;;  %v603_v7 = vmul.f32 0.2, %v421_v63  ;;  %vm587_vm9 = vcmp.ge.f32.partialorder %v501_v0, 0.0  ;;  %v430_v9 = vpop.f32.mrf.mxu0  ;;  %v510_v10 = vpop.f32.mrf.mxu1 }
 0x102   : > { %685 = vst.msk [vmem:[%s1196_s10 + $0x98] sm:$0xff] %vm665_vm1, %v652_v4  ;;  %v619_v8 = vmul.f32 0.2, %v501_v0  ;;  %vm574_vm10 = vcmp.ge.f32.partialorder %v436_v5, 0.0  ;;  %v606_v11 = vmul.f32 0.2, %v436_v5  ;;  %v431_v15 = vadd.f32 %v1187_v38, %v430_v9 }
 0x103   : > { %vm590_vm11 = vcmp.ge.f32.partialorder %v516_v6, 0.0  ;;  %v622_v12 = vmul.f32 0.2, %v516_v6  ;;  %v635_v13 = vsel %vm571_vm8, %v421_v63, %v603_v7  ;;  %v511_v16 = vadd.f32 %v1187_v38, %v510_v10  ;;  %v885_v17 = vpop.f32.mrf.mxu0  ;;  %v909_v18 = vpop.f32.mrf.mxu1 }
 0x104   : > { %v651_v14 = vsel %vm587_vm9, %v501_v0, %v619_v8  ;;  %668 = vst.msk [vmem:[%s1196_s10 + $0x10] sm:$0xff] %vm665_vm1, %v635_v13  ;;  %v638_v19 = vsel %vm574_vm10, %v436_v5, %v606_v11  ;;  %v446_v21 = vadd.f32 %v885_v17, %v1187_v38  ;;  %v526_v22 = vadd.f32 %v909_v18, %v1187_v38 }
 0x105   : > { %684 = vst.msk [vmem:[%s1196_s10 + $0x90] sm:$0xff] %vm665_vm1, %v651_v14  ;;  %v654_v20 = vsel %vm590_vm11, %v516_v6, %v622_v12  ;;  %671 = vst.msk [vmem:[%s1196_s10 + $0x28] sm:$0xff] %vm665_vm1, %v638_v19  ;;  %vm573_vm12 = vcmp.ge.f32.partialorder %v431_v15, 0.0  ;;  %v605_v23 = vmul.f32 0.2, %v431_v15  ;;  %vm589_vm13 = vcmp.ge.f32.partialorder %v511_v16, 0.0  ;;  %v440_v25 = vpop.f32.mrf.mxu0  ;;  %v520_v26 = vpop.f32.mrf.mxu1 }
 0x106   : > { %687 = vst.msk [vmem:[%s1196_s10 + $0xa8] sm:$0xff] %vm665_vm1, %v654_v20  ;;  %v621_v24 = vmul.f32 0.2, %v511_v16  ;;  %vm576_vm14 = vcmp.ge.f32.partialorder %v446_v21, 0.0  ;;  %v608_v27 = vmul.f32 0.2, %v446_v21  ;;  %v441_v31 = vadd.f32 %v1187_v38, %v440_v25 }
 0x107   : > { %vm592_vm15 = vcmp.ge.f32.partialorder %v526_v22, 0.0  ;;  %v624_v28 = vmul.f32 0.2, %v526_v22  ;;  %v637_v29 = vsel %vm573_vm12, %v431_v15, %v605_v23  ;;  %v521_v32 = vadd.f32 %v1187_v38, %v520_v26  ;;  %v888_v33 = vpop.f32.mrf.mxu0  ;;  %v912_v34 = vpop.f32.mrf.mxu1 }
 0x108   : > { %v653_v30 = vsel %vm589_vm13, %v511_v16, %v621_v24  ;;  %670 = vst.msk [vmem:[%s1196_s10 + $0x20] sm:$0xff] %vm665_vm1, %v637_v29  ;;  %v640_v35 = vsel %vm576_vm14, %v446_v21, %v608_v27  ;;  %v456_v37 = vadd.f32 %v888_v33, %v1187_v38  ;;  %v536_v39 = vadd.f32 %v912_v34, %v1187_v38 }
 0x109   : > { %686 = vst.msk [vmem:[%s1196_s10 + $0xa0] sm:$0xff] %vm665_vm1, %v653_v30  ;;  %v656_v36 = vsel %vm592_vm15, %v526_v22, %v624_v28  ;;  %673 = vst.msk [vmem:[%s1196_s10 + $0x38] sm:$0xff] %vm665_vm1, %v640_v35  ;;  %vm575_vm0 = vcmp.ge.f32.partialorder %v441_v31, 0.0  ;;  %v607_v40 = vmul.f32 0.2, %v441_v31  ;;  %vm591_vm2 = vcmp.ge.f32.partialorder %v521_v32, 0.0  ;;  %v450_v42 = vpop.f32.mrf.mxu0  ;;  %v530_v43 = vpop.f32.mrf.mxu1 }
 0x10a   : > { %689 = vst.msk [vmem:[%s1196_s10 + $0xb8] sm:$0xff] %vm665_vm1, %v656_v36  ;;  %v623_v41 = vmul.f32 0.2, %v521_v32  ;;  %vm578_vm3 = vcmp.ge.f32.partialorder %v456_v37, 0.0  ;;  %v610_v44 = vmul.f32 0.2, %v456_v37  ;;  %v451_v48 = vadd.f32 %v1187_v38, %v450_v42 }
 0x10b   : > { %vm594_vm4 = vcmp.ge.f32.partialorder %v536_v39, 0.0  ;;  %v626_v45 = vmul.f32 0.2, %v536_v39  ;;  %v639_v46 = vsel %vm575_vm0, %v441_v31, %v607_v40  ;;  %v531_v49 = vadd.f32 %v1187_v38, %v530_v43  ;;  %v891_v50 = vpop.f32.mrf.mxu0  ;;  %v915_v51 = vpop.f32.mrf.mxu1 }
 0x10c   : > { %v655_v47 = vsel %vm591_vm2, %v521_v32, %v623_v41  ;;  %672 = vst.msk [vmem:[%s1196_s10 + $0x30] sm:$0xff] %vm665_vm1, %v639_v46  ;;  %v642_v52 = vsel %vm578_vm3, %v456_v37, %v610_v44  ;;  %v466_v54 = vadd.f32 %v891_v50, %v1187_v38  ;;  %v546_v55 = vadd.f32 %v915_v51, %v1187_v38 }
 0x10d   : > { %688 = vst.msk [vmem:[%s1196_s10 + $0xb0] sm:$0xff] %vm665_vm1, %v655_v47  ;;  %v658_v53 = vsel %vm594_vm4, %v536_v39, %v626_v45  ;;  %675 = vst.msk [vmem:[%s1196_s10 + $0x48] sm:$0xff] %vm665_vm1, %v642_v52  ;;  %vm577_vm5 = vcmp.ge.f32.partialorder %v451_v48, 0.0  ;;  %v609_v56 = vmul.f32 0.2, %v451_v48  ;;  %vm593_vm6 = vcmp.ge.f32.partialorder %v531_v49, 0.0  ;;  %v460_v58 = vpop.f32.mrf.mxu0  ;;  %v540_v59 = vpop.f32.mrf.mxu1 }
 0x10e   : > { %691 = vst.msk [vmem:[%s1196_s10 + $0xc8] sm:$0xff] %vm665_vm1, %v658_v53  ;;  %v625_v57 = vmul.f32 0.2, %v531_v49  ;;  %vm580_vm7 = vcmp.ge.f32.partialorder %v466_v54, 0.0  ;;  %v612_v60 = vmul.f32 0.2, %v466_v54  ;;  %v461_v0 = vadd.f32 %v1187_v38, %v460_v58 }
 0x10f   : > { %vm596_vm8 = vcmp.ge.f32.partialorder %v546_v55, 0.0  ;;  %v628_v61 = vmul.f32 0.2, %v546_v55  ;;  %v641_v62 = vsel %vm577_vm5, %v451_v48, %v609_v56  ;;  %v541_v1 = vadd.f32 %v1187_v38, %v540_v59  ;;  %v894_v2 = vpop.f32.mrf.mxu0  ;;  %v918_v3 = vpop.f32.mrf.mxu1 }
 0x110   : > { %v657_v63 = vsel %vm593_vm6, %v531_v49, %v625_v57  ;;  %674 = vst.msk [vmem:[%s1196_s10 + $0x40] sm:$0xff] %vm665_vm1, %v641_v62  ;;  %v644_v4 = vsel %vm580_vm7, %v466_v54, %v612_v60  ;;  %v476_v6 = vadd.f32 %v894_v2, %v1187_v38  ;;  %v556_v7 = vadd.f32 %v918_v3, %v1187_v38 }
 0x111   : > { %690 = vst.msk [vmem:[%s1196_s10 + $0xc0] sm:$0xff] %vm665_vm1, %v657_v63  ;;  %v660_v5 = vsel %vm596_vm8, %v546_v55, %v628_v61  ;;  %677 = vst.msk [vmem:[%s1196_s10 + $0x58] sm:$0xff] %vm665_vm1, %v644_v4  ;;  %vm579_vm9 = vcmp.ge.f32.partialorder %v461_v0, 0.0  ;;  %v611_v8 = vmul.f32 0.2, %v461_v0  ;;  %vm595_vm10 = vcmp.ge.f32.partialorder %v541_v1, 0.0  ;;  %v470_v10 = vpop.f32.mrf.mxu0  ;;  %v550_v11 = vpop.f32.mrf.mxu1 }
 0x112   : > { %693 = vst.msk [vmem:[%s1196_s10 + $0xd8] sm:$0xff] %vm665_vm1, %v660_v5  ;;  %v627_v9 = vmul.f32 0.2, %v541_v1  ;;  %vm582_vm11 = vcmp.ge.f32.partialorder %v476_v6, 0.0  ;;  %v614_v12 = vmul.f32 0.2, %v476_v6  ;;  %v471_v16 = vadd.f32 %v1187_v38, %v470_v10 }
 0x113   : > { %vm598_vm12 = vcmp.ge.f32.partialorder %v556_v7, 0.0  ;;  %v630_v13 = vmul.f32 0.2, %v556_v7  ;;  %v643_v14 = vsel %vm579_vm9, %v461_v0, %v611_v8  ;;  %v551_v17 = vadd.f32 %v1187_v38, %v550_v11  ;;  %v897_v18 = vpop.f32.mrf.mxu0  ;;  %v921_v19 = vpop.f32.mrf.mxu1 }
 0x114   : > { %v659_v15 = vsel %vm595_vm10, %v541_v1, %v627_v9  ;;  %676 = vst.msk [vmem:[%s1196_s10 + $0x50] sm:$0xff] %vm665_vm1, %v643_v14  ;;  %v646_v20 = vsel %vm582_vm11, %v476_v6, %v614_v12  ;;  %v486_v22 = vadd.f32 %v897_v18, %v1187_v38  ;;  %v566_v23 = vadd.f32 %v921_v19, %v1187_v38 }
 0x115   : > { %692 = vst.msk [vmem:[%s1196_s10 + $0xd0] sm:$0xff] %vm665_vm1, %v659_v15  ;;  %v662_v21 = vsel %vm598_vm12, %v556_v7, %v630_v13  ;;  %679 = vst.msk [vmem:[%s1196_s10 + $0x68] sm:$0xff] %vm665_vm1, %v646_v20  ;;  %vm581_vm13 = vcmp.ge.f32.partialorder %v471_v16, 0.0  ;;  %v613_v24 = vmul.f32 0.2, %v471_v16  ;;  %vm597_vm14 = vcmp.ge.f32.partialorder %v551_v17, 0.0  ;;  %v480_v26 = vpop.f32.mrf.mxu0  ;;  %v560_v27 = vpop.f32.mrf.mxu1 }
 0x116   : > { %695 = vst.msk [vmem:[%s1196_s10 + $0xe8] sm:$0xff] %vm665_vm1, %v662_v21  ;;  %v629_v25 = vmul.f32 0.2, %v551_v17  ;;  %vm584_vm15 = vcmp.ge.f32.partialorder %v486_v22, 0.0  ;;  %v616_v28 = vmul.f32 0.2, %v486_v22  ;;  %v481_v32 = vadd.f32 %v1187_v38, %v480_v26 }
 0x117   : > { %vm600_vm0 = vcmp.ge.f32.partialorder %v566_v23, 0.0  ;;  %v632_v29 = vmul.f32 0.2, %v566_v23  ;;  %v645_v30 = vsel %vm581_vm13, %v471_v16, %v613_v24  ;;  %v561_v33 = vadd.f32 %v1187_v38, %v560_v27 }
 0x118   : > { %v661_v31 = vsel %vm597_vm14, %v551_v17, %v629_v25  ;;  %678 = vst.msk [vmem:[%s1196_s10 + $0x60] sm:$0xff] %vm665_vm1, %v645_v30  ;;  %v648_v34 = vsel %vm584_vm15, %v486_v22, %v616_v28  ;;  %vm583_vm2 = vcmp.ge.f32.partialorder %v481_v32, 0.0  ;;  %v615_v36 = vmul.f32 0.2, %v481_v32 }
 0x119   : > { %694 = vst.msk [vmem:[%s1196_s10 + $0xe0] sm:$0xff] %vm665_vm1, %v661_v31  ;;  %v664_v35 = vsel %vm600_vm0, %v566_v23, %v632_v29  ;;  %681 = vst.msk [vmem:[%s1196_s10 + $0x78] sm:$0xff] %vm665_vm1, %v648_v34  ;;  %vm599_vm3 = vcmp.ge.f32.partialorder %v561_v33, 0.0  ;;  %v631_v37 = vmul.f32 0.2, %v561_v33 }
 0x11a   : > { %697 = vst.msk [vmem:[%s1196_s10 + $0xf8] sm:$0xff] %vm665_vm1, %v664_v35  ;;  %v647_v39 = vsel %vm583_vm2, %v481_v32, %v615_v36 }
 0x11b   : > { %v663_v40 = vsel %vm599_vm3, %v561_v33, %v631_v37  ;;  %680 = vst.msk [vmem:[%s1196_s10 + $0x70] sm:$0xff] %vm665_vm1, %v647_v39 }
 0x11c   : > { %696 = vst.msk [vmem:[%s1196_s10 + $0xf0] sm:$0xff] %vm665_vm1, %v663_v40 }
 0x11d PF: > { %s15_s12 = sadd.s32 1, %s1031_s12  }
 0x11e   : > { %p12_p2 = scmp.ge.s32.totalorder %s15_s12, 4  }
 0x120   :  { %14 = sbr.rel (!%p12_p2) target bundleno = 2 (0x2), region = 71 }
 0x125   :  { %720 = vsyncpa [#allocation3], 1 }
 0x126   :  { %722 = vsyncpa [#allocation3 + $0x1], 1 }
 0x127   :  { %723 = vsyncpa [#allocation5], 1 }

// kernel: encoder_forward.6
= control target key start
LH: loop header
LB: loop body
LE: loop exit
PB: predicated region body
PF: predicated region fallthrough
CT: control target
= control target key end

     0   :  { %vm911_vm1 = vcmask 523264   ;;  %s2514_s1 = inlined_call_operand.vmem [shape: f32[1024,64], index: 1, kind: input, shape index: {}]   ;;  %s2515_s0 = inlined_call_operand.vmem [shape: f32[128,1024], index: 0, kind: input, shape index: {}]   ;;  %s2516_s2 = inlined_call_operand.vmem [shape: f32[1,64], index: 2, kind: input, shape index: {}]   ;;  %s2517_s3 = inlined_call_operand.vmem [shape: f32[1,64], index: 3, kind: input, shape index: {}]   ;;  %s2518_s4 = inlined_call_operand.vmem [shape: f32[1,64], index: 4, kind: input, shape index: {}]   ;;  %s2519_s5 = inlined_call_operand.vmem [shape: f32[128,64], index: 5, kind: output, shape index: {}]  }
   0x1   :  { %v179_v0 = vld [vmem:[%s2514_s1 + $0xf8] sm:$0xff]  ;;  %v178_v3 = vld [vmem:[%s2514_s1 + $0xf0] sm:$0xff]  ;;  %v177_v7 = vld [vmem:[%s2514_s1 + $0xe8] sm:$0xff] }
   0x2   :  { %v163_v1 = vld [vmem:[%s2514_s1 + $0x78] sm:$0xff]  ;;  %1091 = vmatprep.subr.mxu0 %v179_v0  ;;  %v162_v5 = vld [vmem:[%s2514_s1 + $0x70] sm:$0xff]  ;;  %v161_v9 = vld [vmem:[%s2514_s1 + $0x68] sm:$0xff] }
   0x3   :  { %v211_v2 = vld [vmem:[%s2514_s1 + $0x1f8] sm:$0xff]  ;;  %1092 = vmatpush3.msra.mxu0 %v163_v1  ;;  %v210_v6 = vld [vmem:[%s2514_s1 + $0x1f0] sm:$0xff]  ;;  %v209_v10 = vld [vmem:[%s2514_s1 + $0x1e8] sm:$0xff] }
   0x4   :  { %1171 = vmatprep.subr.mxu1 %v211_v2  ;;  %v195_v4 = vld [vmem:[%s2514_s1 + $0x178] sm:$0xff]  ;;  %v194_v8 = vld [vmem:[%s2514_s1 + $0x170] sm:$0xff]  ;;  %1093 = vmatprep.subr.mxu0 %v178_v3  ;;  %v176_v11 = vld [vmem:[%s2514_s1 + $0xe0] sm:$0xff] }
   0x5   :  { %1172 = vmatpush3.msra.mxu1 %v195_v4  ;;  %1094 = vmatpush3.msra.mxu0 %v162_v5  ;;  %v193_v12 = vld [vmem:[%s2514_s1 + $0x168] sm:$0xff]  ;;  %v208_v13 = vld [vmem:[%s2514_s1 + $0x1e0] sm:$0xff]  ;;  %v175_v16 = vld [vmem:[%s2514_s1 + $0xd8] sm:$0xff] }
   0x6   :  { %1173 = vmatprep.subr.mxu1 %v210_v6  ;;  %1095 = vmatprep.subr.mxu0 %v177_v7  ;;  %v160_v14 = vld [vmem:[%s2514_s1 + $0x60] sm:$0xff]  ;;  %v207_v17 = vld [vmem:[%s2514_s1 + $0x1d8] sm:$0xff]  ;;  %v174_v20 = vld [vmem:[%s2514_s1 + $0xd0] sm:$0xff] }
   0x7   :  { %1174 = vmatpush3.msra.mxu1 %v194_v8  ;;  %v192_v15 = vld [vmem:[%s2514_s1 + $0x160] sm:$0xff]  ;;  %1096 = vmatpush3.msra.mxu0 %v161_v9  ;;  %v159_v18 = vld [vmem:[%s2514_s1 + $0x58] sm:$0xff]  ;;  %v206_v21 = vld [vmem:[%s2514_s1 + $0x1d0] sm:$0xff] }
   0x8   :  { %1175 = vmatprep.subr.mxu1 %v209_v10  ;;  %1097 = vmatprep.subr.mxu0 %v176_v11  ;;  %v191_v19 = vld [vmem:[%s2514_s1 + $0x158] sm:$0xff]  ;;  %v158_v22 = vld [vmem:[%s2514_s1 + $0x50] sm:$0xff]  ;;  %v173_v24 = vld [vmem:[%s2514_s1 + $0xc8] sm:$0xff] }
   0x9   :  { %1176 = vmatpush3.msra.mxu1 %v193_v12  ;;  %1098 = vmatpush3.msra.mxu0 %v160_v14  ;;  %v190_v23 = vld [vmem:[%s2514_s1 + $0x150] sm:$0xff]  ;;  %v205_v25 = vld [vmem:[%s2514_s1 + $0x1c8] sm:$0xff]  ;;  %v172_v28 = vld [vmem:[%s2514_s1 + $0xc0] sm:$0xff] }
   0xa   :  { %1177 = vmatprep.subr.mxu1 %v208_v13  ;;  %1099 = vmatprep.subr.mxu0 %v175_v16  ;;  %v157_v26 = vld [vmem:[%s2514_s1 + $0x48] sm:$0xff]  ;;  %v204_v29 = vld [vmem:[%s2514_s1 + $0x1c0] sm:$0xff]  ;;  %v171_v32 = vld [vmem:[%s2514_s1 + $0xb8] sm:$0xff] }
   0xb   :  { %1178 = vmatpush3.msra.mxu1 %v192_v15  ;;  %1100 = vmatpush3.msra.mxu0 %v159_v18  ;;  %v189_v27 = vld [vmem:[%s2514_s1 + $0x148] sm:$0xff]  ;;  %v156_v30 = vld [vmem:[%s2514_s1 + $0x40] sm:$0xff]  ;;  %v203_v33 = vld [vmem:[%s2514_s1 + $0x1b8] sm:$0xff] }
   0xc   :  { %1179 = vmatprep.subr.mxu1 %v207_v17  ;;  %1101 = vmatprep.subr.mxu0 %v174_v20  ;;  %v188_v31 = vld [vmem:[%s2514_s1 + $0x140] sm:$0xff]  ;;  %v155_v34 = vld [vmem:[%s2514_s1 + $0x38] sm:$0xff]  ;;  %v170_v36 = vld [vmem:[%s2514_s1 + $0xb0] sm:$0xff] }
   0xd   :  { %1180 = vmatpush3.msra.mxu1 %v191_v19  ;;  %1102 = vmatpush3.msra.mxu0 %v158_v22  ;;  %v187_v35 = vld [vmem:[%s2514_s1 + $0x138] sm:$0xff]  ;;  %v202_v37 = vld [vmem:[%s2514_s1 + $0x1b0] sm:$0xff]  ;;  %v169_v40 = vld [vmem:[%s2514_s1 + $0xa8] sm:$0xff] }
   0xe   :  { %1181 = vmatprep.subr.mxu1 %v206_v21  ;;  %1103 = vmatprep.subr.mxu0 %v173_v24  ;;  %v154_v38 = vld [vmem:[%s2514_s1 + $0x30] sm:$0xff]  ;;  %v201_v41 = vld [vmem:[%s2514_s1 + $0x1a8] sm:$0xff]  ;;  %v168_v44 = vld [vmem:[%s2514_s1 + $0xa0] sm:$0xff] }
   0xf   :  { %1182 = vmatpush3.msra.mxu1 %v190_v23  ;;  %1104 = vmatpush3.msra.mxu0 %v157_v26  ;;  %v186_v39 = vld [vmem:[%s2514_s1 + $0x130] sm:$0xff]  ;;  %v153_v42 = vld [vmem:[%s2514_s1 + $0x28] sm:$0xff]  ;;  %v200_v45 = vld [vmem:[%s2514_s1 + $0x1a0] sm:$0xff] }
  0x10   :  { %1183 = vmatprep.subr.mxu1 %v205_v25  ;;  %1105 = vmatprep.subr.mxu0 %v172_v28  ;;  %v185_v43 = vld [vmem:[%s2514_s1 + $0x128] sm:$0xff]  ;;  %v152_v46 = vld [vmem:[%s2514_s1 + $0x20] sm:$0xff]  ;;  %v167_v48 = vld [vmem:[%s2514_s1 + $0x98] sm:$0xff] }
  0x11   :  { %1184 = vmatpush3.msra.mxu1 %v189_v27  ;;  %1106 = vmatpush3.msra.mxu0 %v156_v30  ;;  %v184_v47 = vld [vmem:[%s2514_s1 + $0x120] sm:$0xff]  ;;  %v199_v49 = vld [vmem:[%s2514_s1 + $0x198] sm:$0xff]  ;;  %v166_v52 = vld [vmem:[%s2514_s1 + $0x90] sm:$0xff] }
  0x12   :  { %1185 = vmatprep.subr.mxu1 %v204_v29  ;;  %1107 = vmatprep.subr.mxu0 %v171_v32  ;;  %v151_v50 = vld [vmem:[%s2514_s1 + $0x18] sm:$0xff]  ;;  %v198_v53 = vld [vmem:[%s2514_s1 + $0x190] sm:$0xff]  ;;  %v165_v56 = vld [vmem:[%s2514_s1 + $0x88] sm:$0xff] }
  0x13   :  { %1186 = vmatpush3.msra.mxu1 %v188_v31  ;;  %1108 = vmatpush3.msra.mxu0 %v155_v34  ;;  %v183_v51 = vld [vmem:[%s2514_s1 + $0x118] sm:$0xff]  ;;  %v150_v54 = vld [vmem:[%s2514_s1 + $0x10] sm:$0xff]  ;;  %v197_v57 = vld [vmem:[%s2514_s1 + $0x188] sm:$0xff] }
  0x14   :  { %1187 = vmatprep.subr.mxu1 %v203_v33  ;;  %1109 = vmatprep.subr.mxu0 %v170_v36  ;;  %v182_v55 = vld [vmem:[%s2514_s1 + $0x110] sm:$0xff]  ;;  %v149_v58 = vld [vmem:[%s2514_s1 + $0x8] sm:$0xff]  ;;  %v164_v60 = vld [vmem:[%s2514_s1 + $0x80] sm:$0xff] }
  0x15   :  { %1188 = vmatpush3.msra.mxu1 %v187_v35  ;;  %1110 = vmatpush3.msra.mxu0 %v154_v38  ;;  %v181_v59 = vld [vmem:[%s2514_s1 + $0x108] sm:$0xff]  ;;  %v148_v62 = vld [vmem:[%s2514_s1] sm:$0xff]  ;;  %v23_v2 = vld [vmem:[%s2515_s0 + $0x18] sm:$0xff] }
  0x16   :  { %1189 = vmatprep.subr.mxu1 %v202_v37  ;;  %1111 = vmatprep.subr.mxu0 %v169_v40  ;;  %v21_v61 = vld [vmem:[%s2515_s0 + $0x8] sm:$0xff]  ;;  %v196_v63 = vld [vmem:[%s2514_s1 + $0x180] sm:$0xff]  ;;  %v243_v3 = vld [vmem:[%s2514_s1 + $0x2f8] sm:$0xff] }
  0x17   :  { %1190 = vmatpush3.msra.mxu1 %v186_v39  ;;  %1112 = vmatpush3.msra.mxu0 %v153_v42  ;;  %v20_v0 = vld [vmem:[%s2515_s0] sm:$0xff]  ;;  %v22_v4 = vld [vmem:[%s2515_s0 + $0x10] sm:$0xff]  ;;  %v227_v5 = vld [vmem:[%s2514_s1 + $0x278] sm:$0xff] }
  0x18   :  { %1191 = vmatprep.subr.mxu1 %v201_v41  ;;  %1113 = vmatprep.subr.mxu0 %v168_v44  ;;  %v180_v1 = vld [vmem:[%s2514_s1 + $0x100] sm:$0xff]  ;;  %v275_v6 = vld [vmem:[%s2514_s1 + $0x3f8] sm:$0xff]  ;;  %v29_v7 = vld [vmem:[%s2515_s0 + $0x48] sm:$0xff] }
  0x19   :  { %1192 = vmatpush3.msra.mxu1 %v185_v43  ;;  %1114 = vmatpush3.msra.mxu0 %v152_v46  ;;  %v259_v8 = vld [vmem:[%s2514_s1 + $0x378] sm:$0xff]  ;;  %v28_v9 = vld [vmem:[%s2515_s0 + $0x40] sm:$0xff]  ;;  %v242_v11 = vld [vmem:[%s2514_s1 + $0x2f0] sm:$0xff] }
  0x1a   :  { %1193 = vmatprep.subr.mxu1 %v200_v45  ;;  %1115 = vmatprep.subr.mxu0 %v167_v48  ;;  %v31_v10 = vld [vmem:[%s2515_s0 + $0x58] sm:$0xff]  ;;  %v30_v12 = vld [vmem:[%s2515_s0 + $0x50] sm:$0xff]  ;;  %v37_v15 = vld [vmem:[%s2515_s0 + $0x88] sm:$0xff] }
  0x1b   :  { %1194 = vmatpush3.msra.mxu1 %v184_v47  ;;  %1116 = vmatpush3.msra.mxu0 %v151_v50  ;;  %v226_v13 = vld [vmem:[%s2514_s1 + $0x270] sm:$0xff]  ;;  %v36_v17 = vld [vmem:[%s2515_s0 + $0x80] sm:$0xff]  ;;  %v39_v18 = vld [vmem:[%s2515_s0 + $0x98] sm:$0xff] }
  0x1c   :  { %1195 = vmatprep.subr.mxu1 %v199_v49  ;;  %1117 = vmatprep.subr.mxu0 %v166_v52  ;;  %v274_v14 = vld [vmem:[%s2514_s1 + $0x3f0] sm:$0xff]  ;;  %v241_v19 = vld [vmem:[%s2514_s1 + $0x2e8] sm:$0xff]  ;;  %v44_v25 = vld [vmem:[%s2515_s0 + $0xc0] sm:$0xff] }
  0x1d   :  { %1196 = vmatpush3.msra.mxu1 %v183_v51  ;;  %1118 = vmatpush3.msra.mxu0 %v150_v54  ;;  %v258_v16 = vld [vmem:[%s2514_s1 + $0x370] sm:$0xff]  ;;  %v225_v21 = vld [vmem:[%s2514_s1 + $0x268] sm:$0xff]  ;;  %v47_v26 = vld [vmem:[%s2515_s0 + $0xd8] sm:$0xff] }
  0x1e   :  { %1197 = vmatprep.subr.mxu1 %v198_v53  ;;  %1119 = vmatprep.subr.mxu0 %v165_v56  ;;  %v38_v20 = vld [vmem:[%s2515_s0 + $0x90] sm:$0xff]  ;;  %v273_v22 = vld [vmem:[%s2514_s1 + $0x3e8] sm:$0xff]  ;;  %v240_v27 = vld [vmem:[%s2514_s1 + $0x2e0] sm:$0xff] }
  0x1f   :  { %1198 = vmatpush3.msra.mxu1 %v182_v55  ;;  %1120 = vmatpush3.msra.mxu0 %v149_v58  ;;  %v45_v23 = vld [vmem:[%s2515_s0 + $0xc8] sm:$0xff]  ;;  %v46_v28 = vld [vmem:[%s2515_s0 + $0xd0] sm:$0xff]  ;;  %v224_v29 = vld [vmem:[%s2514_s1 + $0x260] sm:$0xff] }
  0x20   :  { %1199 = vmatprep.subr.mxu1 %v197_v57  ;;  %1121 = vmatprep.subr.mxu0 %v164_v60  ;;  %v257_v24 = vld [vmem:[%s2514_s1 + $0x368] sm:$0xff]  ;;  %v272_v30 = vld [vmem:[%s2514_s1 + $0x3e0] sm:$0xff]  ;;  %v55_v34 = vld [vmem:[%s2515_s0 + $0x118] sm:$0xff] }
  0x21   :  { %1200 = vmatpush3.msra.mxu1 %v181_v59  ;;  %347 = vmatprep.mubr.f32.mxu0 %v21_v61  ;;  %v53_v31 = vld [vmem:[%s2515_s0 + $0x108] sm:$0xff]  ;;  %v256_v32 = vld [vmem:[%s2514_s1 + $0x360] sm:$0xff]  ;;  %v239_v35 = vld [vmem:[%s2514_s1 + $0x2d8] sm:$0xff] }
  0x22   :  { %1122 = vmatpush3.msra.mxu0 %v148_v62  ;;  %1201 = vmatprep.subr.mxu1 %v196_v63  ;;  %v52_v33 = vld [vmem:[%s2515_s0 + $0x100] sm:$0xff]  ;;  %v54_v36 = vld [vmem:[%s2515_s0 + $0x110] sm:$0xff]  ;;  %v223_v37 = vld [vmem:[%s2514_s1 + $0x258] sm:$0xff] }
  0x23   :  { %348 = vmatmul.mubr.f32.vlgmr.msra.gmra.mxu0 %v20_v0  ;;  %1202 = vmatpush3.msra.mxu1 %v180_v1  ;;  %v271_v38 = vld [vmem:[%s2514_s1 + $0x3d8] sm:$0xff]  ;;  %v61_v39 = vld [vmem:[%s2515_s0 + $0x148] sm:$0xff]  ;;  %v60_v41 = vld [vmem:[%s2515_s0 + $0x140] sm:$0xff] }
  0x24   :  { %492 = vmatprep.mubr.f32.mxu1 %v23_v2  ;;  %1251 = vmatprep.subr.mxu0 %v243_v3  ;;  %v255_v40 = vld [vmem:[%s2514_s1 + $0x358] sm:$0xff]  ;;  %v238_v43 = vld [vmem:[%s2514_s1 + $0x2d0] sm:$0xff]  ;;  %v69_v47 = vld [vmem:[%s2515_s0 + $0x188] sm:$0xff] }
  0x25   :  { %493 = vmatmul.mubr.f32.vlgmr.msra.gmra.mxu1 %v22_v4  ;;  %1252 = vmatpush3.msra.mxu0 %v227_v5  ;;  %v63_v42 = vld [vmem:[%s2515_s0 + $0x158] sm:$0xff]  ;;  %v62_v44 = vld [vmem:[%s2515_s0 + $0x150] sm:$0xff]  ;;  %v68_v49 = vld [vmem:[%s2515_s0 + $0x180] sm:$0xff] }
  0x26   :  { %1331 = vmatprep.subr.mxu1 %v275_v6  ;;  %352 = vmatprep.mubr.f32.mxu0 %v29_v7  ;;  %v222_v45 = vld [vmem:[%s2514_s1 + $0x250] sm:$0xff]  ;;  %v71_v50 = vld [vmem:[%s2515_s0 + $0x198] sm:$0xff]  ;;  %v237_v51 = vld [vmem:[%s2514_s1 + $0x2c8] sm:$0xff] }
  0x27   :  { %1332 = vmatpush3.msra.mxu1 %v259_v8  ;;  %353 = vmatmul.mubr.f32.gmra.mxu0 %v28_v9  ;;  %v270_v46 = vld [vmem:[%s2514_s1 + $0x3d0] sm:$0xff]  ;;  %v221_v53 = vld [vmem:[%s2514_s1 + $0x248] sm:$0xff]  ;;  %v76_v57 = vld [vmem:[%s2515_s0 + $0x1c0] sm:$0xff] }
  0x28   :  { %497 = vmatprep.mubr.f32.mxu1 %v31_v10  ;;  %1253 = vmatprep.subr.mxu0 %v242_v11  ;;  %v254_v48 = vld [vmem:[%s2514_s1 + $0x350] sm:$0xff]  ;;  %v269_v54 = vld [vmem:[%s2514_s1 + $0x3c8] sm:$0xff]  ;;  %v79_v58 = vld [vmem:[%s2515_s0 + $0x1d8] sm:$0xff] }
  0x29   :  { %498 = vmatmul.mubr.f32.gmra.mxu1 %v30_v12  ;;  %1254 = vmatpush3.msra.mxu0 %v226_v13  ;;  %v70_v52 = vld [vmem:[%s2515_s0 + $0x190] sm:$0xff]  ;;  %v77_v55 = vld [vmem:[%s2515_s0 + $0x1c8] sm:$0xff]  ;;  %v236_v59 = vld [vmem:[%s2514_s1 + $0x2c0] sm:$0xff] }
  0x2a   :  { %1333 = vmatprep.subr.mxu1 %v274_v14  ;;  %357 = vmatprep.mubr.f32.mxu0 %v37_v15  ;;  %v253_v56 = vld [vmem:[%s2514_s1 + $0x348] sm:$0xff]  ;;  %v78_v60 = vld [vmem:[%s2515_s0 + $0x1d0] sm:$0xff]  ;;  %v220_v61 = vld [vmem:[%s2514_s1 + $0x240] sm:$0xff] }
  0x2b   :  { %1334 = vmatpush3.msra.mxu1 %v258_v16  ;;  %358 = vmatmul.mubr.f32.gmra.mxu0 %v36_v17  ;;  %v268_v62 = vld [vmem:[%s2514_s1 + $0x3c0] sm:$0xff]  ;;  %v85_v63 = vld [vmem:[%s2515_s0 + $0x208] sm:$0xff]  ;;  %v87_v2 = vld [vmem:[%s2515_s0 + $0x218] sm:$0xff] }
  0x2c   :  { %502 = vmatprep.mubr.f32.mxu1 %v39_v18  ;;  %1255 = vmatprep.subr.mxu0 %v241_v19  ;;  %v252_v0 = vld [vmem:[%s2514_s1 + $0x340] sm:$0xff]  ;;  %v235_v3 = vld [vmem:[%s2514_s1 + $0x2b8] sm:$0xff]  ;;  %v86_v4 = vld [vmem:[%s2515_s0 + $0x210] sm:$0xff] }
  0x2d   :  { %503 = vmatmul.mubr.f32.gmra.mxu1 %v38_v20  ;;  %1256 = vmatpush3.msra.mxu0 %v225_v21  ;;  %v84_v1 = vld [vmem:[%s2515_s0 + $0x200] sm:$0xff]  ;;  %v219_v5 = vld [vmem:[%s2514_s1 + $0x238] sm:$0xff]  ;;  %v93_v7 = vld [vmem:[%s2515_s0 + $0x248] sm:$0xff] }
  0x2e   :  { %1335 = vmatprep.subr.mxu1 %v273_v22  ;;  %362 = vmatprep.mubr.f32.mxu0 %v45_v23  ;;  %v267_v6 = vld [vmem:[%s2514_s1 + $0x3b8] sm:$0xff]  ;;  %v92_v9 = vld [vmem:[%s2515_s0 + $0x240] sm:$0xff]  ;;  %v234_v11 = vld [vmem:[%s2514_s1 + $0x2b0] sm:$0xff] }
  0x2f   :  { %1336 = vmatpush3.msra.mxu1 %v257_v24  ;;  %363 = vmatmul.mubr.f32.gmra.mxu0 %v44_v25  ;;  %v251_v8 = vld [vmem:[%s2514_s1 + $0x338] sm:$0xff]  ;;  %v94_v12 = vld [vmem:[%s2515_s0 + $0x250] sm:$0xff]  ;;  %v101_v15 = vld [vmem:[%s2515_s0 + $0x288] sm:$0xff] }
  0x30   :  { %507 = vmatprep.mubr.f32.mxu1 %v47_v26  ;;  %1257 = vmatprep.subr.mxu0 %v240_v27  ;;  %v95_v10 = vld [vmem:[%s2515_s0 + $0x258] sm:$0xff]  ;;  %v218_v13 = vld [vmem:[%s2514_s1 + $0x230] sm:$0xff]  ;;  %v100_v17 = vld [vmem:[%s2515_s0 + $0x280] sm:$0xff] }
  0x31   :  { %508 = vmatmul.mubr.f32.gmra.mxu1 %v46_v28  ;;  %1258 = vmatpush3.msra.mxu0 %v224_v29  ;;  %v266_v14 = vld [vmem:[%s2514_s1 + $0x3b0] sm:$0xff]  ;;  %v103_v18 = vld [vmem:[%s2515_s0 + $0x298] sm:$0xff]  ;;  %v233_v19 = vld [vmem:[%s2514_s1 + $0x2a8] sm:$0xff] }
  0x32   :  { %1337 = vmatprep.subr.mxu1 %v272_v30  ;;  %367 = vmatprep.mubr.f32.mxu0 %v53_v31  ;;  %v250_v16 = vld [vmem:[%s2514_s1 + $0x330] sm:$0xff]  ;;  %v217_v21 = vld [vmem:[%s2514_s1 + $0x228] sm:$0xff]  ;;  %v108_v25 = vld [vmem:[%s2515_s0 + $0x2c0] sm:$0xff] }
  0x33   :  { %1338 = vmatpush3.msra.mxu1 %v256_v32  ;;  %368 = vmatmul.mubr.f32.gmra.mxu0 %v52_v33  ;;  %v102_v20 = vld [vmem:[%s2515_s0 + $0x290] sm:$0xff]  ;;  %v265_v22 = vld [vmem:[%s2514_s1 + $0x3a8] sm:$0xff]  ;;  %v111_v26 = vld [vmem:[%s2515_s0 + $0x2d8] sm:$0xff] }
  0x34   :  { %512 = vmatprep.mubr.f32.mxu1 %v55_v34  ;;  %1259 = vmatprep.subr.mxu0 %v239_v35  ;;  %v109_v23 = vld [vmem:[%s2515_s0 + $0x2c8] sm:$0xff]  ;;  %v232_v27 = vld [vmem:[%s2514_s1 + $0x2a0] sm:$0xff]  ;;  %v110_v28 = vld [vmem:[%s2515_s0 + $0x2d0] sm:$0xff] }
  0x35   :  { %513 = vmatmul.mubr.f32.gmra.mxu1 %v54_v36  ;;  %1260 = vmatpush3.msra.mxu0 %v223_v37  ;;  %v249_v24 = vld [vmem:[%s2514_s1 + $0x328] sm:$0xff]  ;;  %v216_v29 = vld [vmem:[%s2514_s1 + $0x220] sm:$0xff]  ;;  %v119_v34 = vld [vmem:[%s2515_s0 + $0x318] sm:$0xff] }
  0x36   :  { %1339 = vmatprep.subr.mxu1 %v271_v38  ;;  %372 = vmatprep.mubr.f32.mxu0 %v61_v39  ;;  %v264_v30 = vld [vmem:[%s2514_s1 + $0x3a0] sm:$0xff]  ;;  %v117_v31 = vld [vmem:[%s2515_s0 + $0x308] sm:$0xff]  ;;  %v231_v35 = vld [vmem:[%s2514_s1 + $0x298] sm:$0xff] }
  0x37   :  { %1340 = vmatpush3.msra.mxu1 %v255_v40  ;;  %373 = vmatmul.mubr.f32.gmra.mxu0 %v60_v41  ;;  %v248_v32 = vld [vmem:[%s2514_s1 + $0x320] sm:$0xff]  ;;  %v118_v36 = vld [vmem:[%s2515_s0 + $0x310] sm:$0xff]  ;;  %v215_v37 = vld [vmem:[%s2514_s1 + $0x218] sm:$0xff] }
  0x38   :  { %517 = vmatprep.mubr.f32.mxu1 %v63_v42  ;;  %1261 = vmatprep.subr.mxu0 %v238_v43  ;;  %v116_v33 = vld [vmem:[%s2515_s0 + $0x300] sm:$0xff]  ;;  %v263_v38 = vld [vmem:[%s2514_s1 + $0x398] sm:$0xff]  ;;  %v125_v39 = vld [vmem:[%s2515_s0 + $0x348] sm:$0xff] }
  0x39   :  { %518 = vmatmul.mubr.f32.gmra.mxu1 %v62_v44  ;;  %1262 = vmatpush3.msra.mxu0 %v222_v45  ;;  %v247_v40 = vld [vmem:[%s2514_s1 + $0x318] sm:$0xff]  ;;  %v124_v41 = vld [vmem:[%s2515_s0 + $0x340] sm:$0xff]  ;;  %v230_v43 = vld [vmem:[%s2514_s1 + $0x290] sm:$0xff] }
  0x3a   :  { %1341 = vmatprep.subr.mxu1 %v270_v46  ;;  %377 = vmatprep.mubr.f32.mxu0 %v69_v47  ;;  %v127_v42 = vld [vmem:[%s2515_s0 + $0x358] sm:$0xff]  ;;  %v126_v44 = vld [vmem:[%s2515_s0 + $0x350] sm:$0xff]  ;;  %v133_v47 = vld [vmem:[%s2515_s0 + $0x388] sm:$0xff] }
  0x3b   :  { %1342 = vmatpush3.msra.mxu1 %v254_v48  ;;  %378 = vmatmul.mubr.f32.gmra.mxu0 %v68_v49  ;;  %v214_v45 = vld [vmem:[%s2514_s1 + $0x210] sm:$0xff]  ;;  %v132_v49 = vld [vmem:[%s2515_s0 + $0x380] sm:$0xff] }
  0x3c   :  { %522 = vmatprep.mubr.f32.mxu1 %v71_v50  ;;  %1263 = vmatprep.subr.mxu0 %v237_v51  ;;  %v262_v46 = vld [vmem:[%s2514_s1 + $0x390] sm:$0xff]  ;;  %v135_v50 = vld [vmem:[%s2515_s0 + $0x398] sm:$0xff]  ;;  %v229_v51 = vld [vmem:[%s2514_s1 + $0x288] sm:$0xff] }
  0x3d   :  { %523 = vmatmul.mubr.f32.gmra.mxu1 %v70_v52  ;;  %1264 = vmatpush3.msra.mxu0 %v221_v53  ;;  %v246_v48 = vld [vmem:[%s2514_s1 + $0x310] sm:$0xff]  ;;  %v213_v53 = vld [vmem:[%s2514_s1 + $0x208] sm:$0xff] }
  0x3e   :  { %1343 = vmatprep.subr.mxu1 %v269_v54  ;;  %382 = vmatprep.mubr.f32.mxu0 %v77_v55  ;;  %v134_v52 = vld [vmem:[%s2515_s0 + $0x390] sm:$0xff]  ;;  %v261_v54 = vld [vmem:[%s2514_s1 + $0x388] sm:$0xff] }
  0x3f   :  { %1344 = vmatpush3.msra.mxu1 %v253_v56  ;;  %383 = vmatmul.mubr.f32.gmra.mxu0 %v76_v57  ;;  %v141_v55 = vld [vmem:[%s2515_s0 + $0x3c8] sm:$0xff]  ;;  %v140_v57 = vld [vmem:[%s2515_s0 + $0x3c0] sm:$0xff] }
  0x40   :  { %527 = vmatprep.mubr.f32.mxu1 %v79_v58  ;;  %1265 = vmatprep.subr.mxu0 %v236_v59  ;;  %v245_v56 = vld [vmem:[%s2514_s1 + $0x308] sm:$0xff]  ;;  %v143_v58 = vld [vmem:[%s2515_s0 + $0x3d8] sm:$0xff]  ;;  %v228_v59 = vld [vmem:[%s2514_s1 + $0x280] sm:$0xff] }
  0x41   :  { %528 = vmatmul.mubr.f32.gmra.mxu1 %v78_v60  ;;  %1266 = vmatpush3.msra.mxu0 %v220_v61  ;;  %v142_v60 = vld [vmem:[%s2515_s0 + $0x3d0] sm:$0xff]  ;;  %v212_v61 = vld [vmem:[%s2514_s1 + $0x200] sm:$0xff] }
  0x42   :  { %1345 = vmatprep.subr.mxu1 %v268_v62  ;;  %387 = vmatprep.mubr.f32.mxu0 %v85_v63  ;;  %v260_v62 = vld [vmem:[%s2514_s1 + $0x380] sm:$0xff]  ;;  %v25_v63 = vld [vmem:[%s2515_s0 + $0x28] sm:$0xff] }
  0x43   :  { %1346 = vmatpush3.msra.mxu1 %v252_v0  ;;  %388 = vmatmul.mubr.f32.gmra.mxu0 %v84_v1  ;;  %v244_v0 = vld [vmem:[%s2514_s1 + $0x300] sm:$0xff] }
  0x44   :  { %532 = vmatprep.mubr.f32.mxu1 %v87_v2  ;;  %1267 = vmatprep.subr.mxu0 %v235_v3  ;;  %v24_v1 = vld [vmem:[%s2515_s0 + $0x20] sm:$0xff]  ;;  %v27_v2 = vld [vmem:[%s2515_s0 + $0x38] sm:$0xff]  ;;  %v33_v3 = vld [vmem:[%s2515_s0 + $0x68] sm:$0xff] }
  0x45   :  { %533 = vmatmul.mubr.f32.gmra.mxu1 %v86_v4  ;;  %1268 = vmatpush3.msra.mxu0 %v219_v5  ;;  %v26_v4 = vld [vmem:[%s2515_s0 + $0x30] sm:$0xff]  ;;  %v35_v5 = vld [vmem:[%s2515_s0 + $0x78] sm:$0xff] }
  0x46   :  { %1347 = vmatprep.subr.mxu1 %v267_v6  ;;  %392 = vmatprep.mubr.f32.mxu0 %v93_v7  ;;  %v32_v6 = vld [vmem:[%s2515_s0 + $0x60] sm:$0xff]  ;;  %v41_v7 = vld [vmem:[%s2515_s0 + $0xa8] sm:$0xff] }
  0x47   :  { %1348 = vmatpush3.msra.mxu1 %v251_v8  ;;  %393 = vmatmul.mubr.f32.gmra.mxu0 %v92_v9  ;;  %v34_v8 = vld [vmem:[%s2515_s0 + $0x70] sm:$0xff]  ;;  %v43_v9 = vld [vmem:[%s2515_s0 + $0xb8] sm:$0xff] }
  0x48   :  { %537 = vmatprep.mubr.f32.mxu1 %v95_v10  ;;  %1269 = vmatprep.subr.mxu0 %v234_v11  ;;  %v40_v10 = vld [vmem:[%s2515_s0 + $0xa0] sm:$0xff]  ;;  %v49_v11 = vld [vmem:[%s2515_s0 + $0xe8] sm:$0xff] }
  0x49   :  { %538 = vmatmul.mubr.f32.gmra.mxu1 %v94_v12  ;;  %1270 = vmatpush3.msra.mxu0 %v218_v13  ;;  %v42_v12 = vld [vmem:[%s2515_s0 + $0xb0] sm:$0xff]  ;;  %v51_v13 = vld [vmem:[%s2515_s0 + $0xf8] sm:$0xff] }
  0x4a   :  { %1349 = vmatprep.subr.mxu1 %v266_v14  ;;  %397 = vmatprep.mubr.f32.mxu0 %v101_v15  ;;  %v48_v14 = vld [vmem:[%s2515_s0 + $0xe0] sm:$0xff]  ;;  %v57_v15 = vld [vmem:[%s2515_s0 + $0x128] sm:$0xff] }
  0x4b   :  { %1350 = vmatpush3.msra.mxu1 %v250_v16  ;;  %398 = vmatmul.mubr.f32.gmra.mxu0 %v100_v17  ;;  %v50_v16 = vld [vmem:[%s2515_s0 + $0xf0] sm:$0xff]  ;;  %v59_v17 = vld [vmem:[%s2515_s0 + $0x138] sm:$0xff] }
  0x4c   :  { %542 = vmatprep.mubr.f32.mxu1 %v103_v18  ;;  %1271 = vmatprep.subr.mxu0 %v233_v19  ;;  %v56_v18 = vld [vmem:[%s2515_s0 + $0x120] sm:$0xff]  ;;  %v65_v19 = vld [vmem:[%s2515_s0 + $0x168] sm:$0xff] }
  0x4d   :  { %543 = vmatmul.mubr.f32.gmra.mxu1 %v102_v20  ;;  %1272 = vmatpush3.msra.mxu0 %v217_v21  ;;  %v58_v20 = vld [vmem:[%s2515_s0 + $0x130] sm:$0xff]  ;;  %v67_v21 = vld [vmem:[%s2515_s0 + $0x178] sm:$0xff] }
  0x4e   :  { %1351 = vmatprep.subr.mxu1 %v265_v22  ;;  %402 = vmatprep.mubr.f32.mxu0 %v109_v23  ;;  %v64_v22 = vld [vmem:[%s2515_s0 + $0x160] sm:$0xff]  ;;  %v73_v23 = vld [vmem:[%s2515_s0 + $0x1a8] sm:$0xff] }
  0x4f   :  { %1352 = vmatpush3.msra.mxu1 %v249_v24  ;;  %403 = vmatmul.mubr.f32.gmra.mxu0 %v108_v25  ;;  %v66_v24 = vld [vmem:[%s2515_s0 + $0x170] sm:$0xff]  ;;  %v75_v25 = vld [vmem:[%s2515_s0 + $0x1b8] sm:$0xff] }
  0x50   :  { %547 = vmatprep.mubr.f32.mxu1 %v111_v26  ;;  %1273 = vmatprep.subr.mxu0 %v232_v27  ;;  %v72_v26 = vld [vmem:[%s2515_s0 + $0x1a0] sm:$0xff]  ;;  %v81_v27 = vld [vmem:[%s2515_s0 + $0x1e8] sm:$0xff] }
  0x51   :  { %548 = vmatmul.mubr.f32.gmra.mxu1 %v110_v28  ;;  %1274 = vmatpush3.msra.mxu0 %v216_v29  ;;  %v74_v28 = vld [vmem:[%s2515_s0 + $0x1b0] sm:$0xff]  ;;  %v83_v29 = vld [vmem:[%s2515_s0 + $0x1f8] sm:$0xff] }
  0x52   :  { %1353 = vmatprep.subr.mxu1 %v264_v30  ;;  %407 = vmatprep.mubr.f32.mxu0 %v117_v31  ;;  %v80_v30 = vld [vmem:[%s2515_s0 + $0x1e0] sm:$0xff]  ;;  %v89_v31 = vld [vmem:[%s2515_s0 + $0x228] sm:$0xff] }
  0x53   :  { %1354 = vmatpush3.msra.mxu1 %v248_v32  ;;  %408 = vmatmul.mubr.f32.gmra.mxu0 %v116_v33  ;;  %v82_v32 = vld [vmem:[%s2515_s0 + $0x1f0] sm:$0xff]  ;;  %v91_v33 = vld [vmem:[%s2515_s0 + $0x238] sm:$0xff] }
  0x54   :  { %552 = vmatprep.mubr.f32.mxu1 %v119_v34  ;;  %1275 = vmatprep.subr.mxu0 %v231_v35  ;;  %v88_v34 = vld [vmem:[%s2515_s0 + $0x220] sm:$0xff]  ;;  %v97_v35 = vld [vmem:[%s2515_s0 + $0x268] sm:$0xff] }
  0x55   :  { %553 = vmatmul.mubr.f32.gmra.mxu1 %v118_v36  ;;  %1276 = vmatpush3.msra.mxu0 %v215_v37  ;;  %v90_v36 = vld [vmem:[%s2515_s0 + $0x230] sm:$0xff]  ;;  %v99_v37 = vld [vmem:[%s2515_s0 + $0x278] sm:$0xff] }
  0x56   :  { %1355 = vmatprep.subr.mxu1 %v263_v38  ;;  %412 = vmatprep.mubr.f32.mxu0 %v125_v39  ;;  %v96_v38 = vld [vmem:[%s2515_s0 + $0x260] sm:$0xff]  ;;  %v105_v39 = vld [vmem:[%s2515_s0 + $0x2a8] sm:$0xff] }
  0x57   :  { %1356 = vmatpush3.msra.mxu1 %v247_v40  ;;  %413 = vmatmul.mubr.f32.gmra.mxu0 %v124_v41  ;;  %v98_v40 = vld [vmem:[%s2515_s0 + $0x270] sm:$0xff]  ;;  %v107_v41 = vld [vmem:[%s2515_s0 + $0x2b8] sm:$0xff] }
  0x58   :  { %557 = vmatprep.mubr.f32.mxu1 %v127_v42  ;;  %1277 = vmatprep.subr.mxu0 %v230_v43  ;;  %v104_v42 = vld [vmem:[%s2515_s0 + $0x2a0] sm:$0xff]  ;;  %v113_v43 = vld [vmem:[%s2515_s0 + $0x2e8] sm:$0xff] }
  0x59   :  { %558 = vmatmul.mubr.f32.gmra.mxu1 %v126_v44  ;;  %1278 = vmatpush3.msra.mxu0 %v214_v45  ;;  %v106_v44 = vld [vmem:[%s2515_s0 + $0x2b0] sm:$0xff]  ;;  %v115_v45 = vld [vmem:[%s2515_s0 + $0x2f8] sm:$0xff] }
  0x5a   :  { %1357 = vmatprep.subr.mxu1 %v262_v46  ;;  %417 = vmatprep.mubr.f32.mxu0 %v133_v47  ;;  %v112_v46 = vld [vmem:[%s2515_s0 + $0x2e0] sm:$0xff]  ;;  %v121_v47 = vld [vmem:[%s2515_s0 + $0x328] sm:$0xff] }
  0x5b   :  { %1358 = vmatpush3.msra.mxu1 %v246_v48  ;;  %418 = vmatmul.mubr.f32.gmra.mxu0 %v132_v49  ;;  %v114_v48 = vld [vmem:[%s2515_s0 + $0x2f0] sm:$0xff]  ;;  %v123_v49 = vld [vmem:[%s2515_s0 + $0x338] sm:$0xff] }
  0x5c   :  { %562 = vmatprep.mubr.f32.mxu1 %v135_v50  ;;  %1279 = vmatprep.subr.mxu0 %v229_v51  ;;  %v120_v50 = vld [vmem:[%s2515_s0 + $0x320] sm:$0xff]  ;;  %v129_v51 = vld [vmem:[%s2515_s0 + $0x368] sm:$0xff] }
  0x5d   :  { %563 = vmatmul.mubr.f32.gmra.mxu1 %v134_v52  ;;  %1280 = vmatpush3.msra.mxu0 %v213_v53  ;;  %v122_v52 = vld [vmem:[%s2515_s0 + $0x330] sm:$0xff]  ;;  %v131_v53 = vld [vmem:[%s2515_s0 + $0x378] sm:$0xff] }
  0x5e   :  { %1359 = vmatprep.subr.mxu1 %v261_v54  ;;  %422 = vmatprep.mubr.f32.mxu0 %v141_v55  ;;  %v128_v54 = vld [vmem:[%s2515_s0 + $0x360] sm:$0xff]  ;;  %v137_v55 = vld [vmem:[%s2515_s0 + $0x3a8] sm:$0xff] }
  0x5f   :  { %1360 = vmatpush3.msra.mxu1 %v245_v56  ;;  %423 = vmatmul.mubr.f32.gmra.mxu0 %v140_v57  ;;  %v130_v56 = vld [vmem:[%s2515_s0 + $0x370] sm:$0xff]  ;;  %v139_v57 = vld [vmem:[%s2515_s0 + $0x3b8] sm:$0xff] }
  0x60   :  { %567 = vmatprep.mubr.f32.mxu1 %v143_v58  ;;  %1281 = vmatprep.subr.mxu0 %v228_v59  ;;  %v136_v58 = vld [vmem:[%s2515_s0 + $0x3a0] sm:$0xff]  ;;  %v145_v59 = vld [vmem:[%s2515_s0 + $0x3e8] sm:$0xff] }
  0x61   :  { %568 = vmatmul.mubr.f32.gmra.mxu1 %v142_v60  ;;  %1282 = vmatpush3.msra.mxu0 %v212_v61  ;;  %v138_v60 = vld [vmem:[%s2515_s0 + $0x3b0] sm:$0xff]  ;;  %v147_v61 = vld [vmem:[%s2515_s0 + $0x3f8] sm:$0xff] }
  0x62   :  { %1361 = vmatprep.subr.mxu1 %v260_v62  ;;  %637 = vmatprep.mubr.f32.mxu0 %v25_v63  ;;  %v144_v62 = vld [vmem:[%s2515_s0 + $0x3e0] sm:$0xff]  ;;  %v146_v63 = vld [vmem:[%s2515_s0 + $0x3f0] sm:$0xff] }
  0x63   :  { %1362 = vmatpush3.msra.mxu1 %v244_v0  ;;  %638 = vmatmul.mubr.f32.vlgmr.msra.gmra.mxu0 %v24_v1 }
  0x64   :  { %782 = vmatprep.mubr.f32.mxu1 %v27_v2  ;;  %642 = vmatprep.mubr.f32.mxu0 %v33_v3  ;;  %v2214_v2 = vld [vmem:[%s2516_s2] ss:$0 sm:$0xff] }
  0x65   :  { %783 = vmatmul.mubr.f32.vlgmr.msra.gmra.mxu1 %v26_v4 }
  0x66   :  { %787 = vmatprep.mubr.f32.mxu1 %v35_v5 }
  0x67   :  { %643 = vmatmul.mubr.f32.gmra.mxu0 %v32_v6 }
  0x68   :  { %647 = vmatprep.mubr.f32.mxu0 %v41_v7 }
  0x69   :  { %788 = vmatmul.mubr.f32.gmra.mxu1 %v34_v8 }
  0x6a   :  { %792 = vmatprep.mubr.f32.mxu1 %v43_v9 }
  0x6b   :  { %648 = vmatmul.mubr.f32.gmra.mxu0 %v40_v10 }
  0x6c   :  { %652 = vmatprep.mubr.f32.mxu0 %v49_v11 }
  0x6d   :  { %793 = vmatmul.mubr.f32.gmra.mxu1 %v42_v12 }
  0x6e   :  { %797 = vmatprep.mubr.f32.mxu1 %v51_v13 }
  0x6f   :  { %653 = vmatmul.mubr.f32.gmra.mxu0 %v48_v14 }
  0x70   :  { %657 = vmatprep.mubr.f32.mxu0 %v57_v15 }
  0x71   :  { %798 = vmatmul.mubr.f32.gmra.mxu1 %v50_v16 }
  0x72   :  { %802 = vmatprep.mubr.f32.mxu1 %v59_v17 }
  0x73   :  { %658 = vmatmul.mubr.f32.gmra.mxu0 %v56_v18 }
  0x74   :  { %662 = vmatprep.mubr.f32.mxu0 %v65_v19 }
  0x75   :  { %803 = vmatmul.mubr.f32.gmra.mxu1 %v58_v20 }
  0x76   :  { %807 = vmatprep.mubr.f32.mxu1 %v67_v21 }
  0x77   :  { %663 = vmatmul.mubr.f32.gmra.mxu0 %v64_v22 }
  0x78   :  { %667 = vmatprep.mubr.f32.mxu0 %v73_v23 }
  0x79   :  { %808 = vmatmul.mubr.f32.gmra.mxu1 %v66_v24 }
  0x7a   :  { %812 = vmatprep.mubr.f32.mxu1 %v75_v25 }
  0x7b   :  { %668 = vmatmul.mubr.f32.gmra.mxu0 %v72_v26 }
  0x7c   :  { %672 = vmatprep.mubr.f32.mxu0 %v81_v27 }
  0x7d   :  { %813 = vmatmul.mubr.f32.gmra.mxu1 %v74_v28 }
  0x7e   :  { %817 = vmatprep.mubr.f32.mxu1 %v83_v29 }
  0x7f   :  { %673 = vmatmul.mubr.f32.gmra.mxu0 %v80_v30 }
  0x80   :  { %677 = vmatprep.mubr.f32.mxu0 %v89_v31 }
  0x81   :  { %818 = vmatmul.mubr.f32.gmra.mxu1 %v82_v32 }
  0x82   :  { %822 = vmatprep.mubr.f32.mxu1 %v91_v33 }
  0x83   :  { %678 = vmatmul.mubr.f32.gmra.mxu0 %v88_v34 }
  0x84   :  { %682 = vmatprep.mubr.f32.mxu0 %v97_v35 }
  0x85   :  { %823 = vmatmul.mubr.f32.gmra.mxu1 %v90_v36 }
  0x86   :  { %827 = vmatprep.mubr.f32.mxu1 %v99_v37 }
  0x87   :  { %683 = vmatmul.mubr.f32.gmra.mxu0 %v96_v38 }
  0x88   :  { %687 = vmatprep.mubr.f32.mxu0 %v105_v39 }
  0x89   :  { %828 = vmatmul.mubr.f32.gmra.mxu1 %v98_v40 }
  0x8a   :  { %832 = vmatprep.mubr.f32.mxu1 %v107_v41 }
  0x8b   :  { %688 = vmatmul.mubr.f32.gmra.mxu0 %v104_v42 }
  0x8c   :  { %692 = vmatprep.mubr.f32.mxu0 %v113_v43 }
  0x8d   :  { %833 = vmatmul.mubr.f32.gmra.mxu1 %v106_v44 }
  0x8e   :  { %837 = vmatprep.mubr.f32.mxu1 %v115_v45 }
  0x8f   :  { %693 = vmatmul.mubr.f32.gmra.mxu0 %v112_v46 }
  0x90   :  { %697 = vmatprep.mubr.f32.mxu0 %v121_v47 }
  0x91   :  { %838 = vmatmul.mubr.f32.gmra.mxu1 %v114_v48 }
  0x92   :  { %842 = vmatprep.mubr.f32.mxu1 %v123_v49 }
  0x93   :  { %698 = vmatmul.mubr.f32.gmra.mxu0 %v120_v50 }
  0x94   :  { %702 = vmatprep.mubr.f32.mxu0 %v129_v51 }
  0x95   :  { %843 = vmatmul.mubr.f32.gmra.mxu1 %v122_v52 }
  0x96   :  { %847 = vmatprep.mubr.f32.mxu1 %v131_v53 }
  0x97   :  { %703 = vmatmul.mubr.f32.gmra.mxu0 %v128_v54 }
  0x98   :  { %707 = vmatprep.mubr.f32.mxu0 %v137_v55 }
  0x99   :  { %848 = vmatmul.mubr.f32.gmra.mxu1 %v130_v56 }
  0x9a   :  { %852 = vmatprep.mubr.f32.mxu1 %v139_v57 }
  0x9b   :  { %708 = vmatmul.mubr.f32.gmra.mxu0 %v136_v58 }
  0x9c   :  { %712 = vmatprep.mubr.f32.mxu0 %v145_v59 }
  0x9d   :  { %853 = vmatmul.mubr.f32.gmra.mxu1 %v138_v60 }
  0x9e   :  { %857 = vmatprep.mubr.f32.mxu1 %v147_v61 }
  0x9f   :  { %713 = vmatmul.mubr.f32.gmra.mxu0 %v144_v62 }
  0xa1   :  { %858 = vmatmul.mubr.f32.gmra.mxu1 %v146_v63 }
  0xe3   :  { %v1123_v0 = vpop.f32.mrf.mxu0 }
  0xe5   :  { %v1203_v1 = vpop.f32.mrf.mxu1  ;;  %v1124_v3 = vpop.f32.mrf.mxu0 }
  0xe6   :  { %v1125_v4 = vadd.f32 %v1124_v3, %v1123_v0 }
  0xe7   :  { %v1204_v5 = vpop.f32.mrf.mxu1  ;;  %v1126_v6 = vpop.f32.mrf.mxu0 }
  0xe8   :  { %v350_v7 = vadd.f32 %v1125_v4, %v2214_v2  ;;  %v1205_v8 = vadd.f32 %v1204_v5, %v1203_v1 }
  0xe9   :  { %v1206_v9 = vpop.f32.mrf.mxu1  ;;  %v1127_v10 = vpop.f32.mrf.mxu0 }
  0xea   :  { %v2217_v11 = vadd.f32 %v1205_v8, %v350_v7  ;;  %v1128_v12 = vadd.f32 %v1127_v10, %v1126_v6 }
  0xeb   :  { %v1207_v13 = vpop.f32.mrf.mxu1  ;;  %v1129_v14 = vpop.f32.mrf.mxu0 }
  0xec   :  { %v355_v15 = vadd.f32 %v1128_v12, %v2214_v2  ;;  %v1208_v16 = vadd.f32 %v1207_v13, %v1206_v9 }
  0xed   :  { %v1209_v17 = vpop.f32.mrf.mxu1  ;;  %v1130_v18 = vpop.f32.mrf.mxu0 }
  0xee   :  { %v2220_v19 = vadd.f32 %v1208_v16, %v355_v15  ;;  %v1131_v20 = vadd.f32 %v1130_v18, %v1129_v14 }
  0xef   :  { %v1210_v21 = vpop.f32.mrf.mxu1  ;;  %v1132_v22 = vpop.f32.mrf.mxu0 }
  0xf0   :  { %v360_v23 = vadd.f32 %v1131_v20, %v2214_v2  ;;  %v1211_v24 = vadd.f32 %v1210_v21, %v1209_v17 }
  0xf1   :  { %v1212_v25 = vpop.f32.mrf.mxu1  ;;  %v1133_v26 = vpop.f32.mrf.mxu0 }
  0xf2   :  { %v2223_v27 = vadd.f32 %v1211_v24, %v360_v23  ;;  %v1134_v28 = vadd.f32 %v1133_v26, %v1132_v22 }
  0xf3   :  { %v1213_v29 = vpop.f32.mrf.mxu1  ;;  %v1135_v30 = vpop.f32.mrf.mxu0 }
  0xf4   :  { %v365_v31 = vadd.f32 %v1134_v28, %v2214_v2  ;;  %v1214_v32 = vadd.f32 %v1213_v29, %v1212_v25 }
  0xf5   :  { %v1215_v33 = vpop.f32.mrf.mxu1  ;;  %v1136_v34 = vpop.f32.mrf.mxu0 }
  0xf6   :  { %v2226_v35 = vadd.f32 %v1214_v32, %v365_v31  ;;  %v1137_v36 = vadd.f32 %v1136_v34, %v1135_v30 }
  0xf7   :  { %v1216_v37 = vpop.f32.mrf.mxu1  ;;  %v1138_v38 = vpop.f32.mrf.mxu0 }
  0xf8   :  { %v370_v39 = vadd.f32 %v1137_v36, %v2214_v2  ;;  %v1217_v40 = vadd.f32 %v1216_v37, %v1215_v33 }
  0xf9   :  { %v1218_v41 = vpop.f32.mrf.mxu1  ;;  %v1139_v42 = vpop.f32.mrf.mxu0 }
  0xfa   :  { %v2229_v43 = vadd.f32 %v1217_v40, %v370_v39  ;;  %v1140_v44 = vadd.f32 %v1139_v42, %v1138_v38 }
  0xfb   :  { %v1219_v45 = vpop.f32.mrf.mxu1  ;;  %v1141_v46 = vpop.f32.mrf.mxu0 }
  0xfc   :  { %v375_v47 = vadd.f32 %v1140_v44, %v2214_v2  ;;  %v1220_v48 = vadd.f32 %v1219_v45, %v1218_v41 }
  0xfd   :  { %v1221_v49 = vpop.f32.mrf.mxu1  ;;  %v1142_v50 = vpop.f32.mrf.mxu0 }
  0xfe   :  { %v2232_v51 = vadd.f32 %v1220_v48, %v375_v47  ;;  %v1143_v52 = vadd.f32 %v1142_v50, %v1141_v46 }
  0xff   :  { %v1222_v53 = vpop.f32.mrf.mxu1  ;;  %v1144_v54 = vpop.f32.mrf.mxu0 }
 0x100   :  { %v380_v55 = vadd.f32 %v1143_v52, %v2214_v2  ;;  %v1223_v56 = vadd.f32 %v1222_v53, %v1221_v49 }
 0x101   :  { %v1224_v57 = vpop.f32.mrf.mxu1  ;;  %v1145_v58 = vpop.f32.mrf.mxu0 }
 0x102   :  { %v2235_v59 = vadd.f32 %v1223_v56, %v380_v55  ;;  %v1146_v60 = vadd.f32 %v1145_v58, %v1144_v54 }
 0x103   :  { %v1225_v61 = vpop.f32.mrf.mxu1  ;;  %v1147_v62 = vpop.f32.mrf.mxu0 }
 0x104   :  { %v385_v63 = vadd.f32 %v1146_v60, %v2214_v2  ;;  %v1226_v0 = vadd.f32 %v1225_v61, %v1224_v57 }
 0x105   :  { %v1227_v1 = vpop.f32.mrf.mxu1  ;;  %v1148_v3 = vpop.f32.mrf.mxu0 }
 0x106   :  { %v2238_v4 = vadd.f32 %v1226_v0, %v385_v63  ;;  %v1149_v5 = vadd.f32 %v1148_v3, %v1147_v62 }
 0x107   :  { %v1228_v6 = vpop.f32.mrf.mxu1  ;;  %v1150_v7 = vpop.f32.mrf.mxu0 }
 0x108   :  { %v390_v8 = vadd.f32 %v1149_v5, %v2214_v2  ;;  %v1229_v9 = vadd.f32 %v1228_v6, %v1227_v1 }
 0x109   :  { %v1230_v10 = vpop.f32.mrf.mxu1  ;;  %v1151_v12 = vpop.f32.mrf.mxu0 }
 0x10a   :  { %v2241_v13 = vadd.f32 %v1229_v9, %v390_v8  ;;  %v1152_v14 = vadd.f32 %v1151_v12, %v1150_v7 }
 0x10b   :  { %v1231_v15 = vpop.f32.mrf.mxu1  ;;  %v1153_v16 = vpop.f32.mrf.mxu0 }
 0x10c   :  { %v395_v17 = vadd.f32 %v1152_v14, %v2214_v2  ;;  %v1232_v18 = vadd.f32 %v1231_v15, %v1230_v10 }
 0x10d   :  { %v1233_v20 = vpop.f32.mrf.mxu1  ;;  %v1154_v21 = vpop.f32.mrf.mxu0 }
 0x10e   :  { %v2244_v22 = vadd.f32 %v1232_v18, %v395_v17  ;;  %v1155_v23 = vadd.f32 %v1154_v21, %v1153_v16 }
 0x10f   :  { %v1234_v24 = vpop.f32.mrf.mxu1  ;;  %v1156_v25 = vpop.f32.mrf.mxu0 }
 0x110   :  { %v400_v26 = vadd.f32 %v1155_v23, %v2214_v2  ;;  %v1235_v28 = vadd.f32 %v1234_v24, %v1233_v20 }
 0x111   :  { %v1236_v29 = vpop.f32.mrf.mxu1  ;;  %v1157_v30 = vpop.f32.mrf.mxu0 }
 0x112   :  { %v2247_v31 = vadd.f32 %v1235_v28, %v400_v26  ;;  %v1158_v32 = vadd.f32 %v1157_v30, %v1156_v25 }
 0x113   :  { %v1237_v33 = vpop.f32.mrf.mxu1  ;;  %v1159_v34 = vpop.f32.mrf.mxu0 }
 0x114   :  { %v405_v36 = vadd.f32 %v1158_v32, %v2214_v2  ;;  %v1238_v37 = vadd.f32 %v1237_v33, %v1236_v29 }
 0x115   :  { %v1239_v38 = vpop.f32.mrf.mxu1  ;;  %v1160_v39 = vpop.f32.mrf.mxu0 }
 0x116   :  { %v2250_v40 = vadd.f32 %v1238_v37, %v405_v36  ;;  %v1161_v41 = vadd.f32 %v1160_v39, %v1159_v34 }
 0x117   :  { %v1240_v42 = vpop.f32.mrf.mxu1  ;;  %v1162_v44 = vpop.f32.mrf.mxu0 }
 0x118   :  { %v410_v45 = vadd.f32 %v1161_v41, %v2214_v2  ;;  %v1241_v46 = vadd.f32 %v1240_v42, %v1239_v38 }
 0x119   :  { %v1242_v47 = vpop.f32.mrf.mxu1  ;;  %v1163_v48 = vpop.f32.mrf.mxu0 }
 0x11a   :  { %v2253_v49 = vadd.f32 %v1241_v46, %v410_v45  ;;  %v1164_v50 = vadd.f32 %v1163_v48, %v1162_v44 }
 0x11b   :  { %v1243_v52 = vpop.f32.mrf.mxu1  ;;  %v1165_v53 = vpop.f32.mrf.mxu0 }
 0x11c   :  { %v415_v54 = vadd.f32 %v1164_v50, %v2214_v2  ;;  %v1244_v55 = vadd.f32 %v1243_v52, %v1242_v47 }
 0x11d   :  { %v1245_v56 = vpop.f32.mrf.mxu1  ;;  %v1166_v57 = vpop.f32.mrf.mxu0 }
 0x11e   :  { %v2256_v58 = vadd.f32 %v1244_v55, %v415_v54  ;;  %v1167_v60 = vadd.f32 %v1166_v57, %v1165_v53 }
 0x11f   :  { %v1246_v61 = vpop.f32.mrf.mxu1  ;;  %v2258_v62 = vpop.f32.mrf.mxu0 }
 0x120   :  { %v420_v63 = vadd.f32 %v1167_v60, %v2214_v2  ;;  %v1247_v0 = vadd.f32 %v1246_v61, %v1245_v56 }
 0x121   :  { %v2261_v1 = vpop.f32.mrf.mxu1  ;;  %v2263_v3 = vpop.f32.mrf.mxu0 }
 0x122   :  { %v2265_v5 = vadd.f32 %v1247_v0, %v420_v63 }
 0x123   :  { %v2267_v6 = vpop.f32.mrf.mxu1  ;;  %v1283_v7 = vpop.f32.mrf.mxu0 }
 0x125   :  { %v1363_v8 = vpop.f32.mrf.mxu1  ;;  %v1284_v9 = vpop.f32.mrf.mxu0 }
 0x126   :  { %v1285_v10 = vadd.f32 %v1284_v9, %v1283_v7 }
 0x127   :  { %v1364_v12 = vpop.f32.mrf.mxu1  ;;  %v1286_v14 = vpop.f32.mrf.mxu0 }
 0x128   :  { %v640_v15 = vadd.f32 %v1285_v10, %v2217_v11  ;;  %v1365_v16 = vadd.f32 %v1364_v12, %v1363_v8 }
 0x129   :  { %v1366_v17 = vpop.f32.mrf.mxu1  ;;  %v1287_v18 = vpop.f32.mrf.mxu0 }
 0x12a   :  { %v785_v20 = vadd.f32 %v1365_v16, %v640_v15  ;;  %v1288_v21 = vadd.f32 %v1287_v18, %v1286_v14 }
 0x12b   :  { %v1367_v23 = vpop.f32.mrf.mxu1  ;;  %v1289_v24 = vpop.f32.mrf.mxu0 }
 0x12c   :  { %vm863_vm0 = vcmp.ge.f32.partialorder %v785_v20, 0.0  ;;  %v879_v25 = vmul.f32 0.2, %v785_v20  ;;  %v645_v26 = vadd.f32 %v1288_v21, %v2220_v19  ;;  %v1368_v28 = vadd.f32 %v1367_v23, %v1366_v17 }
 0x12d   :  { %v1369_v29 = vpop.f32.mrf.mxu1  ;;  %v1290_v30 = vpop.f32.mrf.mxu0 }
 0x12e   :  { %v790_v32 = vadd.f32 %v1368_v28, %v645_v26  ;;  %v1291_v33 = vadd.f32 %v1290_v30, %v1289_v24  ;;  %v2271_v34 = vsel %vm863_vm0, %v785_v20, %v879_v25 }
 0x12f   :  { %v1370_v11 = vpop.f32.mrf.mxu1  ;;  %v1292_v36 = vpop.f32.mrf.mxu0  ;;  %v912_v46 = vsel %vm911_vm1, %v2271_v34, 0.0 }
 0x130   :  { %vm864_vm2 = vcmp.ge.f32.partialorder %v790_v32, 0.0  ;;  %v880_v37 = vmul.f32 0.2, %v790_v32  ;;  %v650_v38 = vadd.f32 %v1291_v33, %v2223_v27  ;;  %v1371_v39 = vadd.f32 %v1370_v11, %v1369_v29 }
 0x131   :  { %v1372_v41 = vpop.f32.mrf.mxu1  ;;  %v1293_v42 = vpop.f32.mrf.mxu0 }
 0x132   :  { %v2274_v44 = vsel %vm864_vm2, %v790_v32, %v880_v37  ;;  %v795_v19 = vadd.f32 %v1371_v39, %v650_v38  ;;  %v1294_v45 = vadd.f32 %v1293_v42, %v1292_v36 }
 0x133   :  { %v913_v47 = vsel %vm911_vm1, %v2274_v44, 0.0  ;;  %v1373_v48 = vpop.f32.mrf.mxu1  ;;  %v1295_v50 = vpop.f32.mrf.mxu0 }
 0x134   :  { %v914_v52 = vadd.f32 %v913_v47, %v912_v46  ;;  %vm865_vm3 = vcmp.ge.f32.partialorder %v795_v19, 0.0  ;;  %v881_v53 = vmul.f32 0.2, %v795_v19  ;;  %v655_v27 = vadd.f32 %v1294_v45, %v2226_v35 }
 0x135   :  { %v1374_v54 = vadd.f32 %v1373_v48, %v1372_v41  ;;  %v1375_v55 = vpop.f32.mrf.mxu1  ;;  %v1296_v56 = vpop.f32.mrf.mxu0 }
 0x136   :  { %v2281_v57 = vsel %vm865_vm3, %v795_v19, %v881_v53  ;;  %v1297_v60 = vadd.f32 %v1296_v56, %v1295_v50 }
 0x137   :  { %v915_v61 = vsel %vm911_vm1, %v2281_v57, 0.0  ;;  %v800_v63 = vadd.f32 %v1374_v54, %v655_v27  ;;  %v1376_v0 = vpop.f32.mrf.mxu1  ;;  %v1298_v7 = vpop.f32.mrf.mxu0 }
 0x138   :  { %v916_v8 = vadd.f32 %v915_v61, %v914_v52  ;;  %v660_v9 = vadd.f32 %v1297_v60, %v2229_v43  ;;  %v1377_v10 = vadd.f32 %v1376_v0, %v1375_v55 }
 0x139   :  { %vm866_vm4 = vcmp.ge.f32.partialorder %v800_v63, 0.0  ;;  %v882_v12 = vmul.f32 0.2, %v800_v63  ;;  %v1378_v14 = vpop.f32.mrf.mxu1  ;;  %v1299_v35 = vpop.f32.mrf.mxu0 }
 0x13a   :  { %v805_v15 = vadd.f32 %v1377_v10, %v660_v9  ;;  %v1300_v16 = vadd.f32 %v1299_v35, %v1298_v7 }
 0x13b   :  { %v2286_v17 = vsel %vm866_vm4, %v800_v63, %v882_v12  ;;  %v1379_v18 = vpop.f32.mrf.mxu1  ;;  %v1301_v20 = vpop.f32.mrf.mxu0 }
 0x13c   :  { %v917_v21 = vsel %vm911_vm1, %v2286_v17, 0.0  ;;  %vm867_vm5 = vcmp.ge.f32.partialorder %v805_v15, 0.0  ;;  %v883_v23 = vmul.f32 0.2, %v805_v15  ;;  %v665_v24 = vadd.f32 %v1300_v16, %v2232_v51 }
 0x13d   :  { %v918_v25 = vadd.f32 %v917_v21, %v916_v8  ;;  %v1380_v43 = vadd.f32 %v1379_v18, %v1378_v14  ;;  %v1381_v26 = vpop.f32.mrf.mxu1  ;;  %v1302_v28 = vpop.f32.mrf.mxu0 }
 0x13e   :  { %v2291_v29 = vsel %vm867_vm5, %v805_v15, %v883_v23  ;;  %v1303_v30 = vadd.f32 %v1302_v28, %v1301_v20 }
 0x13f   :  { %v919_v32 = vsel %vm911_vm1, %v2291_v29, 0.0  ;;  %v810_v33 = vadd.f32 %v1380_v43, %v665_v24  ;;  %v1382_v11 = vpop.f32.mrf.mxu1  ;;  %v1304_v36 = vpop.f32.mrf.mxu0 }
 0x140   :  { %v920_v37 = vadd.f32 %v919_v32, %v918_v25  ;;  %v670_v38 = vadd.f32 %v1303_v30, %v2235_v59  ;;  %v1383_v39 = vadd.f32 %v1382_v11, %v1381_v26 }
 0x141   :  { %vm868_vm6 = vcmp.ge.f32.partialorder %v810_v33, 0.0  ;;  %v884_v41 = vmul.f32 0.2, %v810_v33  ;;  %v1384_v51 = vpop.f32.mrf.mxu1  ;;  %v1305_v42 = vpop.f32.mrf.mxu0 }
 0x142   :  { %v815_v19 = vadd.f32 %v1383_v39, %v670_v38  ;;  %v1306_v45 = vadd.f32 %v1305_v42, %v1304_v36 }
 0x143   :  { %v2296_v46 = vsel %vm868_vm6, %v810_v33, %v884_v41  ;;  %v1385_v47 = vpop.f32.mrf.mxu1  ;;  %v1307_v48 = vpop.f32.mrf.mxu0 }
 0x144   :  { %v921_v50 = vsel %vm911_vm1, %v2296_v46, 0.0  ;;  %vm869_vm7 = vcmp.ge.f32.partialorder %v815_v19, 0.0  ;;  %v885_v52 = vmul.f32 0.2, %v815_v19  ;;  %v675_v53 = vadd.f32 %v1306_v45, %v2238_v4 }
 0x145   :  { %v922_v27 = vadd.f32 %v921_v50, %v920_v37  ;;  %v1386_v59 = vadd.f32 %v1385_v47, %v1384_v51  ;;  %v1387_v54 = vpop.f32.mrf.mxu1  ;;  %v1308_v55 = vpop.f32.mrf.mxu0 }
 0x146   :  { %v2301_v56 = vsel %vm869_vm7, %v815_v19, %v885_v52  ;;  %v1309_v60 = vadd.f32 %v1308_v55, %v1307_v48 }
 0x147   :  { %v923_v61 = vsel %vm911_vm1, %v2301_v56, 0.0  ;;  %v820_v63 = vadd.f32 %v1386_v59, %v675_v53  ;;  %v1388_v0 = vpop.f32.mrf.mxu1  ;;  %v1310_v7 = vpop.f32.mrf.mxu0 }
 0x148   :  { %v924_v8 = vadd.f32 %v923_v61, %v922_v27  ;;  %v680_v9 = vadd.f32 %v1309_v60, %v2241_v13  ;;  %v1389_v10 = vadd.f32 %v1388_v0, %v1387_v54 }
 0x149   :  { %vm870_vm8 = vcmp.ge.f32.partialorder %v820_v63, 0.0  ;;  %v886_v12 = vmul.f32 0.2, %v820_v63  ;;  %v1390_v4 = vpop.f32.mrf.mxu1  ;;  %v1311_v14 = vpop.f32.mrf.mxu0 }
 0x14a   :  { %v825_v35 = vadd.f32 %v1389_v10, %v680_v9  ;;  %v1312_v15 = vadd.f32 %v1311_v14, %v1310_v7  ;;  %v1170_v14 = vadd.f32 %v2263_v3, %v2258_v62 }
 0x14b   :  { %v2306_v16 = vsel %vm870_vm8, %v820_v63, %v886_v12  ;;  %v1391_v18 = vpop.f32.mrf.mxu1  ;;  %v1313_v20 = vpop.f32.mrf.mxu0 }
 0x14c   :  { %v925_v21 = vsel %vm911_vm1, %v2306_v16, 0.0  ;;  %vm871_vm9 = vcmp.ge.f32.partialorder %v825_v35, 0.0  ;;  %v887_v23 = vmul.f32 0.2, %v825_v35  ;;  %v685_v24 = vadd.f32 %v1312_v15, %v2244_v22 }
 0x14d   :  { %v926_v25 = vadd.f32 %v925_v21, %v924_v8  ;;  %v1392_v13 = vadd.f32 %v1391_v18, %v1390_v4  ;;  %v1393_v43 = vpop.f32.mrf.mxu1  ;;  %v1314_v26 = vpop.f32.mrf.mxu0 }
 0x14e   :  { %v2311_v28 = vsel %vm871_vm9, %v825_v35, %v887_v23  ;;  %v1315_v30 = vadd.f32 %v1314_v26, %v1313_v20 }
 0x14f   :  { %v927_v32 = vsel %vm911_vm1, %v2311_v28, 0.0  ;;  %v830_v33 = vadd.f32 %v1392_v13, %v685_v24  ;;  %v1394_v11 = vpop.f32.mrf.mxu1  ;;  %v1316_v36 = vpop.f32.mrf.mxu0 }
 0x150   :  { %v928_v37 = vadd.f32 %v927_v32, %v926_v25  ;;  %v690_v38 = vadd.f32 %v1315_v30, %v2247_v31  ;;  %v1395_v39 = vadd.f32 %v1394_v11, %v1393_v43  ;;  %v425_v30 = vadd.f32 %v1170_v14, %v2214_v2 }
 0x151   :  { %vm872_vm10 = vcmp.ge.f32.partialorder %v830_v33, 0.0  ;;  %v888_v41 = vmul.f32 0.2, %v830_v33  ;;  %v1396_v22 = vpop.f32.mrf.mxu1  ;;  %v1317_v51 = vpop.f32.mrf.mxu0 }
 0x152   :  { %v835_v42 = vadd.f32 %v1395_v39, %v690_v38  ;;  %v1318_v19 = vadd.f32 %v1317_v51, %v1316_v36 }
 0x153   :  { %v2316_v45 = vsel %vm872_vm10, %v830_v33, %v888_v41  ;;  %v1397_v47 = vpop.f32.mrf.mxu1  ;;  %v1319_v48 = vpop.f32.mrf.mxu0 }
 0x154   :  { %v929_v50 = vsel %vm911_vm1, %v2316_v45, 0.0  ;;  %vm873_vm11 = vcmp.ge.f32.partialorder %v835_v42, 0.0  ;;  %v889_v52 = vmul.f32 0.2, %v835_v42  ;;  %v695_v53 = vadd.f32 %v1318_v19, %v2250_v40 }
 0x155   :  { %v930_v27 = vadd.f32 %v929_v50, %v928_v37  ;;  %v1398_v31 = vadd.f32 %v1397_v47, %v1396_v22  ;;  %v1399_v59 = vpop.f32.mrf.mxu1  ;;  %v1320_v54 = vpop.f32.mrf.mxu0  ;;  %v1250_v37 = vadd.f32 %v2267_v6, %v2261_v1 }
 0x156   :  { %v2321_v55 = vsel %vm873_vm11, %v835_v42, %v889_v52  ;;  %v1321_v60 = vadd.f32 %v1320_v54, %v1319_v48 }
 0x157   :  { %v931_v61 = vsel %vm911_vm1, %v2321_v55, 0.0  ;;  %v840_v63 = vadd.f32 %v1398_v31, %v695_v53  ;;  %v1400_v0 = vpop.f32.mrf.mxu1  ;;  %v1322_v7 = vpop.f32.mrf.mxu0  ;;  %v570_v42 = vadd.f32 %v1250_v37, %v425_v30 }
 0x158   :  { %v932_v8 = vadd.f32 %v931_v61, %v930_v27  ;;  %v700_v9 = vadd.f32 %v1321_v60, %v2253_v49  ;;  %v1401_v10 = vadd.f32 %v1400_v0, %v1399_v59 }
 0x159   :  { %vm874_vm12 = vcmp.ge.f32.partialorder %v840_v63, 0.0  ;;  %v890_v12 = vmul.f32 0.2, %v840_v63  ;;  %v1402_v40 = vpop.f32.mrf.mxu1  ;;  %v1323_v4 = vpop.f32.mrf.mxu0 }
 0x15a   :  { %v845_v35 = vadd.f32 %v1401_v10, %v700_v9  ;;  %v1324_v15 = vadd.f32 %v1323_v4, %v1322_v7 }
 0x15b   :  { %v2328_v18 = vsel %vm874_vm12, %v840_v63, %v890_v12  ;;  %v1403_v20 = vpop.f32.mrf.mxu1  ;;  %v1325_v21 = vpop.f32.mrf.mxu0 }
 0x15c   :  { %v933_v23 = vsel %vm911_vm1, %v2328_v18, 0.0  ;;  %vm875_vm13 = vcmp.ge.f32.partialorder %v845_v35, 0.0  ;;  %v891_v24 = vmul.f32 0.2, %v845_v35  ;;  %v705_v49 = vadd.f32 %v1324_v15, %v2256_v58 }
 0x15d   :  { %v934_v25 = vadd.f32 %v933_v23, %v932_v8  ;;  %v1404_v13 = vadd.f32 %v1403_v20, %v1402_v40  ;;  %v1405_v43 = vpop.f32.mrf.mxu1  ;;  %v1326_v26 = vpop.f32.mrf.mxu0 }
 0x15e   :  { %v907_v62 = vsel %vm875_vm13, %v845_v35, %v891_v24  ;;  %v1327_v3 = vadd.f32 %v1326_v26, %v1325_v21 }
 0x15f   :  { %v935_v32 = vsel %vm911_vm1, %v907_v62, 0.0  ;;  %v850_v33 = vadd.f32 %v1404_v13, %v705_v49  ;;  %v1406_v11 = vpop.f32.mrf.mxu1  ;;  %v1328_v36 = vpop.f32.mrf.mxu0 }
 0x160   :  { %v936_v38 = vadd.f32 %v935_v32, %v934_v25  ;;  %v710_v39 = vadd.f32 %v1327_v3, %v2265_v5  ;;  %v1407_v58 = vadd.f32 %v1406_v11, %v1405_v43 }
 0x161   :  { %vm876_vm14 = vcmp.ge.f32.partialorder %v850_v33, 0.0  ;;  %v892_v41 = vmul.f32 0.2, %v850_v33  ;;  %v1408_v22 = vpop.f32.mrf.mxu1  ;;  %v1329_v51 = vpop.f32.mrf.mxu0 }
 0x162   :  { %v855_v2 = vadd.f32 %v1407_v58, %v710_v39  ;;  %v1330_v19 = vadd.f32 %v1329_v51, %v1328_v36 }
 0x163   :  { %v908_v47 = vsel %vm876_vm14, %v850_v33, %v892_v41  ;;  %v1409_v48 = vpop.f32.mrf.mxu1 }
 0x164   :  { %v937_v50 = vsel %vm911_vm1, %v908_v47, 0.0  ;;  %vm877_vm15 = vcmp.ge.f32.partialorder %v855_v2, 0.0  ;;  %v893_v52 = vmul.f32 0.2, %v855_v2  ;;  %v715_v53 = vadd.f32 %v1330_v19, %v570_v42 }
 0x165   :  { %v938_v27 = vadd.f32 %v937_v50, %v936_v38  ;;  %v1410_v1 = vadd.f32 %v1409_v48, %v1408_v22 }
 0x166   :  { %v909_v6 = vsel %vm877_vm15, %v855_v2, %v893_v52 }
 0x167   :  { %v939_v5 = vsel %vm911_vm1, %v909_v6, 0.0  ;;  %v860_v31 = vadd.f32 %v1410_v1, %v715_v53 }
 0x168   :  { %v940_v59 = vadd.f32 %v939_v5, %v938_v27 }
 0x169   :  { %vm878_vm0 = vcmp.ge.f32.partialorder %v860_v31, 0.0  ;;  %v894_v54 = vmul.f32 0.2, %v860_v31 }
 0x16b   :  { %v910_v60 = vsel %vm878_vm0, %v860_v31, %v894_v54 }
 0x16c   :  { %v941_v61 = vsel %vm911_vm1, %v910_v60, 0.0 }
 0x16d   :  { %v942_v63 = vadd.f32 %v941_v61, %v940_v59 }
 0x16f   :  { %v943_v0 = vrot.slane %v942_v63, 4 }
 0x171   :  { %v944_v7 = vadd.f32 %v943_v0, %v942_v63 }
 0x173   :  { %v945_v8 = vrot.slane %v944_v7, 2 }
 0x175   :  { %v946_v9 = vadd.f32 %v945_v8, %v944_v7 }
 0x177   :  { %v947_v10 = vrot.slane %v946_v9, 1 }
 0x179   :  { %v948_v12 = vadd.f32 %v947_v10, %v946_v9 }
 0x17b   :  { %v949_v40 = vmul.f32 0.0078125, %v948_v12 }
 0x17d   :  { %v2342_v4 = vsub.f32 %v2271_v34, %v949_v40  ;;  %v2345_v14 = vsub.f32 %v2274_v44, %v949_v40  ;;  %v2348_v35 = vsub.f32 %v2281_v57, %v949_v40  ;;  %v2351_v15 = vsub.f32 %v2286_v17, %v949_v40 }
 0x17e   :  { %v2354_v20 = vsub.f32 %v2291_v29, %v949_v40  ;;  %v2357_v21 = vsub.f32 %v2296_v46, %v949_v40  ;;  %v2360_v23 = vsub.f32 %v2301_v56, %v949_v40  ;;  %v2363_v34 = vsub.f32 %v2306_v16, %v949_v40 }
 0x17f   :  { %v2366_v44 = vsub.f32 %v2311_v28, %v949_v40  ;;  %v2369_v57 = vsub.f32 %v2316_v45, %v949_v40  ;;  %v2372_v17 = vsub.f32 %v2321_v55, %v949_v40  ;;  %v2375_v29 = vsub.f32 %v2328_v18, %v949_v40 }
 0x180   :  { %v2377_v46 = vsub.f32 %v907_v62, %v949_v40  ;;  %v2379_v24 = vsub.f32 %v908_v47, %v949_v40  ;;  %v2381_v56 = vsub.f32 %v909_v6, %v949_v40  ;;  %v966_v16 = vmul.f32 %v2342_v4, %v2342_v4 }
 0x181   :  { %v967_v28 = vmul.f32 %v2345_v14, %v2345_v14  ;;  %v968_v45 = vmul.f32 %v2348_v35, %v2348_v35  ;;  %v969_v55 = vmul.f32 %v2351_v15, %v2351_v15  ;;  %v970_v13 = vmul.f32 %v2354_v20, %v2354_v20 }
 0x182   :  { %v982_v18 = vsel %vm911_vm1, %v966_v16, 0.0  ;;  %v971_v30 = vmul.f32 %v2357_v21, %v2357_v21  ;;  %v972_v32 = vmul.f32 %v2360_v23, %v2360_v23  ;;  %v973_v36 = vmul.f32 %v2363_v34, %v2363_v34 }
 0x183   :  { %v983_v49 = vsel %vm911_vm1, %v967_v28, 0.0  ;;  %v985_v43 = vsel %vm911_vm1, %v968_v45, 0.0  ;;  %v987_v62 = vsel %vm911_vm1, %v969_v55, 0.0  ;;  %v989_v33 = vsel %vm911_vm1, %v970_v13, 0.0 }
 0x184   :  { %v984_v25 = vadd.f32 %v983_v49, %v982_v18  ;;  %v991_v37 = vsel %vm911_vm1, %v971_v30, 0.0  ;;  %v974_v39 = vmul.f32 %v2366_v44, %v2366_v44  ;;  %v993_v58 = vsel %vm911_vm1, %v972_v32, 0.0 }
 0x185   :  { %v975_v22 = vmul.f32 %v2369_v57, %v2369_v57  ;;  %v995_v51 = vsel %vm911_vm1, %v973_v36, 0.0  ;;  %v976_v2 = vmul.f32 %v2372_v17, %v2372_v17  ;;  %v977_v48 = vmul.f32 %v2375_v29, %v2375_v29 }
 0x186   :  { %v986_v26 = vadd.f32 %v985_v43, %v984_v25  ;;  %v997_v19 = vsel %vm911_vm1, %v974_v39, 0.0  ;;  %v978_v53 = vmul.f32 %v2377_v46, %v2377_v46  ;;  %v965_v6 = vsub.f32 %v910_v60, %v949_v40 }
 0x187   :  { %v999_v50 = vsel %vm911_vm1, %v975_v22, 0.0  ;;  %v1001_v27 = vsel %vm911_vm1, %v976_v2, 0.0  ;;  %v979_v5 = vmul.f32 %v2379_v24, %v2379_v24  ;;  %v1003_v31 = vsel %vm911_vm1, %v977_v48, 0.0  ;;  %v1090_v22 = vld [vmem:[%s2518_s4] ss:$0 sm:$0xff] }
 0x188   :  { %v988_v3 = vadd.f32 %v987_v62, %v986_v26  ;;  %v980_v54 = vmul.f32 %v2381_v56, %v2381_v56  ;;  %v1005_v61 = vsel %vm911_vm1, %v978_v53, 0.0  ;;  %v981_v0 = vmul.f32 %v965_v6, %v965_v6  ;;  %v1020_v26 = vld [vmem:[%s2517_s3] sm:$0x1] }
 0x189   :  { %v1007_v7 = vsel %vm911_vm1, %v979_v5, 0.0  ;;  %v1025_v13 = vlaneseq }
 0x18a   :  { %v990_v11 = vadd.f32 %v989_v33, %v988_v3  ;;  %v1009_v9 = vsel %vm911_vm1, %v980_v54, 0.0  ;;  %v1011_v60 = vsel %vm911_vm1, %v981_v0, 0.0 }
 0x18b   :  { %v1026_v43 = vshrl.u32 %v1025_v13, 7 }
 0x18c   :  { %v992_v38 = vadd.f32 %v991_v37, %v990_v11 }
 0x18d   :  { %v1027_v30 = vsub.s32 0, %v1026_v43 }
 0x18e   :  { %v994_v41 = vadd.f32 %v993_v58, %v992_v38 }
 0x190   :  { %v996_v42 = vadd.f32 %v995_v51, %v994_v41 }
 0x192   :  { %v998_v47 = vadd.f32 %v997_v19, %v996_v42 }
 0x194   :  { %v1000_v52 = vadd.f32 %v999_v50, %v998_v47 }
 0x196   :  { %v1002_v1 = vadd.f32 %v1001_v27, %v1000_v52 }
 0x198   :  { %v1004_v59 = vadd.f32 %v1003_v31, %v1002_v1 }
 0x19a   :  { %v1006_v63 = vadd.f32 %v1005_v61, %v1004_v59 }
 0x19c   :  { %v1008_v8 = vadd.f32 %v1007_v7, %v1006_v63 }
 0x19e   :  { %v1010_v10 = vadd.f32 %v1009_v9, %v1008_v8 }
 0x1a0   :  { %v1012_v12 = vadd.f32 %v1011_v60, %v1010_v10 }
 0x1a2   :  { %v1013_v40 = vrot.slane %v1012_v12, 4 }
 0x1a4   :  { %v1014_v16 = vadd.f32 %v1013_v40, %v1012_v12 }
 0x1a6   :  { %v1015_v28 = vrot.slane %v1014_v16, 2 }
 0x1a8   :  { %v1016_v45 = vadd.f32 %v1015_v28, %v1014_v16 }
 0x1aa   :  { %v1017_v55 = vrot.slane %v1016_v45, 1 }
 0x1ac   :  { %v1018_v18 = vadd.f32 %v1017_v55, %v1016_v45 }
 0x1ae   :  { %v1019_v49 = vmul.f32 0.0078125, %v1018_v18 }
 0x1b0   :  { %v1021_v25 = vadd.f32 1e-05, %v1019_v49 }
 0x1b2   :  { %1411 = vrsqrt.f32 %v1021_v25 }
 0x1bf   :  { %v1412_v62 = vpop.eup %1411 }
 0x1c0   :  { %v1023_v3 = vmul.f32 %v1412_v62, %v1020_v26 }
 0x1c2   :  { %v1028_v32 = vrot.slane %v1023_v3, %v1027_v30 }
 0x1c4   :  { %v1030_v33 = vmul.f32 %v1028_v32, %v2342_v4  ;;  %v1031_v11 = vmul.f32 %v1028_v32, %v2345_v14  ;;  %v1032_v36 = vmul.f32 %v1028_v32, %v2348_v35  ;;  %v1033_v37 = vmul.f32 %v1028_v32, %v2351_v15 }
 0x1c5   :  { %v1034_v38 = vmul.f32 %v1028_v32, %v2354_v20  ;;  %v1035_v39 = vmul.f32 %v1028_v32, %v2357_v21  ;;  %v1036_v58 = vmul.f32 %v1028_v32, %v2360_v23  ;;  %v1037_v41 = vmul.f32 %v1028_v32, %v2363_v34 }
 0x1c6   :  { %v1038_v4 = vmul.f32 %v1028_v32, %v2366_v44  ;;  %v1039_v14 = vmul.f32 %v1028_v32, %v2369_v57  ;;  %v1040_v35 = vmul.f32 %v1028_v32, %v2372_v17  ;;  %v1041_v15 = vmul.f32 %v1028_v32, %v2375_v29 }
 0x1c7   :  { %v1042_v20 = vmul.f32 %v1028_v32, %v2377_v46  ;;  %v1043_v21 = vmul.f32 %v1028_v32, %v2379_v24  ;;  %v1044_v23 = vmul.f32 %v1028_v32, %v2381_v56  ;;  %v1045_v51 = vmul.f32 %v1028_v32, %v965_v6 }
 0x1c8   :  { %v1053_v34 = vadd.f32 %v1090_v22, %v1030_v33  ;;  %v1054_v42 = vadd.f32 %v1090_v22, %v1031_v11  ;;  %v1055_v2 = vadd.f32 %v1090_v22, %v1032_v36  ;;  %v1056_v19 = vadd.f32 %v1090_v22, %v1033_v37 }
 0x1c9   :  { %v1057_v47 = vadd.f32 %v1090_v22, %v1034_v38  ;;  %v1058_v48 = vadd.f32 %v1090_v22, %v1035_v39  ;;  %v1059_v44 = vadd.f32 %v1090_v22, %v1036_v58  ;;  %v1060_v50 = vadd.f32 %v1090_v22, %v1037_v41 }
 0x1ca   :  { %v1061_v57 = vadd.f32 %v1090_v22, %v1038_v4  ;;  %v1062_v52 = vadd.f32 %v1090_v22, %v1039_v14  ;;  %v1063_v17 = vadd.f32 %v1090_v22, %v1040_v35  ;;  %v1064_v53 = vadd.f32 %v1090_v22, %v1041_v15  ;;  %1069 = vst.msk [vmem:[%s2519_s5] sm:$0xff] %vm911_vm1, %v1053_v34 }
 0x1cb   :  { %1070 = vst.msk [vmem:[%s2519_s5 + $0x8] sm:$0xff] %vm911_vm1, %v1054_v42  ;;  %1071 = vst.msk [vmem:[%s2519_s5 + $0x10] sm:$0xff] %vm911_vm1, %v1055_v2  ;;  %v1065_v29 = vadd.f32 %v1090_v22, %v1042_v20  ;;  %v1066_v46 = vadd.f32 %v1090_v22, %v1043_v21  ;;  %v1067_v24 = vadd.f32 %v1090_v22, %v1044_v23 }
 0x1cc   :  { %1072 = vst.msk [vmem:[%s2519_s5 + $0x18] sm:$0xff] %vm911_vm1, %v1056_v19  ;;  %v1068_v56 = vadd.f32 %v1090_v22, %v1045_v51  ;;  %1073 = vst.msk [vmem:[%s2519_s5 + $0x20] sm:$0xff] %vm911_vm1, %v1057_v47 }
 0x1cd   :  { %1074 = vst.msk [vmem:[%s2519_s5 + $0x28] sm:$0xff] %vm911_vm1, %v1058_v48  ;;  %1075 = vst.msk [vmem:[%s2519_s5 + $0x30] sm:$0xff] %vm911_vm1, %v1059_v44 }
 0x1ce   :  { %1076 = vst.msk [vmem:[%s2519_s5 + $0x38] sm:$0xff] %vm911_vm1, %v1060_v50  ;;  %1077 = vst.msk [vmem:[%s2519_s5 + $0x40] sm:$0xff] %vm911_vm1, %v1061_v57 }
 0x1cf   :  { %1078 = vst.msk [vmem:[%s2519_s5 + $0x48] sm:$0xff] %vm911_vm1, %v1062_v52  ;;  %1079 = vst.msk [vmem:[%s2519_s5 + $0x50] sm:$0xff] %vm911_vm1, %v1063_v17 }
 0x1d0   :  { %1080 = vst.msk [vmem:[%s2519_s5 + $0x58] sm:$0xff] %vm911_vm1, %v1064_v53  ;;  %1081 = vst.msk [vmem:[%s2519_s5 + $0x60] sm:$0xff] %vm911_vm1, %v1065_v29 }
 0x1d1   :  { %1082 = vst.msk [vmem:[%s2519_s5 + $0x68] sm:$0xff] %vm911_vm1, %v1066_v46  ;;  %1083 = vst.msk [vmem:[%s2519_s5 + $0x70] sm:$0xff] %vm911_vm1, %v1067_v24 }
 0x1d2   :  { %1084 = vst.msk [vmem:[%s2519_s5 + $0x78] sm:$0xff] %vm911_vm1, %v1068_v56 }

// kernel: encoder_forward.7
= control target key start
LH: loop header
LB: loop body
LE: loop exit
PB: predicated region body
PF: predicated region fallthrough
CT: control target
= control target key end

     0   :  { %s1311_s1 = inlined_call_operand.vmem [shape: f32[1024,128], index: 1, kind: input, shape index: {}]   ;;  %s1312_s0 = inlined_call_operand.vmem [shape: f32[32,1024], index: 0, kind: input, shape index: {}]   ;;  %s1313_s2 = inlined_call_operand.vmem [shape: f32[1,128], index: 2, kind: input, shape index: {}]   ;;  %s1314_s3 = inlined_call_operand.vmem [shape: f32[1,128], index: 3, kind: input, shape index: {}]   ;;  %s1315_s4 = inlined_call_operand.vmem [shape: f32[1,128], index: 4, kind: input, shape index: {}]   ;;  %s1316_s5 = inlined_call_operand.vmem [shape: f32[32,128], index: 5, kind: output, shape index: {}]  }
   0x1   :  { %v83_v0 = vld [vmem:[%s1311_s1 + $0xf8] sm:$0xff]  ;;  %v82_v4 = vld [vmem:[%s1311_s1 + $0xf0] sm:$0xff]  ;;  %v81_v8 = vld [vmem:[%s1311_s1 + $0xe8] sm:$0xff] }
   0x2   :  { %v115_v1 = vld [vmem:[%s1311_s1 + $0x1f8] sm:$0xff]  ;;  %602 = vmatprep.subr.mxu0 %v83_v0  ;;  %v114_v5 = vld [vmem:[%s1311_s1 + $0x1f0] sm:$0xff]  ;;  %v113_v9 = vld [vmem:[%s1311_s1 + $0x1e8] sm:$0xff] }
   0x3   :  { %v67_v2 = vld [vmem:[%s1311_s1 + $0x78] sm:$0xff]  ;;  %646 = vmatprep.subr.mxu1 %v115_v1  ;;  %v66_v6 = vld [vmem:[%s1311_s1 + $0x70] sm:$0xff]  ;;  %v65_v10 = vld [vmem:[%s1311_s1 + $0x68] sm:$0xff] }
   0x4   :  { %v99_v3 = vld [vmem:[%s1311_s1 + $0x178] sm:$0xff]  ;;  %603 = vmatpush3.msra.mxu0 %v67_v2  ;;  %v98_v7 = vld [vmem:[%s1311_s1 + $0x170] sm:$0xff]  ;;  %v97_v11 = vld [vmem:[%s1311_s1 + $0x168] sm:$0xff] }
   0x5   :  { %647 = vmatpush3.msra.mxu1 %v99_v3  ;;  %604 = vmatprep.subr.mxu0 %v82_v4  ;;  %v80_v12 = vld [vmem:[%s1311_s1 + $0xe0] sm:$0xff]  ;;  %v79_v16 = vld [vmem:[%s1311_s1 + $0xd8] sm:$0xff]  ;;  %v78_v20 = vld [vmem:[%s1311_s1 + $0xd0] sm:$0xff] }
   0x6   :  { %648 = vmatprep.subr.mxu1 %v114_v5  ;;  %605 = vmatpush3.msra.mxu0 %v66_v6  ;;  %v112_v13 = vld [vmem:[%s1311_s1 + $0x1e0] sm:$0xff]  ;;  %v111_v17 = vld [vmem:[%s1311_s1 + $0x1d8] sm:$0xff]  ;;  %v110_v21 = vld [vmem:[%s1311_s1 + $0x1d0] sm:$0xff] }
   0x7   :  { %649 = vmatpush3.msra.mxu1 %v98_v7  ;;  %606 = vmatprep.subr.mxu0 %v81_v8  ;;  %v64_v14 = vld [vmem:[%s1311_s1 + $0x60] sm:$0xff]  ;;  %v63_v18 = vld [vmem:[%s1311_s1 + $0x58] sm:$0xff]  ;;  %v62_v22 = vld [vmem:[%s1311_s1 + $0x50] sm:$0xff] }
   0x8   :  { %650 = vmatprep.subr.mxu1 %v113_v9  ;;  %v96_v15 = vld [vmem:[%s1311_s1 + $0x160] sm:$0xff]  ;;  %607 = vmatpush3.msra.mxu0 %v65_v10  ;;  %v95_v19 = vld [vmem:[%s1311_s1 + $0x158] sm:$0xff]  ;;  %v94_v23 = vld [vmem:[%s1311_s1 + $0x150] sm:$0xff] }
   0x9   :  { %651 = vmatpush3.msra.mxu1 %v97_v11  ;;  %608 = vmatprep.subr.mxu0 %v80_v12  ;;  %v77_v24 = vld [vmem:[%s1311_s1 + $0xc8] sm:$0xff]  ;;  %v76_v28 = vld [vmem:[%s1311_s1 + $0xc0] sm:$0xff]  ;;  %v75_v32 = vld [vmem:[%s1311_s1 + $0xb8] sm:$0xff] }
   0xa   :  { %652 = vmatprep.subr.mxu1 %v112_v13  ;;  %609 = vmatpush3.msra.mxu0 %v64_v14  ;;  %v109_v25 = vld [vmem:[%s1311_s1 + $0x1c8] sm:$0xff]  ;;  %v108_v29 = vld [vmem:[%s1311_s1 + $0x1c0] sm:$0xff]  ;;  %v107_v33 = vld [vmem:[%s1311_s1 + $0x1b8] sm:$0xff] }
   0xb   :  { %653 = vmatpush3.msra.mxu1 %v96_v15  ;;  %610 = vmatprep.subr.mxu0 %v79_v16  ;;  %v61_v26 = vld [vmem:[%s1311_s1 + $0x48] sm:$0xff]  ;;  %v60_v30 = vld [vmem:[%s1311_s1 + $0x40] sm:$0xff]  ;;  %v59_v34 = vld [vmem:[%s1311_s1 + $0x38] sm:$0xff] }
   0xc   :  { %654 = vmatprep.subr.mxu1 %v111_v17  ;;  %611 = vmatpush3.msra.mxu0 %v63_v18  ;;  %v93_v27 = vld [vmem:[%s1311_s1 + $0x148] sm:$0xff]  ;;  %v92_v31 = vld [vmem:[%s1311_s1 + $0x140] sm:$0xff]  ;;  %v91_v35 = vld [vmem:[%s1311_s1 + $0x138] sm:$0xff] }
   0xd   :  { %655 = vmatpush3.msra.mxu1 %v95_v19  ;;  %612 = vmatprep.subr.mxu0 %v78_v20  ;;  %v74_v36 = vld [vmem:[%s1311_s1 + $0xb0] sm:$0xff]  ;;  %v73_v40 = vld [vmem:[%s1311_s1 + $0xa8] sm:$0xff]  ;;  %v72_v44 = vld [vmem:[%s1311_s1 + $0xa0] sm:$0xff] }
   0xe   :  { %656 = vmatprep.subr.mxu1 %v110_v21  ;;  %613 = vmatpush3.msra.mxu0 %v62_v22  ;;  %v106_v37 = vld [vmem:[%s1311_s1 + $0x1b0] sm:$0xff]  ;;  %v105_v41 = vld [vmem:[%s1311_s1 + $0x1a8] sm:$0xff]  ;;  %v104_v45 = vld [vmem:[%s1311_s1 + $0x1a0] sm:$0xff] }
   0xf   :  { %657 = vmatpush3.msra.mxu1 %v94_v23  ;;  %614 = vmatprep.subr.mxu0 %v77_v24  ;;  %v58_v38 = vld [vmem:[%s1311_s1 + $0x30] sm:$0xff]  ;;  %v57_v42 = vld [vmem:[%s1311_s1 + $0x28] sm:$0xff]  ;;  %v56_v46 = vld [vmem:[%s1311_s1 + $0x20] sm:$0xff] }
  0x10   :  { %658 = vmatprep.subr.mxu1 %v109_v25  ;;  %615 = vmatpush3.msra.mxu0 %v61_v26  ;;  %v90_v39 = vld [vmem:[%s1311_s1 + $0x130] sm:$0xff]  ;;  %v89_v43 = vld [vmem:[%s1311_s1 + $0x128] sm:$0xff]  ;;  %v88_v47 = vld [vmem:[%s1311_s1 + $0x120] sm:$0xff] }
  0x11   :  { %659 = vmatpush3.msra.mxu1 %v93_v27  ;;  %616 = vmatprep.subr.mxu0 %v76_v28  ;;  %v71_v48 = vld [vmem:[%s1311_s1 + $0x98] sm:$0xff]  ;;  %v70_v52 = vld [vmem:[%s1311_s1 + $0x90] sm:$0xff]  ;;  %v69_v56 = vld [vmem:[%s1311_s1 + $0x88] sm:$0xff] }
  0x12   :  { %660 = vmatprep.subr.mxu1 %v108_v29  ;;  %617 = vmatpush3.msra.mxu0 %v60_v30  ;;  %v103_v49 = vld [vmem:[%s1311_s1 + $0x198] sm:$0xff]  ;;  %v102_v53 = vld [vmem:[%s1311_s1 + $0x190] sm:$0xff]  ;;  %v101_v57 = vld [vmem:[%s1311_s1 + $0x188] sm:$0xff] }
  0x13   :  { %661 = vmatpush3.msra.mxu1 %v92_v31  ;;  %618 = vmatprep.subr.mxu0 %v75_v32  ;;  %v55_v50 = vld [vmem:[%s1311_s1 + $0x18] sm:$0xff]  ;;  %v54_v54 = vld [vmem:[%s1311_s1 + $0x10] sm:$0xff]  ;;  %v53_v58 = vld [vmem:[%s1311_s1 + $0x8] sm:$0xff] }
  0x14   :  { %662 = vmatprep.subr.mxu1 %v107_v33  ;;  %619 = vmatpush3.msra.mxu0 %v59_v34  ;;  %v87_v51 = vld [vmem:[%s1311_s1 + $0x118] sm:$0xff]  ;;  %v86_v55 = vld [vmem:[%s1311_s1 + $0x110] sm:$0xff]  ;;  %v85_v59 = vld [vmem:[%s1311_s1 + $0x108] sm:$0xff] }
  0x15   :  { %663 = vmatpush3.msra.mxu1 %v91_v35  ;;  %620 = vmatprep.subr.mxu0 %v74_v36  ;;  %v68_v60 = vld [vmem:[%s1311_s1 + $0x80] sm:$0xff]  ;;  %v21_v63 = vld [vmem:[%s1312_s0 + $0x8] sm:$0xff]  ;;  %v23_v2 = vld [vmem:[%s1312_s0 + $0x18] sm:$0xff] }
  0x16   :  { %664 = vmatprep.subr.mxu1 %v106_v37  ;;  %621 = vmatpush3.msra.mxu0 %v58_v38  ;;  %v100_v61 = vld [vmem:[%s1311_s1 + $0x180] sm:$0xff]  ;;  %v147_v3 = vld [vmem:[%s1311_s1 + $0x2f8] sm:$0xff]  ;;  %v22_v5 = vld [vmem:[%s1312_s0 + $0x10] sm:$0xff] }
  0x17   :  { %665 = vmatpush3.msra.mxu1 %v90_v39  ;;  %622 = vmatprep.subr.mxu0 %v73_v40  ;;  %v52_v62 = vld [vmem:[%s1311_s1] sm:$0xff]  ;;  %v179_v4 = vld [vmem:[%s1311_s1 + $0x3f8] sm:$0xff]  ;;  %v146_v8 = vld [vmem:[%s1311_s1 + $0x2f0] sm:$0xff] }
  0x18   :  { %666 = vmatprep.subr.mxu1 %v105_v41  ;;  %623 = vmatpush3.msra.mxu0 %v57_v42  ;;  %v84_v0 = vld [vmem:[%s1311_s1 + $0x100] sm:$0xff]  ;;  %v131_v6 = vld [vmem:[%s1311_s1 + $0x278] sm:$0xff]  ;;  %v178_v9 = vld [vmem:[%s1311_s1 + $0x3f0] sm:$0xff] }
  0x19   :  { %667 = vmatpush3.msra.mxu1 %v89_v43  ;;  %624 = vmatprep.subr.mxu0 %v72_v44  ;;  %v20_v1 = vld [vmem:[%s1312_s0] sm:$0xff]  ;;  %v163_v7 = vld [vmem:[%s1311_s1 + $0x378] sm:$0xff]  ;;  %v130_v10 = vld [vmem:[%s1311_s1 + $0x270] sm:$0xff] }
  0x1a   :  { %668 = vmatprep.subr.mxu1 %v104_v45  ;;  %625 = vmatpush3.msra.mxu0 %v56_v46  ;;  %v162_v11 = vld [vmem:[%s1311_s1 + $0x370] sm:$0xff]  ;;  %v145_v12 = vld [vmem:[%s1311_s1 + $0x2e8] sm:$0xff]  ;;  %v144_v16 = vld [vmem:[%s1311_s1 + $0x2e0] sm:$0xff] }
  0x1b   :  { %669 = vmatpush3.msra.mxu1 %v88_v47  ;;  %626 = vmatprep.subr.mxu0 %v71_v48  ;;  %v177_v13 = vld [vmem:[%s1311_s1 + $0x3e8] sm:$0xff]  ;;  %v176_v17 = vld [vmem:[%s1311_s1 + $0x3e0] sm:$0xff]  ;;  %v143_v20 = vld [vmem:[%s1311_s1 + $0x2d8] sm:$0xff] }
  0x1c   :  { %670 = vmatprep.subr.mxu1 %v103_v49  ;;  %627 = vmatpush3.msra.mxu0 %v55_v50  ;;  %v129_v14 = vld [vmem:[%s1311_s1 + $0x268] sm:$0xff]  ;;  %v128_v18 = vld [vmem:[%s1311_s1 + $0x260] sm:$0xff]  ;;  %v175_v21 = vld [vmem:[%s1311_s1 + $0x3d8] sm:$0xff] }
  0x1d   :  { %671 = vmatpush3.msra.mxu1 %v87_v51  ;;  %628 = vmatprep.subr.mxu0 %v70_v52  ;;  %v161_v15 = vld [vmem:[%s1311_s1 + $0x368] sm:$0xff]  ;;  %v160_v19 = vld [vmem:[%s1311_s1 + $0x360] sm:$0xff]  ;;  %v127_v22 = vld [vmem:[%s1311_s1 + $0x258] sm:$0xff] }
  0x1e   :  { %672 = vmatprep.subr.mxu1 %v102_v53  ;;  %629 = vmatpush3.msra.mxu0 %v54_v54  ;;  %v159_v23 = vld [vmem:[%s1311_s1 + $0x358] sm:$0xff]  ;;  %v142_v24 = vld [vmem:[%s1311_s1 + $0x2d0] sm:$0xff]  ;;  %v141_v28 = vld [vmem:[%s1311_s1 + $0x2c8] sm:$0xff] }
  0x1f   :  { %673 = vmatpush3.msra.mxu1 %v86_v55  ;;  %630 = vmatprep.subr.mxu0 %v69_v56  ;;  %v174_v25 = vld [vmem:[%s1311_s1 + $0x3d0] sm:$0xff]  ;;  %v173_v29 = vld [vmem:[%s1311_s1 + $0x3c8] sm:$0xff]  ;;  %v140_v32 = vld [vmem:[%s1311_s1 + $0x2c0] sm:$0xff] }
  0x20   :  { %674 = vmatprep.subr.mxu1 %v101_v57  ;;  %631 = vmatpush3.msra.mxu0 %v53_v58  ;;  %v126_v26 = vld [vmem:[%s1311_s1 + $0x250] sm:$0xff]  ;;  %v125_v30 = vld [vmem:[%s1311_s1 + $0x248] sm:$0xff]  ;;  %v172_v33 = vld [vmem:[%s1311_s1 + $0x3c0] sm:$0xff] }
  0x21   :  { %675 = vmatpush3.msra.mxu1 %v85_v59  ;;  %632 = vmatprep.subr.mxu0 %v68_v60  ;;  %v158_v27 = vld [vmem:[%s1311_s1 + $0x350] sm:$0xff]  ;;  %v157_v31 = vld [vmem:[%s1311_s1 + $0x348] sm:$0xff]  ;;  %v124_v34 = vld [vmem:[%s1311_s1 + $0x240] sm:$0xff] }
  0x22   :  { %676 = vmatprep.subr.mxu1 %v100_v61  ;;  %633 = vmatpush3.msra.mxu0 %v52_v62  ;;  %v156_v35 = vld [vmem:[%s1311_s1 + $0x340] sm:$0xff]  ;;  %v139_v36 = vld [vmem:[%s1311_s1 + $0x2b8] sm:$0xff]  ;;  %v29_v38 = vld [vmem:[%s1312_s0 + $0x48] sm:$0xff] }
  0x23   :  { %251 = vmatprep.mubr.f32.mxu0 %v21_v63  ;;  %677 = vmatpush3.msra.mxu1 %v84_v0  ;;  %v171_v37 = vld [vmem:[%s1311_s1 + $0x3b8] sm:$0xff]  ;;  %v28_v41 = vld [vmem:[%s1312_s0 + $0x40] sm:$0xff]  ;;  %v138_v42 = vld [vmem:[%s1311_s1 + $0x2b0] sm:$0xff] }
  0x24   :  { %252 = vmatmul.mubr.f32.vlgmr.msra.gmra.mxu0 %v20_v1  ;;  %336 = vmatprep.mubr.f32.mxu1 %v23_v2  ;;  %v123_v39 = vld [vmem:[%s1311_s1 + $0x238] sm:$0xff]  ;;  %v170_v43 = vld [vmem:[%s1311_s1 + $0x3b0] sm:$0xff]  ;;  %v137_v47 = vld [vmem:[%s1311_s1 + $0x2a8] sm:$0xff] }
  0x25   :  { %690 = vmatprep.subr.mxu0 %v147_v3  ;;  %734 = vmatprep.subr.mxu1 %v179_v4  ;;  %v155_v40 = vld [vmem:[%s1311_s1 + $0x338] sm:$0xff]  ;;  %v122_v45 = vld [vmem:[%s1311_s1 + $0x230] sm:$0xff]  ;;  %v169_v49 = vld [vmem:[%s1311_s1 + $0x3a8] sm:$0xff] }
  0x26   :  { %337 = vmatmul.mubr.f32.vlgmr.msra.gmra.mxu1 %v22_v5  ;;  %691 = vmatpush3.msra.mxu0 %v131_v6  ;;  %v31_v44 = vld [vmem:[%s1312_s0 + $0x58] sm:$0xff]  ;;  %v154_v46 = vld [vmem:[%s1311_s1 + $0x330] sm:$0xff]  ;;  %v37_v50 = vld [vmem:[%s1312_s0 + $0x88] sm:$0xff] }
  0x27   :  { %735 = vmatpush3.msra.mxu1 %v163_v7  ;;  %692 = vmatprep.subr.mxu0 %v146_v8  ;;  %v30_v48 = vld [vmem:[%s1312_s0 + $0x50] sm:$0xff]  ;;  %v121_v51 = vld [vmem:[%s1311_s1 + $0x228] sm:$0xff]  ;;  %v36_v53 = vld [vmem:[%s1312_s0 + $0x80] sm:$0xff] }
  0x28   :  { %736 = vmatprep.subr.mxu1 %v178_v9  ;;  %693 = vmatpush3.msra.mxu0 %v130_v10  ;;  %v153_v52 = vld [vmem:[%s1311_s1 + $0x328] sm:$0xff]  ;;  %v136_v54 = vld [vmem:[%s1311_s1 + $0x2a0] sm:$0xff]  ;;  %v39_v56 = vld [vmem:[%s1312_s0 + $0x98] sm:$0xff] }
  0x29   :  { %737 = vmatpush3.msra.mxu1 %v162_v11  ;;  %694 = vmatprep.subr.mxu0 %v145_v12  ;;  %v168_v55 = vld [vmem:[%s1311_s1 + $0x3a0] sm:$0xff]  ;;  %v135_v59 = vld [vmem:[%s1311_s1 + $0x298] sm:$0xff]  ;;  %v38_v60 = vld [vmem:[%s1312_s0 + $0x90] sm:$0xff] }
  0x2a   :  { %738 = vmatprep.subr.mxu1 %v177_v13  ;;  %695 = vmatpush3.msra.mxu0 %v129_v14  ;;  %v120_v57 = vld [vmem:[%s1311_s1 + $0x220] sm:$0xff]  ;;  %v167_v61 = vld [vmem:[%s1311_s1 + $0x398] sm:$0xff]  ;;  %v45_v62 = vld [vmem:[%s1312_s0 + $0xc8] sm:$0xff] }
  0x2b   :  { %739 = vmatpush3.msra.mxu1 %v161_v15  ;;  %696 = vmatprep.subr.mxu0 %v144_v16  ;;  %v152_v58 = vld [vmem:[%s1311_s1 + $0x320] sm:$0xff]  ;;  %v119_v63 = vld [vmem:[%s1311_s1 + $0x218] sm:$0xff]  ;;  %v134_v2 = vld [vmem:[%s1311_s1 + $0x290] sm:$0xff] }
  0x2c   :  { %740 = vmatprep.subr.mxu1 %v176_v17  ;;  %697 = vmatpush3.msra.mxu0 %v128_v18  ;;  %v151_v0 = vld [vmem:[%s1311_s1 + $0x318] sm:$0xff]  ;;  %v44_v1 = vld [vmem:[%s1312_s0 + $0xc0] sm:$0xff]  ;;  %v166_v3 = vld [vmem:[%s1311_s1 + $0x390] sm:$0xff] }
  0x2d   :  { %741 = vmatpush3.msra.mxu1 %v160_v19  ;;  %698 = vmatprep.subr.mxu0 %v143_v20  ;;  %v47_v4 = vld [vmem:[%s1312_s0 + $0xd8] sm:$0xff]  ;;  %v118_v5 = vld [vmem:[%s1311_s1 + $0x210] sm:$0xff]  ;;  %v133_v7 = vld [vmem:[%s1311_s1 + $0x288] sm:$0xff] }
  0x2e   :  { %742 = vmatprep.subr.mxu1 %v175_v21  ;;  %699 = vmatpush3.msra.mxu0 %v127_v22  ;;  %v150_v6 = vld [vmem:[%s1311_s1 + $0x310] sm:$0xff]  ;;  %v165_v9 = vld [vmem:[%s1311_s1 + $0x388] sm:$0xff]  ;;  %v132_v12 = vld [vmem:[%s1311_s1 + $0x280] sm:$0xff] }
  0x2f   :  { %743 = vmatpush3.msra.mxu1 %v159_v23  ;;  %700 = vmatprep.subr.mxu0 %v142_v24  ;;  %v46_v8 = vld [vmem:[%s1312_s0 + $0xd0] sm:$0xff]  ;;  %v117_v10 = vld [vmem:[%s1311_s1 + $0x208] sm:$0xff]  ;;  %v164_v13 = vld [vmem:[%s1311_s1 + $0x380] sm:$0xff] }
  0x30   :  { %744 = vmatprep.subr.mxu1 %v174_v25  ;;  %701 = vmatpush3.msra.mxu0 %v126_v26  ;;  %v149_v11 = vld [vmem:[%s1311_s1 + $0x308] sm:$0xff]  ;;  %v116_v14 = vld [vmem:[%s1311_s1 + $0x200] sm:$0xff]  ;;  %v27_v17 = vld [vmem:[%s1312_s0 + $0x38] sm:$0xff] }
  0x31   :  { %745 = vmatpush3.msra.mxu1 %v158_v27  ;;  %702 = vmatprep.subr.mxu0 %v141_v28  ;;  %v25_v15 = vld [vmem:[%s1312_s0 + $0x28] sm:$0xff]  ;;  %v148_v16 = vld [vmem:[%s1311_s1 + $0x300] sm:$0xff]  ;;  %v26_v19 = vld [vmem:[%s1312_s0 + $0x30] sm:$0xff] }
  0x32   :  { %746 = vmatprep.subr.mxu1 %v173_v29  ;;  %703 = vmatpush3.msra.mxu0 %v125_v30  ;;  %v24_v18 = vld [vmem:[%s1312_s0 + $0x20] sm:$0xff]  ;;  %v33_v20 = vld [vmem:[%s1312_s0 + $0x68] sm:$0xff]  ;;  %v35_v21 = vld [vmem:[%s1312_s0 + $0x78] sm:$0xff] }
  0x33   :  { %747 = vmatpush3.msra.mxu1 %v157_v31  ;;  %704 = vmatprep.subr.mxu0 %v140_v32  ;;  %v32_v22 = vld [vmem:[%s1312_s0 + $0x60] sm:$0xff]  ;;  %v34_v23 = vld [vmem:[%s1312_s0 + $0x70] sm:$0xff]  ;;  %v41_v24 = vld [vmem:[%s1312_s0 + $0xa8] sm:$0xff] }
  0x34   :  { %748 = vmatprep.subr.mxu1 %v172_v33  ;;  %705 = vmatpush3.msra.mxu0 %v124_v34  ;;  %v43_v25 = vld [vmem:[%s1312_s0 + $0xb8] sm:$0xff]  ;;  %v40_v26 = vld [vmem:[%s1312_s0 + $0xa0] sm:$0xff]  ;;  %v42_v27 = vld [vmem:[%s1312_s0 + $0xb0] sm:$0xff] }
  0x35   :  { %749 = vmatpush3.msra.mxu1 %v156_v35  ;;  %706 = vmatprep.subr.mxu0 %v139_v36  ;;  %v49_v28 = vld [vmem:[%s1312_s0 + $0xe8] sm:$0xff]  ;;  %v51_v29 = vld [vmem:[%s1312_s0 + $0xf8] sm:$0xff]  ;;  %v48_v30 = vld [vmem:[%s1312_s0 + $0xe0] sm:$0xff] }
  0x36   :  { %750 = vmatprep.subr.mxu1 %v171_v37  ;;  %256 = vmatprep.mubr.f32.mxu0 %v29_v38  ;;  %v50_v31 = vld [vmem:[%s1312_s0 + $0xf0] sm:$0xff] }
  0x37   :  { %707 = vmatpush3.msra.mxu0 %v123_v39  ;;  %751 = vmatpush3.msra.mxu1 %v155_v40 }
  0x38   :  { %257 = vmatmul.mubr.f32.gmra.mxu0 %v28_v41  ;;  %708 = vmatprep.subr.mxu0 %v138_v42 }
  0x39   :  { %752 = vmatprep.subr.mxu1 %v170_v43  ;;  %341 = vmatprep.mubr.f32.mxu1 %v31_v44 }
  0x3a   :  { %709 = vmatpush3.msra.mxu0 %v122_v45  ;;  %753 = vmatpush3.msra.mxu1 %v154_v46 }
  0x3b   :  { %710 = vmatprep.subr.mxu0 %v137_v47  ;;  %342 = vmatmul.mubr.f32.gmra.mxu1 %v30_v48  ;;  %v600_v48 = vld [vmem:[%s1313_s2] ss:$0 sm:$0xff] }
  0x3c   :  { %754 = vmatprep.subr.mxu1 %v169_v49  ;;  %261 = vmatprep.mubr.f32.mxu0 %v37_v50 }
  0x3d   :  { %711 = vmatpush3.msra.mxu0 %v121_v51  ;;  %755 = vmatpush3.msra.mxu1 %v153_v52 }
  0x3e   :  { %262 = vmatmul.mubr.f32.gmra.mxu0 %v36_v53  ;;  %712 = vmatprep.subr.mxu0 %v136_v54 }
  0x3f   :  { %756 = vmatprep.subr.mxu1 %v168_v55  ;;  %346 = vmatprep.mubr.f32.mxu1 %v39_v56 }
  0x40   :  { %713 = vmatpush3.msra.mxu0 %v120_v57  ;;  %757 = vmatpush3.msra.mxu1 %v152_v58 }
  0x41   :  { %714 = vmatprep.subr.mxu0 %v135_v59  ;;  %347 = vmatmul.mubr.f32.gmra.mxu1 %v38_v60 }
  0x42   :  { %758 = vmatprep.subr.mxu1 %v167_v61  ;;  %266 = vmatprep.mubr.f32.mxu0 %v45_v62 }
  0x43   :  { %715 = vmatpush3.msra.mxu0 %v119_v63  ;;  %759 = vmatpush3.msra.mxu1 %v151_v0 }
  0x44   :  { %267 = vmatmul.mubr.f32.gmra.mxu0 %v44_v1  ;;  %716 = vmatprep.subr.mxu0 %v134_v2 }
  0x45   :  { %760 = vmatprep.subr.mxu1 %v166_v3  ;;  %351 = vmatprep.mubr.f32.mxu1 %v47_v4 }
  0x46   :  { %717 = vmatpush3.msra.mxu0 %v118_v5  ;;  %761 = vmatpush3.msra.mxu1 %v150_v6 }
  0x47   :  { %718 = vmatprep.subr.mxu0 %v133_v7  ;;  %352 = vmatmul.mubr.f32.gmra.mxu1 %v46_v8 }
  0x48   :  { %762 = vmatprep.subr.mxu1 %v165_v9  ;;  %719 = vmatpush3.msra.mxu0 %v117_v10 }
  0x49   :  { %763 = vmatpush3.msra.mxu1 %v149_v11  ;;  %720 = vmatprep.subr.mxu0 %v132_v12 }
  0x4a   :  { %764 = vmatprep.subr.mxu1 %v164_v13  ;;  %721 = vmatpush3.msra.mxu0 %v116_v14 }
  0x4b   :  { %421 = vmatprep.mubr.f32.mxu0 %v25_v15  ;;  %765 = vmatpush3.msra.mxu1 %v148_v16 }
  0x4c   :  { %506 = vmatprep.mubr.f32.mxu1 %v27_v17  ;;  %422 = vmatmul.mubr.f32.vlgmr.msra.gmra.mxu0 %v24_v18 }
  0x4d   :  { %507 = vmatmul.mubr.f32.vlgmr.msra.gmra.mxu1 %v26_v19  ;;  %426 = vmatprep.mubr.f32.mxu0 %v33_v20 }
  0x4e   :  { %511 = vmatprep.mubr.f32.mxu1 %v35_v21 }
  0x50   :  { %427 = vmatmul.mubr.f32.gmra.mxu0 %v32_v22 }
  0x51   :  { %512 = vmatmul.mubr.f32.gmra.mxu1 %v34_v23  ;;  %431 = vmatprep.mubr.f32.mxu0 %v41_v24 }
  0x52   :  { %516 = vmatprep.mubr.f32.mxu1 %v43_v25 }
  0x54   :  { %432 = vmatmul.mubr.f32.gmra.mxu0 %v40_v26 }
  0x55   :  { %517 = vmatmul.mubr.f32.gmra.mxu1 %v42_v27  ;;  %436 = vmatprep.mubr.f32.mxu0 %v49_v28 }
  0x56   :  { %521 = vmatprep.mubr.f32.mxu1 %v51_v29 }
  0x58   :  { %437 = vmatmul.mubr.f32.gmra.mxu0 %v48_v30 }
  0x59   :  { %522 = vmatmul.mubr.f32.gmra.mxu1 %v50_v31 }
  0xe4   :  { %v634_v32 = vpop.f32.mrf.mxu0 }
  0xe6   :  { %v678_v33 = vpop.f32.mrf.mxu1  ;;  %v635_v34 = vpop.f32.mrf.mxu0 }
  0xe7   :  { %v636_v46 = vadd.f32 %v635_v34, %v634_v32 }
  0xe8   :  { %v679_v36 = vpop.f32.mrf.mxu1 }
  0xe9   :  { %v254_v53 = vadd.f32 %v636_v46, %v600_v48  ;;  %v680_v54 = vadd.f32 %v679_v36, %v678_v33 }
  0xeb   :  { %v339_v63 = vadd.f32 %v680_v54, %v254_v53 }
  0xf8   :  { %v637_v35 = vpop.f32.mrf.mxu0 }
  0xfa   :  { %v638_v37 = vpop.f32.mrf.mxu0 }
  0xfb   :  { %v681_v38 = vpop.f32.mrf.mxu1  ;;  %v639_v50 = vadd.f32 %v638_v37, %v637_v35 }
  0xfd   :  { %v682_v39 = vpop.f32.mrf.mxu1  ;;  %v259_v58 = vadd.f32 %v639_v50, %v600_v48 }
  0xfe   :  { %v640_v40 = vpop.f32.mrf.mxu0  ;;  %v683_v59 = vadd.f32 %v682_v39, %v681_v38 }
 0x100   :  { %v641_v42 = vpop.f32.mrf.mxu0  ;;  %v344_v5 = vadd.f32 %v683_v59, %v259_v58 }
 0x101   :  { %v684_v41 = vpop.f32.mrf.mxu1  ;;  %v642_v55 = vadd.f32 %v641_v42, %v640_v40 }
 0x103   :  { %v685_v43 = vpop.f32.mrf.mxu1  ;;  %v264_v0 = vadd.f32 %v642_v55, %v600_v48 }
 0x104   :  { %v643_v44 = vpop.f32.mrf.mxu0  ;;  %v686_v1 = vadd.f32 %v685_v43, %v684_v41 }
 0x106   :  { %v644_v49 = vpop.f32.mrf.mxu0  ;;  %v349_v13 = vadd.f32 %v686_v1, %v264_v0 }
 0x107   :  { %v687_v45 = vpop.f32.mrf.mxu1  ;;  %v645_v2 = vadd.f32 %v644_v49, %v643_v44 }
 0x109   :  { %v688_v47 = vpop.f32.mrf.mxu1  ;;  %v269_v14 = vadd.f32 %v645_v2, %v600_v48 }
 0x10a   :  { %v689_v17 = vadd.f32 %v688_v47, %v687_v45 }
 0x10c   :  { %v722_v51 = vpop.f32.mrf.mxu0  ;;  %v354_v28 = vadd.f32 %v689_v17, %v269_v14 }
 0x10d   :  { %v766_v52 = vpop.f32.mrf.mxu1 }
 0x10e   :  { %v723_v56 = vpop.f32.mrf.mxu0 }
 0x10f   :  { %v767_v57 = vpop.f32.mrf.mxu1  ;;  %v724_v60 = vadd.f32 %v723_v56, %v722_v51 }
 0x110   :  { %v725_v61 = vpop.f32.mrf.mxu0  ;;  %v768_v10 = vadd.f32 %v767_v57, %v766_v52 }
 0x111   :  { %v769_v62 = vpop.f32.mrf.mxu1  ;;  %v424_v6 = vadd.f32 %v724_v60, %v339_v63 }
 0x112   :  { %v726_v3 = vpop.f32.mrf.mxu0 }
 0x113   :  { %v770_v4 = vpop.f32.mrf.mxu1  ;;  %v727_v7 = vadd.f32 %v726_v3, %v725_v61  ;;  %v509_v18 = vadd.f32 %v768_v10, %v424_v6  ;;  %v572_v6 = vlaneseq }
 0x114   :  { %v728_v8 = vpop.f32.mrf.mxu0  ;;  %v771_v12 = vadd.f32 %v770_v4, %v769_v62 }
 0x115   :  { %v772_v9 = vpop.f32.mrf.mxu1  ;;  %v429_v11 = vadd.f32 %v727_v7, %v344_v5  ;;  %v531_v29 = vmul.f32 0.2, %v509_v18  ;;  %vm527_vm1 = vcmp.ge.f32.partialorder %v509_v18, 0.0  ;;  %v573_v7 = vshrl.u32 %v572_v6, 7 }
 0x116   :  { %v729_v15 = vpop.f32.mrf.mxu0 }
 0x117   :  { %v773_v16 = vpop.f32.mrf.mxu1  ;;  %v514_v19 = vadd.f32 %v771_v12, %v429_v11  ;;  %v730_v20 = vadd.f32 %v729_v15, %v728_v8  ;;  %v535_v36 = vsel %vm527_vm1, %v509_v18, %v531_v29  ;;  %v567_v8 = vld [vmem:[%s1314_s3] sm:$0x1] }
 0x118   :  { %v731_v21 = vpop.f32.mrf.mxu0  ;;  %v774_v25 = vadd.f32 %v773_v16, %v772_v9  ;;  %v574_v9 = vsub.s32 0, %v573_v7 }
 0x119   :  { %v775_v22 = vpop.f32.mrf.mxu1  ;;  %vm528_vm0 = vcmp.ge.f32.partialorder %v514_v19, 0.0  ;;  %v532_v23 = vmul.f32 0.2, %v514_v19  ;;  %v434_v24 = vadd.f32 %v730_v20, %v349_v13  ;;  %v601_v13 = vld [vmem:[%s1315_s4] ss:$0 sm:$0xff] }
 0x11a   :  { %v732_v26 = vpop.f32.mrf.mxu0 }
 0x11b   :  { %v776_v27 = vpop.f32.mrf.mxu1  ;;  %v519_v30 = vadd.f32 %v774_v25, %v434_v24  ;;  %v733_v31 = vadd.f32 %v732_v26, %v731_v21  ;;  %v536_v32 = vsel %vm528_vm0, %v514_v19, %v532_v23 }
 0x11c   :  { %v777_v35 = vadd.f32 %v776_v27, %v775_v22  ;;  %v539_v39 = vadd.f32 %v536_v32, %v535_v36 }
 0x11d   :  { %vm529_vm2 = vcmp.ge.f32.partialorder %v519_v30, 0.0  ;;  %v533_v33 = vmul.f32 0.2, %v519_v30  ;;  %v439_v34 = vadd.f32 %v733_v31, %v354_v28 }
 0x11f   :  { %v537_v37 = vsel %vm529_vm2, %v519_v30, %v533_v33  ;;  %v524_v38 = vadd.f32 %v777_v35, %v439_v34 }
 0x120   :  { %v540_v41 = vadd.f32 %v539_v39, %v537_v37 }
 0x121   :  { %vm530_vm3 = vcmp.ge.f32.partialorder %v524_v38, 0.0  ;;  %v534_v40 = vmul.f32 0.2, %v524_v38 }
 0x123   :  { %v538_v42 = vsel %vm530_vm3, %v524_v38, %v534_v40 }
 0x124   :  { %v541_v43 = vadd.f32 %v540_v41, %v538_v42 }
 0x126   :  { %v542_v44 = vrot.slane %v541_v43, 4 }
 0x128   :  { %v543_v45 = vadd.f32 %v542_v44, %v541_v43 }
 0x12a   :  { %v544_v46 = vrot.slane %v543_v45, 2 }
 0x12c   :  { %v545_v47 = vadd.f32 %v544_v46, %v543_v45 }
 0x12e   :  { %v546_v48 = vrot.slane %v545_v47, 1 }
 0x130   :  { %v547_v49 = vadd.f32 %v546_v48, %v545_v47 }
 0x132   :  { %v548_v50 = vmul.f32 0.03125, %v547_v49 }
 0x134   :  { %v549_v51 = vsub.f32 %v535_v36, %v548_v50  ;;  %v550_v52 = vsub.f32 %v536_v32, %v548_v50  ;;  %v551_v53 = vsub.f32 %v537_v37, %v548_v50  ;;  %v552_v54 = vsub.f32 %v538_v42, %v548_v50 }
 0x136   :  { %v553_v55 = vmul.f32 %v549_v51, %v549_v51  ;;  %v554_v56 = vmul.f32 %v550_v52, %v550_v52  ;;  %v555_v57 = vmul.f32 %v551_v53, %v551_v53  ;;  %v556_v59 = vmul.f32 %v552_v54, %v552_v54 }
 0x138   :  { %v557_v58 = vadd.f32 %v554_v56, %v553_v55 }
 0x13a   :  { %v558_v60 = vadd.f32 %v557_v58, %v555_v57 }
 0x13c   :  { %v559_v61 = vadd.f32 %v558_v60, %v556_v59 }
 0x13e   :  { %v560_v62 = vrot.slane %v559_v61, 4 }
 0x140   :  { %v561_v63 = vadd.f32 %v560_v62, %v559_v61 }
 0x142   :  { %v562_v0 = vrot.slane %v561_v63, 2 }
 0x144   :  { %v563_v1 = vadd.f32 %v562_v0, %v561_v63 }
 0x146   :  { %v564_v2 = vrot.slane %v563_v1, 1 }
 0x148   :  { %v565_v3 = vadd.f32 %v564_v2, %v563_v1 }
 0x14a   :  { %v566_v4 = vmul.f32 0.03125, %v565_v3 }
 0x14c   :  { %v568_v5 = vadd.f32 1e-05, %v566_v4 }
 0x14e   :  { %778 = vrsqrt.f32 %v568_v5 }
 0x15b   :  { %v779_v10 = vpop.eup %778 }
 0x15c   :  { %v570_v11 = vmul.f32 %v779_v10, %v567_v8 }
 0x15e   :  { %v575_v12 = vrot.slane %v570_v11, %v574_v9 }
 0x160   :  { %v577_v14 = vmul.f32 %v575_v12, %v549_v51  ;;  %v578_v15 = vmul.f32 %v575_v12, %v550_v52  ;;  %v579_v16 = vmul.f32 %v575_v12, %v551_v53  ;;  %v580_v17 = vmul.f32 %v575_v12, %v552_v54 }
 0x162   :  { %v588_v18 = vadd.f32 %v601_v13, %v577_v14  ;;  %v589_v19 = vadd.f32 %v601_v13, %v578_v15  ;;  %v590_v20 = vadd.f32 %v601_v13, %v579_v16  ;;  %v591_v21 = vadd.f32 %v601_v13, %v580_v17 }
 0x164   :  { %592 = vst [vmem:[%s1316_s5] sm:$0xff] %v588_v18  ;;  %593 = vst [vmem:[%s1316_s5 + $0x8] sm:$0xff] %v589_v19 }
 0x165   :  { %594 = vst [vmem:[%s1316_s5 + $0x10] sm:$0xff] %v590_v20  ;;  %595 = vst [vmem:[%s1316_s5 + $0x18] sm:$0xff] %v591_v21 }

// kernel: encoder_forward.8
= control target key start
LH: loop header
LB: loop body
LE: loop exit
PB: predicated region body
PF: predicated region fallthrough
CT: control target
= control target key end

     0   :  { %s2657_s18 = smov 0   ;;  %s2659_s19 = smov 0   ;;  %s3548_s0 = inlined_call_operand.vmem [shape: f32[8,2048], index: 0, kind: input, shape index: {}]   ;;  %s3549_s1 = inlined_call_operand.vmem [shape: f32[2048,256], index: 1, kind: input, shape index: {}]   ;;  %s3550_s2 = inlined_call_operand.vmem [shape: f32[1,256], index: 2, kind: input, shape index: {}]   ;;  %s3551_s3 = inlined_call_operand.vmem [shape: f32[1,256], index: 3, kind: input, shape index: {}]   ;;  %s3552_s4 = inlined_call_operand.vmem [shape: f32[1,256], index: 4, kind: input, shape index: {}]   ;;  %s3553_s5 = inlined_call_operand.vmem [shape: f32[8,256], index: 5, kind: output, shape index: {}]  }
   0x1   :  { %s2661_s20 = smov 0  }
   0x2 LB: > { %s2284_s21 = sadd.s32 4294967295, %s2625_s20   ;;  %s2674_s22 = sadd.s32 1, %s2625_s20   ;;  %s2625_s20 = sphi %s2661_s20, %s3556_s20   ;;  %s2621_s19 = sphi %s2659_s19, %s3555_s19   ;;  %s2617_s18 = sphi %s2657_s18, %s3554_s18  }
   0x3   : > { %s40_s23 = ssub.s32 %s2625_s20, %s2674_s22  ;;  %s43_s24 = sadd.s32 1, %s2621_s19 }
   0x4   : > { %p41_p0 = scmp.eq.s32.totalorder %s40_s23, 0  ;;  %p50_p1 = scmp.ne.s32.totalorder %s2621_s19, %s2617_s18 }
   0x5   : > { %p51_p2 = scmp.eq.s32.totalorder %s2625_s20, 0  ;;  %p2287_p4 = scmp.ge.s32.totalorder %s2625_s20, 2 }
   0x6   : > { %s2683_s25 = scalar_select %p41_p0, %s2621_s19, %s43_s24  }
   0x7   : > { %p52_p3 = por %p51_p2, %p50_p1  ;;  %183 = sbr.rel (%p2287_p4) target bundleno = 144 (0x90), region = 20 }
   0xc   : > { %186 = sbr.rel (!%p52_p3) target bundleno = 144 (0x90), region = 24  ;;  %s188_s26 = sand.u32 (%p52_p3), 1, %s2621_s19  }
   0xd   : > { %s2289_s27 = sshll.u32 (%p52_p3), %s2625_s20, 3  ;;  %s2288_s28 = sshll.u32 (%p52_p3), %s188_s26, 11 }
   0xe   : > { %s2691_s6 = scalar_lea.vmem (%p52_p3), %s3549_s1, %s2289_s27  ;;  %s2696_s7 = scalar_lea.vmem (%p52_p3), [#allocation2], %s2288_s28 }
   0xf   : > { %v731_v0 = vld [vmem:[%s2691_s6] sm:$0xff] (%p52_p3)  ;;  %v733_v1 = vld [vmem:[%s2691_s6 + $0x10] sm:$0xff] (%p52_p3) }
  0x10   : > { %v735_v2 = vld [vmem:[%s2691_s6 + $0x20] sm:$0xff] (%p52_p3)  ;;  %732 = vst [vmem:[%s2696_s7] sm:$0xff] (%p52_p3), %v731_v0  ;;  %734 = vst [vmem:[%s2696_s7 + $0x8] sm:$0xff] (%p52_p3), %v733_v1  ;;  %v737_v3 = vld [vmem:[%s2691_s6 + $0x30] sm:$0xff] (%p52_p3) }
  0x11   : > { %736 = vst [vmem:[%s2696_s7 + $0x10] sm:$0xff] %v735_v2  ;;  %v739_v4 = vld [vmem:[%s2691_s6 + $0x40] sm:$0xff]  ;;  %v741_v5 = vld [vmem:[%s2691_s6 + $0x50] sm:$0xff]  ;;  %738 = vst [vmem:[%s2696_s7 + $0x18] sm:$0xff] %v737_v3 }
  0x12   : > { %740 = vst [vmem:[%s2696_s7 + $0x20] sm:$0xff] %v739_v4  ;;  %742 = vst [vmem:[%s2696_s7 + $0x28] sm:$0xff] %v741_v5  ;;  %v743_v6 = vld [vmem:[%s2691_s6 + $0x60] sm:$0xff]  ;;  %v745_v7 = vld [vmem:[%s2691_s6 + $0x70] sm:$0xff] }
  0x13   : > { %v747_v8 = vld [vmem:[%s2691_s6 + $0x80] sm:$0xff]  ;;  %744 = vst [vmem:[%s2696_s7 + $0x30] sm:$0xff] %v743_v6  ;;  %746 = vst [vmem:[%s2696_s7 + $0x38] sm:$0xff] %v745_v7  ;;  %v749_v9 = vld [vmem:[%s2691_s6 + $0x90] sm:$0xff] }
  0x14   : > { %748 = vst [vmem:[%s2696_s7 + $0x40] sm:$0xff] %v747_v8  ;;  %v751_v10 = vld [vmem:[%s2691_s6 + $0xa0] sm:$0xff]  ;;  %v753_v11 = vld [vmem:[%s2691_s6 + $0xb0] sm:$0xff]  ;;  %750 = vst [vmem:[%s2696_s7 + $0x48] sm:$0xff] %v749_v9 }
  0x15   : > { %752 = vst [vmem:[%s2696_s7 + $0x50] sm:$0xff] %v751_v10  ;;  %754 = vst [vmem:[%s2696_s7 + $0x58] sm:$0xff] %v753_v11  ;;  %v755_v12 = vld [vmem:[%s2691_s6 + $0xc0] sm:$0xff]  ;;  %v757_v13 = vld [vmem:[%s2691_s6 + $0xd0] sm:$0xff] }
  0x16   : > { %v759_v14 = vld [vmem:[%s2691_s6 + $0xe0] sm:$0xff]  ;;  %756 = vst [vmem:[%s2696_s7 + $0x60] sm:$0xff] %v755_v12  ;;  %758 = vst [vmem:[%s2696_s7 + $0x68] sm:$0xff] %v757_v13  ;;  %v761_v15 = vld [vmem:[%s2691_s6 + $0xf0] sm:$0xff] }
  0x17   : > { %760 = vst [vmem:[%s2696_s7 + $0x70] sm:$0xff] %v759_v14  ;;  %v763_v16 = vld [vmem:[%s2691_s6 + $0x100] sm:$0xff]  ;;  %v765_v17 = vld [vmem:[%s2691_s6 + $0x110] sm:$0xff]  ;;  %762 = vst [vmem:[%s2696_s7 + $0x78] sm:$0xff] %v761_v15 }
  0x18   : > { %764 = vst [vmem:[%s2696_s7 + $0x80] sm:$0xff] %v763_v16  ;;  %766 = vst [vmem:[%s2696_s7 + $0x88] sm:$0xff] %v765_v17  ;;  %v767_v18 = vld [vmem:[%s2691_s6 + $0x120] sm:$0xff]  ;;  %v769_v19 = vld [vmem:[%s2691_s6 + $0x130] sm:$0xff] }
  0x19   : > { %v771_v20 = vld [vmem:[%s2691_s6 + $0x140] sm:$0xff]  ;;  %768 = vst [vmem:[%s2696_s7 + $0x90] sm:$0xff] %v767_v18  ;;  %770 = vst [vmem:[%s2696_s7 + $0x98] sm:$0xff] %v769_v19  ;;  %v773_v21 = vld [vmem:[%s2691_s6 + $0x150] sm:$0xff] }
  0x1a   : > { %772 = vst [vmem:[%s2696_s7 + $0xa0] sm:$0xff] %v771_v20  ;;  %v775_v22 = vld [vmem:[%s2691_s6 + $0x160] sm:$0xff]  ;;  %v777_v23 = vld [vmem:[%s2691_s6 + $0x170] sm:$0xff]  ;;  %774 = vst [vmem:[%s2696_s7 + $0xa8] sm:$0xff] %v773_v21 }
  0x1b   : > { %776 = vst [vmem:[%s2696_s7 + $0xb0] sm:$0xff] %v775_v22  ;;  %778 = vst [vmem:[%s2696_s7 + $0xb8] sm:$0xff] %v777_v23  ;;  %v779_v24 = vld [vmem:[%s2691_s6 + $0x180] sm:$0xff]  ;;  %v781_v25 = vld [vmem:[%s2691_s6 + $0x190] sm:$0xff] }
  0x1c   : > { %v783_v26 = vld [vmem:[%s2691_s6 + $0x1a0] sm:$0xff]  ;;  %780 = vst [vmem:[%s2696_s7 + $0xc0] sm:$0xff] %v779_v24  ;;  %782 = vst [vmem:[%s2696_s7 + $0xc8] sm:$0xff] %v781_v25  ;;  %v785_v27 = vld [vmem:[%s2691_s6 + $0x1b0] sm:$0xff] }
  0x1d   : > { %784 = vst [vmem:[%s2696_s7 + $0xd0] sm:$0xff] %v783_v26  ;;  %v787_v28 = vld [vmem:[%s2691_s6 + $0x1c0] sm:$0xff]  ;;  %v789_v29 = vld [vmem:[%s2691_s6 + $0x1d0] sm:$0xff]  ;;  %786 = vst [vmem:[%s2696_s7 + $0xd8] sm:$0xff] %v785_v27 }
  0x1e   : > { %788 = vst [vmem:[%s2696_s7 + $0xe0] sm:$0xff] %v787_v28  ;;  %790 = vst [vmem:[%s2696_s7 + $0xe8] sm:$0xff] %v789_v29  ;;  %v791_v30 = vld [vmem:[%s2691_s6 + $0x1e0] sm:$0xff]  ;;  %v793_v31 = vld [vmem:[%s2691_s6 + $0x1f0] sm:$0xff] }
  0x1f   : > { %v795_v32 = vld [vmem:[%s2691_s6 + $0x200] sm:$0xff]  ;;  %792 = vst [vmem:[%s2696_s7 + $0xf0] sm:$0xff] %v791_v30  ;;  %794 = vst [vmem:[%s2696_s7 + $0xf8] sm:$0xff] %v793_v31  ;;  %v797_v33 = vld [vmem:[%s2691_s6 + $0x210] sm:$0xff] }
  0x20   : > { %796 = vst [vmem:[%s2696_s7 + $0x100] sm:$0xff] %v795_v32  ;;  %v799_v34 = vld [vmem:[%s2691_s6 + $0x220] sm:$0xff]  ;;  %v801_v35 = vld [vmem:[%s2691_s6 + $0x230] sm:$0xff]  ;;  %798 = vst [vmem:[%s2696_s7 + $0x108] sm:$0xff] %v797_v33 }
  0x21   : > { %800 = vst [vmem:[%s2696_s7 + $0x110] sm:$0xff] %v799_v34  ;;  %802 = vst [vmem:[%s2696_s7 + $0x118] sm:$0xff] %v801_v35  ;;  %v803_v36 = vld [vmem:[%s2691_s6 + $0x240] sm:$0xff]  ;;  %v805_v37 = vld [vmem:[%s2691_s6 + $0x250] sm:$0xff] }
  0x22   : > { %v807_v38 = vld [vmem:[%s2691_s6 + $0x260] sm:$0xff]  ;;  %804 = vst [vmem:[%s2696_s7 + $0x120] sm:$0xff] %v803_v36  ;;  %806 = vst [vmem:[%s2696_s7 + $0x128] sm:$0xff] %v805_v37  ;;  %v809_v39 = vld [vmem:[%s2691_s6 + $0x270] sm:$0xff] }
  0x23   : > { %808 = vst [vmem:[%s2696_s7 + $0x130] sm:$0xff] %v807_v38  ;;  %v811_v40 = vld [vmem:[%s2691_s6 + $0x280] sm:$0xff]  ;;  %v813_v41 = vld [vmem:[%s2691_s6 + $0x290] sm:$0xff]  ;;  %810 = vst [vmem:[%s2696_s7 + $0x138] sm:$0xff] %v809_v39 }
  0x24   : > { %812 = vst [vmem:[%s2696_s7 + $0x140] sm:$0xff] %v811_v40  ;;  %814 = vst [vmem:[%s2696_s7 + $0x148] sm:$0xff] %v813_v41  ;;  %v815_v42 = vld [vmem:[%s2691_s6 + $0x2a0] sm:$0xff]  ;;  %v817_v43 = vld [vmem:[%s2691_s6 + $0x2b0] sm:$0xff] }
  0x25   : > { %v819_v44 = vld [vmem:[%s2691_s6 + $0x2c0] sm:$0xff]  ;;  %816 = vst [vmem:[%s2696_s7 + $0x150] sm:$0xff] %v815_v42  ;;  %818 = vst [vmem:[%s2696_s7 + $0x158] sm:$0xff] %v817_v43  ;;  %v821_v45 = vld [vmem:[%s2691_s6 + $0x2d0] sm:$0xff] }
  0x26   : > { %820 = vst [vmem:[%s2696_s7 + $0x160] sm:$0xff] %v819_v44  ;;  %v823_v46 = vld [vmem:[%s2691_s6 + $0x2e0] sm:$0xff]  ;;  %v825_v47 = vld [vmem:[%s2691_s6 + $0x2f0] sm:$0xff]  ;;  %822 = vst [vmem:[%s2696_s7 + $0x168] sm:$0xff] %v821_v45 }
  0x27   : > { %824 = vst [vmem:[%s2696_s7 + $0x170] sm:$0xff] %v823_v46  ;;  %826 = vst [vmem:[%s2696_s7 + $0x178] sm:$0xff] %v825_v47  ;;  %v827_v48 = vld [vmem:[%s2691_s6 + $0x300] sm:$0xff]  ;;  %v829_v49 = vld [vmem:[%s2691_s6 + $0x310] sm:$0xff] }
  0x28   : > { %v831_v50 = vld [vmem:[%s2691_s6 + $0x320] sm:$0xff]  ;;  %828 = vst [vmem:[%s2696_s7 + $0x180] sm:$0xff] %v827_v48  ;;  %830 = vst [vmem:[%s2696_s7 + $0x188] sm:$0xff] %v829_v49  ;;  %v833_v51 = vld [vmem:[%s2691_s6 + $0x330] sm:$0xff] }
  0x29   : > { %832 = vst [vmem:[%s2696_s7 + $0x190] sm:$0xff] %v831_v50  ;;  %v835_v52 = vld [vmem:[%s2691_s6 + $0x340] sm:$0xff]  ;;  %v837_v53 = vld [vmem:[%s2691_s6 + $0x350] sm:$0xff]  ;;  %834 = vst [vmem:[%s2696_s7 + $0x198] sm:$0xff] %v833_v51 }
  0x2a   : > { %836 = vst [vmem:[%s2696_s7 + $0x1a0] sm:$0xff] %v835_v52  ;;  %838 = vst [vmem:[%s2696_s7 + $0x1a8] sm:$0xff] %v837_v53  ;;  %v839_v54 = vld [vmem:[%s2691_s6 + $0x360] sm:$0xff]  ;;  %v841_v55 = vld [vmem:[%s2691_s6 + $0x370] sm:$0xff] }
  0x2b   : > { %v843_v56 = vld [vmem:[%s2691_s6 + $0x380] sm:$0xff]  ;;  %840 = vst [vmem:[%s2696_s7 + $0x1b0] sm:$0xff] %v839_v54  ;;  %842 = vst [vmem:[%s2696_s7 + $0x1b8] sm:$0xff] %v841_v55  ;;  %v845_v57 = vld [vmem:[%s2691_s6 + $0x390] sm:$0xff] }
  0x2c   : > { %844 = vst [vmem:[%s2696_s7 + $0x1c0] sm:$0xff] %v843_v56  ;;  %v847_v58 = vld [vmem:[%s2691_s6 + $0x3a0] sm:$0xff]  ;;  %v849_v59 = vld [vmem:[%s2691_s6 + $0x3b0] sm:$0xff]  ;;  %846 = vst [vmem:[%s2696_s7 + $0x1c8] sm:$0xff] %v845_v57 }
  0x2d   : > { %848 = vst [vmem:[%s2696_s7 + $0x1d0] sm:$0xff] %v847_v58  ;;  %850 = vst [vmem:[%s2696_s7 + $0x1d8] sm:$0xff] %v849_v59  ;;  %v851_v60 = vld [vmem:[%s2691_s6 + $0x3c0] sm:$0xff]  ;;  %v853_v61 = vld [vmem:[%s2691_s6 + $0x3d0] sm:$0xff] }
  0x2e   : > { %v855_v62 = vld [vmem:[%s2691_s6 + $0x3e0] sm:$0xff]  ;;  %852 = vst [vmem:[%s2696_s7 + $0x1e0] sm:$0xff] %v851_v60  ;;  %854 = vst [vmem:[%s2696_s7 + $0x1e8] sm:$0xff] %v853_v61  ;;  %v857_v63 = vld [vmem:[%s2691_s6 + $0x3f0] sm:$0xff] }
  0x2f   : > { %856 = vst [vmem:[%s2696_s7 + $0x1f0] sm:$0xff] %v855_v62  ;;  %v859_v0 = vld [vmem:[%s2691_s6 + $0x400] sm:$0xff]  ;;  %v861_v1 = vld [vmem:[%s2691_s6 + $0x410] sm:$0xff]  ;;  %858 = vst [vmem:[%s2696_s7 + $0x1f8] sm:$0xff] %v857_v63 }
  0x30   : > { %860 = vst [vmem:[%s2696_s7 + $0x200] sm:$0xff] %v859_v0  ;;  %862 = vst [vmem:[%s2696_s7 + $0x208] sm:$0xff] %v861_v1  ;;  %v863_v2 = vld [vmem:[%s2691_s6 + $0x420] sm:$0xff]  ;;  %v865_v3 = vld [vmem:[%s2691_s6 + $0x430] sm:$0xff] }
  0x31   : > { %v867_v4 = vld [vmem:[%s2691_s6 + $0x440] sm:$0xff]  ;;  %864 = vst [vmem:[%s2696_s7 + $0x210] sm:$0xff] %v863_v2  ;;  %866 = vst [vmem:[%s2696_s7 + $0x218] sm:$0xff] %v865_v3  ;;  %v869_v5 = vld [vmem:[%s2691_s6 + $0x450] sm:$0xff] }
  0x32   : > { %868 = vst [vmem:[%s2696_s7 + $0x220] sm:$0xff] %v867_v4  ;;  %v871_v6 = vld [vmem:[%s2691_s6 + $0x460] sm:$0xff]  ;;  %v873_v7 = vld [vmem:[%s2691_s6 + $0x470] sm:$0xff]  ;;  %870 = vst [vmem:[%s2696_s7 + $0x228] sm:$0xff] %v869_v5 }
  0x33   : > { %872 = vst [vmem:[%s2696_s7 + $0x230] sm:$0xff] %v871_v6  ;;  %874 = vst [vmem:[%s2696_s7 + $0x238] sm:$0xff] %v873_v7  ;;  %v875_v8 = vld [vmem:[%s2691_s6 + $0x480] sm:$0xff]  ;;  %v877_v9 = vld [vmem:[%s2691_s6 + $0x490] sm:$0xff] }
  0x34   : > { %v879_v10 = vld [vmem:[%s2691_s6 + $0x4a0] sm:$0xff]  ;;  %876 = vst [vmem:[%s2696_s7 + $0x240] sm:$0xff] %v875_v8  ;;  %878 = vst [vmem:[%s2696_s7 + $0x248] sm:$0xff] %v877_v9  ;;  %v881_v11 = vld [vmem:[%s2691_s6 + $0x4b0] sm:$0xff] }
  0x35   : > { %880 = vst [vmem:[%s2696_s7 + $0x250] sm:$0xff] %v879_v10  ;;  %v883_v12 = vld [vmem:[%s2691_s6 + $0x4c0] sm:$0xff]  ;;  %v885_v13 = vld [vmem:[%s2691_s6 + $0x4d0] sm:$0xff]  ;;  %882 = vst [vmem:[%s2696_s7 + $0x258] sm:$0xff] %v881_v11 }
  0x36   : > { %884 = vst [vmem:[%s2696_s7 + $0x260] sm:$0xff] %v883_v12  ;;  %886 = vst [vmem:[%s2696_s7 + $0x268] sm:$0xff] %v885_v13  ;;  %v887_v14 = vld [vmem:[%s2691_s6 + $0x4e0] sm:$0xff]  ;;  %v889_v15 = vld [vmem:[%s2691_s6 + $0x4f0] sm:$0xff] }
  0x37   : > { %v891_v16 = vld [vmem:[%s2691_s6 + $0x500] sm:$0xff]  ;;  %888 = vst [vmem:[%s2696_s7 + $0x270] sm:$0xff] %v887_v14  ;;  %890 = vst [vmem:[%s2696_s7 + $0x278] sm:$0xff] %v889_v15  ;;  %v893_v17 = vld [vmem:[%s2691_s6 + $0x510] sm:$0xff] }
  0x38   : > { %892 = vst [vmem:[%s2696_s7 + $0x280] sm:$0xff] %v891_v16  ;;  %v895_v18 = vld [vmem:[%s2691_s6 + $0x520] sm:$0xff]  ;;  %v897_v19 = vld [vmem:[%s2691_s6 + $0x530] sm:$0xff]  ;;  %894 = vst [vmem:[%s2696_s7 + $0x288] sm:$0xff] %v893_v17 }
  0x39   : > { %896 = vst [vmem:[%s2696_s7 + $0x290] sm:$0xff] %v895_v18  ;;  %898 = vst [vmem:[%s2696_s7 + $0x298] sm:$0xff] %v897_v19  ;;  %v899_v20 = vld [vmem:[%s2691_s6 + $0x540] sm:$0xff]  ;;  %v901_v21 = vld [vmem:[%s2691_s6 + $0x550] sm:$0xff] }
  0x3a   : > { %v903_v22 = vld [vmem:[%s2691_s6 + $0x560] sm:$0xff]  ;;  %900 = vst [vmem:[%s2696_s7 + $0x2a0] sm:$0xff] %v899_v20  ;;  %902 = vst [vmem:[%s2696_s7 + $0x2a8] sm:$0xff] %v901_v21  ;;  %v905_v23 = vld [vmem:[%s2691_s6 + $0x570] sm:$0xff] }
  0x3b   : > { %904 = vst [vmem:[%s2696_s7 + $0x2b0] sm:$0xff] %v903_v22  ;;  %v907_v24 = vld [vmem:[%s2691_s6 + $0x580] sm:$0xff]  ;;  %v909_v25 = vld [vmem:[%s2691_s6 + $0x590] sm:$0xff]  ;;  %906 = vst [vmem:[%s2696_s7 + $0x2b8] sm:$0xff] %v905_v23 }
  0x3c   : > { %908 = vst [vmem:[%s2696_s7 + $0x2c0] sm:$0xff] %v907_v24  ;;  %910 = vst [vmem:[%s2696_s7 + $0x2c8] sm:$0xff] %v909_v25  ;;  %v911_v26 = vld [vmem:[%s2691_s6 + $0x5a0] sm:$0xff]  ;;  %v913_v27 = vld [vmem:[%s2691_s6 + $0x5b0] sm:$0xff] }
  0x3d   : > { %v915_v28 = vld [vmem:[%s2691_s6 + $0x5c0] sm:$0xff]  ;;  %912 = vst [vmem:[%s2696_s7 + $0x2d0] sm:$0xff] %v911_v26  ;;  %914 = vst [vmem:[%s2696_s7 + $0x2d8] sm:$0xff] %v913_v27  ;;  %v917_v29 = vld [vmem:[%s2691_s6 + $0x5d0] sm:$0xff] }
  0x3e   : > { %916 = vst [vmem:[%s2696_s7 + $0x2e0] sm:$0xff] %v915_v28  ;;  %v919_v30 = vld [vmem:[%s2691_s6 + $0x5e0] sm:$0xff]  ;;  %v921_v31 = vld [vmem:[%s2691_s6 + $0x5f0] sm:$0xff]  ;;  %918 = vst [vmem:[%s2696_s7 + $0x2e8] sm:$0xff] %v917_v29 }
  0x3f   : > { %920 = vst [vmem:[%s2696_s7 + $0x2f0] sm:$0xff] %v919_v30  ;;  %922 = vst [vmem:[%s2696_s7 + $0x2f8] sm:$0xff] %v921_v31  ;;  %v923_v32 = vld [vmem:[%s2691_s6 + $0x600] sm:$0xff]  ;;  %v925_v33 = vld [vmem:[%s2691_s6 + $0x610] sm:$0xff] }
  0x40   : > { %v927_v34 = vld [vmem:[%s2691_s6 + $0x620] sm:$0xff]  ;;  %924 = vst [vmem:[%s2696_s7 + $0x300] sm:$0xff] %v923_v32  ;;  %926 = vst [vmem:[%s2696_s7 + $0x308] sm:$0xff] %v925_v33  ;;  %v929_v35 = vld [vmem:[%s2691_s6 + $0x630] sm:$0xff] }
  0x41   : > { %928 = vst [vmem:[%s2696_s7 + $0x310] sm:$0xff] %v927_v34  ;;  %v931_v36 = vld [vmem:[%s2691_s6 + $0x640] sm:$0xff]  ;;  %v933_v37 = vld [vmem:[%s2691_s6 + $0x650] sm:$0xff]  ;;  %930 = vst [vmem:[%s2696_s7 + $0x318] sm:$0xff] %v929_v35 }
  0x42   : > { %932 = vst [vmem:[%s2696_s7 + $0x320] sm:$0xff] %v931_v36  ;;  %934 = vst [vmem:[%s2696_s7 + $0x328] sm:$0xff] %v933_v37  ;;  %v935_v38 = vld [vmem:[%s2691_s6 + $0x660] sm:$0xff]  ;;  %v937_v39 = vld [vmem:[%s2691_s6 + $0x670] sm:$0xff] }
  0x43   : > { %v939_v40 = vld [vmem:[%s2691_s6 + $0x680] sm:$0xff]  ;;  %936 = vst [vmem:[%s2696_s7 + $0x330] sm:$0xff] %v935_v38  ;;  %938 = vst [vmem:[%s2696_s7 + $0x338] sm:$0xff] %v937_v39  ;;  %v941_v41 = vld [vmem:[%s2691_s6 + $0x690] sm:$0xff] }
  0x44   : > { %940 = vst [vmem:[%s2696_s7 + $0x340] sm:$0xff] %v939_v40  ;;  %v943_v42 = vld [vmem:[%s2691_s6 + $0x6a0] sm:$0xff]  ;;  %v945_v43 = vld [vmem:[%s2691_s6 + $0x6b0] sm:$0xff]  ;;  %942 = vst [vmem:[%s2696_s7 + $0x348] sm:$0xff] %v941_v41 }
  0x45   : > { %944 = vst [vmem:[%s2696_s7 + $0x350] sm:$0xff] %v943_v42  ;;  %946 = vst [vmem:[%s2696_s7 + $0x358] sm:$0xff] %v945_v43  ;;  %v947_v44 = vld [vmem:[%s2691_s6 + $0x6c0] sm:$0xff]  ;;  %v949_v45 = vld [vmem:[%s2691_s6 + $0x6d0] sm:$0xff] }
  0x46   : > { %v951_v46 = vld [vmem:[%s2691_s6 + $0x6e0] sm:$0xff]  ;;  %948 = vst [vmem:[%s2696_s7 + $0x360] sm:$0xff] %v947_v44  ;;  %950 = vst [vmem:[%s2696_s7 + $0x368] sm:$0xff] %v949_v45  ;;  %v953_v47 = vld [vmem:[%s2691_s6 + $0x6f0] sm:$0xff] }
  0x47   : > { %952 = vst [vmem:[%s2696_s7 + $0x370] sm:$0xff] %v951_v46  ;;  %v955_v48 = vld [vmem:[%s2691_s6 + $0x700] sm:$0xff]  ;;  %v957_v49 = vld [vmem:[%s2691_s6 + $0x710] sm:$0xff]  ;;  %954 = vst [vmem:[%s2696_s7 + $0x378] sm:$0xff] %v953_v47 }
  0x48   : > { %956 = vst [vmem:[%s2696_s7 + $0x380] sm:$0xff] %v955_v48  ;;  %958 = vst [vmem:[%s2696_s7 + $0x388] sm:$0xff] %v957_v49  ;;  %v959_v50 = vld [vmem:[%s2691_s6 + $0x720] sm:$0xff]  ;;  %v961_v51 = vld [vmem:[%s2691_s6 + $0x730] sm:$0xff] }
  0x49   : > { %v963_v52 = vld [vmem:[%s2691_s6 + $0x740] sm:$0xff]  ;;  %960 = vst [vmem:[%s2696_s7 + $0x390] sm:$0xff] %v959_v50  ;;  %962 = vst [vmem:[%s2696_s7 + $0x398] sm:$0xff] %v961_v51  ;;  %v965_v53 = vld [vmem:[%s2691_s6 + $0x750] sm:$0xff] }
  0x4a   : > { %964 = vst [vmem:[%s2696_s7 + $0x3a0] sm:$0xff] %v963_v52  ;;  %v967_v54 = vld [vmem:[%s2691_s6 + $0x760] sm:$0xff]  ;;  %v969_v55 = vld [vmem:[%s2691_s6 + $0x770] sm:$0xff]  ;;  %966 = vst [vmem:[%s2696_s7 + $0x3a8] sm:$0xff] %v965_v53 }
  0x4b   : > { %968 = vst [vmem:[%s2696_s7 + $0x3b0] sm:$0xff] %v967_v54  ;;  %970 = vst [vmem:[%s2696_s7 + $0x3b8] sm:$0xff] %v969_v55  ;;  %v971_v56 = vld [vmem:[%s2691_s6 + $0x780] sm:$0xff]  ;;  %v973_v57 = vld [vmem:[%s2691_s6 + $0x790] sm:$0xff] }
  0x4c   : > { %v975_v58 = vld [vmem:[%s2691_s6 + $0x7a0] sm:$0xff]  ;;  %972 = vst [vmem:[%s2696_s7 + $0x3c0] sm:$0xff] %v971_v56  ;;  %974 = vst [vmem:[%s2696_s7 + $0x3c8] sm:$0xff] %v973_v57  ;;  %v977_v59 = vld [vmem:[%s2691_s6 + $0x7b0] sm:$0xff] }
  0x4d   : > { %976 = vst [vmem:[%s2696_s7 + $0x3d0] sm:$0xff] %v975_v58  ;;  %v979_v60 = vld [vmem:[%s2691_s6 + $0x7c0] sm:$0xff]  ;;  %v981_v61 = vld [vmem:[%s2691_s6 + $0x7d0] sm:$0xff]  ;;  %978 = vst [vmem:[%s2696_s7 + $0x3d8] sm:$0xff] %v977_v59 }
  0x4e   : > { %980 = vst [vmem:[%s2696_s7 + $0x3e0] sm:$0xff] %v979_v60  ;;  %982 = vst [vmem:[%s2696_s7 + $0x3e8] sm:$0xff] %v981_v61  ;;  %v983_v62 = vld [vmem:[%s2691_s6 + $0x7e0] sm:$0xff]  ;;  %v985_v63 = vld [vmem:[%s2691_s6 + $0x7f0] sm:$0xff] }
  0x4f   : > { %v987_v0 = vld [vmem:[%s2691_s6 + $0x800] sm:$0xff]  ;;  %984 = vst [vmem:[%s2696_s7 + $0x3f0] sm:$0xff] %v983_v62  ;;  %986 = vst [vmem:[%s2696_s7 + $0x3f8] sm:$0xff] %v985_v63  ;;  %v989_v1 = vld [vmem:[%s2691_s6 + $0x810] sm:$0xff] }
  0x50   : > { %988 = vst [vmem:[%s2696_s7 + $0x400] sm:$0xff] %v987_v0  ;;  %v991_v2 = vld [vmem:[%s2691_s6 + $0x820] sm:$0xff]  ;;  %v993_v3 = vld [vmem:[%s2691_s6 + $0x830] sm:$0xff]  ;;  %990 = vst [vmem:[%s2696_s7 + $0x408] sm:$0xff] %v989_v1 }
  0x51   : > { %992 = vst [vmem:[%s2696_s7 + $0x410] sm:$0xff] %v991_v2  ;;  %994 = vst [vmem:[%s2696_s7 + $0x418] sm:$0xff] %v993_v3  ;;  %v995_v4 = vld [vmem:[%s2691_s6 + $0x840] sm:$0xff]  ;;  %v997_v5 = vld [vmem:[%s2691_s6 + $0x850] sm:$0xff] }
  0x52   : > { %v999_v6 = vld [vmem:[%s2691_s6 + $0x860] sm:$0xff]  ;;  %996 = vst [vmem:[%s2696_s7 + $0x420] sm:$0xff] %v995_v4  ;;  %998 = vst [vmem:[%s2696_s7 + $0x428] sm:$0xff] %v997_v5  ;;  %v1001_v7 = vld [vmem:[%s2691_s6 + $0x870] sm:$0xff] }
  0x53   : > { %1000 = vst [vmem:[%s2696_s7 + $0x430] sm:$0xff] %v999_v6  ;;  %v1003_v8 = vld [vmem:[%s2691_s6 + $0x880] sm:$0xff]  ;;  %v1005_v9 = vld [vmem:[%s2691_s6 + $0x890] sm:$0xff]  ;;  %1002 = vst [vmem:[%s2696_s7 + $0x438] sm:$0xff] %v1001_v7 }
  0x54   : > { %1004 = vst [vmem:[%s2696_s7 + $0x440] sm:$0xff] %v1003_v8  ;;  %1006 = vst [vmem:[%s2696_s7 + $0x448] sm:$0xff] %v1005_v9  ;;  %v1007_v10 = vld [vmem:[%s2691_s6 + $0x8a0] sm:$0xff]  ;;  %v1009_v11 = vld [vmem:[%s2691_s6 + $0x8b0] sm:$0xff] }
  0x55   : > { %v1011_v12 = vld [vmem:[%s2691_s6 + $0x8c0] sm:$0xff]  ;;  %1008 = vst [vmem:[%s2696_s7 + $0x450] sm:$0xff] %v1007_v10  ;;  %1010 = vst [vmem:[%s2696_s7 + $0x458] sm:$0xff] %v1009_v11  ;;  %v1013_v13 = vld [vmem:[%s2691_s6 + $0x8d0] sm:$0xff] }
  0x56   : > { %1012 = vst [vmem:[%s2696_s7 + $0x460] sm:$0xff] %v1011_v12  ;;  %v1015_v14 = vld [vmem:[%s2691_s6 + $0x8e0] sm:$0xff]  ;;  %v1017_v15 = vld [vmem:[%s2691_s6 + $0x8f0] sm:$0xff]  ;;  %1014 = vst [vmem:[%s2696_s7 + $0x468] sm:$0xff] %v1013_v13 }
  0x57   : > { %1016 = vst [vmem:[%s2696_s7 + $0x470] sm:$0xff] %v1015_v14  ;;  %1018 = vst [vmem:[%s2696_s7 + $0x478] sm:$0xff] %v1017_v15  ;;  %v1019_v16 = vld [vmem:[%s2691_s6 + $0x900] sm:$0xff]  ;;  %v1021_v17 = vld [vmem:[%s2691_s6 + $0x910] sm:$0xff] }
  0x58   : > { %v1023_v18 = vld [vmem:[%s2691_s6 + $0x920] sm:$0xff]  ;;  %1020 = vst [vmem:[%s2696_s7 + $0x480] sm:$0xff] %v1019_v16  ;;  %1022 = vst [vmem:[%s2696_s7 + $0x488] sm:$0xff] %v1021_v17  ;;  %v1025_v19 = vld [vmem:[%s2691_s6 + $0x930] sm:$0xff] }
  0x59   : > { %1024 = vst [vmem:[%s2696_s7 + $0x490] sm:$0xff] %v1023_v18  ;;  %v1027_v20 = vld [vmem:[%s2691_s6 + $0x940] sm:$0xff]  ;;  %v1029_v21 = vld [vmem:[%s2691_s6 + $0x950] sm:$0xff]  ;;  %1026 = vst [vmem:[%s2696_s7 + $0x498] sm:$0xff] %v1025_v19 }
  0x5a   : > { %1028 = vst [vmem:[%s2696_s7 + $0x4a0] sm:$0xff] %v1027_v20  ;;  %1030 = vst [vmem:[%s2696_s7 + $0x4a8] sm:$0xff] %v1029_v21  ;;  %v1031_v22 = vld [vmem:[%s2691_s6 + $0x960] sm:$0xff]  ;;  %v1033_v23 = vld [vmem:[%s2691_s6 + $0x970] sm:$0xff] }
  0x5b   : > { %v1035_v24 = vld [vmem:[%s2691_s6 + $0x980] sm:$0xff]  ;;  %1032 = vst [vmem:[%s2696_s7 + $0x4b0] sm:$0xff] %v1031_v22  ;;  %1034 = vst [vmem:[%s2696_s7 + $0x4b8] sm:$0xff] %v1033_v23  ;;  %v1037_v25 = vld [vmem:[%s2691_s6 + $0x990] sm:$0xff] }
  0x5c   : > { %1036 = vst [vmem:[%s2696_s7 + $0x4c0] sm:$0xff] %v1035_v24  ;;  %v1039_v26 = vld [vmem:[%s2691_s6 + $0x9a0] sm:$0xff]  ;;  %v1041_v27 = vld [vmem:[%s2691_s6 + $0x9b0] sm:$0xff]  ;;  %1038 = vst [vmem:[%s2696_s7 + $0x4c8] sm:$0xff] %v1037_v25 }
  0x5d   : > { %1040 = vst [vmem:[%s2696_s7 + $0x4d0] sm:$0xff] %v1039_v26  ;;  %1042 = vst [vmem:[%s2696_s7 + $0x4d8] sm:$0xff] %v1041_v27  ;;  %v1043_v28 = vld [vmem:[%s2691_s6 + $0x9c0] sm:$0xff]  ;;  %v1045_v29 = vld [vmem:[%s2691_s6 + $0x9d0] sm:$0xff] }
  0x5e   : > { %v1047_v30 = vld [vmem:[%s2691_s6 + $0x9e0] sm:$0xff]  ;;  %1044 = vst [vmem:[%s2696_s7 + $0x4e0] sm:$0xff] %v1043_v28  ;;  %1046 = vst [vmem:[%s2696_s7 + $0x4e8] sm:$0xff] %v1045_v29  ;;  %v1049_v31 = vld [vmem:[%s2691_s6 + $0x9f0] sm:$0xff] }
  0x5f   : > { %1048 = vst [vmem:[%s2696_s7 + $0x4f0] sm:$0xff] %v1047_v30  ;;  %v1051_v32 = vld [vmem:[%s2691_s6 + $0xa00] sm:$0xff]  ;;  %v1053_v33 = vld [vmem:[%s2691_s6 + $0xa10] sm:$0xff]  ;;  %1050 = vst [vmem:[%s2696_s7 + $0x4f8] sm:$0xff] %v1049_v31 }
  0x60   : > { %1052 = vst [vmem:[%s2696_s7 + $0x500] sm:$0xff] %v1051_v32  ;;  %1054 = vst [vmem:[%s2696_s7 + $0x508] sm:$0xff] %v1053_v33  ;;  %v1055_v34 = vld [vmem:[%s2691_s6 + $0xa20] sm:$0xff]  ;;  %v1057_v35 = vld [vmem:[%s2691_s6 + $0xa30] sm:$0xff] }
  0x61   : > { %v1059_v36 = vld [vmem:[%s2691_s6 + $0xa40] sm:$0xff]  ;;  %1056 = vst [vmem:[%s2696_s7 + $0x510] sm:$0xff] %v1055_v34  ;;  %1058 = vst [vmem:[%s2696_s7 + $0x518] sm:$0xff] %v1057_v35  ;;  %v1061_v37 = vld [vmem:[%s2691_s6 + $0xa50] sm:$0xff] }
  0x62   : > { %1060 = vst [vmem:[%s2696_s7 + $0x520] sm:$0xff] %v1059_v36  ;;  %v1063_v38 = vld [vmem:[%s2691_s6 + $0xa60] sm:$0xff]  ;;  %v1065_v39 = vld [vmem:[%s2691_s6 + $0xa70] sm:$0xff]  ;;  %1062 = vst [vmem:[%s2696_s7 + $0x528] sm:$0xff] %v1061_v37 }
  0x63   : > { %1064 = vst [vmem:[%s2696_s7 + $0x530] sm:$0xff] %v1063_v38  ;;  %1066 = vst [vmem:[%s2696_s7 + $0x538] sm:$0xff] %v1065_v39  ;;  %v1067_v40 = vld [vmem:[%s2691_s6 + $0xa80] sm:$0xff]  ;;  %v1069_v41 = vld [vmem:[%s2691_s6 + $0xa90] sm:$0xff] }
  0x64   : > { %v1071_v42 = vld [vmem:[%s2691_s6 + $0xaa0] sm:$0xff]  ;;  %1068 = vst [vmem:[%s2696_s7 + $0x540] sm:$0xff] %v1067_v40  ;;  %1070 = vst [vmem:[%s2696_s7 + $0x548] sm:$0xff] %v1069_v41  ;;  %v1073_v43 = vld [vmem:[%s2691_s6 + $0xab0] sm:$0xff] }
  0x65   : > { %1072 = vst [vmem:[%s2696_s7 + $0x550] sm:$0xff] %v1071_v42  ;;  %v1075_v44 = vld [vmem:[%s2691_s6 + $0xac0] sm:$0xff]  ;;  %v1077_v45 = vld [vmem:[%s2691_s6 + $0xad0] sm:$0xff]  ;;  %1074 = vst [vmem:[%s2696_s7 + $0x558] sm:$0xff] %v1073_v43 }
  0x66   : > { %1076 = vst [vmem:[%s2696_s7 + $0x560] sm:$0xff] %v1075_v44  ;;  %1078 = vst [vmem:[%s2696_s7 + $0x568] sm:$0xff] %v1077_v45  ;;  %v1079_v46 = vld [vmem:[%s2691_s6 + $0xae0] sm:$0xff]  ;;  %v1081_v47 = vld [vmem:[%s2691_s6 + $0xaf0] sm:$0xff] }
  0x67   : > { %v1083_v48 = vld [vmem:[%s2691_s6 + $0xb00] sm:$0xff]  ;;  %1080 = vst [vmem:[%s2696_s7 + $0x570] sm:$0xff] %v1079_v46  ;;  %1082 = vst [vmem:[%s2696_s7 + $0x578] sm:$0xff] %v1081_v47  ;;  %v1085_v49 = vld [vmem:[%s2691_s6 + $0xb10] sm:$0xff] }
  0x68   : > { %1084 = vst [vmem:[%s2696_s7 + $0x580] sm:$0xff] %v1083_v48  ;;  %v1087_v50 = vld [vmem:[%s2691_s6 + $0xb20] sm:$0xff]  ;;  %v1089_v51 = vld [vmem:[%s2691_s6 + $0xb30] sm:$0xff]  ;;  %1086 = vst [vmem:[%s2696_s7 + $0x588] sm:$0xff] %v1085_v49 }
  0x69   : > { %1088 = vst [vmem:[%s2696_s7 + $0x590] sm:$0xff] %v1087_v50  ;;  %1090 = vst [vmem:[%s2696_s7 + $0x598] sm:$0xff] %v1089_v51  ;;  %v1091_v52 = vld [vmem:[%s2691_s6 + $0xb40] sm:$0xff]  ;;  %v1093_v53 = vld [vmem:[%s2691_s6 + $0xb50] sm:$0xff] }
  0x6a   : > { %v1095_v54 = vld [vmem:[%s2691_s6 + $0xb60] sm:$0xff]  ;;  %1092 = vst [vmem:[%s2696_s7 + $0x5a0] sm:$0xff] %v1091_v52  ;;  %1094 = vst [vmem:[%s2696_s7 + $0x5a8] sm:$0xff] %v1093_v53  ;;  %v1097_v55 = vld [vmem:[%s2691_s6 + $0xb70] sm:$0xff] }
  0x6b   : > { %1096 = vst [vmem:[%s2696_s7 + $0x5b0] sm:$0xff] %v1095_v54  ;;  %v1099_v56 = vld [vmem:[%s2691_s6 + $0xb80] sm:$0xff]  ;;  %v1101_v57 = vld [vmem:[%s2691_s6 + $0xb90] sm:$0xff]  ;;  %1098 = vst [vmem:[%s2696_s7 + $0x5b8] sm:$0xff] %v1097_v55 }
  0x6c   : > { %1100 = vst [vmem:[%s2696_s7 + $0x5c0] sm:$0xff] %v1099_v56  ;;  %1102 = vst [vmem:[%s2696_s7 + $0x5c8] sm:$0xff] %v1101_v57  ;;  %v1103_v58 = vld [vmem:[%s2691_s6 + $0xba0] sm:$0xff]  ;;  %v1105_v59 = vld [vmem:[%s2691_s6 + $0xbb0] sm:$0xff] }
  0x6d   : > { %v1107_v60 = vld [vmem:[%s2691_s6 + $0xbc0] sm:$0xff]  ;;  %1104 = vst [vmem:[%s2696_s7 + $0x5d0] sm:$0xff] %v1103_v58  ;;  %1106 = vst [vmem:[%s2696_s7 + $0x5d8] sm:$0xff] %v1105_v59  ;;  %v1109_v61 = vld [vmem:[%s2691_s6 + $0xbd0] sm:$0xff] }
  0x6e   : > { %1108 = vst [vmem:[%s2696_s7 + $0x5e0] sm:$0xff] %v1107_v60  ;;  %v1111_v62 = vld [vmem:[%s2691_s6 + $0xbe0] sm:$0xff]  ;;  %v1113_v63 = vld [vmem:[%s2691_s6 + $0xbf0] sm:$0xff]  ;;  %1110 = vst [vmem:[%s2696_s7 + $0x5e8] sm:$0xff] %v1109_v61 }
  0x6f   : > { %1112 = vst [vmem:[%s2696_s7 + $0x5f0] sm:$0xff] %v1111_v62  ;;  %1114 = vst [vmem:[%s2696_s7 + $0x5f8] sm:$0xff] %v1113_v63  ;;  %v1115_v0 = vld [vmem:[%s2691_s6 + $0xc00] sm:$0xff]  ;;  %v1117_v1 = vld [vmem:[%s2691_s6 + $0xc10] sm:$0xff] }
  0x70   : > { %v1119_v2 = vld [vmem:[%s2691_s6 + $0xc20] sm:$0xff]  ;;  %1116 = vst [vmem:[%s2696_s7 + $0x600] sm:$0xff] %v1115_v0  ;;  %1118 = vst [vmem:[%s2696_s7 + $0x608] sm:$0xff] %v1117_v1  ;;  %v1121_v3 = vld [vmem:[%s2691_s6 + $0xc30] sm:$0xff] }
  0x71   : > { %1120 = vst [vmem:[%s2696_s7 + $0x610] sm:$0xff] %v1119_v2  ;;  %v1123_v4 = vld [vmem:[%s2691_s6 + $0xc40] sm:$0xff]  ;;  %v1125_v5 = vld [vmem:[%s2691_s6 + $0xc50] sm:$0xff]  ;;  %1122 = vst [vmem:[%s2696_s7 + $0x618] sm:$0xff] %v1121_v3 }
  0x72   : > { %1124 = vst [vmem:[%s2696_s7 + $0x620] sm:$0xff] %v1123_v4  ;;  %1126 = vst [vmem:[%s2696_s7 + $0x628] sm:$0xff] %v1125_v5  ;;  %v1127_v6 = vld [vmem:[%s2691_s6 + $0xc60] sm:$0xff]  ;;  %v1129_v7 = vld [vmem:[%s2691_s6 + $0xc70] sm:$0xff] }
  0x73   : > { %v1131_v8 = vld [vmem:[%s2691_s6 + $0xc80] sm:$0xff]  ;;  %1128 = vst [vmem:[%s2696_s7 + $0x630] sm:$0xff] %v1127_v6  ;;  %1130 = vst [vmem:[%s2696_s7 + $0x638] sm:$0xff] %v1129_v7  ;;  %v1133_v9 = vld [vmem:[%s2691_s6 + $0xc90] sm:$0xff] }
  0x74   : > { %1132 = vst [vmem:[%s2696_s7 + $0x640] sm:$0xff] %v1131_v8  ;;  %v1135_v10 = vld [vmem:[%s2691_s6 + $0xca0] sm:$0xff]  ;;  %v1137_v11 = vld [vmem:[%s2691_s6 + $0xcb0] sm:$0xff]  ;;  %1134 = vst [vmem:[%s2696_s7 + $0x648] sm:$0xff] %v1133_v9 }
  0x75   : > { %1136 = vst [vmem:[%s2696_s7 + $0x650] sm:$0xff] %v1135_v10  ;;  %1138 = vst [vmem:[%s2696_s7 + $0x658] sm:$0xff] %v1137_v11  ;;  %v1139_v12 = vld [vmem:[%s2691_s6 + $0xcc0] sm:$0xff]  ;;  %v1141_v13 = vld [vmem:[%s2691_s6 + $0xcd0] sm:$0xff] }
  0x76   : > { %v1143_v14 = vld [vmem:[%s2691_s6 + $0xce0] sm:$0xff]  ;;  %1140 = vst [vmem:[%s2696_s7 + $0x660] sm:$0xff] %v1139_v12  ;;  %1142 = vst [vmem:[%s2696_s7 + $0x668] sm:$0xff] %v1141_v13  ;;  %v1145_v15 = vld [vmem:[%s2691_s6 + $0xcf0] sm:$0xff] }
  0x77   : > { %1144 = vst [vmem:[%s2696_s7 + $0x670] sm:$0xff] %v1143_v14  ;;  %v1147_v16 = vld [vmem:[%s2691_s6 + $0xd00] sm:$0xff]  ;;  %v1149_v17 = vld [vmem:[%s2691_s6 + $0xd10] sm:$0xff]  ;;  %1146 = vst [vmem:[%s2696_s7 + $0x678] sm:$0xff] %v1145_v15 }
  0x78   : > { %1148 = vst [vmem:[%s2696_s7 + $0x680] sm:$0xff] %v1147_v16  ;;  %1150 = vst [vmem:[%s2696_s7 + $0x688] sm:$0xff] %v1149_v17  ;;  %v1151_v18 = vld [vmem:[%s2691_s6 + $0xd20] sm:$0xff]  ;;  %v1153_v19 = vld [vmem:[%s2691_s6 + $0xd30] sm:$0xff] }
  0x79   : > { %v1155_v20 = vld [vmem:[%s2691_s6 + $0xd40] sm:$0xff]  ;;  %1152 = vst [vmem:[%s2696_s7 + $0x690] sm:$0xff] %v1151_v18  ;;  %1154 = vst [vmem:[%s2696_s7 + $0x698] sm:$0xff] %v1153_v19  ;;  %v1157_v21 = vld [vmem:[%s2691_s6 + $0xd50] sm:$0xff] }
  0x7a   : > { %1156 = vst [vmem:[%s2696_s7 + $0x6a0] sm:$0xff] %v1155_v20  ;;  %v1159_v22 = vld [vmem:[%s2691_s6 + $0xd60] sm:$0xff]  ;;  %v1161_v23 = vld [vmem:[%s2691_s6 + $0xd70] sm:$0xff]  ;;  %1158 = vst [vmem:[%s2696_s7 + $0x6a8] sm:$0xff] %v1157_v21 }
  0x7b   : > { %1160 = vst [vmem:[%s2696_s7 + $0x6b0] sm:$0xff] %v1159_v22  ;;  %1162 = vst [vmem:[%s2696_s7 + $0x6b8] sm:$0xff] %v1161_v23  ;;  %v1163_v24 = vld [vmem:[%s2691_s6 + $0xd80] sm:$0xff]  ;;  %v1165_v25 = vld [vmem:[%s2691_s6 + $0xd90] sm:$0xff] }
  0x7c   : > { %v1167_v26 = vld [vmem:[%s2691_s6 + $0xda0] sm:$0xff]  ;;  %1164 = vst [vmem:[%s2696_s7 + $0x6c0] sm:$0xff] %v1163_v24  ;;  %1166 = vst [vmem:[%s2696_s7 + $0x6c8] sm:$0xff] %v1165_v25  ;;  %v1169_v27 = vld [vmem:[%s2691_s6 + $0xdb0] sm:$0xff] }
  0x7d   : > { %1168 = vst [vmem:[%s2696_s7 + $0x6d0] sm:$0xff] %v1167_v26  ;;  %v1171_v28 = vld [vmem:[%s2691_s6 + $0xdc0] sm:$0xff]  ;;  %v1173_v29 = vld [vmem:[%s2691_s6 + $0xdd0] sm:$0xff]  ;;  %1170 = vst [vmem:[%s2696_s7 + $0x6d8] sm:$0xff] %v1169_v27 }
  0x7e   : > { %1172 = vst [vmem:[%s2696_s7 + $0x6e0] sm:$0xff] %v1171_v28  ;;  %1174 = vst [vmem:[%s2696_s7 + $0x6e8] sm:$0xff] %v1173_v29  ;;  %v1175_v30 = vld [vmem:[%s2691_s6 + $0xde0] sm:$0xff]  ;;  %v1177_v31 = vld [vmem:[%s2691_s6 + $0xdf0] sm:$0xff] }
  0x7f   : > { %v1179_v32 = vld [vmem:[%s2691_s6 + $0xe00] sm:$0xff]  ;;  %1176 = vst [vmem:[%s2696_s7 + $0x6f0] sm:$0xff] %v1175_v30  ;;  %1178 = vst [vmem:[%s2696_s7 + $0x6f8] sm:$0xff] %v1177_v31  ;;  %v1181_v33 = vld [vmem:[%s2691_s6 + $0xe10] sm:$0xff] }
  0x80   : > { %1180 = vst [vmem:[%s2696_s7 + $0x700] sm:$0xff] %v1179_v32  ;;  %v1183_v34 = vld [vmem:[%s2691_s6 + $0xe20] sm:$0xff]  ;;  %v1185_v35 = vld [vmem:[%s2691_s6 + $0xe30] sm:$0xff]  ;;  %1182 = vst [vmem:[%s2696_s7 + $0x708] sm:$0xff] %v1181_v33 }
  0x81   : > { %1184 = vst [vmem:[%s2696_s7 + $0x710] sm:$0xff] %v1183_v34  ;;  %1186 = vst [vmem:[%s2696_s7 + $0x718] sm:$0xff] %v1185_v35  ;;  %v1187_v36 = vld [vmem:[%s2691_s6 + $0xe40] sm:$0xff]  ;;  %v1189_v37 = vld [vmem:[%s2691_s6 + $0xe50] sm:$0xff] }
  0x82   : > { %v1191_v38 = vld [vmem:[%s2691_s6 + $0xe60] sm:$0xff]  ;;  %1188 = vst [vmem:[%s2696_s7 + $0x720] sm:$0xff] %v1187_v36  ;;  %1190 = vst [vmem:[%s2696_s7 + $0x728] sm:$0xff] %v1189_v37  ;;  %v1193_v39 = vld [vmem:[%s2691_s6 + $0xe70] sm:$0xff] }
  0x83   : > { %1192 = vst [vmem:[%s2696_s7 + $0x730] sm:$0xff] %v1191_v38  ;;  %v1195_v40 = vld [vmem:[%s2691_s6 + $0xe80] sm:$0xff]  ;;  %v1197_v41 = vld [vmem:[%s2691_s6 + $0xe90] sm:$0xff]  ;;  %1194 = vst [vmem:[%s2696_s7 + $0x738] sm:$0xff] %v1193_v39 }
  0x84   : > { %1196 = vst [vmem:[%s2696_s7 + $0x740] sm:$0xff] %v1195_v40  ;;  %1198 = vst [vmem:[%s2696_s7 + $0x748] sm:$0xff] %v1197_v41  ;;  %v1199_v42 = vld [vmem:[%s2691_s6 + $0xea0] sm:$0xff]  ;;  %v1201_v43 = vld [vmem:[%s2691_s6 + $0xeb0] sm:$0xff] }
  0x85   : > { %v1203_v44 = vld [vmem:[%s2691_s6 + $0xec0] sm:$0xff]  ;;  %1200 = vst [vmem:[%s2696_s7 + $0x750] sm:$0xff] %v1199_v42  ;;  %1202 = vst [vmem:[%s2696_s7 + $0x758] sm:$0xff] %v1201_v43  ;;  %v1205_v45 = vld [vmem:[%s2691_s6 + $0xed0] sm:$0xff] }
  0x86   : > { %1204 = vst [vmem:[%s2696_s7 + $0x760] sm:$0xff] %v1203_v44  ;;  %v1207_v46 = vld [vmem:[%s2691_s6 + $0xee0] sm:$0xff]  ;;  %v1209_v47 = vld [vmem:[%s2691_s6 + $0xef0] sm:$0xff]  ;;  %1206 = vst [vmem:[%s2696_s7 + $0x768] sm:$0xff] %v1205_v45 }
  0x87   : > { %1208 = vst [vmem:[%s2696_s7 + $0x770] sm:$0xff] %v1207_v46  ;;  %1210 = vst [vmem:[%s2696_s7 + $0x778] sm:$0xff] %v1209_v47  ;;  %v1211_v48 = vld [vmem:[%s2691_s6 + $0xf00] sm:$0xff]  ;;  %v1213_v49 = vld [vmem:[%s2691_s6 + $0xf10] sm:$0xff] }
  0x88   : > { %v1215_v50 = vld [vmem:[%s2691_s6 + $0xf20] sm:$0xff]  ;;  %1212 = vst [vmem:[%s2696_s7 + $0x780] sm:$0xff] %v1211_v48  ;;  %1214 = vst [vmem:[%s2696_s7 + $0x788] sm:$0xff] %v1213_v49  ;;  %v1217_v51 = vld [vmem:[%s2691_s6 + $0xf30] sm:$0xff] }
  0x89   : > { %1216 = vst [vmem:[%s2696_s7 + $0x790] sm:$0xff] %v1215_v50  ;;  %v1219_v52 = vld [vmem:[%s2691_s6 + $0xf40] sm:$0xff]  ;;  %v1221_v53 = vld [vmem:[%s2691_s6 + $0xf50] sm:$0xff]  ;;  %1218 = vst [vmem:[%s2696_s7 + $0x798] sm:$0xff] %v1217_v51 }
  0x8a   : > { %1220 = vst [vmem:[%s2696_s7 + $0x7a0] sm:$0xff] %v1219_v52  ;;  %1222 = vst [vmem:[%s2696_s7 + $0x7a8] sm:$0xff] %v1221_v53  ;;  %v1223_v54 = vld [vmem:[%s2691_s6 + $0xf60] sm:$0xff]  ;;  %v1225_v55 = vld [vmem:[%s2691_s6 + $0xf70] sm:$0xff] }
  0x8b   : > { %v1227_v56 = vld [vmem:[%s2691_s6 + $0xf80] sm:$0xff]  ;;  %1224 = vst [vmem:[%s2696_s7 + $0x7b0] sm:$0xff] %v1223_v54  ;;  %1226 = vst [vmem:[%s2696_s7 + $0x7b8] sm:$0xff] %v1225_v55  ;;  %v1229_v57 = vld [vmem:[%s2691_s6 + $0xf90] sm:$0xff] }
  0x8c   : > { %1228 = vst [vmem:[%s2696_s7 + $0x7c0] sm:$0xff] %v1227_v56  ;;  %v1231_v58 = vld [vmem:[%s2691_s6 + $0xfa0] sm:$0xff]  ;;  %v1233_v59 = vld [vmem:[%s2691_s6 + $0xfb0] sm:$0xff]  ;;  %1230 = vst [vmem:[%s2696_s7 + $0x7c8] sm:$0xff] %v1229_v57 }
  0x8d   : > { %1232 = vst [vmem:[%s2696_s7 + $0x7d0] sm:$0xff] %v1231_v58  ;;  %1234 = vst [vmem:[%s2696_s7 + $0x7d8] sm:$0xff] %v1233_v59  ;;  %v1235_v60 = vld [vmem:[%s2691_s6 + $0xfc0] sm:$0xff]  ;;  %v1237_v61 = vld [vmem:[%s2691_s6 + $0xfd0] sm:$0xff] }
  0x8e   : > { %v1239_v62 = vld [vmem:[%s2691_s6 + $0xfe0] sm:$0xff]  ;;  %1236 = vst [vmem:[%s2696_s7 + $0x7e0] sm:$0xff] %v1235_v60  ;;  %1238 = vst [vmem:[%s2696_s7 + $0x7e8] sm:$0xff] %v1237_v61  ;;  %v1241_v63 = vld [vmem:[%s2691_s6 + $0xff0] sm:$0xff] }
  0x8f   : > { %1240 = vst [vmem:[%s2696_s7 + $0x7f0] sm:$0xff] %v1239_v62  ;;  %1242 = vst [vmem:[%s2696_s7 + $0x7f8] sm:$0xff] %v1241_v63 }
  0x90 PF: > { %p2290_p5 = scmp.ge.s32.totalorder %s2625_s20, 1  ;;  %p1265_p6 = scmp.lt.s32.totalorder %s2625_s20, 3 }
  0x92   : > { %p1266_p7 = pnand %p2290_p5, %p1265_p6 }
  0x93   : > { %s1272_s8 = sand.u32 (!%p1266_p7), 1, %s2617_s18   ;;  %p1307_p8 = scmp.lt.s32.totalorder (!%p1266_p7), %s2284_s21, 1 }
  0x94   : > { %1269 = sbr.rel (%p1266_p7) target bundleno = 551 (0x227), region = 74  ;;  %s2291_s13 = sshll.u32 (!%p1266_p7), %s1272_s8, 11 }
  0x95   : > { %s3216_s14 = scalar_lea.vmem (!%p1266_p7), [#allocation2], %s2291_s13 }
  0x99   : > { %v1321_v0 = vld [vmem:[%s3548_s0 + $0x8] sm:$0xff]  ;;  %v1323_v1 = vld [vmem:[%s3548_s0 + $0x18] sm:$0xff]  ;;  %v1366_v6 = vld [vmem:[%s3216_s14 + $0xf0] sm:$0xff]  ;;  %s3558_s21 = smov (!%p1307_p8, %s2284_s21), 1 }
  0x9a   : > { %1663 = vmatprep.mubr.f32.mxu0 %v1321_v0  ;;  %1733 = vmatprep.mubr.f32.mxu1 %v1323_v1  ;;  %v1367_v2 = vld [vmem:[%s3216_s14 + $0xf8] sm:$0xff]  ;;  %v1398_v7 = vld [vmem:[%s3216_s14 + $0x1f0] sm:$0xff]  ;;  %v1365_v10 = vld [vmem:[%s3216_s14 + $0xe8] sm:$0xff]  ;;  %s1309_s30 = scalar_lea.vmem %s3550_s2, %s3558_s21  ;;  %s1312_s7 = scalar_lea.vmem %s3551_s3, %s3558_s21 }
  0x9b   : > { %v1399_v3 = vld [vmem:[%s3216_s14 + $0x1f8] sm:$0xff]  ;;  %2297 = vmatprep.subr.mxu0 %v1367_v2  ;;  %v1350_v8 = vld [vmem:[%s3216_s14 + $0x70] sm:$0xff]  ;;  %v1397_v11 = vld [vmem:[%s3216_s14 + $0x1e8] sm:$0xff]  ;;  %s1315_s10 = scalar_lea.vmem %s3552_s4, %s3558_s21  ;;  %s2292_s11 = sshll.u32 %s3558_s21, 3 }
  0x9c   : > { %v1351_v4 = vld [vmem:[%s3216_s14 + $0x78] sm:$0xff]  ;;  %2332 = vmatprep.subr.mxu1 %v1399_v3  ;;  %v1382_v9 = vld [vmem:[%s3216_s14 + $0x170] sm:$0xff]  ;;  %v1349_v12 = vld [vmem:[%s3216_s14 + $0x68] sm:$0xff]  ;;  %s1319_s15 = scalar_lea.vmem %s3553_s5, %s2292_s11 }
  0x9d   : > { %v1383_v5 = vld [vmem:[%s3216_s14 + $0x178] sm:$0xff]  ;;  %2298 = vmatpush3.msra.mxu0 %v1351_v4  ;;  %v1381_v13 = vld [vmem:[%s3216_s14 + $0x168] sm:$0xff]  ;;  %v1364_v14 = vld [vmem:[%s3216_s14 + $0xe0] sm:$0xff] }
  0x9e   : > { %2333 = vmatpush3.msra.mxu1 %v1383_v5  ;;  %2299 = vmatprep.subr.mxu0 %v1366_v6  ;;  %v1396_v15 = vld [vmem:[%s3216_s14 + $0x1e0] sm:$0xff]  ;;  %v1363_v18 = vld [vmem:[%s3216_s14 + $0xd8] sm:$0xff]  ;;  %v1362_v22 = vld [vmem:[%s3216_s14 + $0xd0] sm:$0xff] }
  0x9f   : > { %2334 = vmatprep.subr.mxu1 %v1398_v7  ;;  %2300 = vmatpush3.msra.mxu0 %v1350_v8  ;;  %v1348_v16 = vld [vmem:[%s3216_s14 + $0x60] sm:$0xff]  ;;  %v1395_v19 = vld [vmem:[%s3216_s14 + $0x1d8] sm:$0xff]  ;;  %v1394_v23 = vld [vmem:[%s3216_s14 + $0x1d0] sm:$0xff] }
  0xa0   : > { %2335 = vmatpush3.msra.mxu1 %v1382_v9  ;;  %2301 = vmatprep.subr.mxu0 %v1365_v10  ;;  %v1380_v17 = vld [vmem:[%s3216_s14 + $0x160] sm:$0xff]  ;;  %v1347_v20 = vld [vmem:[%s3216_s14 + $0x58] sm:$0xff]  ;;  %v1346_v24 = vld [vmem:[%s3216_s14 + $0x50] sm:$0xff] }
  0xa1   : > { %2336 = vmatprep.subr.mxu1 %v1397_v11  ;;  %2302 = vmatpush3.msra.mxu0 %v1349_v12  ;;  %v1379_v21 = vld [vmem:[%s3216_s14 + $0x158] sm:$0xff]  ;;  %v1378_v25 = vld [vmem:[%s3216_s14 + $0x150] sm:$0xff]  ;;  %v1361_v26 = vld [vmem:[%s3216_s14 + $0xc8] sm:$0xff] }
  0xa2   : > { %2337 = vmatpush3.msra.mxu1 %v1381_v13  ;;  %2303 = vmatprep.subr.mxu0 %v1364_v14  ;;  %v1393_v27 = vld [vmem:[%s3216_s14 + $0x1c8] sm:$0xff]  ;;  %v1360_v30 = vld [vmem:[%s3216_s14 + $0xc0] sm:$0xff]  ;;  %v1359_v34 = vld [vmem:[%s3216_s14 + $0xb8] sm:$0xff] }
  0xa3   : > { %2338 = vmatprep.subr.mxu1 %v1396_v15  ;;  %2304 = vmatpush3.msra.mxu0 %v1348_v16  ;;  %v1345_v28 = vld [vmem:[%s3216_s14 + $0x48] sm:$0xff]  ;;  %v1392_v31 = vld [vmem:[%s3216_s14 + $0x1c0] sm:$0xff]  ;;  %v1391_v35 = vld [vmem:[%s3216_s14 + $0x1b8] sm:$0xff] }
  0xa4   : > { %2339 = vmatpush3.msra.mxu1 %v1380_v17  ;;  %2305 = vmatprep.subr.mxu0 %v1363_v18  ;;  %v1377_v29 = vld [vmem:[%s3216_s14 + $0x148] sm:$0xff]  ;;  %v1344_v32 = vld [vmem:[%s3216_s14 + $0x40] sm:$0xff]  ;;  %v1343_v36 = vld [vmem:[%s3216_s14 + $0x38] sm:$0xff] }
  0xa5   : > { %2340 = vmatprep.subr.mxu1 %v1395_v19  ;;  %2306 = vmatpush3.msra.mxu0 %v1347_v20  ;;  %v1376_v33 = vld [vmem:[%s3216_s14 + $0x140] sm:$0xff]  ;;  %v1375_v37 = vld [vmem:[%s3216_s14 + $0x138] sm:$0xff]  ;;  %v1358_v38 = vld [vmem:[%s3216_s14 + $0xb0] sm:$0xff] }
  0xa6   : > { %2341 = vmatpush3.msra.mxu1 %v1379_v21  ;;  %2307 = vmatprep.subr.mxu0 %v1362_v22  ;;  %v1390_v39 = vld [vmem:[%s3216_s14 + $0x1b0] sm:$0xff]  ;;  %v1357_v42 = vld [vmem:[%s3216_s14 + $0xa8] sm:$0xff]  ;;  %v1356_v46 = vld [vmem:[%s3216_s14 + $0xa0] sm:$0xff] }
  0xa7   : > { %2342 = vmatprep.subr.mxu1 %v1394_v23  ;;  %2308 = vmatpush3.msra.mxu0 %v1346_v24  ;;  %v1342_v40 = vld [vmem:[%s3216_s14 + $0x30] sm:$0xff]  ;;  %v1389_v43 = vld [vmem:[%s3216_s14 + $0x1a8] sm:$0xff]  ;;  %v1388_v47 = vld [vmem:[%s3216_s14 + $0x1a0] sm:$0xff] }
  0xa8   : > { %2343 = vmatpush3.msra.mxu1 %v1378_v25  ;;  %2309 = vmatprep.subr.mxu0 %v1361_v26  ;;  %v1374_v41 = vld [vmem:[%s3216_s14 + $0x130] sm:$0xff]  ;;  %v1341_v44 = vld [vmem:[%s3216_s14 + $0x28] sm:$0xff]  ;;  %v1340_v48 = vld [vmem:[%s3216_s14 + $0x20] sm:$0xff] }
  0xa9   : > { %2344 = vmatprep.subr.mxu1 %v1393_v27  ;;  %2310 = vmatpush3.msra.mxu0 %v1345_v28  ;;  %v1373_v45 = vld [vmem:[%s3216_s14 + $0x128] sm:$0xff]  ;;  %v1372_v49 = vld [vmem:[%s3216_s14 + $0x120] sm:$0xff]  ;;  %v1355_v50 = vld [vmem:[%s3216_s14 + $0x98] sm:$0xff] }
  0xaa   : > { %2345 = vmatpush3.msra.mxu1 %v1377_v29  ;;  %2311 = vmatprep.subr.mxu0 %v1360_v30  ;;  %v1387_v51 = vld [vmem:[%s3216_s14 + $0x198] sm:$0xff]  ;;  %v1354_v54 = vld [vmem:[%s3216_s14 + $0x90] sm:$0xff]  ;;  %v1353_v58 = vld [vmem:[%s3216_s14 + $0x88] sm:$0xff] }
  0xab   : > { %2346 = vmatprep.subr.mxu1 %v1392_v31  ;;  %2312 = vmatpush3.msra.mxu0 %v1344_v32  ;;  %v1339_v52 = vld [vmem:[%s3216_s14 + $0x18] sm:$0xff]  ;;  %v1386_v55 = vld [vmem:[%s3216_s14 + $0x190] sm:$0xff]  ;;  %v1385_v59 = vld [vmem:[%s3216_s14 + $0x188] sm:$0xff] }
  0xac   : > { %2347 = vmatpush3.msra.mxu1 %v1376_v33  ;;  %2313 = vmatprep.subr.mxu0 %v1359_v34  ;;  %v1371_v53 = vld [vmem:[%s3216_s14 + $0x118] sm:$0xff]  ;;  %v1338_v56 = vld [vmem:[%s3216_s14 + $0x10] sm:$0xff]  ;;  %v1337_v60 = vld [vmem:[%s3216_s14 + $0x8] sm:$0xff] }
  0xad   : > { %2348 = vmatprep.subr.mxu1 %v1391_v35  ;;  %2314 = vmatpush3.msra.mxu0 %v1343_v36  ;;  %v1370_v57 = vld [vmem:[%s3216_s14 + $0x110] sm:$0xff]  ;;  %v1369_v61 = vld [vmem:[%s3216_s14 + $0x108] sm:$0xff]  ;;  %v1352_v62 = vld [vmem:[%s3216_s14 + $0x80] sm:$0xff] }
  0xae   : > { %2349 = vmatpush3.msra.mxu1 %v1375_v37  ;;  %2315 = vmatprep.subr.mxu0 %v1358_v38  ;;  %v1384_v63 = vld [vmem:[%s3216_s14 + $0x180] sm:$0xff]  ;;  %v1431_v3 = vld [vmem:[%s3216_s14 + $0x2f8] sm:$0xff]  ;;  %v1322_v5 = vld [vmem:[%s3548_s0 + $0x10] sm:$0xff] }
  0xaf   : > { %2350 = vmatprep.subr.mxu1 %v1390_v39  ;;  %2316 = vmatpush3.msra.mxu0 %v1342_v40  ;;  %v1336_v0 = vld [vmem:[%s3216_s14] sm:$0xff]  ;;  %v1463_v4 = vld [vmem:[%s3216_s14 + $0x3f8] sm:$0xff]  ;;  %v1430_v8 = vld [vmem:[%s3216_s14 + $0x2f0] sm:$0xff] }
  0xb0   : > { %2351 = vmatpush3.msra.mxu1 %v1374_v41  ;;  %2317 = vmatprep.subr.mxu0 %v1357_v42  ;;  %v1368_v1 = vld [vmem:[%s3216_s14 + $0x100] sm:$0xff]  ;;  %v1415_v6 = vld [vmem:[%s3216_s14 + $0x278] sm:$0xff]  ;;  %v1462_v9 = vld [vmem:[%s3216_s14 + $0x3f0] sm:$0xff] }
  0xb1   : > { %2352 = vmatprep.subr.mxu1 %v1389_v43  ;;  %2318 = vmatpush3.msra.mxu0 %v1341_v44  ;;  %v1320_v2 = vld [vmem:[%s3548_s0] sm:$0xff]  ;;  %v1447_v7 = vld [vmem:[%s3216_s14 + $0x378] sm:$0xff]  ;;  %v1414_v10 = vld [vmem:[%s3216_s14 + $0x270] sm:$0xff] }
  0xb2   : > { %2353 = vmatpush3.msra.mxu1 %v1373_v45  ;;  %2319 = vmatprep.subr.mxu0 %v1356_v46  ;;  %v1446_v11 = vld [vmem:[%s3216_s14 + $0x370] sm:$0xff]  ;;  %v1429_v12 = vld [vmem:[%s3216_s14 + $0x2e8] sm:$0xff]  ;;  %v1428_v16 = vld [vmem:[%s3216_s14 + $0x2e0] sm:$0xff] }
  0xb3   : > { %2354 = vmatprep.subr.mxu1 %v1388_v47  ;;  %2320 = vmatpush3.msra.mxu0 %v1340_v48  ;;  %v1461_v13 = vld [vmem:[%s3216_s14 + $0x3e8] sm:$0xff]  ;;  %v1460_v17 = vld [vmem:[%s3216_s14 + $0x3e0] sm:$0xff]  ;;  %v1427_v20 = vld [vmem:[%s3216_s14 + $0x2d8] sm:$0xff] }
  0xb4   : > { %2355 = vmatpush3.msra.mxu1 %v1372_v49  ;;  %2321 = vmatprep.subr.mxu0 %v1355_v50  ;;  %v1413_v14 = vld [vmem:[%s3216_s14 + $0x268] sm:$0xff]  ;;  %v1412_v18 = vld [vmem:[%s3216_s14 + $0x260] sm:$0xff]  ;;  %v1459_v21 = vld [vmem:[%s3216_s14 + $0x3d8] sm:$0xff] }
  0xb5   : > { %2356 = vmatprep.subr.mxu1 %v1387_v51  ;;  %2322 = vmatpush3.msra.mxu0 %v1339_v52  ;;  %v1445_v15 = vld [vmem:[%s3216_s14 + $0x368] sm:$0xff]  ;;  %v1444_v19 = vld [vmem:[%s3216_s14 + $0x360] sm:$0xff]  ;;  %v1411_v22 = vld [vmem:[%s3216_s14 + $0x258] sm:$0xff] }
  0xb6   : > { %2357 = vmatpush3.msra.mxu1 %v1371_v53  ;;  %2323 = vmatprep.subr.mxu0 %v1354_v54  ;;  %v1443_v23 = vld [vmem:[%s3216_s14 + $0x358] sm:$0xff]  ;;  %v1426_v24 = vld [vmem:[%s3216_s14 + $0x2d0] sm:$0xff]  ;;  %v1425_v28 = vld [vmem:[%s3216_s14 + $0x2c8] sm:$0xff] }
  0xb7   : > { %2358 = vmatprep.subr.mxu1 %v1386_v55  ;;  %2324 = vmatpush3.msra.mxu0 %v1338_v56  ;;  %v1458_v25 = vld [vmem:[%s3216_s14 + $0x3d0] sm:$0xff]  ;;  %v1457_v29 = vld [vmem:[%s3216_s14 + $0x3c8] sm:$0xff]  ;;  %v1424_v32 = vld [vmem:[%s3216_s14 + $0x2c0] sm:$0xff] }
  0xb8   : > { %2359 = vmatpush3.msra.mxu1 %v1370_v57  ;;  %2325 = vmatprep.subr.mxu0 %v1353_v58  ;;  %v1410_v26 = vld [vmem:[%s3216_s14 + $0x250] sm:$0xff]  ;;  %v1409_v30 = vld [vmem:[%s3216_s14 + $0x248] sm:$0xff]  ;;  %v1456_v33 = vld [vmem:[%s3216_s14 + $0x3c0] sm:$0xff] }
  0xb9   : > { %2360 = vmatprep.subr.mxu1 %v1385_v59  ;;  %2326 = vmatpush3.msra.mxu0 %v1337_v60  ;;  %v1442_v27 = vld [vmem:[%s3216_s14 + $0x350] sm:$0xff]  ;;  %v1441_v31 = vld [vmem:[%s3216_s14 + $0x348] sm:$0xff]  ;;  %v1408_v34 = vld [vmem:[%s3216_s14 + $0x240] sm:$0xff] }
  0xba   : > { %2361 = vmatpush3.msra.mxu1 %v1369_v61  ;;  %2327 = vmatprep.subr.mxu0 %v1352_v62  ;;  %v1440_v35 = vld [vmem:[%s3216_s14 + $0x340] sm:$0xff]  ;;  %v1423_v36 = vld [vmem:[%s3216_s14 + $0x2b8] sm:$0xff]  ;;  %v1422_v40 = vld [vmem:[%s3216_s14 + $0x2b0] sm:$0xff] }
  0xbb   : > { %2362 = vmatprep.subr.mxu1 %v1384_v63  ;;  %2328 = vmatpush3.msra.mxu0 %v1336_v0  ;;  %v1455_v37 = vld [vmem:[%s3216_s14 + $0x3b8] sm:$0xff]  ;;  %v1454_v41 = vld [vmem:[%s3216_s14 + $0x3b0] sm:$0xff]  ;;  %v1421_v44 = vld [vmem:[%s3216_s14 + $0x2a8] sm:$0xff] }
  0xbc   : > { %2363 = vmatpush3.msra.mxu1 %v1368_v1  ;;  %1664 = vmatmul.mubr.f32.vlgmr.msra.gmra.mxu0 %v1320_v2  ;;  %v1407_v38 = vld [vmem:[%s3216_s14 + $0x238] sm:$0xff]  ;;  %v1406_v42 = vld [vmem:[%s3216_s14 + $0x230] sm:$0xff]  ;;  %v1453_v45 = vld [vmem:[%s3216_s14 + $0x3a8] sm:$0xff] }
  0xbd   : > { %2367 = vmatprep.subr.mxu0 %v1431_v3  ;;  %2402 = vmatprep.subr.mxu1 %v1463_v4  ;;  %v1439_v39 = vld [vmem:[%s3216_s14 + $0x338] sm:$0xff]  ;;  %v1438_v43 = vld [vmem:[%s3216_s14 + $0x330] sm:$0xff]  ;;  %v1405_v46 = vld [vmem:[%s3216_s14 + $0x228] sm:$0xff] }
  0xbe   : > { %1734 = vmatmul.mubr.f32.vlgmr.msra.gmra.mxu1 %v1322_v5  ;;  %2368 = vmatpush3.msra.mxu0 %v1415_v6  ;;  %v1437_v47 = vld [vmem:[%s3216_s14 + $0x328] sm:$0xff]  ;;  %v1420_v48 = vld [vmem:[%s3216_s14 + $0x2a0] sm:$0xff]  ;;  %v1419_v52 = vld [vmem:[%s3216_s14 + $0x298] sm:$0xff] }
  0xbf   : > { %2403 = vmatpush3.msra.mxu1 %v1447_v7  ;;  %2369 = vmatprep.subr.mxu0 %v1430_v8  ;;  %v1452_v49 = vld [vmem:[%s3216_s14 + $0x3a0] sm:$0xff]  ;;  %v1451_v53 = vld [vmem:[%s3216_s14 + $0x398] sm:$0xff]  ;;  %v1418_v56 = vld [vmem:[%s3216_s14 + $0x290] sm:$0xff] }
  0xc0   : > { %2404 = vmatprep.subr.mxu1 %v1462_v9  ;;  %2370 = vmatpush3.msra.mxu0 %v1414_v10  ;;  %v1404_v50 = vld [vmem:[%s3216_s14 + $0x220] sm:$0xff]  ;;  %v1403_v54 = vld [vmem:[%s3216_s14 + $0x218] sm:$0xff]  ;;  %v1450_v57 = vld [vmem:[%s3216_s14 + $0x390] sm:$0xff] }
  0xc1   : > { %2405 = vmatpush3.msra.mxu1 %v1446_v11  ;;  %2371 = vmatprep.subr.mxu0 %v1429_v12  ;;  %v1436_v51 = vld [vmem:[%s3216_s14 + $0x320] sm:$0xff]  ;;  %v1435_v55 = vld [vmem:[%s3216_s14 + $0x318] sm:$0xff]  ;;  %v1402_v58 = vld [vmem:[%s3216_s14 + $0x210] sm:$0xff] }
  0xc2   : > { %2406 = vmatprep.subr.mxu1 %v1461_v13  ;;  %2372 = vmatpush3.msra.mxu0 %v1413_v14  ;;  %v1434_v59 = vld [vmem:[%s3216_s14 + $0x310] sm:$0xff]  ;;  %v1417_v60 = vld [vmem:[%s3216_s14 + $0x288] sm:$0xff]  ;;  %v1416_v0 = vld [vmem:[%s3216_s14 + $0x280] sm:$0xff] }
  0xc3   : > { %2407 = vmatpush3.msra.mxu1 %v1445_v15  ;;  %2373 = vmatprep.subr.mxu0 %v1428_v16  ;;  %v1449_v61 = vld [vmem:[%s3216_s14 + $0x388] sm:$0xff]  ;;  %v1448_v1 = vld [vmem:[%s3216_s14 + $0x380] sm:$0xff]  ;;  %v1327_v6 = vld [vmem:[%s3548_s0 + $0x38] sm:$0xff] }
  0xc4   : > { %2408 = vmatprep.subr.mxu1 %v1460_v17  ;;  %2374 = vmatpush3.msra.mxu0 %v1412_v18  ;;  %v1401_v62 = vld [vmem:[%s3216_s14 + $0x208] sm:$0xff]  ;;  %v1400_v2 = vld [vmem:[%s3216_s14 + $0x200] sm:$0xff]  ;;  %v1495_v7 = vld [vmem:[%s3216_s14 + $0x4f8] sm:$0xff] }
  0xc5   : > { %2409 = vmatpush3.msra.mxu1 %v1444_v19  ;;  %2375 = vmatprep.subr.mxu0 %v1427_v20  ;;  %v1433_v63 = vld [vmem:[%s3216_s14 + $0x308] sm:$0xff]  ;;  %v1432_v4 = vld [vmem:[%s3216_s14 + $0x300] sm:$0xff]  ;;  %v1527_v8 = vld [vmem:[%s3216_s14 + $0x5f8] sm:$0xff] }
  0xc6   : > { %2410 = vmatprep.subr.mxu1 %v1459_v21  ;;  %2376 = vmatpush3.msra.mxu0 %v1411_v22  ;;  %v1325_v3 = vld [vmem:[%s3548_s0 + $0x28] sm:$0xff]  ;;  %v1324_v5 = vld [vmem:[%s3548_s0 + $0x20] sm:$0xff]  ;;  %v1326_v9 = vld [vmem:[%s3548_s0 + $0x30] sm:$0xff] }
  0xc7   : > { %2411 = vmatpush3.msra.mxu1 %v1443_v23  ;;  %2377 = vmatprep.subr.mxu0 %v1426_v24  ;;  %v1479_v10 = vld [vmem:[%s3216_s14 + $0x478] sm:$0xff]  ;;  %v1494_v12 = vld [vmem:[%s3216_s14 + $0x4f0] sm:$0xff]  ;;  %v1493_v16 = vld [vmem:[%s3216_s14 + $0x4e8] sm:$0xff] }
  0xc8   : > { %2412 = vmatprep.subr.mxu1 %v1458_v25  ;;  %2378 = vmatpush3.msra.mxu0 %v1410_v26  ;;  %v1511_v11 = vld [vmem:[%s3216_s14 + $0x578] sm:$0xff]  ;;  %v1526_v13 = vld [vmem:[%s3216_s14 + $0x5f0] sm:$0xff]  ;;  %v1525_v17 = vld [vmem:[%s3216_s14 + $0x5e8] sm:$0xff] }
  0xc9   : > { %2413 = vmatpush3.msra.mxu1 %v1442_v27  ;;  %2379 = vmatprep.subr.mxu0 %v1425_v28  ;;  %v1478_v14 = vld [vmem:[%s3216_s14 + $0x470] sm:$0xff]  ;;  %v1477_v18 = vld [vmem:[%s3216_s14 + $0x468] sm:$0xff]  ;;  %v1492_v20 = vld [vmem:[%s3216_s14 + $0x4e0] sm:$0xff] }
  0xca   : > { %2414 = vmatprep.subr.mxu1 %v1457_v29  ;;  %2380 = vmatpush3.msra.mxu0 %v1409_v30  ;;  %v1510_v15 = vld [vmem:[%s3216_s14 + $0x570] sm:$0xff]  ;;  %v1509_v19 = vld [vmem:[%s3216_s14 + $0x568] sm:$0xff]  ;;  %v1524_v21 = vld [vmem:[%s3216_s14 + $0x5e0] sm:$0xff] }
  0xcb   : > { %2415 = vmatpush3.msra.mxu1 %v1441_v31  ;;  %2381 = vmatprep.subr.mxu0 %v1424_v32  ;;  %v1476_v22 = vld [vmem:[%s3216_s14 + $0x460] sm:$0xff]  ;;  %v1491_v24 = vld [vmem:[%s3216_s14 + $0x4d8] sm:$0xff]  ;;  %v1490_v28 = vld [vmem:[%s3216_s14 + $0x4d0] sm:$0xff] }
  0xcc   : > { %2416 = vmatprep.subr.mxu1 %v1456_v33  ;;  %2382 = vmatpush3.msra.mxu0 %v1408_v34  ;;  %v1508_v23 = vld [vmem:[%s3216_s14 + $0x560] sm:$0xff]  ;;  %v1523_v25 = vld [vmem:[%s3216_s14 + $0x5d8] sm:$0xff]  ;;  %v1522_v29 = vld [vmem:[%s3216_s14 + $0x5d0] sm:$0xff] }
  0xcd   : > { %2417 = vmatpush3.msra.mxu1 %v1440_v35  ;;  %2383 = vmatprep.subr.mxu0 %v1423_v36  ;;  %v1475_v26 = vld [vmem:[%s3216_s14 + $0x458] sm:$0xff]  ;;  %v1474_v30 = vld [vmem:[%s3216_s14 + $0x450] sm:$0xff]  ;;  %v1489_v32 = vld [vmem:[%s3216_s14 + $0x4c8] sm:$0xff] }
  0xce   : > { %2418 = vmatprep.subr.mxu1 %v1455_v37  ;;  %2384 = vmatpush3.msra.mxu0 %v1407_v38  ;;  %v1507_v27 = vld [vmem:[%s3216_s14 + $0x558] sm:$0xff]  ;;  %v1506_v31 = vld [vmem:[%s3216_s14 + $0x550] sm:$0xff]  ;;  %v1521_v33 = vld [vmem:[%s3216_s14 + $0x5c8] sm:$0xff] }
  0xcf   : > { %2419 = vmatpush3.msra.mxu1 %v1439_v39  ;;  %2385 = vmatprep.subr.mxu0 %v1422_v40  ;;  %v1473_v34 = vld [vmem:[%s3216_s14 + $0x448] sm:$0xff]  ;;  %v1488_v36 = vld [vmem:[%s3216_s14 + $0x4c0] sm:$0xff]  ;;  %v1487_v40 = vld [vmem:[%s3216_s14 + $0x4b8] sm:$0xff] }
  0xd0   : > { %2420 = vmatprep.subr.mxu1 %v1454_v41  ;;  %2386 = vmatpush3.msra.mxu0 %v1406_v42  ;;  %v1505_v35 = vld [vmem:[%s3216_s14 + $0x548] sm:$0xff]  ;;  %v1520_v37 = vld [vmem:[%s3216_s14 + $0x5c0] sm:$0xff]  ;;  %v1519_v41 = vld [vmem:[%s3216_s14 + $0x5b8] sm:$0xff] }
  0xd1   : > { %2421 = vmatpush3.msra.mxu1 %v1438_v43  ;;  %2387 = vmatprep.subr.mxu0 %v1421_v44  ;;  %v1472_v38 = vld [vmem:[%s3216_s14 + $0x440] sm:$0xff]  ;;  %v1471_v42 = vld [vmem:[%s3216_s14 + $0x438] sm:$0xff]  ;;  %v1486_v44 = vld [vmem:[%s3216_s14 + $0x4b0] sm:$0xff] }
  0xd2   : > { %2422 = vmatprep.subr.mxu1 %v1453_v45  ;;  %2388 = vmatpush3.msra.mxu0 %v1405_v46  ;;  %v1504_v39 = vld [vmem:[%s3216_s14 + $0x540] sm:$0xff]  ;;  %v1503_v43 = vld [vmem:[%s3216_s14 + $0x538] sm:$0xff]  ;;  %v1518_v45 = vld [vmem:[%s3216_s14 + $0x5b0] sm:$0xff] }
  0xd3   : > { %2423 = vmatpush3.msra.mxu1 %v1437_v47  ;;  %2389 = vmatprep.subr.mxu0 %v1420_v48  ;;  %v1470_v46 = vld [vmem:[%s3216_s14 + $0x430] sm:$0xff]  ;;  %v1485_v48 = vld [vmem:[%s3216_s14 + $0x4a8] sm:$0xff] }
  0xd4   : > { %2424 = vmatprep.subr.mxu1 %v1452_v49  ;;  %2390 = vmatpush3.msra.mxu0 %v1404_v50  ;;  %v1502_v47 = vld [vmem:[%s3216_s14 + $0x530] sm:$0xff]  ;;  %v1517_v49 = vld [vmem:[%s3216_s14 + $0x5a8] sm:$0xff] }
  0xd5   : > { %2425 = vmatpush3.msra.mxu1 %v1436_v51  ;;  %2391 = vmatprep.subr.mxu0 %v1419_v52  ;;  %v1469_v50 = vld [vmem:[%s3216_s14 + $0x428] sm:$0xff]  ;;  %v1484_v52 = vld [vmem:[%s3216_s14 + $0x4a0] sm:$0xff] }
  0xd6   : > { %2426 = vmatprep.subr.mxu1 %v1451_v53  ;;  %2392 = vmatpush3.msra.mxu0 %v1403_v54  ;;  %v1501_v51 = vld [vmem:[%s3216_s14 + $0x528] sm:$0xff]  ;;  %v1516_v53 = vld [vmem:[%s3216_s14 + $0x5a0] sm:$0xff] }
  0xd7   : > { %2427 = vmatpush3.msra.mxu1 %v1435_v55  ;;  %2393 = vmatprep.subr.mxu0 %v1418_v56  ;;  %v1468_v54 = vld [vmem:[%s3216_s14 + $0x420] sm:$0xff]  ;;  %v1483_v56 = vld [vmem:[%s3216_s14 + $0x498] sm:$0xff] }
  0xd8   : > { %2428 = vmatprep.subr.mxu1 %v1450_v57  ;;  %2394 = vmatpush3.msra.mxu0 %v1402_v58  ;;  %v1500_v55 = vld [vmem:[%s3216_s14 + $0x520] sm:$0xff]  ;;  %v1515_v57 = vld [vmem:[%s3216_s14 + $0x598] sm:$0xff] }
  0xd9   : > { %2429 = vmatpush3.msra.mxu1 %v1434_v59  ;;  %2395 = vmatprep.subr.mxu0 %v1417_v60  ;;  %v1467_v58 = vld [vmem:[%s3216_s14 + $0x418] sm:$0xff]  ;;  %v1482_v60 = vld [vmem:[%s3216_s14 + $0x490] sm:$0xff] }
  0xda   : > { %2430 = vmatprep.subr.mxu1 %v1449_v61  ;;  %2396 = vmatpush3.msra.mxu0 %v1401_v62  ;;  %v1499_v59 = vld [vmem:[%s3216_s14 + $0x518] sm:$0xff]  ;;  %v1514_v61 = vld [vmem:[%s3216_s14 + $0x590] sm:$0xff] }
  0xdb   : > { %2431 = vmatpush3.msra.mxu1 %v1433_v63  ;;  %2397 = vmatprep.subr.mxu0 %v1416_v0  ;;  %v1466_v62 = vld [vmem:[%s3216_s14 + $0x410] sm:$0xff]  ;;  %v1481_v0 = vld [vmem:[%s3216_s14 + $0x488] sm:$0xff] }
  0xdc   : > { %2432 = vmatprep.subr.mxu1 %v1448_v1  ;;  %2398 = vmatpush3.msra.mxu0 %v1400_v2  ;;  %v1498_v63 = vld [vmem:[%s3216_s14 + $0x510] sm:$0xff]  ;;  %v1513_v1 = vld [vmem:[%s3216_s14 + $0x588] sm:$0xff] }
  0xdd   : > { %1803 = vmatprep.mubr.f32.mxu0 %v1325_v3  ;;  %2433 = vmatpush3.msra.mxu1 %v1432_v4  ;;  %v1465_v2 = vld [vmem:[%s3216_s14 + $0x408] sm:$0xff]  ;;  %v1480_v4 = vld [vmem:[%s3216_s14 + $0x480] sm:$0xff] }
  0xde   : > { %1804 = vmatmul.mubr.f32.vlgmr.msra.gmra.mxu0 %v1324_v5  ;;  %1873 = vmatprep.mubr.f32.mxu1 %v1327_v6  ;;  %v1497_v3 = vld [vmem:[%s3216_s14 + $0x508] sm:$0xff]  ;;  %v1512_v5 = vld [vmem:[%s3216_s14 + $0x580] sm:$0xff] }
  0xdf   : > { %2437 = vmatprep.subr.mxu0 %v1495_v7  ;;  %2472 = vmatprep.subr.mxu1 %v1527_v8  ;;  %v1464_v6 = vld [vmem:[%s3216_s14 + $0x400] sm:$0xff]  ;;  %v1329_v7 = vld [vmem:[%s3548_s0 + $0x48] sm:$0xff] }
  0xe0   : > { %1874 = vmatmul.mubr.f32.vlgmr.msra.gmra.mxu1 %v1326_v9  ;;  %2438 = vmatpush3.msra.mxu0 %v1479_v10  ;;  %v1496_v8 = vld [vmem:[%s3216_s14 + $0x500] sm:$0xff]  ;;  %v1331_v10 = vld [vmem:[%s3548_s0 + $0x58] sm:$0xff] }
  0xe1   : > { %2473 = vmatpush3.msra.mxu1 %v1511_v11  ;;  %2439 = vmatprep.subr.mxu0 %v1494_v12  ;;  %v1328_v9 = vld [vmem:[%s3548_s0 + $0x40] sm:$0xff]  ;;  %v1559_v11 = vld [vmem:[%s3216_s14 + $0x6f8] sm:$0xff] }
  0xe2   : > { %2474 = vmatprep.subr.mxu1 %v1526_v13  ;;  %2440 = vmatpush3.msra.mxu0 %v1478_v14  ;;  %v1591_v12 = vld [vmem:[%s3216_s14 + $0x7f8] sm:$0xff]  ;;  %v1330_v13 = vld [vmem:[%s3548_s0 + $0x50] sm:$0xff] }
  0xe3   : > { %2475 = vmatpush3.msra.mxu1 %v1510_v15  ;;  %2441 = vmatprep.subr.mxu0 %v1493_v16  ;;  %v1543_v14 = vld [vmem:[%s3216_s14 + $0x678] sm:$0xff]  ;;  %v1558_v16 = vld [vmem:[%s3216_s14 + $0x6f0] sm:$0xff] }
  0xe4   : > { %2476 = vmatprep.subr.mxu1 %v1525_v17  ;;  %2442 = vmatpush3.msra.mxu0 %v1477_v18  ;;  %v1575_v15 = vld [vmem:[%s3216_s14 + $0x778] sm:$0xff]  ;;  %v1590_v17 = vld [vmem:[%s3216_s14 + $0x7f0] sm:$0xff] }
  0xe5   : > { %2477 = vmatpush3.msra.mxu1 %v1509_v19  ;;  %2443 = vmatprep.subr.mxu0 %v1492_v20  ;;  %v1542_v18 = vld [vmem:[%s3216_s14 + $0x670] sm:$0xff]  ;;  %v1557_v20 = vld [vmem:[%s3216_s14 + $0x6e8] sm:$0xff] }
  0xe6   : > { %2478 = vmatprep.subr.mxu1 %v1524_v21  ;;  %2444 = vmatpush3.msra.mxu0 %v1476_v22  ;;  %v1574_v19 = vld [vmem:[%s3216_s14 + $0x770] sm:$0xff]  ;;  %v1589_v21 = vld [vmem:[%s3216_s14 + $0x7e8] sm:$0xff] }
  0xe7   : > { %2479 = vmatpush3.msra.mxu1 %v1508_v23  ;;  %2445 = vmatprep.subr.mxu0 %v1491_v24  ;;  %v1541_v22 = vld [vmem:[%s3216_s14 + $0x668] sm:$0xff]  ;;  %v1556_v24 = vld [vmem:[%s3216_s14 + $0x6e0] sm:$0xff] }
  0xe8   : > { %2480 = vmatprep.subr.mxu1 %v1523_v25  ;;  %2446 = vmatpush3.msra.mxu0 %v1475_v26  ;;  %v1573_v23 = vld [vmem:[%s3216_s14 + $0x768] sm:$0xff]  ;;  %v1588_v25 = vld [vmem:[%s3216_s14 + $0x7e0] sm:$0xff] }
  0xe9   : > { %2481 = vmatpush3.msra.mxu1 %v1507_v27  ;;  %2447 = vmatprep.subr.mxu0 %v1490_v28  ;;  %v1540_v26 = vld [vmem:[%s3216_s14 + $0x660] sm:$0xff]  ;;  %v1555_v28 = vld [vmem:[%s3216_s14 + $0x6d8] sm:$0xff] }
  0xea   : > { %2482 = vmatprep.subr.mxu1 %v1522_v29  ;;  %2448 = vmatpush3.msra.mxu0 %v1474_v30  ;;  %v1572_v27 = vld [vmem:[%s3216_s14 + $0x760] sm:$0xff]  ;;  %v1587_v29 = vld [vmem:[%s3216_s14 + $0x7d8] sm:$0xff] }
  0xeb   : > { %2483 = vmatpush3.msra.mxu1 %v1506_v31  ;;  %2449 = vmatprep.subr.mxu0 %v1489_v32  ;;  %v1539_v30 = vld [vmem:[%s3216_s14 + $0x658] sm:$0xff]  ;;  %v1554_v32 = vld [vmem:[%s3216_s14 + $0x6d0] sm:$0xff] }
  0xec   : > { %2484 = vmatprep.subr.mxu1 %v1521_v33  ;;  %2450 = vmatpush3.msra.mxu0 %v1473_v34  ;;  %v1571_v31 = vld [vmem:[%s3216_s14 + $0x758] sm:$0xff]  ;;  %v1586_v33 = vld [vmem:[%s3216_s14 + $0x7d0] sm:$0xff] }
  0xed   : > { %2485 = vmatpush3.msra.mxu1 %v1505_v35  ;;  %2451 = vmatprep.subr.mxu0 %v1488_v36  ;;  %v1538_v34 = vld [vmem:[%s3216_s14 + $0x650] sm:$0xff]  ;;  %v1553_v36 = vld [vmem:[%s3216_s14 + $0x6c8] sm:$0xff] }
  0xee   : > { %2486 = vmatprep.subr.mxu1 %v1520_v37  ;;  %2452 = vmatpush3.msra.mxu0 %v1472_v38  ;;  %v1570_v35 = vld [vmem:[%s3216_s14 + $0x750] sm:$0xff]  ;;  %v1585_v37 = vld [vmem:[%s3216_s14 + $0x7c8] sm:$0xff] }
  0xef   : > { %2487 = vmatpush3.msra.mxu1 %v1504_v39  ;;  %2453 = vmatprep.subr.mxu0 %v1487_v40  ;;  %v1537_v38 = vld [vmem:[%s3216_s14 + $0x648] sm:$0xff]  ;;  %v1552_v40 = vld [vmem:[%s3216_s14 + $0x6c0] sm:$0xff] }
  0xf0   : > { %2488 = vmatprep.subr.mxu1 %v1519_v41  ;;  %2454 = vmatpush3.msra.mxu0 %v1471_v42  ;;  %v1569_v39 = vld [vmem:[%s3216_s14 + $0x748] sm:$0xff]  ;;  %v1584_v41 = vld [vmem:[%s3216_s14 + $0x7c0] sm:$0xff] }
  0xf1   : > { %2489 = vmatpush3.msra.mxu1 %v1503_v43  ;;  %2455 = vmatprep.subr.mxu0 %v1486_v44  ;;  %v1536_v42 = vld [vmem:[%s3216_s14 + $0x640] sm:$0xff]  ;;  %v1551_v44 = vld [vmem:[%s3216_s14 + $0x6b8] sm:$0xff] }
  0xf2   : > { %2490 = vmatprep.subr.mxu1 %v1518_v45  ;;  %2456 = vmatpush3.msra.mxu0 %v1470_v46  ;;  %v1568_v43 = vld [vmem:[%s3216_s14 + $0x740] sm:$0xff]  ;;  %v1583_v45 = vld [vmem:[%s3216_s14 + $0x7b8] sm:$0xff] }
  0xf3   : > { %2491 = vmatpush3.msra.mxu1 %v1502_v47  ;;  %2457 = vmatprep.subr.mxu0 %v1485_v48  ;;  %v1535_v46 = vld [vmem:[%s3216_s14 + $0x638] sm:$0xff]  ;;  %v1550_v48 = vld [vmem:[%s3216_s14 + $0x6b0] sm:$0xff] }
  0xf4   : > { %2492 = vmatprep.subr.mxu1 %v1517_v49  ;;  %2458 = vmatpush3.msra.mxu0 %v1469_v50  ;;  %v1567_v47 = vld [vmem:[%s3216_s14 + $0x738] sm:$0xff]  ;;  %v1582_v49 = vld [vmem:[%s3216_s14 + $0x7b0] sm:$0xff] }
  0xf5   : > { %2493 = vmatpush3.msra.mxu1 %v1501_v51  ;;  %2459 = vmatprep.subr.mxu0 %v1484_v52  ;;  %v1534_v50 = vld [vmem:[%s3216_s14 + $0x630] sm:$0xff]  ;;  %v1549_v52 = vld [vmem:[%s3216_s14 + $0x6a8] sm:$0xff] }
  0xf6   : > { %2494 = vmatprep.subr.mxu1 %v1516_v53  ;;  %2460 = vmatpush3.msra.mxu0 %v1468_v54  ;;  %v1566_v51 = vld [vmem:[%s3216_s14 + $0x730] sm:$0xff]  ;;  %v1581_v53 = vld [vmem:[%s3216_s14 + $0x7a8] sm:$0xff] }
  0xf7   : > { %2495 = vmatpush3.msra.mxu1 %v1500_v55  ;;  %2461 = vmatprep.subr.mxu0 %v1483_v56  ;;  %v1533_v54 = vld [vmem:[%s3216_s14 + $0x628] sm:$0xff]  ;;  %v1548_v56 = vld [vmem:[%s3216_s14 + $0x6a0] sm:$0xff] }
  0xf8   : > { %2496 = vmatprep.subr.mxu1 %v1515_v57  ;;  %2462 = vmatpush3.msra.mxu0 %v1467_v58  ;;  %v1565_v55 = vld [vmem:[%s3216_s14 + $0x728] sm:$0xff]  ;;  %v1580_v57 = vld [vmem:[%s3216_s14 + $0x7a0] sm:$0xff] }
  0xf9   : > { %2497 = vmatpush3.msra.mxu1 %v1499_v59  ;;  %2463 = vmatprep.subr.mxu0 %v1482_v60  ;;  %v1532_v58 = vld [vmem:[%s3216_s14 + $0x620] sm:$0xff]  ;;  %v1547_v60 = vld [vmem:[%s3216_s14 + $0x698] sm:$0xff] }
  0xfa   : > { %2498 = vmatprep.subr.mxu1 %v1514_v61  ;;  %2464 = vmatpush3.msra.mxu0 %v1466_v62  ;;  %v1564_v59 = vld [vmem:[%s3216_s14 + $0x720] sm:$0xff]  ;;  %v1579_v61 = vld [vmem:[%s3216_s14 + $0x798] sm:$0xff] }
  0xfb   : > { %2499 = vmatpush3.msra.mxu1 %v1498_v63  ;;  %2465 = vmatprep.subr.mxu0 %v1481_v0  ;;  %v1531_v62 = vld [vmem:[%s3216_s14 + $0x618] sm:$0xff]  ;;  %v1546_v0 = vld [vmem:[%s3216_s14 + $0x690] sm:$0xff] }
  0xfc   : > { %2500 = vmatprep.subr.mxu1 %v1513_v1  ;;  %2466 = vmatpush3.msra.mxu0 %v1465_v2  ;;  %v1563_v63 = vld [vmem:[%s3216_s14 + $0x718] sm:$0xff]  ;;  %v1578_v1 = vld [vmem:[%s3216_s14 + $0x790] sm:$0xff] }
  0xfd   : > { %2501 = vmatpush3.msra.mxu1 %v1497_v3  ;;  %2467 = vmatprep.subr.mxu0 %v1480_v4  ;;  %v1530_v2 = vld [vmem:[%s3216_s14 + $0x610] sm:$0xff]  ;;  %v1545_v4 = vld [vmem:[%s3216_s14 + $0x688] sm:$0xff] }
  0xfe   : > { %2502 = vmatprep.subr.mxu1 %v1512_v5  ;;  %2468 = vmatpush3.msra.mxu0 %v1464_v6  ;;  %v1562_v3 = vld [vmem:[%s3216_s14 + $0x710] sm:$0xff]  ;;  %v1577_v5 = vld [vmem:[%s3216_s14 + $0x788] sm:$0xff] }
  0xff   : > { %1943 = vmatprep.mubr.f32.mxu0 %v1329_v7  ;;  %2503 = vmatpush3.msra.mxu1 %v1496_v8  ;;  %v1529_v6 = vld [vmem:[%s3216_s14 + $0x608] sm:$0xff]  ;;  %v1544_v8 = vld [vmem:[%s3216_s14 + $0x680] sm:$0xff] }
 0x100   : > { %1944 = vmatmul.mubr.f32.vlgmr.msra.gmra.mxu0 %v1328_v9  ;;  %2013 = vmatprep.mubr.f32.mxu1 %v1331_v10  ;;  %v1561_v7 = vld [vmem:[%s3216_s14 + $0x708] sm:$0xff]  ;;  %v1576_v9 = vld [vmem:[%s3216_s14 + $0x780] sm:$0xff] }
 0x101   : > { %2507 = vmatprep.subr.mxu0 %v1559_v11  ;;  %2542 = vmatprep.subr.mxu1 %v1591_v12  ;;  %v1528_v10 = vld [vmem:[%s3216_s14 + $0x600] sm:$0xff]  ;;  %v1333_v11 = vld [vmem:[%s3548_s0 + $0x68] sm:$0xff] }
 0x102   : > { %2014 = vmatmul.mubr.f32.vlgmr.msra.gmra.mxu1 %v1330_v13  ;;  %2508 = vmatpush3.msra.mxu0 %v1543_v14  ;;  %v1560_v12 = vld [vmem:[%s3216_s14 + $0x700] sm:$0xff]  ;;  %v1335_v13 = vld [vmem:[%s3548_s0 + $0x78] sm:$0xff] }
 0x103   : > { %2543 = vmatpush3.msra.mxu1 %v1575_v15  ;;  %2509 = vmatprep.subr.mxu0 %v1558_v16  ;;  %v1332_v14 = vld [vmem:[%s3548_s0 + $0x60] sm:$0xff]  ;;  %v1334_v15 = vld [vmem:[%s3548_s0 + $0x70] sm:$0xff] }
 0x104   : > { %2544 = vmatprep.subr.mxu1 %v1590_v17  ;;  %2510 = vmatpush3.msra.mxu0 %v1542_v18 }
 0x105   : > { %2545 = vmatpush3.msra.mxu1 %v1574_v19  ;;  %2511 = vmatprep.subr.mxu0 %v1557_v20 }
 0x106   : > { %2546 = vmatprep.subr.mxu1 %v1589_v21  ;;  %2512 = vmatpush3.msra.mxu0 %v1541_v22  ;;  %v2293_v21 = vld [vmem:[%s1309_s30] ss:$0 sm:$0xff] }
 0x107   : > { %2547 = vmatpush3.msra.mxu1 %v1573_v23  ;;  %2513 = vmatprep.subr.mxu0 %v1556_v24 }
 0x108   : > { %2548 = vmatprep.subr.mxu1 %v1588_v25  ;;  %2514 = vmatpush3.msra.mxu0 %v1540_v26 }
 0x109   : > { %2549 = vmatpush3.msra.mxu1 %v1572_v27  ;;  %2515 = vmatprep.subr.mxu0 %v1555_v28 }
 0x10a   : > { %2550 = vmatprep.subr.mxu1 %v1587_v29  ;;  %2516 = vmatpush3.msra.mxu0 %v1539_v30 }
 0x10b   : > { %2551 = vmatpush3.msra.mxu1 %v1571_v31  ;;  %2517 = vmatprep.subr.mxu0 %v1554_v32 }
 0x10c   : > { %2552 = vmatprep.subr.mxu1 %v1586_v33  ;;  %2518 = vmatpush3.msra.mxu0 %v1538_v34 }
 0x10d   : > { %2553 = vmatpush3.msra.mxu1 %v1570_v35  ;;  %2519 = vmatprep.subr.mxu0 %v1553_v36 }
 0x10e   : > { %2554 = vmatprep.subr.mxu1 %v1585_v37  ;;  %2520 = vmatpush3.msra.mxu0 %v1537_v38 }
 0x10f   : > { %2555 = vmatpush3.msra.mxu1 %v1569_v39  ;;  %2521 = vmatprep.subr.mxu0 %v1552_v40 }
 0x110   : > { %2556 = vmatprep.subr.mxu1 %v1584_v41  ;;  %2522 = vmatpush3.msra.mxu0 %v1536_v42 }
 0x111   : > { %2557 = vmatpush3.msra.mxu1 %v1568_v43  ;;  %2523 = vmatprep.subr.mxu0 %v1551_v44 }
 0x112   : > { %2558 = vmatprep.subr.mxu1 %v1583_v45  ;;  %2524 = vmatpush3.msra.mxu0 %v1535_v46 }
 0x113   : > { %2559 = vmatpush3.msra.mxu1 %v1567_v47  ;;  %2525 = vmatprep.subr.mxu0 %v1550_v48 }
 0x114   : > { %2560 = vmatprep.subr.mxu1 %v1582_v49  ;;  %2526 = vmatpush3.msra.mxu0 %v1534_v50 }
 0x115   : > { %2561 = vmatpush3.msra.mxu1 %v1566_v51  ;;  %2527 = vmatprep.subr.mxu0 %v1549_v52 }
 0x116   : > { %2562 = vmatprep.subr.mxu1 %v1581_v53  ;;  %2528 = vmatpush3.msra.mxu0 %v1533_v54 }
 0x117   : > { %2563 = vmatpush3.msra.mxu1 %v1565_v55  ;;  %2529 = vmatprep.subr.mxu0 %v1548_v56 }
 0x118   : > { %2564 = vmatprep.subr.mxu1 %v1580_v57  ;;  %2530 = vmatpush3.msra.mxu0 %v1532_v58 }
 0x119   : > { %2565 = vmatpush3.msra.mxu1 %v1564_v59  ;;  %2531 = vmatprep.subr.mxu0 %v1547_v60 }
 0x11a   : > { %2566 = vmatprep.subr.mxu1 %v1579_v61  ;;  %2532 = vmatpush3.msra.mxu0 %v1531_v62 }
 0x11b   : > { %2567 = vmatpush3.msra.mxu1 %v1563_v63  ;;  %2533 = vmatprep.subr.mxu0 %v1546_v0 }
 0x11c   : > { %2568 = vmatprep.subr.mxu1 %v1578_v1  ;;  %2534 = vmatpush3.msra.mxu0 %v1530_v2 }
 0x11d   : > { %2569 = vmatpush3.msra.mxu1 %v1562_v3  ;;  %2535 = vmatprep.subr.mxu0 %v1545_v4  ;;  %v2183_v4 = vlaneseq }
 0x11e   : > { %2570 = vmatprep.subr.mxu1 %v1577_v5  ;;  %2536 = vmatpush3.msra.mxu0 %v1529_v6  ;;  %v2178_v6 = vld [vmem:[%s1312_s7] sm:$0x1] }
 0x11f   : > { %2571 = vmatpush3.msra.mxu1 %v1561_v7  ;;  %2537 = vmatprep.subr.mxu0 %v1544_v8  ;;  %v2184_v5 = vshrl.u32 %v2183_v4, 7 }
 0x120   : > { %2572 = vmatprep.subr.mxu1 %v1576_v9  ;;  %2538 = vmatpush3.msra.mxu0 %v1528_v10 }
 0x121   : > { %2083 = vmatprep.mubr.f32.mxu0 %v1333_v11  ;;  %2573 = vmatpush3.msra.mxu1 %v1560_v12  ;;  %v2185_v7 = vsub.s32 0, %v2184_v5  ;;  %v2294_v11 = vld [vmem:[%s1315_s10] ss:$0 sm:$0xff] }
 0x122   : > { %2153 = vmatprep.mubr.f32.mxu1 %v1335_v13  ;;  %2084 = vmatmul.mubr.f32.vlgmr.msra.gmra.mxu0 %v1332_v14 }
 0x123   : > { %2154 = vmatmul.mubr.f32.vlgmr.msra.gmra.mxu1 %v1334_v15 }
 0x17c   : > { %v2329_v16 = vpop.f32.mrf.mxu0 }
 0x17e   : > { %v2364_v17 = vpop.f32.mrf.mxu1  ;;  %v2330_v18 = vpop.f32.mrf.mxu0 }
 0x17f   : > { %v2331_v20 = vadd.f32 %v2330_v18, %v2329_v16 }
 0x180   : > { %v2365_v22 = vpop.f32.mrf.mxu1 }
 0x181   : > { %v1666_v25 = vadd.f32 %v2331_v20, %v2293_v21  ;;  %v2366_v26 = vadd.f32 %v2365_v22, %v2364_v17 }
 0x183   : > { %v1736_v30 = vadd.f32 %v2366_v26, %v1666_v25 }
 0x19e   : > { %v2399_v19 = vpop.f32.mrf.mxu0 }
 0x1a0   : > { %v2434_v23 = vpop.f32.mrf.mxu1  ;;  %v2400_v24 = vpop.f32.mrf.mxu0 }
 0x1a1   : > { %v2401_v28 = vadd.f32 %v2400_v24, %v2399_v19 }
 0x1a2   : > { %v2435_v29 = vpop.f32.mrf.mxu1 }
 0x1a3   : > { %v1806_v33 = vadd.f32 %v2401_v28, %v1736_v30  ;;  %v2436_v34 = vadd.f32 %v2435_v29, %v2434_v23 }
 0x1a5   : > { %v1876_v37 = vadd.f32 %v2436_v34, %v1806_v33 }
 0x1c0   : > { %v2469_v27 = vpop.f32.mrf.mxu0 }
 0x1c2   : > { %v2504_v31 = vpop.f32.mrf.mxu1  ;;  %v2470_v32 = vpop.f32.mrf.mxu0 }
 0x1c3   : > { %v2471_v35 = vadd.f32 %v2470_v32, %v2469_v27 }
 0x1c4   : > { %v2505_v36 = vpop.f32.mrf.mxu1 }
 0x1c5   : > { %v1946_v38 = vadd.f32 %v2471_v35, %v1876_v37  ;;  %v2506_v39 = vadd.f32 %v2505_v36, %v2504_v31 }
 0x1c7   : > { %v2016_v44 = vadd.f32 %v2506_v39, %v1946_v38 }
 0x1e2   : > { %v2539_v40 = vpop.f32.mrf.mxu0 }
 0x1e3   : > { %v2574_v41 = vpop.f32.mrf.mxu1 }
 0x1e4   : > { %v2540_v42 = vpop.f32.mrf.mxu0 }
 0x1e5   : > { %v2575_v43 = vpop.f32.mrf.mxu1  ;;  %v2541_v45 = vadd.f32 %v2540_v42, %v2539_v40 }
 0x1e6   : > { %v2576_v47 = vadd.f32 %v2575_v43, %v2574_v41 }
 0x1e7   : > { %v2086_v46 = vadd.f32 %v2541_v45, %v2016_v44 }
 0x1e9   : > { %v2156_v48 = vadd.f32 %v2576_v47, %v2086_v46 }
 0x1eb   : > { %vm2159_vm0 = vcmp.ge.f32.partialorder %v2156_v48, 0.0  ;;  %v2160_v49 = vmul.f32 0.2, %v2156_v48 }
 0x1ed   : > { %v2161_v50 = vsel %vm2159_vm0, %v2156_v48, %v2160_v49 }
 0x1ee   : > { %v2162_v51 = vrot.slane %v2161_v50, 4 }
 0x1f0   : > { %v2163_v52 = vadd.f32 %v2162_v51, %v2161_v50 }
 0x1f2   : > { %v2164_v53 = vrot.slane %v2163_v52, 2 }
 0x1f4   : > { %v2165_v54 = vadd.f32 %v2164_v53, %v2163_v52 }
 0x1f6   : > { %v2166_v55 = vrot.slane %v2165_v54, 1 }
 0x1f8   : > { %v2167_v56 = vadd.f32 %v2166_v55, %v2165_v54 }
 0x1fa   : > { %v2168_v57 = vmul.f32 0.125, %v2167_v56 }
 0x1fc   : > { %v2169_v58 = vsub.f32 %v2161_v50, %v2168_v57 }
 0x1fe   : > { %v2170_v59 = vmul.f32 %v2169_v58, %v2169_v58 }
 0x200   : > { %v2171_v60 = vrot.slane %v2170_v59, 4 }
 0x202   : > { %v2172_v61 = vadd.f32 %v2171_v60, %v2170_v59 }
 0x204   : > { %v2173_v62 = vrot.slane %v2172_v61, 2 }
 0x206   : > { %v2174_v63 = vadd.f32 %v2173_v62, %v2172_v61 }
 0x208   : > { %v2175_v0 = vrot.slane %v2174_v63, 1 }
 0x20a   : > { %v2176_v1 = vadd.f32 %v2175_v0, %v2174_v63 }
 0x20c   : > { %v2177_v2 = vmul.f32 0.125, %v2176_v1 }
 0x20e   : > { %v2179_v3 = vadd.f32 1e-05, %v2177_v2 }
 0x210   : > { %2601 = vrsqrt.f32 %v2179_v3 }
 0x21d   : > { %v2602_v8 = vpop.eup %2601 }
 0x21e   : > { %v2181_v9 = vmul.f32 %v2602_v8, %v2178_v6 }
 0x220   : > { %v2186_v10 = vrot.slane %v2181_v9, %v2185_v7 }
 0x222   : > { %v2188_v12 = vmul.f32 %v2186_v10, %v2169_v58 }
 0x224   : > { %v2196_v13 = vadd.f32 %v2294_v11, %v2188_v12 }
 0x226   : > { %2197 = vst [vmem:[%s1319_s15] sm:$0xff] %v2196_v13 }
 0x227 PF: > { %p12_p9 = scmp.ge.s32.totalorder %s2674_s22, 4   ;;  %s3554_s18 = smov %s2621_s19 }
 0x228   : > { %s3555_s19 = smov %s2683_s25  ;;  %s3556_s20 = smov %s2674_s22 }
 0x229   :  { %14 = sbr.rel (!%p12_p9) target bundleno = 2 (0x2), region = 122 }

// kernel: encoder_forward.9
= control target key start
LH: loop header
LB: loop body
LE: loop exit
PB: predicated region body
PF: predicated region fallthrough
CT: control target
= control target key end

     0   :  { %s5990_s18 = smov 0   ;;  %s5992_s19 = smov 0   ;;  %s8278_s0 = inlined_call_operand.vmem [shape: f32[8,4096], index: 0, kind: input, shape index: {}]   ;;  %s8279_s1 = inlined_call_operand.vmem [shape: f32[4096,512], index: 1, kind: input, shape index: {}]   ;;  %s8280_s2 = inlined_call_operand.vmem [shape: f32[1,512], index: 2, kind: input, shape index: {}]   ;;  %s8281_s3 = inlined_call_operand.vmem [shape: f32[1,512], index: 3, kind: input, shape index: {}]   ;;  %s8282_s4 = inlined_call_operand.vmem [shape: f32[1,512], index: 4, kind: input, shape index: {}]   ;;  %s8283_s5 = inlined_call_operand.vmem [shape: f32[8,512], index: 5, kind: output, shape index: {}]  }
   0x1   :  { %s5994_s20 = smov 0  }
   0x2 LB: > { %s5823_s21 = sadd.s32 4294967295, %s5941_s20   ;;  %s6007_s22 = sadd.s32 1, %s5941_s20   ;;  %s5941_s20 = sphi %s5994_s20, %s8291_s20   ;;  %s5937_s19 = sphi %s5992_s19, %s8290_s19   ;;  %s5933_s18 = sphi %s5990_s18, %s8289_s18  }
   0x3   : > { %s40_s23 = ssub.s32 %s5941_s20, %s6007_s22  ;;  %s43_s24 = sadd.s32 1, %s5937_s19 }
   0x4   : > { %p41_p0 = scmp.eq.s32.totalorder %s40_s23, 0  ;;  %p50_p1 = scmp.ne.s32.totalorder %s5937_s19, %s5933_s18 }
   0x5   : > { %p51_p2 = scmp.eq.s32.totalorder %s5941_s20, 0  ;;  %p5826_p4 = scmp.ge.s32.totalorder %s5941_s20, 2 }
   0x6   : > { %s6016_s25 = scalar_select %p41_p0, %s5937_s19, %s43_s24  }
   0x7   : > { %p52_p3 = por %p51_p2, %p50_p1  ;;  %183 = sbr.rel (%p5826_p4) target bundleno = 530 (0x212), region = 20 }
   0xc   : > { %186 = sbr.rel (!%p52_p3) target bundleno = 530 (0x212), region = 24  ;;  %s188_s26 = sand.u32 (%p52_p3), 1, %s5937_s19  }
   0xd   : > { %s5841_s27 = sshll.u32 (%p52_p3), %s5941_s20, 4  ;;  %s6021_s28 = sshll.u32 (%p52_p3), %s188_s26, 13 }
   0xe   : > { %s6026_s6 = scalar_lea.vmem (%p52_p3), %s8279_s1, %s5841_s27   ;;  %s190_s7 = scalar_lea.vmem (%p52_p3), [#allocation2], %s6021_s28  }
   0xf   : > { %s8284_s8 = smov (%p52_p3), %s190_s7  ;;  %s8285_s9 = smov (%p52_p3), %s6026_s6 }
  0x10   : > { %s6036_s10 = smov (%p52_p3), 0   ;;  %s6038_s11 = smov (%p52_p3), 0  }
  0x11 LB: >> { %v209_v0 = vld [vmem:[%s5949_s9] sm:$0xff]  ;;  %s1233_s12 = sadd.s32 1, %s5953_s10  ;;  %s205_s11 = sadd.s32 1, %s5957_s11   ;;  %s5957_s11 = sphi %s6038_s11, %s205_s11   ;;  %s5953_s10 = sphi %s6036_s10, %s8288_s10   ;;  %s5949_s9 = sphi %s8285_s9, %s8287_s9   ;;  %s5945_s8 = sphi %s8284_s8, %s8286_s8  }
  0x12   : >> { %v211_v1 = vld [vmem:[%s5949_s9 + $0x20] sm:$0xff]  ;;  %210 = vst [vmem:[%s5945_s8] sm:$0xff] %v209_v0  ;;  %p1234_p5 = scmp.ge.s32.totalorder %s1233_s12, 2  ;;  %p202_p6 = scmp.ge.s32.totalorder %s205_s11, 2  }
  0x13   : >> { %v213_v2 = vld [vmem:[%s5949_s9 + $0x40] sm:$0xff]  ;;  %212 = vst [vmem:[%s5945_s8 + $0x10] sm:$0xff] %v211_v1 }
  0x14   : >> { %214 = vst [vmem:[%s5945_s8 + $0x20] sm:$0xff] %v213_v2  ;;  %v215_v3 = vld [vmem:[%s5949_s9 + $0x60] sm:$0xff]  ;;  %s8293_s12 = smov (%p1234_p5, %s1233_s12), 0 }
  0x15   : >> { %v217_v4 = vld [vmem:[%s5949_s9 + $0x80] sm:$0xff]  ;;  %216 = vst [vmem:[%s5945_s8 + $0x30] sm:$0xff] %v215_v3  ;;  %s5830_s13 = sshll.u32 %s8293_s12, 3  ;;  %s8288_s10 = smov %s8293_s12 }
  0x16   : >> { %v219_v5 = vld [vmem:[%s5949_s9 + $0xa0] sm:$0xff]  ;;  %218 = vst [vmem:[%s5945_s8 + $0x40] sm:$0xff] %v217_v4  ;;  %s6318_s14 = scalar_lea.vmem %s6026_s6, %s5830_s13   ;;  %s6322_s15 = scalar_lea.vmem %s190_s7, %s5830_s13 [#allocation2]  }
  0x17   : >> { %220 = vst [vmem:[%s5945_s8 + $0x50] sm:$0xff] %v219_v5  ;;  %v221_v6 = vld [vmem:[%s5949_s9 + $0xc0] sm:$0xff] }
  0x18   : >> { %v223_v7 = vld [vmem:[%s5949_s9 + $0xe0] sm:$0xff]  ;;  %222 = vst [vmem:[%s5945_s8 + $0x60] sm:$0xff] %v221_v6 }
  0x19   : >> { %v225_v8 = vld [vmem:[%s5949_s9 + $0x100] sm:$0xff]  ;;  %224 = vst [vmem:[%s5945_s8 + $0x70] sm:$0xff] %v223_v7 }
  0x1a   : >> { %226 = vst [vmem:[%s5945_s8 + $0x80] sm:$0xff] %v225_v8  ;;  %v227_v9 = vld [vmem:[%s5949_s9 + $0x120] sm:$0xff] }
  0x1b   : >> { %v229_v10 = vld [vmem:[%s5949_s9 + $0x140] sm:$0xff]  ;;  %228 = vst [vmem:[%s5945_s8 + $0x90] sm:$0xff] %v227_v9 }
  0x1c   : >> { %v231_v11 = vld [vmem:[%s5949_s9 + $0x160] sm:$0xff]  ;;  %230 = vst [vmem:[%s5945_s8 + $0xa0] sm:$0xff] %v229_v10 }
  0x1d   : >> { %232 = vst [vmem:[%s5945_s8 + $0xb0] sm:$0xff] %v231_v11  ;;  %v233_v12 = vld [vmem:[%s5949_s9 + $0x180] sm:$0xff] }
  0x1e   : >> { %v235_v13 = vld [vmem:[%s5949_s9 + $0x1a0] sm:$0xff]  ;;  %234 = vst [vmem:[%s5945_s8 + $0xc0] sm:$0xff] %v233_v12 }
  0x1f   : >> { %v237_v14 = vld [vmem:[%s5949_s9 + $0x1c0] sm:$0xff]  ;;  %236 = vst [vmem:[%s5945_s8 + $0xd0] sm:$0xff] %v235_v13 }
  0x20   : >> { %238 = vst [vmem:[%s5945_s8 + $0xe0] sm:$0xff] %v237_v14  ;;  %v239_v15 = vld [vmem:[%s5949_s9 + $0x1e0] sm:$0xff] }
  0x21   : >> { %v241_v16 = vld [vmem:[%s5949_s9 + $0x200] sm:$0xff]  ;;  %240 = vst [vmem:[%s5945_s8 + $0xf0] sm:$0xff] %v239_v15 }
  0x22   : >> { %v243_v17 = vld [vmem:[%s5949_s9 + $0x220] sm:$0xff]  ;;  %242 = vst [vmem:[%s5945_s8 + $0x100] sm:$0xff] %v241_v16 }
  0x23   : >> { %244 = vst [vmem:[%s5945_s8 + $0x110] sm:$0xff] %v243_v17  ;;  %v245_v18 = vld [vmem:[%s5949_s9 + $0x240] sm:$0xff] }
  0x24   : >> { %v247_v19 = vld [vmem:[%s5949_s9 + $0x260] sm:$0xff]  ;;  %246 = vst [vmem:[%s5945_s8 + $0x120] sm:$0xff] %v245_v18 }
  0x25   : >> { %v249_v20 = vld [vmem:[%s5949_s9 + $0x280] sm:$0xff]  ;;  %248 = vst [vmem:[%s5945_s8 + $0x130] sm:$0xff] %v247_v19 }
  0x26   : >> { %250 = vst [vmem:[%s5945_s8 + $0x140] sm:$0xff] %v249_v20  ;;  %v251_v21 = vld [vmem:[%s5949_s9 + $0x2a0] sm:$0xff] }
  0x27   : >> { %v253_v22 = vld [vmem:[%s5949_s9 + $0x2c0] sm:$0xff]  ;;  %252 = vst [vmem:[%s5945_s8 + $0x150] sm:$0xff] %v251_v21 }
  0x28   : >> { %v255_v23 = vld [vmem:[%s5949_s9 + $0x2e0] sm:$0xff]  ;;  %254 = vst [vmem:[%s5945_s8 + $0x160] sm:$0xff] %v253_v22 }
  0x29   : >> { %256 = vst [vmem:[%s5945_s8 + $0x170] sm:$0xff] %v255_v23  ;;  %v257_v24 = vld [vmem:[%s5949_s9 + $0x300] sm:$0xff] }
  0x2a   : >> { %v259_v25 = vld [vmem:[%s5949_s9 + $0x320] sm:$0xff]  ;;  %258 = vst [vmem:[%s5945_s8 + $0x180] sm:$0xff] %v257_v24 }
  0x2b   : >> { %v261_v26 = vld [vmem:[%s5949_s9 + $0x340] sm:$0xff]  ;;  %260 = vst [vmem:[%s5945_s8 + $0x190] sm:$0xff] %v259_v25 }
  0x2c   : >> { %262 = vst [vmem:[%s5945_s8 + $0x1a0] sm:$0xff] %v261_v26  ;;  %v263_v27 = vld [vmem:[%s5949_s9 + $0x360] sm:$0xff] }
  0x2d   : >> { %v265_v28 = vld [vmem:[%s5949_s9 + $0x380] sm:$0xff]  ;;  %264 = vst [vmem:[%s5945_s8 + $0x1b0] sm:$0xff] %v263_v27 }
  0x2e   : >> { %v267_v29 = vld [vmem:[%s5949_s9 + $0x3a0] sm:$0xff]  ;;  %266 = vst [vmem:[%s5945_s8 + $0x1c0] sm:$0xff] %v265_v28 }
  0x2f   : >> { %268 = vst [vmem:[%s5945_s8 + $0x1d0] sm:$0xff] %v267_v29  ;;  %v269_v30 = vld [vmem:[%s5949_s9 + $0x3c0] sm:$0xff] }
  0x30   : >> { %v271_v31 = vld [vmem:[%s5949_s9 + $0x3e0] sm:$0xff]  ;;  %270 = vst [vmem:[%s5945_s8 + $0x1e0] sm:$0xff] %v269_v30 }
  0x31   : >> { %v273_v32 = vld [vmem:[%s5949_s9 + $0x400] sm:$0xff]  ;;  %272 = vst [vmem:[%s5945_s8 + $0x1f0] sm:$0xff] %v271_v31 }
  0x32   : >> { %274 = vst [vmem:[%s5945_s8 + $0x200] sm:$0xff] %v273_v32  ;;  %v275_v33 = vld [vmem:[%s5949_s9 + $0x420] sm:$0xff] }
  0x33   : >> { %v277_v34 = vld [vmem:[%s5949_s9 + $0x440] sm:$0xff]  ;;  %276 = vst [vmem:[%s5945_s8 + $0x210] sm:$0xff] %v275_v33 }
  0x34   : >> { %v279_v35 = vld [vmem:[%s5949_s9 + $0x460] sm:$0xff]  ;;  %278 = vst [vmem:[%s5945_s8 + $0x220] sm:$0xff] %v277_v34 }
  0x35   : >> { %280 = vst [vmem:[%s5945_s8 + $0x230] sm:$0xff] %v279_v35  ;;  %v281_v36 = vld [vmem:[%s5949_s9 + $0x480] sm:$0xff] }
  0x36   : >> { %v283_v37 = vld [vmem:[%s5949_s9 + $0x4a0] sm:$0xff]  ;;  %282 = vst [vmem:[%s5945_s8 + $0x240] sm:$0xff] %v281_v36 }
  0x37   : >> { %v285_v38 = vld [vmem:[%s5949_s9 + $0x4c0] sm:$0xff]  ;;  %284 = vst [vmem:[%s5945_s8 + $0x250] sm:$0xff] %v283_v37 }
  0x38   : >> { %286 = vst [vmem:[%s5945_s8 + $0x260] sm:$0xff] %v285_v38  ;;  %v287_v39 = vld [vmem:[%s5949_s9 + $0x4e0] sm:$0xff] }
  0x39   : >> { %v289_v40 = vld [vmem:[%s5949_s9 + $0x500] sm:$0xff]  ;;  %288 = vst [vmem:[%s5945_s8 + $0x270] sm:$0xff] %v287_v39 }
  0x3a   : >> { %v291_v41 = vld [vmem:[%s5949_s9 + $0x520] sm:$0xff]  ;;  %290 = vst [vmem:[%s5945_s8 + $0x280] sm:$0xff] %v289_v40 }
  0x3b   : >> { %292 = vst [vmem:[%s5945_s8 + $0x290] sm:$0xff] %v291_v41  ;;  %v293_v42 = vld [vmem:[%s5949_s9 + $0x540] sm:$0xff] }
  0x3c   : >> { %v295_v43 = vld [vmem:[%s5949_s9 + $0x560] sm:$0xff]  ;;  %294 = vst [vmem:[%s5945_s8 + $0x2a0] sm:$0xff] %v293_v42 }
  0x3d   : >> { %v297_v44 = vld [vmem:[%s5949_s9 + $0x580] sm:$0xff]  ;;  %296 = vst [vmem:[%s5945_s8 + $0x2b0] sm:$0xff] %v295_v43 }
  0x3e   : >> { %298 = vst [vmem:[%s5945_s8 + $0x2c0] sm:$0xff] %v297_v44  ;;  %v299_v45 = vld [vmem:[%s5949_s9 + $0x5a0] sm:$0xff] }
  0x3f   : >> { %v301_v46 = vld [vmem:[%s5949_s9 + $0x5c0] sm:$0xff]  ;;  %300 = vst [vmem:[%s5945_s8 + $0x2d0] sm:$0xff] %v299_v45 }
  0x40   : >> { %v303_v47 = vld [vmem:[%s5949_s9 + $0x5e0] sm:$0xff]  ;;  %302 = vst [vmem:[%s5945_s8 + $0x2e0] sm:$0xff] %v301_v46 }
  0x41   : >> { %304 = vst [vmem:[%s5945_s8 + $0x2f0] sm:$0xff] %v303_v47  ;;  %v305_v48 = vld [vmem:[%s5949_s9 + $0x600] sm:$0xff] }
  0x42   : >> { %v307_v49 = vld [vmem:[%s5949_s9 + $0x620] sm:$0xff]  ;;  %306 = vst [vmem:[%s5945_s8 + $0x300] sm:$0xff] %v305_v48 }
  0x43   : >> { %v309_v50 = vld [vmem:[%s5949_s9 + $0x640] sm:$0xff]  ;;  %308 = vst [vmem:[%s5945_s8 + $0x310] sm:$0xff] %v307_v49 }
  0x44   : >> { %310 = vst [vmem:[%s5945_s8 + $0x320] sm:$0xff] %v309_v50  ;;  %v311_v51 = vld [vmem:[%s5949_s9 + $0x660] sm:$0xff] }
  0x45   : >> { %v313_v52 = vld [vmem:[%s5949_s9 + $0x680] sm:$0xff]  ;;  %312 = vst [vmem:[%s5945_s8 + $0x330] sm:$0xff] %v311_v51 }
  0x46   : >> { %v315_v53 = vld [vmem:[%s5949_s9 + $0x6a0] sm:$0xff]  ;;  %314 = vst [vmem:[%s5945_s8 + $0x340] sm:$0xff] %v313_v52 }
  0x47   : >> { %316 = vst [vmem:[%s5945_s8 + $0x350] sm:$0xff] %v315_v53  ;;  %v317_v54 = vld [vmem:[%s5949_s9 + $0x6c0] sm:$0xff] }
  0x48   : >> { %v319_v55 = vld [vmem:[%s5949_s9 + $0x6e0] sm:$0xff]  ;;  %318 = vst [vmem:[%s5945_s8 + $0x360] sm:$0xff] %v317_v54 }
  0x49   : >> { %v321_v56 = vld [vmem:[%s5949_s9 + $0x700] sm:$0xff]  ;;  %320 = vst [vmem:[%s5945_s8 + $0x370] sm:$0xff] %v319_v55 }
  0x4a   : >> { %322 = vst [vmem:[%s5945_s8 + $0x380] sm:$0xff] %v321_v56  ;;  %v323_v57 = vld [vmem:[%s5949_s9 + $0x720] sm:$0xff] }
  0x4b   : >> { %v325_v58 = vld [vmem:[%s5949_s9 + $0x740] sm:$0xff]  ;;  %324 = vst [vmem:[%s5945_s8 + $0x390] sm:$0xff] %v323_v57 }
  0x4c   : >> { %v327_v59 = vld [vmem:[%s5949_s9 + $0x760] sm:$0xff]  ;;  %326 = vst [vmem:[%s5945_s8 + $0x3a0] sm:$0xff] %v325_v58 }
  0x4d   : >> { %328 = vst [vmem:[%s5945_s8 + $0x3b0] sm:$0xff] %v327_v59  ;;  %v329_v60 = vld [vmem:[%s5949_s9 + $0x780] sm:$0xff] }
  0x4e   : >> { %v331_v61 = vld [vmem:[%s5949_s9 + $0x7a0] sm:$0xff]  ;;  %330 = vst [vmem:[%s5945_s8 + $0x3c0] sm:$0xff] %v329_v60 }
  0x4f   : >> { %v333_v62 = vld [vmem:[%s5949_s9 + $0x7c0] sm:$0xff]  ;;  %332 = vst [vmem:[%s5945_s8 + $0x3d0] sm:$0xff] %v331_v61 }
  0x50   : >> { %334 = vst [vmem:[%s5945_s8 + $0x3e0] sm:$0xff] %v333_v62  ;;  %v335_v63 = vld [vmem:[%s5949_s9 + $0x7e0] sm:$0xff] }
  0x51   : >> { %v337_v0 = vld [vmem:[%s5949_s9 + $0x800] sm:$0xff]  ;;  %336 = vst [vmem:[%s5945_s8 + $0x3f0] sm:$0xff] %v335_v63 }
  0x52   : >> { %v339_v1 = vld [vmem:[%s5949_s9 + $0x820] sm:$0xff]  ;;  %338 = vst [vmem:[%s5945_s8 + $0x400] sm:$0xff] %v337_v0 }
  0x53   : >> { %340 = vst [vmem:[%s5945_s8 + $0x410] sm:$0xff] %v339_v1  ;;  %v341_v2 = vld [vmem:[%s5949_s9 + $0x840] sm:$0xff] }
  0x54   : >> { %v343_v3 = vld [vmem:[%s5949_s9 + $0x860] sm:$0xff]  ;;  %342 = vst [vmem:[%s5945_s8 + $0x420] sm:$0xff] %v341_v2 }
  0x55   : >> { %v345_v4 = vld [vmem:[%s5949_s9 + $0x880] sm:$0xff]  ;;  %344 = vst [vmem:[%s5945_s8 + $0x430] sm:$0xff] %v343_v3 }
  0x56   : >> { %346 = vst [vmem:[%s5945_s8 + $0x440] sm:$0xff] %v345_v4  ;;  %v347_v5 = vld [vmem:[%s5949_s9 + $0x8a0] sm:$0xff] }
  0x57   : >> { %v349_v6 = vld [vmem:[%s5949_s9 + $0x8c0] sm:$0xff]  ;;  %348 = vst [vmem:[%s5945_s8 + $0x450] sm:$0xff] %v347_v5 }
  0x58   : >> { %v351_v7 = vld [vmem:[%s5949_s9 + $0x8e0] sm:$0xff]  ;;  %350 = vst [vmem:[%s5945_s8 + $0x460] sm:$0xff] %v349_v6 }
  0x59   : >> { %352 = vst [vmem:[%s5945_s8 + $0x470] sm:$0xff] %v351_v7  ;;  %v353_v8 = vld [vmem:[%s5949_s9 + $0x900] sm:$0xff] }
  0x5a   : >> { %v355_v9 = vld [vmem:[%s5949_s9 + $0x920] sm:$0xff]  ;;  %354 = vst [vmem:[%s5945_s8 + $0x480] sm:$0xff] %v353_v8 }
  0x5b   : >> { %v357_v10 = vld [vmem:[%s5949_s9 + $0x940] sm:$0xff]  ;;  %356 = vst [vmem:[%s5945_s8 + $0x490] sm:$0xff] %v355_v9 }
  0x5c   : >> { %358 = vst [vmem:[%s5945_s8 + $0x4a0] sm:$0xff] %v357_v10  ;;  %v359_v11 = vld [vmem:[%s5949_s9 + $0x960] sm:$0xff] }
  0x5d   : >> { %v361_v12 = vld [vmem:[%s5949_s9 + $0x980] sm:$0xff]  ;;  %360 = vst [vmem:[%s5945_s8 + $0x4b0] sm:$0xff] %v359_v11 }
  0x5e   : >> { %v363_v13 = vld [vmem:[%s5949_s9 + $0x9a0] sm:$0xff]  ;;  %362 = vst [vmem:[%s5945_s8 + $0x4c0] sm:$0xff] %v361_v12 }
  0x5f   : >> { %364 = vst [vmem:[%s5945_s8 + $0x4d0] sm:$0xff] %v363_v13  ;;  %v365_v14 = vld [vmem:[%s5949_s9 + $0x9c0] sm:$0xff] }
  0x60   : >> { %v367_v15 = vld [vmem:[%s5949_s9 + $0x9e0] sm:$0xff]  ;;  %366 = vst [vmem:[%s5945_s8 + $0x4e0] sm:$0xff] %v365_v14 }
  0x61   : >> { %v369_v16 = vld [vmem:[%s5949_s9 + $0xa00] sm:$0xff]  ;;  %368 = vst [vmem:[%s5945_s8 + $0x4f0] sm:$0xff] %v367_v15 }
  0x62   : >> { %370 = vst [vmem:[%s5945_s8 + $0x500] sm:$0xff] %v369_v16  ;;  %v371_v17 = vld [vmem:[%s5949_s9 + $0xa20] sm:$0xff] }
  0x63   : >> { %v373_v18 = vld [vmem:[%s5949_s9 + $0xa40] sm:$0xff]  ;;  %372 = vst [vmem:[%s5945_s8 + $0x510] sm:$0xff] %v371_v17 }
  0x64   : >> { %v375_v19 = vld [vmem:[%s5949_s9 + $0xa60] sm:$0xff]  ;;  %374 = vst [vmem:[%s5945_s8 + $0x520] sm:$0xff] %v373_v18 }
  0x65   : >> { %376 = vst [vmem:[%s5945_s8 + $0x530] sm:$0xff] %v375_v19  ;;  %v377_v20 = vld [vmem:[%s5949_s9 + $0xa80] sm:$0xff] }
  0x66   : >> { %v379_v21 = vld [vmem:[%s5949_s9 + $0xaa0] sm:$0xff]  ;;  %378 = vst [vmem:[%s5945_s8 + $0x540] sm:$0xff] %v377_v20 }
  0x67   : >> { %v381_v22 = vld [vmem:[%s5949_s9 + $0xac0] sm:$0xff]  ;;  %380 = vst [vmem:[%s5945_s8 + $0x550] sm:$0xff] %v379_v21 }
  0x68   : >> { %382 = vst [vmem:[%s5945_s8 + $0x560] sm:$0xff] %v381_v22  ;;  %v383_v23 = vld [vmem:[%s5949_s9 + $0xae0] sm:$0xff] }
  0x69   : >> { %v385_v24 = vld [vmem:[%s5949_s9 + $0xb00] sm:$0xff]  ;;  %384 = vst [vmem:[%s5945_s8 + $0x570] sm:$0xff] %v383_v23 }
  0x6a   : >> { %v387_v25 = vld [vmem:[%s5949_s9 + $0xb20] sm:$0xff]  ;;  %386 = vst [vmem:[%s5945_s8 + $0x580] sm:$0xff] %v385_v24 }
  0x6b   : >> { %388 = vst [vmem:[%s5945_s8 + $0x590] sm:$0xff] %v387_v25  ;;  %v389_v26 = vld [vmem:[%s5949_s9 + $0xb40] sm:$0xff] }
  0x6c   : >> { %v391_v27 = vld [vmem:[%s5949_s9 + $0xb60] sm:$0xff]  ;;  %390 = vst [vmem:[%s5945_s8 + $0x5a0] sm:$0xff] %v389_v26 }
  0x6d   : >> { %v393_v28 = vld [vmem:[%s5949_s9 + $0xb80] sm:$0xff]  ;;  %392 = vst [vmem:[%s5945_s8 + $0x5b0] sm:$0xff] %v391_v27 }
  0x6e   : >> { %394 = vst [vmem:[%s5945_s8 + $0x5c0] sm:$0xff] %v393_v28  ;;  %v395_v29 = vld [vmem:[%s5949_s9 + $0xba0] sm:$0xff] }
  0x6f   : >> { %v397_v30 = vld [vmem:[%s5949_s9 + $0xbc0] sm:$0xff]  ;;  %396 = vst [vmem:[%s5945_s8 + $0x5d0] sm:$0xff] %v395_v29 }
  0x70   : >> { %v399_v31 = vld [vmem:[%s5949_s9 + $0xbe0] sm:$0xff]  ;;  %398 = vst [vmem:[%s5945_s8 + $0x5e0] sm:$0xff] %v397_v30 }
  0x71   : >> { %400 = vst [vmem:[%s5945_s8 + $0x5f0] sm:$0xff] %v399_v31  ;;  %v401_v32 = vld [vmem:[%s5949_s9 + $0xc00] sm:$0xff] }
  0x72   : >> { %v403_v33 = vld [vmem:[%s5949_s9 + $0xc20] sm:$0xff]  ;;  %402 = vst [vmem:[%s5945_s8 + $0x600] sm:$0xff] %v401_v32 }
  0x73   : >> { %v405_v34 = vld [vmem:[%s5949_s9 + $0xc40] sm:$0xff]  ;;  %404 = vst [vmem:[%s5945_s8 + $0x610] sm:$0xff] %v403_v33 }
  0x74   : >> { %406 = vst [vmem:[%s5945_s8 + $0x620] sm:$0xff] %v405_v34  ;;  %v407_v35 = vld [vmem:[%s5949_s9 + $0xc60] sm:$0xff] }
  0x75   : >> { %v409_v36 = vld [vmem:[%s5949_s9 + $0xc80] sm:$0xff]  ;;  %408 = vst [vmem:[%s5945_s8 + $0x630] sm:$0xff] %v407_v35 }
  0x76   : >> { %v411_v37 = vld [vmem:[%s5949_s9 + $0xca0] sm:$0xff]  ;;  %410 = vst [vmem:[%s5945_s8 + $0x640] sm:$0xff] %v409_v36 }
  0x77   : >> { %412 = vst [vmem:[%s5945_s8 + $0x650] sm:$0xff] %v411_v37  ;;  %v413_v38 = vld [vmem:[%s5949_s9 + $0xcc0] sm:$0xff] }
  0x78   : >> { %v415_v39 = vld [vmem:[%s5949_s9 + $0xce0] sm:$0xff]  ;;  %414 = vst [vmem:[%s5945_s8 + $0x660] sm:$0xff] %v413_v38 }
  0x79   : >> { %v417_v40 = vld [vmem:[%s5949_s9 + $0xd00] sm:$0xff]  ;;  %416 = vst [vmem:[%s5945_s8 + $0x670] sm:$0xff] %v415_v39 }
  0x7a   : >> { %418 = vst [vmem:[%s5945_s8 + $0x680] sm:$0xff] %v417_v40  ;;  %v419_v41 = vld [vmem:[%s5949_s9 + $0xd20] sm:$0xff] }
  0x7b   : >> { %v421_v42 = vld [vmem:[%s5949_s9 + $0xd40] sm:$0xff]  ;;  %420 = vst [vmem:[%s5945_s8 + $0x690] sm:$0xff] %v419_v41 }
  0x7c   : >> { %v423_v43 = vld [vmem:[%s5949_s9 + $0xd60] sm:$0xff]  ;;  %422 = vst [vmem:[%s5945_s8 + $0x6a0] sm:$0xff] %v421_v42 }
  0x7d   : >> { %424 = vst [vmem:[%s5945_s8 + $0x6b0] sm:$0xff] %v423_v43  ;;  %v425_v44 = vld [vmem:[%s5949_s9 + $0xd80] sm:$0xff] }
  0x7e   : >> { %v427_v45 = vld [vmem:[%s5949_s9 + $0xda0] sm:$0xff]  ;;  %426 = vst [vmem:[%s5945_s8 + $0x6c0] sm:$0xff] %v425_v44 }
  0x7f   : >> { %v429_v46 = vld [vmem:[%s5949_s9 + $0xdc0] sm:$0xff]  ;;  %428 = vst [vmem:[%s5945_s8 + $0x6d0] sm:$0xff] %v427_v45 }
  0x80   : >> { %430 = vst [vmem:[%s5945_s8 + $0x6e0] sm:$0xff] %v429_v46  ;;  %v431_v47 = vld [vmem:[%s5949_s9 + $0xde0] sm:$0xff] }
  0x81   : >> { %v433_v48 = vld [vmem:[%s5949_s9 + $0xe00] sm:$0xff]  ;;  %432 = vst [vmem:[%s5945_s8 + $0x6f0] sm:$0xff] %v431_v47 }
  0x82   : >> { %v435_v49 = vld [vmem:[%s5949_s9 + $0xe20] sm:$0xff]  ;;  %434 = vst [vmem:[%s5945_s8 + $0x700] sm:$0xff] %v433_v48 }
  0x83   : >> { %436 = vst [vmem:[%s5945_s8 + $0x710] sm:$0xff] %v435_v49  ;;  %v437_v50 = vld [vmem:[%s5949_s9 + $0xe40] sm:$0xff] }
  0x84   : >> { %v439_v51 = vld [vmem:[%s5949_s9 + $0xe60] sm:$0xff]  ;;  %438 = vst [vmem:[%s5945_s8 + $0x720] sm:$0xff] %v437_v50 }
  0x85   : >> { %v441_v52 = vld [vmem:[%s5949_s9 + $0xe80] sm:$0xff]  ;;  %440 = vst [vmem:[%s5945_s8 + $0x730] sm:$0xff] %v439_v51 }
  0x86   : >> { %442 = vst [vmem:[%s5945_s8 + $0x740] sm:$0xff] %v441_v52  ;;  %v443_v53 = vld [vmem:[%s5949_s9 + $0xea0] sm:$0xff] }
  0x87   : >> { %v445_v54 = vld [vmem:[%s5949_s9 + $0xec0] sm:$0xff]  ;;  %444 = vst [vmem:[%s5945_s8 + $0x750] sm:$0xff] %v443_v53 }
  0x88   : >> { %v447_v55 = vld [vmem:[%s5949_s9 + $0xee0] sm:$0xff]  ;;  %446 = vst [vmem:[%s5945_s8 + $0x760] sm:$0xff] %v445_v54 }
  0x89   : >> { %448 = vst [vmem:[%s5945_s8 + $0x770] sm:$0xff] %v447_v55  ;;  %v449_v56 = vld [vmem:[%s5949_s9 + $0xf00] sm:$0xff] }
  0x8a   : >> { %v451_v57 = vld [vmem:[%s5949_s9 + $0xf20] sm:$0xff]  ;;  %450 = vst [vmem:[%s5945_s8 + $0x780] sm:$0xff] %v449_v56 }
  0x8b   : >> { %v453_v58 = vld [vmem:[%s5949_s9 + $0xf40] sm:$0xff]  ;;  %452 = vst [vmem:[%s5945_s8 + $0x790] sm:$0xff] %v451_v57 }
  0x8c   : >> { %454 = vst [vmem:[%s5945_s8 + $0x7a0] sm:$0xff] %v453_v58  ;;  %v455_v59 = vld [vmem:[%s5949_s9 + $0xf60] sm:$0xff] }
  0x8d   : >> { %v457_v60 = vld [vmem:[%s5949_s9 + $0xf80] sm:$0xff]  ;;  %456 = vst [vmem:[%s5945_s8 + $0x7b0] sm:$0xff] %v455_v59 }
  0x8e   : >> { %v459_v61 = vld [vmem:[%s5949_s9 + $0xfa0] sm:$0xff]  ;;  %458 = vst [vmem:[%s5945_s8 + $0x7c0] sm:$0xff] %v457_v60 }
  0x8f   : >> { %460 = vst [vmem:[%s5945_s8 + $0x7d0] sm:$0xff] %v459_v61  ;;  %v461_v62 = vld [vmem:[%s5949_s9 + $0xfc0] sm:$0xff] }
  0x90   : >> { %v463_v63 = vld [vmem:[%s5949_s9 + $0xfe0] sm:$0xff]  ;;  %462 = vst [vmem:[%s5945_s8 + $0x7e0] sm:$0xff] %v461_v62 }
  0x91   : >> { %v465_v0 = vld [vmem:[%s5949_s9 + $0x1000] sm:$0xff]  ;;  %464 = vst [vmem:[%s5945_s8 + $0x7f0] sm:$0xff] %v463_v63 }
  0x92   : >> { %466 = vst [vmem:[%s5945_s8 + $0x800] sm:$0xff] %v465_v0  ;;  %v467_v1 = vld [vmem:[%s5949_s9 + $0x1020] sm:$0xff] }
  0x93   : >> { %v469_v2 = vld [vmem:[%s5949_s9 + $0x1040] sm:$0xff]  ;;  %468 = vst [vmem:[%s5945_s8 + $0x810] sm:$0xff] %v467_v1 }
  0x94   : >> { %v471_v3 = vld [vmem:[%s5949_s9 + $0x1060] sm:$0xff]  ;;  %470 = vst [vmem:[%s5945_s8 + $0x820] sm:$0xff] %v469_v2 }
  0x95   : >> { %472 = vst [vmem:[%s5945_s8 + $0x830] sm:$0xff] %v471_v3  ;;  %v473_v4 = vld [vmem:[%s5949_s9 + $0x1080] sm:$0xff] }
  0x96   : >> { %v475_v5 = vld [vmem:[%s5949_s9 + $0x10a0] sm:$0xff]  ;;  %474 = vst [vmem:[%s5945_s8 + $0x840] sm:$0xff] %v473_v4 }
  0x97   : >> { %v477_v6 = vld [vmem:[%s5949_s9 + $0x10c0] sm:$0xff]  ;;  %476 = vst [vmem:[%s5945_s8 + $0x850] sm:$0xff] %v475_v5 }
  0x98   : >> { %478 = vst [vmem:[%s5945_s8 + $0x860] sm:$0xff] %v477_v6  ;;  %v479_v7 = vld [vmem:[%s5949_s9 + $0x10e0] sm:$0xff] }
  0x99   : >> { %v481_v8 = vld [vmem:[%s5949_s9 + $0x1100] sm:$0xff]  ;;  %480 = vst [vmem:[%s5945_s8 + $0x870] sm:$0xff] %v479_v7 }
  0x9a   : >> { %v483_v9 = vld [vmem:[%s5949_s9 + $0x1120] sm:$0xff]  ;;  %482 = vst [vmem:[%s5945_s8 + $0x880] sm:$0xff] %v481_v8 }
  0x9b   : >> { %484 = vst [vmem:[%s5945_s8 + $0x890] sm:$0xff] %v483_v9  ;;  %v485_v10 = vld [vmem:[%s5949_s9 + $0x1140] sm:$0xff] }
  0x9c   : >> { %v487_v11 = vld [vmem:[%s5949_s9 + $0x1160] sm:$0xff]  ;;  %486 = vst [vmem:[%s5945_s8 + $0x8a0] sm:$0xff] %v485_v10 }
  0x9d   : >> { %v489_v12 = vld [vmem:[%s5949_s9 + $0x1180] sm:$0xff]  ;;  %488 = vst [vmem:[%s5945_s8 + $0x8b0] sm:$0xff] %v487_v11 }
  0x9e   : >> { %490 = vst [vmem:[%s5945_s8 + $0x8c0] sm:$0xff] %v489_v12  ;;  %v491_v13 = vld [vmem:[%s5949_s9 + $0x11a0] sm:$0xff] }
  0x9f   : >> { %v493_v14 = vld [vmem:[%s5949_s9 + $0x11c0] sm:$0xff]  ;;  %492 = vst [vmem:[%s5945_s8 + $0x8d0] sm:$0xff] %v491_v13 }
  0xa0   : >> { %v495_v15 = vld [vmem:[%s5949_s9 + $0x11e0] sm:$0xff]  ;;  %494 = vst [vmem:[%s5945_s8 + $0x8e0] sm:$0xff] %v493_v14 }
  0xa1   : >> { %496 = vst [vmem:[%s5945_s8 + $0x8f0] sm:$0xff] %v495_v15  ;;  %v497_v16 = vld [vmem:[%s5949_s9 + $0x1200] sm:$0xff] }
  0xa2   : >> { %v499_v17 = vld [vmem:[%s5949_s9 + $0x1220] sm:$0xff]  ;;  %498 = vst [vmem:[%s5945_s8 + $0x900] sm:$0xff] %v497_v16 }
  0xa3   : >> { %v501_v18 = vld [vmem:[%s5949_s9 + $0x1240] sm:$0xff]  ;;  %500 = vst [vmem:[%s5945_s8 + $0x910] sm:$0xff] %v499_v17 }
  0xa4   : >> { %502 = vst [vmem:[%s5945_s8 + $0x920] sm:$0xff] %v501_v18  ;;  %v503_v19 = vld [vmem:[%s5949_s9 + $0x1260] sm:$0xff] }
  0xa5   : >> { %v505_v20 = vld [vmem:[%s5949_s9 + $0x1280] sm:$0xff]  ;;  %504 = vst [vmem:[%s5945_s8 + $0x930] sm:$0xff] %v503_v19 }
  0xa6   : >> { %v507_v21 = vld [vmem:[%s5949_s9 + $0x12a0] sm:$0xff]  ;;  %506 = vst [vmem:[%s5945_s8 + $0x940] sm:$0xff] %v505_v20 }
  0xa7   : >> { %508 = vst [vmem:[%s5945_s8 + $0x950] sm:$0xff] %v507_v21  ;;  %v509_v22 = vld [vmem:[%s5949_s9 + $0x12c0] sm:$0xff] }
  0xa8   : >> { %v511_v23 = vld [vmem:[%s5949_s9 + $0x12e0] sm:$0xff]  ;;  %510 = vst [vmem:[%s5945_s8 + $0x960] sm:$0xff] %v509_v22 }
  0xa9   : >> { %v513_v24 = vld [vmem:[%s5949_s9 + $0x1300] sm:$0xff]  ;;  %512 = vst [vmem:[%s5945_s8 + $0x970] sm:$0xff] %v511_v23 }
  0xaa   : >> { %514 = vst [vmem:[%s5945_s8 + $0x980] sm:$0xff] %v513_v24  ;;  %v515_v25 = vld [vmem:[%s5949_s9 + $0x1320] sm:$0xff] }
  0xab   : >> { %v517_v26 = vld [vmem:[%s5949_s9 + $0x1340] sm:$0xff]  ;;  %516 = vst [vmem:[%s5945_s8 + $0x990] sm:$0xff] %v515_v25 }
  0xac   : >> { %v519_v27 = vld [vmem:[%s5949_s9 + $0x1360] sm:$0xff]  ;;  %518 = vst [vmem:[%s5945_s8 + $0x9a0] sm:$0xff] %v517_v26 }
  0xad   : >> { %520 = vst [vmem:[%s5945_s8 + $0x9b0] sm:$0xff] %v519_v27  ;;  %v521_v28 = vld [vmem:[%s5949_s9 + $0x1380] sm:$0xff] }
  0xae   : >> { %v523_v29 = vld [vmem:[%s5949_s9 + $0x13a0] sm:$0xff]  ;;  %522 = vst [vmem:[%s5945_s8 + $0x9c0] sm:$0xff] %v521_v28 }
  0xaf   : >> { %v525_v30 = vld [vmem:[%s5949_s9 + $0x13c0] sm:$0xff]  ;;  %524 = vst [vmem:[%s5945_s8 + $0x9d0] sm:$0xff] %v523_v29 }
  0xb0   : >> { %526 = vst [vmem:[%s5945_s8 + $0x9e0] sm:$0xff] %v525_v30  ;;  %v527_v31 = vld [vmem:[%s5949_s9 + $0x13e0] sm:$0xff] }
  0xb1   : >> { %v529_v32 = vld [vmem:[%s5949_s9 + $0x1400] sm:$0xff]  ;;  %528 = vst [vmem:[%s5945_s8 + $0x9f0] sm:$0xff] %v527_v31 }
  0xb2   : >> { %v531_v33 = vld [vmem:[%s5949_s9 + $0x1420] sm:$0xff]  ;;  %530 = vst [vmem:[%s5945_s8 + $0xa00] sm:$0xff] %v529_v32 }
  0xb3   : >> { %532 = vst [vmem:[%s5945_s8 + $0xa10] sm:$0xff] %v531_v33  ;;  %v533_v34 = vld [vmem:[%s5949_s9 + $0x1440] sm:$0xff] }
  0xb4   : >> { %v535_v35 = vld [vmem:[%s5949_s9 + $0x1460] sm:$0xff]  ;;  %534 = vst [vmem:[%s5945_s8 + $0xa20] sm:$0xff] %v533_v34 }
  0xb5   : >> { %v537_v36 = vld [vmem:[%s5949_s9 + $0x1480] sm:$0xff]  ;;  %536 = vst [vmem:[%s5945_s8 + $0xa30] sm:$0xff] %v535_v35 }
  0xb6   : >> { %538 = vst [vmem:[%s5945_s8 + $0xa40] sm:$0xff] %v537_v36  ;;  %v539_v37 = vld [vmem:[%s5949_s9 + $0x14a0] sm:$0xff] }
  0xb7   : >> { %v541_v38 = vld [vmem:[%s5949_s9 + $0x14c0] sm:$0xff]  ;;  %540 = vst [vmem:[%s5945_s8 + $0xa50] sm:$0xff] %v539_v37 }
  0xb8   : >> { %v543_v39 = vld [vmem:[%s5949_s9 + $0x14e0] sm:$0xff]  ;;  %542 = vst [vmem:[%s5945_s8 + $0xa60] sm:$0xff] %v541_v38 }
  0xb9   : >> { %544 = vst [vmem:[%s5945_s8 + $0xa70] sm:$0xff] %v543_v39  ;;  %v545_v40 = vld [vmem:[%s5949_s9 + $0x1500] sm:$0xff] }
  0xba   : >> { %v547_v41 = vld [vmem:[%s5949_s9 + $0x1520] sm:$0xff]  ;;  %546 = vst [vmem:[%s5945_s8 + $0xa80] sm:$0xff] %v545_v40 }
  0xbb   : >> { %v549_v42 = vld [vmem:[%s5949_s9 + $0x1540] sm:$0xff]  ;;  %548 = vst [vmem:[%s5945_s8 + $0xa90] sm:$0xff] %v547_v41 }
  0xbc   : >> { %550 = vst [vmem:[%s5945_s8 + $0xaa0] sm:$0xff] %v549_v42  ;;  %v551_v43 = vld [vmem:[%s5949_s9 + $0x1560] sm:$0xff] }
  0xbd   : >> { %v553_v44 = vld [vmem:[%s5949_s9 + $0x1580] sm:$0xff]  ;;  %552 = vst [vmem:[%s5945_s8 + $0xab0] sm:$0xff] %v551_v43 }
  0xbe   : >> { %v555_v45 = vld [vmem:[%s5949_s9 + $0x15a0] sm:$0xff]  ;;  %554 = vst [vmem:[%s5945_s8 + $0xac0] sm:$0xff] %v553_v44 }
  0xbf   : >> { %556 = vst [vmem:[%s5945_s8 + $0xad0] sm:$0xff] %v555_v45  ;;  %v557_v46 = vld [vmem:[%s5949_s9 + $0x15c0] sm:$0xff] }
  0xc0   : >> { %v559_v47 = vld [vmem:[%s5949_s9 + $0x15e0] sm:$0xff]  ;;  %558 = vst [vmem:[%s5945_s8 + $0xae0] sm:$0xff] %v557_v46 }
  0xc1   : >> { %v561_v48 = vld [vmem:[%s5949_s9 + $0x1600] sm:$0xff]  ;;  %560 = vst [vmem:[%s5945_s8 + $0xaf0] sm:$0xff] %v559_v47 }
  0xc2   : >> { %562 = vst [vmem:[%s5945_s8 + $0xb00] sm:$0xff] %v561_v48  ;;  %v563_v49 = vld [vmem:[%s5949_s9 + $0x1620] sm:$0xff] }
  0xc3   : >> { %v565_v50 = vld [vmem:[%s5949_s9 + $0x1640] sm:$0xff]  ;;  %564 = vst [vmem:[%s5945_s8 + $0xb10] sm:$0xff] %v563_v49 }
  0xc4   : >> { %v567_v51 = vld [vmem:[%s5949_s9 + $0x1660] sm:$0xff]  ;;  %566 = vst [vmem:[%s5945_s8 + $0xb20] sm:$0xff] %v565_v50 }
  0xc5   : >> { %568 = vst [vmem:[%s5945_s8 + $0xb30] sm:$0xff] %v567_v51  ;;  %v569_v52 = vld [vmem:[%s5949_s9 + $0x1680] sm:$0xff] }
  0xc6   : >> { %v571_v53 = vld [vmem:[%s5949_s9 + $0x16a0] sm:$0xff]  ;;  %570 = vst [vmem:[%s5945_s8 + $0xb40] sm:$0xff] %v569_v52 }
  0xc7   : >> { %v573_v54 = vld [vmem:[%s5949_s9 + $0x16c0] sm:$0xff]  ;;  %572 = vst [vmem:[%s5945_s8 + $0xb50] sm:$0xff] %v571_v53 }
  0xc8   : >> { %574 = vst [vmem:[%s5945_s8 + $0xb60] sm:$0xff] %v573_v54  ;;  %v575_v55 = vld [vmem:[%s5949_s9 + $0x16e0] sm:$0xff] }
  0xc9   : >> { %v577_v56 = vld [vmem:[%s5949_s9 + $0x1700] sm:$0xff]  ;;  %576 = vst [vmem:[%s5945_s8 + $0xb70] sm:$0xff] %v575_v55 }
  0xca   : >> { %v579_v57 = vld [vmem:[%s5949_s9 + $0x1720] sm:$0xff]  ;;  %578 = vst [vmem:[%s5945_s8 + $0xb80] sm:$0xff] %v577_v56 }
  0xcb   : >> { %580 = vst [vmem:[%s5945_s8 + $0xb90] sm:$0xff] %v579_v57  ;;  %v581_v58 = vld [vmem:[%s5949_s9 + $0x1740] sm:$0xff] }
  0xcc   : >> { %v583_v59 = vld [vmem:[%s5949_s9 + $0x1760] sm:$0xff]  ;;  %582 = vst [vmem:[%s5945_s8 + $0xba0] sm:$0xff] %v581_v58 }
  0xcd   : >> { %v585_v60 = vld [vmem:[%s5949_s9 + $0x1780] sm:$0xff]  ;;  %584 = vst [vmem:[%s5945_s8 + $0xbb0] sm:$0xff] %v583_v59 }
  0xce   : >> { %586 = vst [vmem:[%s5945_s8 + $0xbc0] sm:$0xff] %v585_v60  ;;  %v587_v61 = vld [vmem:[%s5949_s9 + $0x17a0] sm:$0xff] }
  0xcf   : >> { %v589_v62 = vld [vmem:[%s5949_s9 + $0x17c0] sm:$0xff]  ;;  %588 = vst [vmem:[%s5945_s8 + $0xbd0] sm:$0xff] %v587_v61 }
  0xd0   : >> { %v591_v63 = vld [vmem:[%s5949_s9 + $0x17e0] sm:$0xff]  ;;  %590 = vst [vmem:[%s5945_s8 + $0xbe0] sm:$0xff] %v589_v62 }
  0xd1   : >> { %592 = vst [vmem:[%s5945_s8 + $0xbf0] sm:$0xff] %v591_v63  ;;  %v593_v0 = vld [vmem:[%s5949_s9 + $0x1800] sm:$0xff] }
  0xd2   : >> { %v595_v1 = vld [vmem:[%s5949_s9 + $0x1820] sm:$0xff]  ;;  %594 = vst [vmem:[%s5945_s8 + $0xc00] sm:$0xff] %v593_v0 }
  0xd3   : >> { %v597_v2 = vld [vmem:[%s5949_s9 + $0x1840] sm:$0xff]  ;;  %596 = vst [vmem:[%s5945_s8 + $0xc10] sm:$0xff] %v595_v1 }
  0xd4   : >> { %598 = vst [vmem:[%s5945_s8 + $0xc20] sm:$0xff] %v597_v2  ;;  %v599_v3 = vld [vmem:[%s5949_s9 + $0x1860] sm:$0xff] }
  0xd5   : >> { %v601_v4 = vld [vmem:[%s5949_s9 + $0x1880] sm:$0xff]  ;;  %600 = vst [vmem:[%s5945_s8 + $0xc30] sm:$0xff] %v599_v3 }
  0xd6   : >> { %v603_v5 = vld [vmem:[%s5949_s9 + $0x18a0] sm:$0xff]  ;;  %602 = vst [vmem:[%s5945_s8 + $0xc40] sm:$0xff] %v601_v4 }
  0xd7   : >> { %604 = vst [vmem:[%s5945_s8 + $0xc50] sm:$0xff] %v603_v5  ;;  %v605_v6 = vld [vmem:[%s5949_s9 + $0x18c0] sm:$0xff] }
  0xd8   : >> { %v607_v7 = vld [vmem:[%s5949_s9 + $0x18e0] sm:$0xff]  ;;  %606 = vst [vmem:[%s5945_s8 + $0xc60] sm:$0xff] %v605_v6 }
  0xd9   : >> { %v609_v8 = vld [vmem:[%s5949_s9 + $0x1900] sm:$0xff]  ;;  %608 = vst [vmem:[%s5945_s8 + $0xc70] sm:$0xff] %v607_v7 }
  0xda   : >> { %610 = vst [vmem:[%s5945_s8 + $0xc80] sm:$0xff] %v609_v8  ;;  %v611_v9 = vld [vmem:[%s5949_s9 + $0x1920] sm:$0xff] }
  0xdb   : >> { %v613_v10 = vld [vmem:[%s5949_s9 + $0x1940] sm:$0xff]  ;;  %612 = vst [vmem:[%s5945_s8 + $0xc90] sm:$0xff] %v611_v9 }
  0xdc   : >> { %v615_v11 = vld [vmem:[%s5949_s9 + $0x1960] sm:$0xff]  ;;  %614 = vst [vmem:[%s5945_s8 + $0xca0] sm:$0xff] %v613_v10 }
  0xdd   : >> { %616 = vst [vmem:[%s5945_s8 + $0xcb0] sm:$0xff] %v615_v11  ;;  %v617_v12 = vld [vmem:[%s5949_s9 + $0x1980] sm:$0xff] }
  0xde   : >> { %v619_v13 = vld [vmem:[%s5949_s9 + $0x19a0] sm:$0xff]  ;;  %618 = vst [vmem:[%s5945_s8 + $0xcc0] sm:$0xff] %v617_v12 }
  0xdf   : >> { %v621_v14 = vld [vmem:[%s5949_s9 + $0x19c0] sm:$0xff]  ;;  %620 = vst [vmem:[%s5945_s8 + $0xcd0] sm:$0xff] %v619_v13 }
  0xe0   : >> { %622 = vst [vmem:[%s5945_s8 + $0xce0] sm:$0xff] %v621_v14  ;;  %v623_v15 = vld [vmem:[%s5949_s9 + $0x19e0] sm:$0xff] }
  0xe1   : >> { %v625_v16 = vld [vmem:[%s5949_s9 + $0x1a00] sm:$0xff]  ;;  %624 = vst [vmem:[%s5945_s8 + $0xcf0] sm:$0xff] %v623_v15 }
  0xe2   : >> { %v627_v17 = vld [vmem:[%s5949_s9 + $0x1a20] sm:$0xff]  ;;  %626 = vst [vmem:[%s5945_s8 + $0xd00] sm:$0xff] %v625_v16 }
  0xe3   : >> { %628 = vst [vmem:[%s5945_s8 + $0xd10] sm:$0xff] %v627_v17  ;;  %v629_v18 = vld [vmem:[%s5949_s9 + $0x1a40] sm:$0xff] }
  0xe4   : >> { %v631_v19 = vld [vmem:[%s5949_s9 + $0x1a60] sm:$0xff]  ;;  %630 = vst [vmem:[%s5945_s8 + $0xd20] sm:$0xff] %v629_v18 }
  0xe5   : >> { %v633_v20 = vld [vmem:[%s5949_s9 + $0x1a80] sm:$0xff]  ;;  %632 = vst [vmem:[%s5945_s8 + $0xd30] sm:$0xff] %v631_v19 }
  0xe6   : >> { %634 = vst [vmem:[%s5945_s8 + $0xd40] sm:$0xff] %v633_v20  ;;  %v635_v21 = vld [vmem:[%s5949_s9 + $0x1aa0] sm:$0xff] }
  0xe7   : >> { %v637_v22 = vld [vmem:[%s5949_s9 + $0x1ac0] sm:$0xff]  ;;  %636 = vst [vmem:[%s5945_s8 + $0xd50] sm:$0xff] %v635_v21 }
  0xe8   : >> { %v639_v23 = vld [vmem:[%s5949_s9 + $0x1ae0] sm:$0xff]  ;;  %638 = vst [vmem:[%s5945_s8 + $0xd60] sm:$0xff] %v637_v22 }
  0xe9   : >> { %640 = vst [vmem:[%s5945_s8 + $0xd70] sm:$0xff] %v639_v23  ;;  %v641_v24 = vld [vmem:[%s5949_s9 + $0x1b00] sm:$0xff] }
  0xea   : >> { %v643_v25 = vld [vmem:[%s5949_s9 + $0x1b20] sm:$0xff]  ;;  %642 = vst [vmem:[%s5945_s8 + $0xd80] sm:$0xff] %v641_v24 }
  0xeb   : >> { %v645_v26 = vld [vmem:[%s5949_s9 + $0x1b40] sm:$0xff]  ;;  %644 = vst [vmem:[%s5945_s8 + $0xd90] sm:$0xff] %v643_v25 }
  0xec   : >> { %646 = vst [vmem:[%s5945_s8 + $0xda0] sm:$0xff] %v645_v26  ;;  %v647_v27 = vld [vmem:[%s5949_s9 + $0x1b60] sm:$0xff] }
  0xed   : >> { %v649_v28 = vld [vmem:[%s5949_s9 + $0x1b80] sm:$0xff]  ;;  %648 = vst [vmem:[%s5945_s8 + $0xdb0] sm:$0xff] %v647_v27 }
  0xee   : >> { %v651_v29 = vld [vmem:[%s5949_s9 + $0x1ba0] sm:$0xff]  ;;  %650 = vst [vmem:[%s5945_s8 + $0xdc0] sm:$0xff] %v649_v28 }
  0xef   : >> { %652 = vst [vmem:[%s5945_s8 + $0xdd0] sm:$0xff] %v651_v29  ;;  %v653_v30 = vld [vmem:[%s5949_s9 + $0x1bc0] sm:$0xff] }
  0xf0   : >> { %v655_v31 = vld [vmem:[%s5949_s9 + $0x1be0] sm:$0xff]  ;;  %654 = vst [vmem:[%s5945_s8 + $0xde0] sm:$0xff] %v653_v30 }
  0xf1   : >> { %v657_v32 = vld [vmem:[%s5949_s9 + $0x1c00] sm:$0xff]  ;;  %656 = vst [vmem:[%s5945_s8 + $0xdf0] sm:$0xff] %v655_v31 }
  0xf2   : >> { %658 = vst [vmem:[%s5945_s8 + $0xe00] sm:$0xff] %v657_v32  ;;  %v659_v33 = vld [vmem:[%s5949_s9 + $0x1c20] sm:$0xff] }
  0xf3   : >> { %v661_v34 = vld [vmem:[%s5949_s9 + $0x1c40] sm:$0xff]  ;;  %660 = vst [vmem:[%s5945_s8 + $0xe10] sm:$0xff] %v659_v33 }
  0xf4   : >> { %v663_v35 = vld [vmem:[%s5949_s9 + $0x1c60] sm:$0xff]  ;;  %662 = vst [vmem:[%s5945_s8 + $0xe20] sm:$0xff] %v661_v34 }
  0xf5   : >> { %664 = vst [vmem:[%s5945_s8 + $0xe30] sm:$0xff] %v663_v35  ;;  %v665_v36 = vld [vmem:[%s5949_s9 + $0x1c80] sm:$0xff] }
  0xf6   : >> { %v667_v37 = vld [vmem:[%s5949_s9 + $0x1ca0] sm:$0xff]  ;;  %666 = vst [vmem:[%s5945_s8 + $0xe40] sm:$0xff] %v665_v36 }
  0xf7   : >> { %v669_v38 = vld [vmem:[%s5949_s9 + $0x1cc0] sm:$0xff]  ;;  %668 = vst [vmem:[%s5945_s8 + $0xe50] sm:$0xff] %v667_v37 }
  0xf8   : >> { %670 = vst [vmem:[%s5945_s8 + $0xe60] sm:$0xff] %v669_v38  ;;  %v671_v39 = vld [vmem:[%s5949_s9 + $0x1ce0] sm:$0xff] }
  0xf9   : >> { %v673_v40 = vld [vmem:[%s5949_s9 + $0x1d00] sm:$0xff]  ;;  %672 = vst [vmem:[%s5945_s8 + $0xe70] sm:$0xff] %v671_v39 }
  0xfa   : >> { %v675_v41 = vld [vmem:[%s5949_s9 + $0x1d20] sm:$0xff]  ;;  %674 = vst [vmem:[%s5945_s8 + $0xe80] sm:$0xff] %v673_v40 }
  0xfb   : >> { %676 = vst [vmem:[%s5945_s8 + $0xe90] sm:$0xff] %v675_v41  ;;  %v677_v42 = vld [vmem:[%s5949_s9 + $0x1d40] sm:$0xff] }
  0xfc   : >> { %v679_v43 = vld [vmem:[%s5949_s9 + $0x1d60] sm:$0xff]  ;;  %678 = vst [vmem:[%s5945_s8 + $0xea0] sm:$0xff] %v677_v42 }
  0xfd   : >> { %v681_v44 = vld [vmem:[%s5949_s9 + $0x1d80] sm:$0xff]  ;;  %680 = vst [vmem:[%s5945_s8 + $0xeb0] sm:$0xff] %v679_v43 }
  0xfe   : >> { %682 = vst [vmem:[%s5945_s8 + $0xec0] sm:$0xff] %v681_v44  ;;  %v683_v45 = vld [vmem:[%s5949_s9 + $0x1da0] sm:$0xff] }
  0xff   : >> { %v685_v46 = vld [vmem:[%s5949_s9 + $0x1dc0] sm:$0xff]  ;;  %684 = vst [vmem:[%s5945_s8 + $0xed0] sm:$0xff] %v683_v45 }
 0x100   : >> { %v687_v47 = vld [vmem:[%s5949_s9 + $0x1de0] sm:$0xff]  ;;  %686 = vst [vmem:[%s5945_s8 + $0xee0] sm:$0xff] %v685_v46 }
 0x101   : >> { %688 = vst [vmem:[%s5945_s8 + $0xef0] sm:$0xff] %v687_v47  ;;  %v689_v48 = vld [vmem:[%s5949_s9 + $0x1e00] sm:$0xff] }
 0x102   : >> { %v691_v49 = vld [vmem:[%s5949_s9 + $0x1e20] sm:$0xff]  ;;  %690 = vst [vmem:[%s5945_s8 + $0xf00] sm:$0xff] %v689_v48 }
 0x103   : >> { %v693_v50 = vld [vmem:[%s5949_s9 + $0x1e40] sm:$0xff]  ;;  %692 = vst [vmem:[%s5945_s8 + $0xf10] sm:$0xff] %v691_v49 }
 0x104   : >> { %694 = vst [vmem:[%s5945_s8 + $0xf20] sm:$0xff] %v693_v50  ;;  %v695_v51 = vld [vmem:[%s5949_s9 + $0x1e60] sm:$0xff] }
 0x105   : >> { %v697_v52 = vld [vmem:[%s5949_s9 + $0x1e80] sm:$0xff]  ;;  %696 = vst [vmem:[%s5945_s8 + $0xf30] sm:$0xff] %v695_v51 }
 0x106   : >> { %v699_v53 = vld [vmem:[%s5949_s9 + $0x1ea0] sm:$0xff]  ;;  %698 = vst [vmem:[%s5945_s8 + $0xf40] sm:$0xff] %v697_v52 }
 0x107   : >> { %700 = vst [vmem:[%s5945_s8 + $0xf50] sm:$0xff] %v699_v53  ;;  %v701_v54 = vld [vmem:[%s5949_s9 + $0x1ec0] sm:$0xff] }
 0x108   : >> { %v703_v55 = vld [vmem:[%s5949_s9 + $0x1ee0] sm:$0xff]  ;;  %702 = vst [vmem:[%s5945_s8 + $0xf60] sm:$0xff] %v701_v54 }
 0x109   : >> { %v705_v56 = vld [vmem:[%s5949_s9 + $0x1f00] sm:$0xff]  ;;  %704 = vst [vmem:[%s5945_s8 + $0xf70] sm:$0xff] %v703_v55 }
 0x10a   : >> { %706 = vst [vmem:[%s5945_s8 + $0xf80] sm:$0xff] %v705_v56  ;;  %v707_v57 = vld [vmem:[%s5949_s9 + $0x1f20] sm:$0xff] }
 0x10b   : >> { %v709_v58 = vld [vmem:[%s5949_s9 + $0x1f40] sm:$0xff]  ;;  %708 = vst [vmem:[%s5945_s8 + $0xf90] sm:$0xff] %v707_v57 }
 0x10c   : >> { %v711_v59 = vld [vmem:[%s5949_s9 + $0x1f60] sm:$0xff]  ;;  %710 = vst [vmem:[%s5945_s8 + $0xfa0] sm:$0xff] %v709_v58 }
 0x10d   : >> { %712 = vst [vmem:[%s5945_s8 + $0xfb0] sm:$0xff] %v711_v59  ;;  %v713_v60 = vld [vmem:[%s5949_s9 + $0x1f80] sm:$0xff] }
 0x10e   : >> { %v715_v61 = vld [vmem:[%s5949_s9 + $0x1fa0] sm:$0xff]  ;;  %714 = vst [vmem:[%s5945_s8 + $0xfc0] sm:$0xff] %v713_v60 }
 0x10f   : >> { %v717_v62 = vld [vmem:[%s5949_s9 + $0x1fc0] sm:$0xff]  ;;  %716 = vst [vmem:[%s5945_s8 + $0xfd0] sm:$0xff] %v715_v61 }
 0x110   : >> { %718 = vst [vmem:[%s5945_s8 + $0xfe0] sm:$0xff] %v717_v62  ;;  %v719_v63 = vld [vmem:[%s5949_s9 + $0x1fe0] sm:$0xff] }
 0x111   : >> { %v721_v0 = vld [vmem:[%s5949_s9 + $0x2000] sm:$0xff]  ;;  %720 = vst [vmem:[%s5945_s8 + $0xff0] sm:$0xff] %v719_v63 }
 0x112   : >> { %v723_v1 = vld [vmem:[%s5949_s9 + $0x2020] sm:$0xff]  ;;  %722 = vst [vmem:[%s5945_s8 + $0x1000] sm:$0xff] %v721_v0 }
 0x113   : >> { %724 = vst [vmem:[%s5945_s8 + $0x1010] sm:$0xff] %v723_v1  ;;  %v725_v2 = vld [vmem:[%s5949_s9 + $0x2040] sm:$0xff] }
 0x114   : >> { %v727_v3 = vld [vmem:[%s5949_s9 + $0x2060] sm:$0xff]  ;;  %726 = vst [vmem:[%s5945_s8 + $0x1020] sm:$0xff] %v725_v2 }
 0x115   : >> { %v729_v4 = vld [vmem:[%s5949_s9 + $0x2080] sm:$0xff]  ;;  %728 = vst [vmem:[%s5945_s8 + $0x1030] sm:$0xff] %v727_v3 }
 0x116   : >> { %730 = vst [vmem:[%s5945_s8 + $0x1040] sm:$0xff] %v729_v4  ;;  %v731_v5 = vld [vmem:[%s5949_s9 + $0x20a0] sm:$0xff] }
 0x117   : >> { %v733_v6 = vld [vmem:[%s5949_s9 + $0x20c0] sm:$0xff]  ;;  %732 = vst [vmem:[%s5945_s8 + $0x1050] sm:$0xff] %v731_v5 }
 0x118   : >> { %v735_v7 = vld [vmem:[%s5949_s9 + $0x20e0] sm:$0xff]  ;;  %734 = vst [vmem:[%s5945_s8 + $0x1060] sm:$0xff] %v733_v6 }
 0x119   : >> { %736 = vst [vmem:[%s5945_s8 + $0x1070] sm:$0xff] %v735_v7  ;;  %v737_v8 = vld [vmem:[%s5949_s9 + $0x2100] sm:$0xff] }
 0x11a   : >> { %v739_v9 = vld [vmem:[%s5949_s9 + $0x2120] sm:$0xff]  ;;  %738 = vst [vmem:[%s5945_s8 + $0x1080] sm:$0xff] %v737_v8 }
 0x11b   : >> { %v741_v10 = vld [vmem:[%s5949_s9 + $0x2140] sm:$0xff]  ;;  %740 = vst [vmem:[%s5945_s8 + $0x1090] sm:$0xff] %v739_v9 }
 0x11c   : >> { %742 = vst [vmem:[%s5945_s8 + $0x10a0] sm:$0xff] %v741_v10  ;;  %v743_v11 = vld [vmem:[%s5949_s9 + $0x2160] sm:$0xff] }
 0x11d   : >> { %v745_v12 = vld [vmem:[%s5949_s9 + $0x2180] sm:$0xff]  ;;  %744 = vst [vmem:[%s5945_s8 + $0x10b0] sm:$0xff] %v743_v11 }
 0x11e   : >> { %v747_v13 = vld [vmem:[%s5949_s9 + $0x21a0] sm:$0xff]  ;;  %746 = vst [vmem:[%s5945_s8 + $0x10c0] sm:$0xff] %v745_v12 }
 0x11f   : >> { %748 = vst [vmem:[%s5945_s8 + $0x10d0] sm:$0xff] %v747_v13  ;;  %v749_v14 = vld [vmem:[%s5949_s9 + $0x21c0] sm:$0xff] }
 0x120   : >> { %v751_v15 = vld [vmem:[%s5949_s9 + $0x21e0] sm:$0xff]  ;;  %750 = vst [vmem:[%s5945_s8 + $0x10e0] sm:$0xff] %v749_v14 }
 0x121   : >> { %v753_v16 = vld [vmem:[%s5949_s9 + $0x2200] sm:$0xff]  ;;  %752 = vst [vmem:[%s5945_s8 + $0x10f0] sm:$0xff] %v751_v15 }
 0x122   : >> { %754 = vst [vmem:[%s5945_s8 + $0x1100] sm:$0xff] %v753_v16  ;;  %v755_v17 = vld [vmem:[%s5949_s9 + $0x2220] sm:$0xff] }
 0x123   : >> { %v757_v18 = vld [vmem:[%s5949_s9 + $0x2240] sm:$0xff]  ;;  %756 = vst [vmem:[%s5945_s8 + $0x1110] sm:$0xff] %v755_v17 }
 0x124   : >> { %v759_v19 = vld [vmem:[%s5949_s9 + $0x2260] sm:$0xff]  ;;  %758 = vst [vmem:[%s5945_s8 + $0x1120] sm:$0xff] %v757_v18 }
 0x125   : >> { %760 = vst [vmem:[%s5945_s8 + $0x1130] sm:$0xff] %v759_v19  ;;  %v761_v20 = vld [vmem:[%s5949_s9 + $0x2280] sm:$0xff] }
 0x126   : >> { %v763_v21 = vld [vmem:[%s5949_s9 + $0x22a0] sm:$0xff]  ;;  %762 = vst [vmem:[%s5945_s8 + $0x1140] sm:$0xff] %v761_v20 }
 0x127   : >> { %v765_v22 = vld [vmem:[%s5949_s9 + $0x22c0] sm:$0xff]  ;;  %764 = vst [vmem:[%s5945_s8 + $0x1150] sm:$0xff] %v763_v21 }
 0x128   : >> { %766 = vst [vmem:[%s5945_s8 + $0x1160] sm:$0xff] %v765_v22  ;;  %v767_v23 = vld [vmem:[%s5949_s9 + $0x22e0] sm:$0xff] }
 0x129   : >> { %v769_v24 = vld [vmem:[%s5949_s9 + $0x2300] sm:$0xff]  ;;  %768 = vst [vmem:[%s5945_s8 + $0x1170] sm:$0xff] %v767_v23 }
 0x12a   : >> { %v771_v25 = vld [vmem:[%s5949_s9 + $0x2320] sm:$0xff]  ;;  %770 = vst [vmem:[%s5945_s8 + $0x1180] sm:$0xff] %v769_v24 }
 0x12b   : >> { %772 = vst [vmem:[%s5945_s8 + $0x1190] sm:$0xff] %v771_v25  ;;  %v773_v26 = vld [vmem:[%s5949_s9 + $0x2340] sm:$0xff] }
 0x12c   : >> { %v775_v27 = vld [vmem:[%s5949_s9 + $0x2360] sm:$0xff]  ;;  %774 = vst [vmem:[%s5945_s8 + $0x11a0] sm:$0xff] %v773_v26 }
 0x12d   : >> { %v777_v28 = vld [vmem:[%s5949_s9 + $0x2380] sm:$0xff]  ;;  %776 = vst [vmem:[%s5945_s8 + $0x11b0] sm:$0xff] %v775_v27 }
 0x12e   : >> { %778 = vst [vmem:[%s5945_s8 + $0x11c0] sm:$0xff] %v777_v28  ;;  %v779_v29 = vld [vmem:[%s5949_s9 + $0x23a0] sm:$0xff] }
 0x12f   : >> { %v781_v30 = vld [vmem:[%s5949_s9 + $0x23c0] sm:$0xff]  ;;  %780 = vst [vmem:[%s5945_s8 + $0x11d0] sm:$0xff] %v779_v29 }
 0x130   : >> { %v783_v31 = vld [vmem:[%s5949_s9 + $0x23e0] sm:$0xff]  ;;  %782 = vst [vmem:[%s5945_s8 + $0x11e0] sm:$0xff] %v781_v30 }
 0x131   : >> { %784 = vst [vmem:[%s5945_s8 + $0x11f0] sm:$0xff] %v783_v31  ;;  %v785_v32 = vld [vmem:[%s5949_s9 + $0x2400] sm:$0xff] }
 0x132   : >> { %v787_v33 = vld [vmem:[%s5949_s9 + $0x2420] sm:$0xff]  ;;  %786 = vst [vmem:[%s5945_s8 + $0x1200] sm:$0xff] %v785_v32 }
 0x133   : >> { %v789_v34 = vld [vmem:[%s5949_s9 + $0x2440] sm:$0xff]  ;;  %788 = vst [vmem:[%s5945_s8 + $0x1210] sm:$0xff] %v787_v33 }
 0x134   : >> { %790 = vst [vmem:[%s5945_s8 + $0x1220] sm:$0xff] %v789_v34  ;;  %v791_v35 = vld [vmem:[%s5949_s9 + $0x2460] sm:$0xff] }
 0x135   : >> { %v793_v36 = vld [vmem:[%s5949_s9 + $0x2480] sm:$0xff]  ;;  %792 = vst [vmem:[%s5945_s8 + $0x1230] sm:$0xff] %v791_v35 }
 0x136   : >> { %v795_v37 = vld [vmem:[%s5949_s9 + $0x24a0] sm:$0xff]  ;;  %794 = vst [vmem:[%s5945_s8 + $0x1240] sm:$0xff] %v793_v36 }
 0x137   : >> { %796 = vst [vmem:[%s5945_s8 + $0x1250] sm:$0xff] %v795_v37  ;;  %v797_v38 = vld [vmem:[%s5949_s9 + $0x24c0] sm:$0xff] }
 0x138   : >> { %v799_v39 = vld [vmem:[%s5949_s9 + $0x24e0] sm:$0xff]  ;;  %798 = vst [vmem:[%s5945_s8 + $0x1260] sm:$0xff] %v797_v38 }
 0x139   : >> { %v801_v40 = vld [vmem:[%s5949_s9 + $0x2500] sm:$0xff]  ;;  %800 = vst [vmem:[%s5945_s8 + $0x1270] sm:$0xff] %v799_v39 }
 0x13a   : >> { %802 = vst [vmem:[%s5945_s8 + $0x1280] sm:$0xff] %v801_v40  ;;  %v803_v41 = vld [vmem:[%s5949_s9 + $0x2520] sm:$0xff] }
 0x13b   : >> { %v805_v42 = vld [vmem:[%s5949_s9 + $0x2540] sm:$0xff]  ;;  %804 = vst [vmem:[%s5945_s8 + $0x1290] sm:$0xff] %v803_v41 }
 0x13c   : >> { %v807_v43 = vld [vmem:[%s5949_s9 + $0x2560] sm:$0xff]  ;;  %806 = vst [vmem:[%s5945_s8 + $0x12a0] sm:$0xff] %v805_v42 }
 0x13d   : >> { %808 = vst [vmem:[%s5945_s8 + $0x12b0] sm:$0xff] %v807_v43  ;;  %v809_v44 = vld [vmem:[%s5949_s9 + $0x2580] sm:$0xff] }
 0x13e   : >> { %v811_v45 = vld [vmem:[%s5949_s9 + $0x25a0] sm:$0xff]  ;;  %810 = vst [vmem:[%s5945_s8 + $0x12c0] sm:$0xff] %v809_v44 }
 0x13f   : >> { %v813_v46 = vld [vmem:[%s5949_s9 + $0x25c0] sm:$0xff]  ;;  %812 = vst [vmem:[%s5945_s8 + $0x12d0] sm:$0xff] %v811_v45 }
 0x140   : >> { %814 = vst [vmem:[%s5945_s8 + $0x12e0] sm:$0xff] %v813_v46  ;;  %v815_v47 = vld [vmem:[%s5949_s9 + $0x25e0] sm:$0xff] }
 0x141   : >> { %v817_v48 = vld [vmem:[%s5949_s9 + $0x2600] sm:$0xff]  ;;  %816 = vst [vmem:[%s5945_s8 + $0x12f0] sm:$0xff] %v815_v47 }
 0x142   : >> { %v819_v49 = vld [vmem:[%s5949_s9 + $0x2620] sm:$0xff]  ;;  %818 = vst [vmem:[%s5945_s8 + $0x1300] sm:$0xff] %v817_v48 }
 0x143   : >> { %820 = vst [vmem:[%s5945_s8 + $0x1310] sm:$0xff] %v819_v49  ;;  %v821_v50 = vld [vmem:[%s5949_s9 + $0x2640] sm:$0xff] }
 0x144   : >> { %v823_v51 = vld [vmem:[%s5949_s9 + $0x2660] sm:$0xff]  ;;  %822 = vst [vmem:[%s5945_s8 + $0x1320] sm:$0xff] %v821_v50 }
 0x145   : >> { %v825_v52 = vld [vmem:[%s5949_s9 + $0x2680] sm:$0xff]  ;;  %824 = vst [vmem:[%s5945_s8 + $0x1330] sm:$0xff] %v823_v51 }
 0x146   : >> { %826 = vst [vmem:[%s5945_s8 + $0x1340] sm:$0xff] %v825_v52  ;;  %v827_v53 = vld [vmem:[%s5949_s9 + $0x26a0] sm:$0xff] }
 0x147   : >> { %v829_v54 = vld [vmem:[%s5949_s9 + $0x26c0] sm:$0xff]  ;;  %828 = vst [vmem:[%s5945_s8 + $0x1350] sm:$0xff] %v827_v53 }
 0x148   : >> { %v831_v55 = vld [vmem:[%s5949_s9 + $0x26e0] sm:$0xff]  ;;  %830 = vst [vmem:[%s5945_s8 + $0x1360] sm:$0xff] %v829_v54 }
 0x149   : >> { %832 = vst [vmem:[%s5945_s8 + $0x1370] sm:$0xff] %v831_v55  ;;  %v833_v56 = vld [vmem:[%s5949_s9 + $0x2700] sm:$0xff] }
 0x14a   : >> { %v835_v57 = vld [vmem:[%s5949_s9 + $0x2720] sm:$0xff]  ;;  %834 = vst [vmem:[%s5945_s8 + $0x1380] sm:$0xff] %v833_v56 }
 0x14b   : >> { %v837_v58 = vld [vmem:[%s5949_s9 + $0x2740] sm:$0xff]  ;;  %836 = vst [vmem:[%s5945_s8 + $0x1390] sm:$0xff] %v835_v57 }
 0x14c   : >> { %838 = vst [vmem:[%s5945_s8 + $0x13a0] sm:$0xff] %v837_v58  ;;  %v839_v59 = vld [vmem:[%s5949_s9 + $0x2760] sm:$0xff] }
 0x14d   : >> { %v841_v60 = vld [vmem:[%s5949_s9 + $0x2780] sm:$0xff]  ;;  %840 = vst [vmem:[%s5945_s8 + $0x13b0] sm:$0xff] %v839_v59 }
 0x14e   : >> { %v843_v61 = vld [vmem:[%s5949_s9 + $0x27a0] sm:$0xff]  ;;  %842 = vst [vmem:[%s5945_s8 + $0x13c0] sm:$0xff] %v841_v60 }
 0x14f   : >> { %844 = vst [vmem:[%s5945_s8 + $0x13d0] sm:$0xff] %v843_v61  ;;  %v845_v62 = vld [vmem:[%s5949_s9 + $0x27c0] sm:$0xff] }
 0x150   : >> { %v847_v63 = vld [vmem:[%s5949_s9 + $0x27e0] sm:$0xff]  ;;  %846 = vst [vmem:[%s5945_s8 + $0x13e0] sm:$0xff] %v845_v62 }
 0x151   : >> { %v849_v0 = vld [vmem:[%s5949_s9 + $0x2800] sm:$0xff]  ;;  %848 = vst [vmem:[%s5945_s8 + $0x13f0] sm:$0xff] %v847_v63 }
 0x152   : >> { %850 = vst [vmem:[%s5945_s8 + $0x1400] sm:$0xff] %v849_v0  ;;  %v851_v1 = vld [vmem:[%s5949_s9 + $0x2820] sm:$0xff] }
 0x153   : >> { %v853_v2 = vld [vmem:[%s5949_s9 + $0x2840] sm:$0xff]  ;;  %852 = vst [vmem:[%s5945_s8 + $0x1410] sm:$0xff] %v851_v1 }
 0x154   : >> { %v855_v3 = vld [vmem:[%s5949_s9 + $0x2860] sm:$0xff]  ;;  %854 = vst [vmem:[%s5945_s8 + $0x1420] sm:$0xff] %v853_v2 }
 0x155   : >> { %856 = vst [vmem:[%s5945_s8 + $0x1430] sm:$0xff] %v855_v3  ;;  %v857_v4 = vld [vmem:[%s5949_s9 + $0x2880] sm:$0xff] }
 0x156   : >> { %v859_v5 = vld [vmem:[%s5949_s9 + $0x28a0] sm:$0xff]  ;;  %858 = vst [vmem:[%s5945_s8 + $0x1440] sm:$0xff] %v857_v4 }
 0x157   : >> { %v861_v6 = vld [vmem:[%s5949_s9 + $0x28c0] sm:$0xff]  ;;  %860 = vst [vmem:[%s5945_s8 + $0x1450] sm:$0xff] %v859_v5 }
 0x158   : >> { %862 = vst [vmem:[%s5945_s8 + $0x1460] sm:$0xff] %v861_v6  ;;  %v863_v7 = vld [vmem:[%s5949_s9 + $0x28e0] sm:$0xff] }
 0x159   : >> { %v865_v8 = vld [vmem:[%s5949_s9 + $0x2900] sm:$0xff]  ;;  %864 = vst [vmem:[%s5945_s8 + $0x1470] sm:$0xff] %v863_v7 }
 0x15a   : >> { %v867_v9 = vld [vmem:[%s5949_s9 + $0x2920] sm:$0xff]  ;;  %866 = vst [vmem:[%s5945_s8 + $0x1480] sm:$0xff] %v865_v8 }
 0x15b   : >> { %868 = vst [vmem:[%s5945_s8 + $0x1490] sm:$0xff] %v867_v9  ;;  %v869_v10 = vld [vmem:[%s5949_s9 + $0x2940] sm:$0xff] }
 0x15c   : >> { %v871_v11 = vld [vmem:[%s5949_s9 + $0x2960] sm:$0xff]  ;;  %870 = vst [vmem:[%s5945_s8 + $0x14a0] sm:$0xff] %v869_v10 }
 0x15d   : >> { %v873_v12 = vld [vmem:[%s5949_s9 + $0x2980] sm:$0xff]  ;;  %872 = vst [vmem:[%s5945_s8 + $0x14b0] sm:$0xff] %v871_v11 }
 0x15e   : >> { %874 = vst [vmem:[%s5945_s8 + $0x14c0] sm:$0xff] %v873_v12  ;;  %v875_v13 = vld [vmem:[%s5949_s9 + $0x29a0] sm:$0xff] }
 0x15f   : >> { %v877_v14 = vld [vmem:[%s5949_s9 + $0x29c0] sm:$0xff]  ;;  %876 = vst [vmem:[%s5945_s8 + $0x14d0] sm:$0xff] %v875_v13 }
 0x160   : >> { %v879_v15 = vld [vmem:[%s5949_s9 + $0x29e0] sm:$0xff]  ;;  %878 = vst [vmem:[%s5945_s8 + $0x14e0] sm:$0xff] %v877_v14 }
 0x161   : >> { %880 = vst [vmem:[%s5945_s8 + $0x14f0] sm:$0xff] %v879_v15  ;;  %v881_v16 = vld [vmem:[%s5949_s9 + $0x2a00] sm:$0xff] }
 0x162   : >> { %v883_v17 = vld [vmem:[%s5949_s9 + $0x2a20] sm:$0xff]  ;;  %882 = vst [vmem:[%s5945_s8 + $0x1500] sm:$0xff] %v881_v16 }
 0x163   : >> { %v885_v18 = vld [vmem:[%s5949_s9 + $0x2a40] sm:$0xff]  ;;  %884 = vst [vmem:[%s5945_s8 + $0x1510] sm:$0xff] %v883_v17 }
 0x164   : >> { %886 = vst [vmem:[%s5945_s8 + $0x1520] sm:$0xff] %v885_v18  ;;  %v887_v19 = vld [vmem:[%s5949_s9 + $0x2a60] sm:$0xff] }
 0x165   : >> { %v889_v20 = vld [vmem:[%s5949_s9 + $0x2a80] sm:$0xff]  ;;  %888 = vst [vmem:[%s5945_s8 + $0x1530] sm:$0xff] %v887_v19 }
 0x166   : >> { %v891_v21 = vld [vmem:[%s5949_s9 + $0x2aa0] sm:$0xff]  ;;  %890 = vst [vmem:[%s5945_s8 + $0x1540] sm:$0xff] %v889_v20 }
 0x167   : >> { %892 = vst [vmem:[%s5945_s8 + $0x1550] sm:$0xff] %v891_v21  ;;  %v893_v22 = vld [vmem:[%s5949_s9 + $0x2ac0] sm:$0xff] }
 0x168   : >> { %v895_v23 = vld [vmem:[%s5949_s9 + $0x2ae0] sm:$0xff]  ;;  %894 = vst [vmem:[%s5945_s8 + $0x1560] sm:$0xff] %v893_v22 }
 0x169   : >> { %v897_v24 = vld [vmem:[%s5949_s9 + $0x2b00] sm:$0xff]  ;;  %896 = vst [vmem:[%s5945_s8 + $0x1570] sm:$0xff] %v895_v23 }
 0x16a   : >> { %898 = vst [vmem:[%s5945_s8 + $0x1580] sm:$0xff] %v897_v24  ;;  %v899_v25 = vld [vmem:[%s5949_s9 + $0x2b20] sm:$0xff] }
 0x16b   : >> { %v901_v26 = vld [vmem:[%s5949_s9 + $0x2b40] sm:$0xff]  ;;  %900 = vst [vmem:[%s5945_s8 + $0x1590] sm:$0xff] %v899_v25 }
 0x16c   : >> { %v903_v27 = vld [vmem:[%s5949_s9 + $0x2b60] sm:$0xff]  ;;  %902 = vst [vmem:[%s5945_s8 + $0x15a0] sm:$0xff] %v901_v26 }
 0x16d   : >> { %904 = vst [vmem:[%s5945_s8 + $0x15b0] sm:$0xff] %v903_v27  ;;  %v905_v28 = vld [vmem:[%s5949_s9 + $0x2b80] sm:$0xff] }
 0x16e   : >> { %v907_v29 = vld [vmem:[%s5949_s9 + $0x2ba0] sm:$0xff]  ;;  %906 = vst [vmem:[%s5945_s8 + $0x15c0] sm:$0xff] %v905_v28 }
 0x16f   : >> { %v909_v30 = vld [vmem:[%s5949_s9 + $0x2bc0] sm:$0xff]  ;;  %908 = vst [vmem:[%s5945_s8 + $0x15d0] sm:$0xff] %v907_v29 }
 0x170   : >> { %910 = vst [vmem:[%s5945_s8 + $0x15e0] sm:$0xff] %v909_v30  ;;  %v911_v31 = vld [vmem:[%s5949_s9 + $0x2be0] sm:$0xff] }
 0x171   : >> { %v913_v32 = vld [vmem:[%s5949_s9 + $0x2c00] sm:$0xff]  ;;  %912 = vst [vmem:[%s5945_s8 + $0x15f0] sm:$0xff] %v911_v31 }
 0x172   : >> { %v915_v33 = vld [vmem:[%s5949_s9 + $0x2c20] sm:$0xff]  ;;  %914 = vst [vmem:[%s5945_s8 + $0x1600] sm:$0xff] %v913_v32 }
 0x173   : >> { %916 = vst [vmem:[%s5945_s8 + $0x1610] sm:$0xff] %v915_v33  ;;  %v917_v34 = vld [vmem:[%s5949_s9 + $0x2c40] sm:$0xff] }
 0x174   : >> { %v919_v35 = vld [vmem:[%s5949_s9 + $0x2c60] sm:$0xff]  ;;  %918 = vst [vmem:[%s5945_s8 + $0x1620] sm:$0xff] %v917_v34 }
 0x175   : >> { %v921_v36 = vld [vmem:[%s5949_s9 + $0x2c80] sm:$0xff]  ;;  %920 = vst [vmem:[%s5945_s8 + $0x1630] sm:$0xff] %v919_v35 }
 0x176   : >> { %922 = vst [vmem:[%s5945_s8 + $0x1640] sm:$0xff] %v921_v36  ;;  %v923_v37 = vld [vmem:[%s5949_s9 + $0x2ca0] sm:$0xff] }
 0x177   : >> { %v925_v38 = vld [vmem:[%s5949_s9 + $0x2cc0] sm:$0xff]  ;;  %924 = vst [vmem:[%s5945_s8 + $0x1650] sm:$0xff] %v923_v37 }
 0x178   : >> { %v927_v39 = vld [vmem:[%s5949_s9 + $0x2ce0] sm:$0xff]  ;;  %926 = vst [vmem:[%s5945_s8 + $0x1660] sm:$0xff] %v925_v38 }
 0x179   : >> { %928 = vst [vmem:[%s5945_s8 + $0x1670] sm:$0xff] %v927_v39  ;;  %v929_v40 = vld [vmem:[%s5949_s9 + $0x2d00] sm:$0xff] }
 0x17a   : >> { %v931_v41 = vld [vmem:[%s5949_s9 + $0x2d20] sm:$0xff]  ;;  %930 = vst [vmem:[%s5945_s8 + $0x1680] sm:$0xff] %v929_v40 }
 0x17b   : >> { %v933_v42 = vld [vmem:[%s5949_s9 + $0x2d40] sm:$0xff]  ;;  %932 = vst [vmem:[%s5945_s8 + $0x1690] sm:$0xff] %v931_v41 }
 0x17c   : >> { %934 = vst [vmem:[%s5945_s8 + $0x16a0] sm:$0xff] %v933_v42  ;;  %v935_v43 = vld [vmem:[%s5949_s9 + $0x2d60] sm:$0xff] }
 0x17d   : >> { %v937_v44 = vld [vmem:[%s5949_s9 + $0x2d80] sm:$0xff]  ;;  %936 = vst [vmem:[%s5945_s8 + $0x16b0] sm:$0xff] %v935_v43 }
 0x17e   : >> { %v939_v45 = vld [vmem:[%s5949_s9 + $0x2da0] sm:$0xff]  ;;  %938 = vst [vmem:[%s5945_s8 + $0x16c0] sm:$0xff] %v937_v44 }
 0x17f   : >> { %940 = vst [vmem:[%s5945_s8 + $0x16d0] sm:$0xff] %v939_v45  ;;  %v941_v46 = vld [vmem:[%s5949_s9 + $0x2dc0] sm:$0xff] }
 0x180   : >> { %v943_v47 = vld [vmem:[%s5949_s9 + $0x2de0] sm:$0xff]  ;;  %942 = vst [vmem:[%s5945_s8 + $0x16e0] sm:$0xff] %v941_v46 }
 0x181   : >> { %v945_v48 = vld [vmem:[%s5949_s9 + $0x2e00] sm:$0xff]  ;;  %944 = vst [vmem:[%s5945_s8 + $0x16f0] sm:$0xff] %v943_v47 }
 0x182   : >> { %946 = vst [vmem:[%s5945_s8 + $0x1700] sm:$0xff] %v945_v48  ;;  %v947_v49 = vld [vmem:[%s5949_s9 + $0x2e20] sm:$0xff] }
 0x183   : >> { %v949_v50 = vld [vmem:[%s5949_s9 + $0x2e40] sm:$0xff]  ;;  %948 = vst [vmem:[%s5945_s8 + $0x1710] sm:$0xff] %v947_v49 }
 0x184   : >> { %v951_v51 = vld [vmem:[%s5949_s9 + $0x2e60] sm:$0xff]  ;;  %950 = vst [vmem:[%s5945_s8 + $0x1720] sm:$0xff] %v949_v50 }
 0x185   : >> { %952 = vst [vmem:[%s5945_s8 + $0x1730] sm:$0xff] %v951_v51  ;;  %v953_v52 = vld [vmem:[%s5949_s9 + $0x2e80] sm:$0xff] }
 0x186   : >> { %v955_v53 = vld [vmem:[%s5949_s9 + $0x2ea0] sm:$0xff]  ;;  %954 = vst [vmem:[%s5945_s8 + $0x1740] sm:$0xff] %v953_v52 }
 0x187   : >> { %v957_v54 = vld [vmem:[%s5949_s9 + $0x2ec0] sm:$0xff]  ;;  %956 = vst [vmem:[%s5945_s8 + $0x1750] sm:$0xff] %v955_v53 }
 0x188   : >> { %958 = vst [vmem:[%s5945_s8 + $0x1760] sm:$0xff] %v957_v54  ;;  %v959_v55 = vld [vmem:[%s5949_s9 + $0x2ee0] sm:$0xff] }
 0x189   : >> { %v961_v56 = vld [vmem:[%s5949_s9 + $0x2f00] sm:$0xff]  ;;  %960 = vst [vmem:[%s5945_s8 + $0x1770] sm:$0xff] %v959_v55 }
 0x18a   : >> { %v963_v57 = vld [vmem:[%s5949_s9 + $0x2f20] sm:$0xff]  ;;  %962 = vst [vmem:[%s5945_s8 + $0x1780] sm:$0xff] %v961_v56 }
 0x18b   : >> { %964 = vst [vmem:[%s5945_s8 + $0x1790] sm:$0xff] %v963_v57  ;;  %v965_v58 = vld [vmem:[%s5949_s9 + $0x2f40] sm:$0xff] }
 0x18c   : >> { %v967_v59 = vld [vmem:[%s5949_s9 + $0x2f60] sm:$0xff]  ;;  %966 = vst [vmem:[%s5945_s8 + $0x17a0] sm:$0xff] %v965_v58 }
 0x18d   : >> { %v969_v60 = vld [vmem:[%s5949_s9 + $0x2f80] sm:$0xff]  ;;  %968 = vst [vmem:[%s5945_s8 + $0x17b0] sm:$0xff] %v967_v59 }
 0x18e   : >> { %970 = vst [vmem:[%s5945_s8 + $0x17c0] sm:$0xff] %v969_v60  ;;  %v971_v61 = vld [vmem:[%s5949_s9 + $0x2fa0] sm:$0xff] }
 0x18f   : >> { %v973_v62 = vld [vmem:[%s5949_s9 + $0x2fc0] sm:$0xff]  ;;  %972 = vst [vmem:[%s5945_s8 + $0x17d0] sm:$0xff] %v971_v61 }
 0x190   : >> { %v975_v63 = vld [vmem:[%s5949_s9 + $0x2fe0] sm:$0xff]  ;;  %974 = vst [vmem:[%s5945_s8 + $0x17e0] sm:$0xff] %v973_v62 }
 0x191   : >> { %976 = vst [vmem:[%s5945_s8 + $0x17f0] sm:$0xff] %v975_v63  ;;  %v977_v0 = vld [vmem:[%s5949_s9 + $0x3000] sm:$0xff] }
 0x192   : >> { %v979_v1 = vld [vmem:[%s5949_s9 + $0x3020] sm:$0xff]  ;;  %978 = vst [vmem:[%s5945_s8 + $0x1800] sm:$0xff] %v977_v0 }
 0x193   : >> { %v981_v2 = vld [vmem:[%s5949_s9 + $0x3040] sm:$0xff]  ;;  %980 = vst [vmem:[%s5945_s8 + $0x1810] sm:$0xff] %v979_v1 }
 0x194   : >> { %982 = vst [vmem:[%s5945_s8 + $0x1820] sm:$0xff] %v981_v2  ;;  %v983_v3 = vld [vmem:[%s5949_s9 + $0x3060] sm:$0xff] }
 0x195   : >> { %v985_v4 = vld [vmem:[%s5949_s9 + $0x3080] sm:$0xff]  ;;  %984 = vst [vmem:[%s5945_s8 + $0x1830] sm:$0xff] %v983_v3 }
 0x196   : >> { %v987_v5 = vld [vmem:[%s5949_s9 + $0x30a0] sm:$0xff]  ;;  %986 = vst [vmem:[%s5945_s8 + $0x1840] sm:$0xff] %v985_v4 }
 0x197   : >> { %988 = vst [vmem:[%s5945_s8 + $0x1850] sm:$0xff] %v987_v5  ;;  %v989_v6 = vld [vmem:[%s5949_s9 + $0x30c0] sm:$0xff] }
 0x198   : >> { %v991_v7 = vld [vmem:[%s5949_s9 + $0x30e0] sm:$0xff]  ;;  %990 = vst [vmem:[%s5945_s8 + $0x1860] sm:$0xff] %v989_v6 }
 0x199   : >> { %v993_v8 = vld [vmem:[%s5949_s9 + $0x3100] sm:$0xff]  ;;  %992 = vst [vmem:[%s5945_s8 + $0x1870] sm:$0xff] %v991_v7 }
 0x19a   : >> { %994 = vst [vmem:[%s5945_s8 + $0x1880] sm:$0xff] %v993_v8  ;;  %v995_v9 = vld [vmem:[%s5949_s9 + $0x3120] sm:$0xff] }
 0x19b   : >> { %v997_v10 = vld [vmem:[%s5949_s9 + $0x3140] sm:$0xff]  ;;  %996 = vst [vmem:[%s5945_s8 + $0x1890] sm:$0xff] %v995_v9 }
 0x19c   : >> { %v999_v11 = vld [vmem:[%s5949_s9 + $0x3160] sm:$0xff]  ;;  %998 = vst [vmem:[%s5945_s8 + $0x18a0] sm:$0xff] %v997_v10 }
 0x19d   : >> { %1000 = vst [vmem:[%s5945_s8 + $0x18b0] sm:$0xff] %v999_v11  ;;  %v1001_v12 = vld [vmem:[%s5949_s9 + $0x3180] sm:$0xff] }
 0x19e   : >> { %v1003_v13 = vld [vmem:[%s5949_s9 + $0x31a0] sm:$0xff]  ;;  %1002 = vst [vmem:[%s5945_s8 + $0x18c0] sm:$0xff] %v1001_v12 }
 0x19f   : >> { %v1005_v14 = vld [vmem:[%s5949_s9 + $0x31c0] sm:$0xff]  ;;  %1004 = vst [vmem:[%s5945_s8 + $0x18d0] sm:$0xff] %v1003_v13 }
 0x1a0   : >> { %1006 = vst [vmem:[%s5945_s8 + $0x18e0] sm:$0xff] %v1005_v14  ;;  %v1007_v15 = vld [vmem:[%s5949_s9 + $0x31e0] sm:$0xff] }
 0x1a1   : >> { %v1009_v16 = vld [vmem:[%s5949_s9 + $0x3200] sm:$0xff]  ;;  %1008 = vst [vmem:[%s5945_s8 + $0x18f0] sm:$0xff] %v1007_v15 }
 0x1a2   : >> { %v1011_v17 = vld [vmem:[%s5949_s9 + $0x3220] sm:$0xff]  ;;  %1010 = vst [vmem:[%s5945_s8 + $0x1900] sm:$0xff] %v1009_v16 }
 0x1a3   : >> { %1012 = vst [vmem:[%s5945_s8 + $0x1910] sm:$0xff] %v1011_v17  ;;  %v1013_v18 = vld [vmem:[%s5949_s9 + $0x3240] sm:$0xff] }
 0x1a4   : >> { %v1015_v19 = vld [vmem:[%s5949_s9 + $0x3260] sm:$0xff]  ;;  %1014 = vst [vmem:[%s5945_s8 + $0x1920] sm:$0xff] %v1013_v18 }
 0x1a5   : >> { %v1017_v20 = vld [vmem:[%s5949_s9 + $0x3280] sm:$0xff]  ;;  %1016 = vst [vmem:[%s5945_s8 + $0x1930] sm:$0xff] %v1015_v19 }
 0x1a6   : >> { %1018 = vst [vmem:[%s5945_s8 + $0x1940] sm:$0xff] %v1017_v20  ;;  %v1019_v21 = vld [vmem:[%s5949_s9 + $0x32a0] sm:$0xff] }
 0x1a7   : >> { %v1021_v22 = vld [vmem:[%s5949_s9 + $0x32c0] sm:$0xff]  ;;  %1020 = vst [vmem:[%s5945_s8 + $0x1950] sm:$0xff] %v1019_v21 }
 0x1a8   : >> { %v1023_v23 = vld [vmem:[%s5949_s9 + $0x32e0] sm:$0xff]  ;;  %1022 = vst [vmem:[%s5945_s8 + $0x1960] sm:$0xff] %v1021_v22 }
 0x1a9   : >> { %1024 = vst [vmem:[%s5945_s8 + $0x1970] sm:$0xff] %v1023_v23  ;;  %v1025_v24 = vld [vmem:[%s5949_s9 + $0x3300] sm:$0xff] }
 0x1aa   : >> { %v1027_v25 = vld [vmem:[%s5949_s9 + $0x3320] sm:$0xff]  ;;  %1026 = vst [vmem:[%s5945_s8 + $0x1980] sm:$0xff] %v1025_v24 }
 0x1ab   : >> { %v1029_v26 = vld [vmem:[%s5949_s9 + $0x3340] sm:$0xff]  ;;  %1028 = vst [vmem:[%s5945_s8 + $0x1990] sm:$0xff] %v1027_v25 }
 0x1ac   : >> { %1030 = vst [vmem:[%s5945_s8 + $0x19a0] sm:$0xff] %v1029_v26  ;;  %v1031_v27 = vld [vmem:[%s5949_s9 + $0x3360] sm:$0xff] }
 0x1ad   : >> { %v1033_v28 = vld [vmem:[%s5949_s9 + $0x3380] sm:$0xff]  ;;  %1032 = vst [vmem:[%s5945_s8 + $0x19b0] sm:$0xff] %v1031_v27 }
 0x1ae   : >> { %v1035_v29 = vld [vmem:[%s5949_s9 + $0x33a0] sm:$0xff]  ;;  %1034 = vst [vmem:[%s5945_s8 + $0x19c0] sm:$0xff] %v1033_v28 }
 0x1af   : >> { %1036 = vst [vmem:[%s5945_s8 + $0x19d0] sm:$0xff] %v1035_v29  ;;  %v1037_v30 = vld [vmem:[%s5949_s9 + $0x33c0] sm:$0xff] }
 0x1b0   : >> { %v1039_v31 = vld [vmem:[%s5949_s9 + $0x33e0] sm:$0xff]  ;;  %1038 = vst [vmem:[%s5945_s8 + $0x19e0] sm:$0xff] %v1037_v30 }
 0x1b1   : >> { %v1041_v32 = vld [vmem:[%s5949_s9 + $0x3400] sm:$0xff]  ;;  %1040 = vst [vmem:[%s5945_s8 + $0x19f0] sm:$0xff] %v1039_v31 }
 0x1b2   : >> { %1042 = vst [vmem:[%s5945_s8 + $0x1a00] sm:$0xff] %v1041_v32  ;;  %v1043_v33 = vld [vmem:[%s5949_s9 + $0x3420] sm:$0xff] }
 0x1b3   : >> { %v1045_v34 = vld [vmem:[%s5949_s9 + $0x3440] sm:$0xff]  ;;  %1044 = vst [vmem:[%s5945_s8 + $0x1a10] sm:$0xff] %v1043_v33 }
 0x1b4   : >> { %v1047_v35 = vld [vmem:[%s5949_s9 + $0x3460] sm:$0xff]  ;;  %1046 = vst [vmem:[%s5945_s8 + $0x1a20] sm:$0xff] %v1045_v34 }
 0x1b5   : >> { %1048 = vst [vmem:[%s5945_s8 + $0x1a30] sm:$0xff] %v1047_v35  ;;  %v1049_v36 = vld [vmem:[%s5949_s9 + $0x3480] sm:$0xff] }
 0x1b6   : >> { %v1051_v37 = vld [vmem:[%s5949_s9 + $0x34a0] sm:$0xff]  ;;  %1050 = vst [vmem:[%s5945_s8 + $0x1a40] sm:$0xff] %v1049_v36 }
 0x1b7   : >> { %v1053_v38 = vld [vmem:[%s5949_s9 + $0x34c0] sm:$0xff]  ;;  %1052 = vst [vmem:[%s5945_s8 + $0x1a50] sm:$0xff] %v1051_v37 }
 0x1b8   : >> { %1054 = vst [vmem:[%s5945_s8 + $0x1a60] sm:$0xff] %v1053_v38  ;;  %v1055_v39 = vld [vmem:[%s5949_s9 + $0x34e0] sm:$0xff] }
 0x1b9   : >> { %v1057_v40 = vld [vmem:[%s5949_s9 + $0x3500] sm:$0xff]  ;;  %1056 = vst [vmem:[%s5945_s8 + $0x1a70] sm:$0xff] %v1055_v39 }
 0x1ba   : >> { %v1059_v41 = vld [vmem:[%s5949_s9 + $0x3520] sm:$0xff]  ;;  %1058 = vst [vmem:[%s5945_s8 + $0x1a80] sm:$0xff] %v1057_v40 }
 0x1bb   : >> { %1060 = vst [vmem:[%s5945_s8 + $0x1a90] sm:$0xff] %v1059_v41  ;;  %v1061_v42 = vld [vmem:[%s5949_s9 + $0x3540] sm:$0xff] }
 0x1bc   : >> { %v1063_v43 = vld [vmem:[%s5949_s9 + $0x3560] sm:$0xff]  ;;  %1062 = vst [vmem:[%s5945_s8 + $0x1aa0] sm:$0xff] %v1061_v42 }
 0x1bd   : >> { %v1065_v44 = vld [vmem:[%s5949_s9 + $0x3580] sm:$0xff]  ;;  %1064 = vst [vmem:[%s5945_s8 + $0x1ab0] sm:$0xff] %v1063_v43 }
 0x1be   : >> { %1066 = vst [vmem:[%s5945_s8 + $0x1ac0] sm:$0xff] %v1065_v44  ;;  %v1067_v45 = vld [vmem:[%s5949_s9 + $0x35a0] sm:$0xff] }
 0x1bf   : >> { %v1069_v46 = vld [vmem:[%s5949_s9 + $0x35c0] sm:$0xff]  ;;  %1068 = vst [vmem:[%s5945_s8 + $0x1ad0] sm:$0xff] %v1067_v45 }
 0x1c0   : >> { %v1071_v47 = vld [vmem:[%s5949_s9 + $0x35e0] sm:$0xff]  ;;  %1070 = vst [vmem:[%s5945_s8 + $0x1ae0] sm:$0xff] %v1069_v46 }
 0x1c1   : >> { %1072 = vst [vmem:[%s5945_s8 + $0x1af0] sm:$0xff] %v1071_v47  ;;  %v1073_v48 = vld [vmem:[%s5949_s9 + $0x3600] sm:$0xff] }
 0x1c2   : >> { %v1075_v49 = vld [vmem:[%s5949_s9 + $0x3620] sm:$0xff]  ;;  %1074 = vst [vmem:[%s5945_s8 + $0x1b00] sm:$0xff] %v1073_v48 }
 0x1c3   : >> { %v1077_v50 = vld [vmem:[%s5949_s9 + $0x3640] sm:$0xff]  ;;  %1076 = vst [vmem:[%s5945_s8 + $0x1b10] sm:$0xff] %v1075_v49 }
 0x1c4   : >> { %1078 = vst [vmem:[%s5945_s8 + $0x1b20] sm:$0xff] %v1077_v50  ;;  %v1079_v51 = vld [vmem:[%s5949_s9 + $0x3660] sm:$0xff] }
 0x1c5   : >> { %v1081_v52 = vld [vmem:[%s5949_s9 + $0x3680] sm:$0xff]  ;;  %1080 = vst [vmem:[%s5945_s8 + $0x1b30] sm:$0xff] %v1079_v51 }
 0x1c6   : >> { %v1083_v53 = vld [vmem:[%s5949_s9 + $0x36a0] sm:$0xff]  ;;  %1082 = vst [vmem:[%s5945_s8 + $0x1b40] sm:$0xff] %v1081_v52 }
 0x1c7   : >> { %1084 = vst [vmem:[%s5945_s8 + $0x1b50] sm:$0xff] %v1083_v53  ;;  %v1085_v54 = vld [vmem:[%s5949_s9 + $0x36c0] sm:$0xff] }
 0x1c8   : >> { %v1087_v55 = vld [vmem:[%s5949_s9 + $0x36e0] sm:$0xff]  ;;  %1086 = vst [vmem:[%s5945_s8 + $0x1b60] sm:$0xff] %v1085_v54 }
 0x1c9   : >> { %v1089_v56 = vld [vmem:[%s5949_s9 + $0x3700] sm:$0xff]  ;;  %1088 = vst [vmem:[%s5945_s8 + $0x1b70] sm:$0xff] %v1087_v55 }
 0x1ca   : >> { %1090 = vst [vmem:[%s5945_s8 + $0x1b80] sm:$0xff] %v1089_v56  ;;  %v1091_v57 = vld [vmem:[%s5949_s9 + $0x3720] sm:$0xff] }
 0x1cb   : >> { %v1093_v58 = vld [vmem:[%s5949_s9 + $0x3740] sm:$0xff]  ;;  %1092 = vst [vmem:[%s5945_s8 + $0x1b90] sm:$0xff] %v1091_v57 }
 0x1cc   : >> { %v1095_v59 = vld [vmem:[%s5949_s9 + $0x3760] sm:$0xff]  ;;  %1094 = vst [vmem:[%s5945_s8 + $0x1ba0] sm:$0xff] %v1093_v58 }
 0x1cd   : >> { %1096 = vst [vmem:[%s5945_s8 + $0x1bb0] sm:$0xff] %v1095_v59  ;;  %v1097_v60 = vld [vmem:[%s5949_s9 + $0x3780] sm:$0xff] }
 0x1ce   : >> { %v1099_v61 = vld [vmem:[%s5949_s9 + $0x37a0] sm:$0xff]  ;;  %1098 = vst [vmem:[%s5945_s8 + $0x1bc0] sm:$0xff] %v1097_v60 }
 0x1cf   : >> { %v1101_v62 = vld [vmem:[%s5949_s9 + $0x37c0] sm:$0xff]  ;;  %1100 = vst [vmem:[%s5945_s8 + $0x1bd0] sm:$0xff] %v1099_v61 }
 0x1d0   : >> { %1102 = vst [vmem:[%s5945_s8 + $0x1be0] sm:$0xff] %v1101_v62  ;;  %v1103_v63 = vld [vmem:[%s5949_s9 + $0x37e0] sm:$0xff] }
 0x1d1   : >> { %v1105_v0 = vld [vmem:[%s5949_s9 + $0x3800] sm:$0xff]  ;;  %1104 = vst [vmem:[%s5945_s8 + $0x1bf0] sm:$0xff] %v1103_v63 }
 0x1d2   : >> { %v1107_v1 = vld [vmem:[%s5949_s9 + $0x3820] sm:$0xff]  ;;  %1106 = vst [vmem:[%s5945_s8 + $0x1c00] sm:$0xff] %v1105_v0 }
 0x1d3   : >> { %1108 = vst [vmem:[%s5945_s8 + $0x1c10] sm:$0xff] %v1107_v1  ;;  %v1109_v2 = vld [vmem:[%s5949_s9 + $0x3840] sm:$0xff] }
 0x1d4   : >> { %v1111_v3 = vld [vmem:[%s5949_s9 + $0x3860] sm:$0xff]  ;;  %1110 = vst [vmem:[%s5945_s8 + $0x1c20] sm:$0xff] %v1109_v2 }
 0x1d5   : >> { %v1113_v4 = vld [vmem:[%s5949_s9 + $0x3880] sm:$0xff]  ;;  %1112 = vst [vmem:[%s5945_s8 + $0x1c30] sm:$0xff] %v1111_v3 }
 0x1d6   : >> { %1114 = vst [vmem:[%s5945_s8 + $0x1c40] sm:$0xff] %v1113_v4  ;;  %v1115_v5 = vld [vmem:[%s5949_s9 + $0x38a0] sm:$0xff] }
 0x1d7   : >> { %v1117_v6 = vld [vmem:[%s5949_s9 + $0x38c0] sm:$0xff]  ;;  %1116 = vst [vmem:[%s5945_s8 + $0x1c50] sm:$0xff] %v1115_v5 }
 0x1d8   : >> { %v1119_v7 = vld [vmem:[%s5949_s9 + $0x38e0] sm:$0xff]  ;;  %1118 = vst [vmem:[%s5945_s8 + $0x1c60] sm:$0xff] %v1117_v6 }
 0x1d9   : >> { %1120 = vst [vmem:[%s5945_s8 + $0x1c70] sm:$0xff] %v1119_v7  ;;  %v1121_v8 = vld [vmem:[%s5949_s9 + $0x3900] sm:$0xff] }
 0x1da   : >> { %v1123_v9 = vld [vmem:[%s5949_s9 + $0x3920] sm:$0xff]  ;;  %1122 = vst [vmem:[%s5945_s8 + $0x1c80] sm:$0xff] %v1121_v8 }
 0x1db   : >> { %v1125_v10 = vld [vmem:[%s5949_s9 + $0x3940] sm:$0xff]  ;;  %1124 = vst [vmem:[%s5945_s8 + $0x1c90] sm:$0xff] %v1123_v9 }
 0x1dc   : >> { %1126 = vst [vmem:[%s5945_s8 + $0x1ca0] sm:$0xff] %v1125_v10  ;;  %v1127_v11 = vld [vmem:[%s5949_s9 + $0x3960] sm:$0xff] }
 0x1dd   : >> { %v1129_v12 = vld [vmem:[%s5949_s9 + $0x3980] sm:$0xff]  ;;  %1128 = vst [vmem:[%s5945_s8 + $0x1cb0] sm:$0xff] %v1127_v11 }
 0x1de   : >> { %v1131_v13 = vld [vmem:[%s5949_s9 + $0x39a0] sm:$0xff]  ;;  %1130 = vst [vmem:[%s5945_s8 + $0x1cc0] sm:$0xff] %v1129_v12 }
 0x1df   : >> { %1132 = vst [vmem:[%s5945_s8 + $0x1cd0] sm:$0xff] %v1131_v13  ;;  %v1133_v14 = vld [vmem:[%s5949_s9 + $0x39c0] sm:$0xff] }
 0x1e0   : >> { %v1135_v15 = vld [vmem:[%s5949_s9 + $0x39e0] sm:$0xff]  ;;  %1134 = vst [vmem:[%s5945_s8 + $0x1ce0] sm:$0xff] %v1133_v14 }
 0x1e1   : >> { %v1137_v16 = vld [vmem:[%s5949_s9 + $0x3a00] sm:$0xff]  ;;  %1136 = vst [vmem:[%s5945_s8 + $0x1cf0] sm:$0xff] %v1135_v15 }
 0x1e2   : >> { %1138 = vst [vmem:[%s5945_s8 + $0x1d00] sm:$0xff] %v1137_v16  ;;  %v1139_v17 = vld [vmem:[%s5949_s9 + $0x3a20] sm:$0xff] }
 0x1e3   : >> { %v1141_v18 = vld [vmem:[%s5949_s9 + $0x3a40] sm:$0xff]  ;;  %1140 = vst [vmem:[%s5945_s8 + $0x1d10] sm:$0xff] %v1139_v17 }
 0x1e4   : >> { %v1143_v19 = vld [vmem:[%s5949_s9 + $0x3a60] sm:$0xff]  ;;  %1142 = vst [vmem:[%s5945_s8 + $0x1d20] sm:$0xff] %v1141_v18 }
 0x1e5   : >> { %1144 = vst [vmem:[%s5945_s8 + $0x1d30] sm:$0xff] %v1143_v19  ;;  %v1145_v20 = vld [vmem:[%s5949_s9 + $0x3a80] sm:$0xff] }
 0x1e6   : >> { %v1147_v21 = vld [vmem:[%s5949_s9 + $0x3aa0] sm:$0xff]  ;;  %1146 = vst [vmem:[%s5945_s8 + $0x1d40] sm:$0xff] %v1145_v20 }
 0x1e7   : >> { %v1149_v22 = vld [vmem:[%s5949_s9 + $0x3ac0] sm:$0xff]  ;;  %1148 = vst [vmem:[%s5945_s8 + $0x1d50] sm:$0xff] %v1147_v21 }
 0x1e8   : >> { %1150 = vst [vmem:[%s5945_s8 + $0x1d60] sm:$0xff] %v1149_v22  ;;  %v1151_v23 = vld [vmem:[%s5949_s9 + $0x3ae0] sm:$0xff] }
 0x1e9   : >> { %v1153_v24 = vld [vmem:[%s5949_s9 + $0x3b00] sm:$0xff]  ;;  %1152 = vst [vmem:[%s5945_s8 + $0x1d70] sm:$0xff] %v1151_v23 }
 0x1ea   : >> { %v1155_v25 = vld [vmem:[%s5949_s9 + $0x3b20] sm:$0xff]  ;;  %1154 = vst [vmem:[%s5945_s8 + $0x1d80] sm:$0xff] %v1153_v24 }
 0x1eb   : >> { %1156 = vst [vmem:[%s5945_s8 + $0x1d90] sm:$0xff] %v1155_v25  ;;  %v1157_v26 = vld [vmem:[%s5949_s9 + $0x3b40] sm:$0xff] }
 0x1ec   : >> { %v1159_v27 = vld [vmem:[%s5949_s9 + $0x3b60] sm:$0xff]  ;;  %1158 = vst [vmem:[%s5945_s8 + $0x1da0] sm:$0xff] %v1157_v26 }
 0x1ed   : >> { %v1161_v28 = vld [vmem:[%s5949_s9 + $0x3b80] sm:$0xff]  ;;  %1160 = vst [vmem:[%s5945_s8 + $0x1db0] sm:$0xff] %v1159_v27 }
 0x1ee   : >> { %1162 = vst [vmem:[%s5945_s8 + $0x1dc0] sm:$0xff] %v1161_v28  ;;  %v1163_v29 = vld [vmem:[%s5949_s9 + $0x3ba0] sm:$0xff] }
 0x1ef   : >> { %v1165_v30 = vld [vmem:[%s5949_s9 + $0x3bc0] sm:$0xff]  ;;  %1164 = vst [vmem:[%s5945_s8 + $0x1dd0] sm:$0xff] %v1163_v29 }
 0x1f0   : >> { %v1167_v31 = vld [vmem:[%s5949_s9 + $0x3be0] sm:$0xff]  ;;  %1166 = vst [vmem:[%s5945_s8 + $0x1de0] sm:$0xff] %v1165_v30 }
 0x1f1   : >> { %1168 = vst [vmem:[%s5945_s8 + $0x1df0] sm:$0xff] %v1167_v31  ;;  %v1169_v32 = vld [vmem:[%s5949_s9 + $0x3c00] sm:$0xff] }
 0x1f2   : >> { %v1171_v33 = vld [vmem:[%s5949_s9 + $0x3c20] sm:$0xff]  ;;  %1170 = vst [vmem:[%s5945_s8 + $0x1e00] sm:$0xff] %v1169_v32 }
 0x1f3   : >> { %v1173_v34 = vld [vmem:[%s5949_s9 + $0x3c40] sm:$0xff]  ;;  %1172 = vst [vmem:[%s5945_s8 + $0x1e10] sm:$0xff] %v1171_v33 }
 0x1f4   : >> { %1174 = vst [vmem:[%s5945_s8 + $0x1e20] sm:$0xff] %v1173_v34  ;;  %v1175_v35 = vld [vmem:[%s5949_s9 + $0x3c60] sm:$0xff] }
 0x1f5   : >> { %v1177_v36 = vld [vmem:[%s5949_s9 + $0x3c80] sm:$0xff]  ;;  %1176 = vst [vmem:[%s5945_s8 + $0x1e30] sm:$0xff] %v1175_v35 }
 0x1f6   : >> { %v1179_v37 = vld [vmem:[%s5949_s9 + $0x3ca0] sm:$0xff]  ;;  %1178 = vst [vmem:[%s5945_s8 + $0x1e40] sm:$0xff] %v1177_v36 }
 0x1f7   : >> { %1180 = vst [vmem:[%s5945_s8 + $0x1e50] sm:$0xff] %v1179_v37  ;;  %v1181_v38 = vld [vmem:[%s5949_s9 + $0x3cc0] sm:$0xff] }
 0x1f8   : >> { %v1183_v39 = vld [vmem:[%s5949_s9 + $0x3ce0] sm:$0xff]  ;;  %1182 = vst [vmem:[%s5945_s8 + $0x1e60] sm:$0xff] %v1181_v38 }
 0x1f9   : >> { %v1185_v40 = vld [vmem:[%s5949_s9 + $0x3d00] sm:$0xff]  ;;  %1184 = vst [vmem:[%s5945_s8 + $0x1e70] sm:$0xff] %v1183_v39 }
 0x1fa   : >> { %1186 = vst [vmem:[%s5945_s8 + $0x1e80] sm:$0xff] %v1185_v40  ;;  %v1187_v41 = vld [vmem:[%s5949_s9 + $0x3d20] sm:$0xff] }
 0x1fb   : >> { %v1189_v42 = vld [vmem:[%s5949_s9 + $0x3d40] sm:$0xff]  ;;  %1188 = vst [vmem:[%s5945_s8 + $0x1e90] sm:$0xff] %v1187_v41 }
 0x1fc   : >> { %v1191_v43 = vld [vmem:[%s5949_s9 + $0x3d60] sm:$0xff]  ;;  %1190 = vst [vmem:[%s5945_s8 + $0x1ea0] sm:$0xff] %v1189_v42 }
 0x1fd   : >> { %1192 = vst [vmem:[%s5945_s8 + $0x1eb0] sm:$0xff] %v1191_v43  ;;  %v1193_v44 = vld [vmem:[%s5949_s9 + $0x3d80] sm:$0xff] }
 0x1fe   : >> { %v1195_v45 = vld [vmem:[%s5949_s9 + $0x3da0] sm:$0xff]  ;;  %1194 = vst [vmem:[%s5945_s8 + $0x1ec0] sm:$0xff] %v1193_v44 }
 0x1ff   : >> { %v1197_v46 = vld [vmem:[%s5949_s9 + $0x3dc0] sm:$0xff]  ;;  %1196 = vst [vmem:[%s5945_s8 + $0x1ed0] sm:$0xff] %v1195_v45 }
 0x200   : >> { %1198 = vst [vmem:[%s5945_s8 + $0x1ee0] sm:$0xff] %v1197_v46  ;;  %v1199_v47 = vld [vmem:[%s5949_s9 + $0x3de0] sm:$0xff] }
 0x201   : >> { %v1201_v48 = vld [vmem:[%s5949_s9 + $0x3e00] sm:$0xff]  ;;  %1200 = vst [vmem:[%s5945_s8 + $0x1ef0] sm:$0xff] %v1199_v47 }
 0x202   : >> { %v1203_v49 = vld [vmem:[%s5949_s9 + $0x3e20] sm:$0xff]  ;;  %1202 = vst [vmem:[%s5945_s8 + $0x1f00] sm:$0xff] %v1201_v48 }
 0x203   : >> { %1204 = vst [vmem:[%s5945_s8 + $0x1f10] sm:$0xff] %v1203_v49  ;;  %v1205_v50 = vld [vmem:[%s5949_s9 + $0x3e40] sm:$0xff] }
 0x204   : >> { %v1207_v51 = vld [vmem:[%s5949_s9 + $0x3e60] sm:$0xff]  ;;  %1206 = vst [vmem:[%s5945_s8 + $0x1f20] sm:$0xff] %v1205_v50 }
 0x205   : >> { %v1209_v52 = vld [vmem:[%s5949_s9 + $0x3e80] sm:$0xff]  ;;  %1208 = vst [vmem:[%s5945_s8 + $0x1f30] sm:$0xff] %v1207_v51 }
 0x206   : >> { %1210 = vst [vmem:[%s5945_s8 + $0x1f40] sm:$0xff] %v1209_v52  ;;  %v1211_v53 = vld [vmem:[%s5949_s9 + $0x3ea0] sm:$0xff] }
 0x207   : >> { %v1213_v54 = vld [vmem:[%s5949_s9 + $0x3ec0] sm:$0xff]  ;;  %1212 = vst [vmem:[%s5945_s8 + $0x1f50] sm:$0xff] %v1211_v53 }
 0x208   : >> { %v1215_v55 = vld [vmem:[%s5949_s9 + $0x3ee0] sm:$0xff]  ;;  %1214 = vst [vmem:[%s5945_s8 + $0x1f60] sm:$0xff] %v1213_v54 }
 0x209   : >> { %1216 = vst [vmem:[%s5945_s8 + $0x1f70] sm:$0xff] %v1215_v55  ;;  %v1217_v56 = vld [vmem:[%s5949_s9 + $0x3f00] sm:$0xff] }
 0x20a   : >> { %v1219_v57 = vld [vmem:[%s5949_s9 + $0x3f20] sm:$0xff]  ;;  %1218 = vst [vmem:[%s5945_s8 + $0x1f80] sm:$0xff] %v1217_v56 }
 0x20b   : >> { %v1221_v58 = vld [vmem:[%s5949_s9 + $0x3f40] sm:$0xff]  ;;  %1220 = vst [vmem:[%s5945_s8 + $0x1f90] sm:$0xff] %v1219_v57 }
 0x20c   : >> { %1222 = vst [vmem:[%s5945_s8 + $0x1fa0] sm:$0xff] %v1221_v58  ;;  %v1223_v59 = vld [vmem:[%s5949_s9 + $0x3f60] sm:$0xff] }
 0x20d   : >> { %v1225_v60 = vld [vmem:[%s5949_s9 + $0x3f80] sm:$0xff]  ;;  %1224 = vst [vmem:[%s5945_s8 + $0x1fb0] sm:$0xff] %v1223_v59  ;;  %204 = sbr.rel (!%p202_p6) target bundleno = 17 (0x11), region = 123 }
 0x20e   : >> { %v1227_v61 = vld [vmem:[%s5949_s9 + $0x3fa0] sm:$0xff]  ;;  %1226 = vst [vmem:[%s5945_s8 + $0x1fc0] sm:$0xff] %v1225_v60 }
 0x20f   : >> { %1228 = vst [vmem:[%s5945_s8 + $0x1fd0] sm:$0xff] %v1227_v61  ;;  %v1229_v62 = vld [vmem:[%s5949_s9 + $0x3fc0] sm:$0xff] }
 0x210   : >> { %v1231_v63 = vld [vmem:[%s5949_s9 + $0x3fe0] sm:$0xff]  ;;  %1230 = vst [vmem:[%s5945_s8 + $0x1fe0] sm:$0xff] %v1229_v62  ;;  %s8287_s9 = smov %s6318_s14 }
 0x211   : >> { %1232 = vst [vmem:[%s5945_s8 + $0x1ff0] sm:$0xff] %v1231_v63  ;;  %s8286_s8 = smov %s6322_s15 }
 0x212 PF: > { %p5832_p7 = scmp.ge.s32.totalorder %s5941_s20, 1  ;;  %p3346_p8 = scmp.lt.s32.totalorder %s5941_s20, 3 }
 0x214   : > { %p3347_p9 = pnand %p5832_p7, %p3346_p8 }
 0x215   : > { %s3353_s16 = sand.u32 (!%p3347_p9), 1, %s5933_s18  }
 0x216   : > { %3350 = sbr.rel (%p3347_p9) target bundleno = 1334 (0x536), region = 73  ;;  %s5833_s27 = sshll.u32 (!%p3347_p9), %s3353_s16, 13 }
 0x217   : > { %s7108_s28 = scalar_lea.vmem (!%p3347_p9), [#allocation2], %s5833_s27 }
 0x21b   : > { %v3415_v0 = vld [vmem:[%s8278_s0 + $0x8] sm:$0xff]  ;;  %v3417_v1 = vld [vmem:[%s8278_s0 + $0x18] sm:$0xff]  ;;  %v3476_v4 = vld [vmem:[%s7108_s28 + $0xf0] sm:$0xff] }
 0x21c   : > { %4546 = vmatprep.mubr.f32.mxu0 %v3415_v0  ;;  %4617 = vmatprep.mubr.f32.mxu1 %v3417_v1  ;;  %v3477_v2 = vld [vmem:[%s7108_s28 + $0xf8] sm:$0xff]  ;;  %v3540_v5 = vld [vmem:[%s7108_s28 + $0x2f0] sm:$0xff]  ;;  %v3475_v6 = vld [vmem:[%s7108_s28 + $0xe8] sm:$0xff] }
 0x21d   : > { %v3541_v3 = vld [vmem:[%s7108_s28 + $0x2f8] sm:$0xff]  ;;  %4482 = vmatprep.subr.mxu0 %v3477_v2  ;;  %v3539_v7 = vld [vmem:[%s7108_s28 + $0x2e8] sm:$0xff]  ;;  %v3474_v8 = vld [vmem:[%s7108_s28 + $0xe0] sm:$0xff] }
 0x21e   : > { %4553 = vmatprep.subr.mxu1 %v3541_v3  ;;  %4483 = vmatpush1.msra.mxu0 %v3476_v4  ;;  %v3538_v9 = vld [vmem:[%s7108_s28 + $0x2e0] sm:$0xff]  ;;  %v3473_v10 = vld [vmem:[%s7108_s28 + $0xd8] sm:$0xff]  ;;  %v3472_v12 = vld [vmem:[%s7108_s28 + $0xd0] sm:$0xff] }
 0x21f   : > { %4554 = vmatpush1.msra.mxu1 %v3540_v5  ;;  %4484 = vmatprep.subr.mxu0 %v3475_v6  ;;  %v3537_v11 = vld [vmem:[%s7108_s28 + $0x2d8] sm:$0xff]  ;;  %v3536_v13 = vld [vmem:[%s7108_s28 + $0x2d0] sm:$0xff]  ;;  %v3471_v14 = vld [vmem:[%s7108_s28 + $0xc8] sm:$0xff] }
 0x220   : > { %4555 = vmatprep.subr.mxu1 %v3539_v7  ;;  %4485 = vmatpush1.msra.mxu0 %v3474_v8  ;;  %v3535_v15 = vld [vmem:[%s7108_s28 + $0x2c8] sm:$0xff]  ;;  %v3470_v16 = vld [vmem:[%s7108_s28 + $0xc0] sm:$0xff]  ;;  %v3469_v18 = vld [vmem:[%s7108_s28 + $0xb8] sm:$0xff] }
 0x221   : > { %4556 = vmatpush1.msra.mxu1 %v3538_v9  ;;  %4486 = vmatprep.subr.mxu0 %v3473_v10  ;;  %v3534_v17 = vld [vmem:[%s7108_s28 + $0x2c0] sm:$0xff]  ;;  %v3533_v19 = vld [vmem:[%s7108_s28 + $0x2b8] sm:$0xff]  ;;  %v3468_v20 = vld [vmem:[%s7108_s28 + $0xb0] sm:$0xff] }
 0x222   : > { %4557 = vmatprep.subr.mxu1 %v3537_v11  ;;  %4487 = vmatpush1.msra.mxu0 %v3472_v12  ;;  %v3532_v21 = vld [vmem:[%s7108_s28 + $0x2b0] sm:$0xff]  ;;  %v3467_v22 = vld [vmem:[%s7108_s28 + $0xa8] sm:$0xff]  ;;  %v3466_v24 = vld [vmem:[%s7108_s28 + $0xa0] sm:$0xff] }
 0x223   : > { %4558 = vmatpush1.msra.mxu1 %v3536_v13  ;;  %4488 = vmatprep.subr.mxu0 %v3471_v14  ;;  %v3531_v23 = vld [vmem:[%s7108_s28 + $0x2a8] sm:$0xff]  ;;  %v3530_v25 = vld [vmem:[%s7108_s28 + $0x2a0] sm:$0xff]  ;;  %v3465_v26 = vld [vmem:[%s7108_s28 + $0x98] sm:$0xff] }
 0x224   : > { %4559 = vmatprep.subr.mxu1 %v3535_v15  ;;  %4489 = vmatpush1.msra.mxu0 %v3470_v16  ;;  %v3529_v27 = vld [vmem:[%s7108_s28 + $0x298] sm:$0xff]  ;;  %v3464_v28 = vld [vmem:[%s7108_s28 + $0x90] sm:$0xff]  ;;  %v3463_v30 = vld [vmem:[%s7108_s28 + $0x88] sm:$0xff] }
 0x225   : > { %4560 = vmatpush1.msra.mxu1 %v3534_v17  ;;  %4490 = vmatprep.subr.mxu0 %v3469_v18  ;;  %v3528_v29 = vld [vmem:[%s7108_s28 + $0x290] sm:$0xff]  ;;  %v3527_v31 = vld [vmem:[%s7108_s28 + $0x288] sm:$0xff]  ;;  %v3462_v32 = vld [vmem:[%s7108_s28 + $0x80] sm:$0xff] }
 0x226   : > { %4561 = vmatprep.subr.mxu1 %v3533_v19  ;;  %4491 = vmatpush1.msra.mxu0 %v3468_v20  ;;  %v3526_v33 = vld [vmem:[%s7108_s28 + $0x280] sm:$0xff]  ;;  %v3461_v34 = vld [vmem:[%s7108_s28 + $0x78] sm:$0xff]  ;;  %v3460_v36 = vld [vmem:[%s7108_s28 + $0x70] sm:$0xff] }
 0x227   : > { %4562 = vmatpush1.msra.mxu1 %v3532_v21  ;;  %4492 = vmatprep.subr.mxu0 %v3467_v22  ;;  %v3525_v35 = vld [vmem:[%s7108_s28 + $0x278] sm:$0xff]  ;;  %v3524_v37 = vld [vmem:[%s7108_s28 + $0x270] sm:$0xff]  ;;  %v3459_v38 = vld [vmem:[%s7108_s28 + $0x68] sm:$0xff] }
 0x228   : > { %4563 = vmatprep.subr.mxu1 %v3531_v23  ;;  %4493 = vmatpush1.msra.mxu0 %v3466_v24  ;;  %v3523_v39 = vld [vmem:[%s7108_s28 + $0x268] sm:$0xff]  ;;  %v3458_v40 = vld [vmem:[%s7108_s28 + $0x60] sm:$0xff]  ;;  %v3457_v42 = vld [vmem:[%s7108_s28 + $0x58] sm:$0xff] }
 0x229   : > { %4564 = vmatpush1.msra.mxu1 %v3530_v25  ;;  %4494 = vmatprep.subr.mxu0 %v3465_v26  ;;  %v3522_v41 = vld [vmem:[%s7108_s28 + $0x260] sm:$0xff]  ;;  %v3521_v43 = vld [vmem:[%s7108_s28 + $0x258] sm:$0xff]  ;;  %v3456_v44 = vld [vmem:[%s7108_s28 + $0x50] sm:$0xff] }
 0x22a   : > { %4565 = vmatprep.subr.mxu1 %v3529_v27  ;;  %4495 = vmatpush1.msra.mxu0 %v3464_v28  ;;  %v3520_v45 = vld [vmem:[%s7108_s28 + $0x250] sm:$0xff]  ;;  %v3455_v46 = vld [vmem:[%s7108_s28 + $0x48] sm:$0xff]  ;;  %v3454_v48 = vld [vmem:[%s7108_s28 + $0x40] sm:$0xff] }
 0x22b   : > { %4566 = vmatpush1.msra.mxu1 %v3528_v29  ;;  %4496 = vmatprep.subr.mxu0 %v3463_v30  ;;  %v3519_v47 = vld [vmem:[%s7108_s28 + $0x248] sm:$0xff]  ;;  %v3518_v49 = vld [vmem:[%s7108_s28 + $0x240] sm:$0xff]  ;;  %v3453_v50 = vld [vmem:[%s7108_s28 + $0x38] sm:$0xff] }
 0x22c   : > { %4567 = vmatprep.subr.mxu1 %v3527_v31  ;;  %4497 = vmatpush1.msra.mxu0 %v3462_v32  ;;  %v3517_v51 = vld [vmem:[%s7108_s28 + $0x238] sm:$0xff]  ;;  %v3452_v52 = vld [vmem:[%s7108_s28 + $0x30] sm:$0xff]  ;;  %v3451_v54 = vld [vmem:[%s7108_s28 + $0x28] sm:$0xff] }
 0x22d   : > { %4568 = vmatpush1.msra.mxu1 %v3526_v33  ;;  %4498 = vmatprep.subr.mxu0 %v3461_v34  ;;  %v3516_v53 = vld [vmem:[%s7108_s28 + $0x230] sm:$0xff]  ;;  %v3515_v55 = vld [vmem:[%s7108_s28 + $0x228] sm:$0xff]  ;;  %v3450_v56 = vld [vmem:[%s7108_s28 + $0x20] sm:$0xff] }
 0x22e   : > { %4569 = vmatprep.subr.mxu1 %v3525_v35  ;;  %4499 = vmatpush1.msra.mxu0 %v3460_v36  ;;  %v3514_v57 = vld [vmem:[%s7108_s28 + $0x220] sm:$0xff]  ;;  %v3449_v58 = vld [vmem:[%s7108_s28 + $0x18] sm:$0xff]  ;;  %v3448_v60 = vld [vmem:[%s7108_s28 + $0x10] sm:$0xff] }
 0x22f   : > { %4570 = vmatpush1.msra.mxu1 %v3524_v37  ;;  %4500 = vmatprep.subr.mxu0 %v3459_v38  ;;  %v3513_v59 = vld [vmem:[%s7108_s28 + $0x218] sm:$0xff]  ;;  %v3512_v61 = vld [vmem:[%s7108_s28 + $0x210] sm:$0xff]  ;;  %v3447_v62 = vld [vmem:[%s7108_s28 + $0x8] sm:$0xff] }
 0x230   : > { %4571 = vmatprep.subr.mxu1 %v3523_v39  ;;  %4501 = vmatpush1.msra.mxu0 %v3458_v40  ;;  %v3511_v63 = vld [vmem:[%s7108_s28 + $0x208] sm:$0xff]  ;;  %v3446_v0 = vld [vmem:[%s7108_s28] sm:$0xff]  ;;  %v3509_v2 = vld [vmem:[%s7108_s28 + $0x1f8] sm:$0xff] }
 0x231   : > { %4572 = vmatpush1.msra.mxu1 %v3522_v41  ;;  %4502 = vmatprep.subr.mxu0 %v3457_v42  ;;  %v3510_v1 = vld [vmem:[%s7108_s28 + $0x200] sm:$0xff]  ;;  %v3573_v3 = vld [vmem:[%s7108_s28 + $0x3f8] sm:$0xff]  ;;  %v3508_v4 = vld [vmem:[%s7108_s28 + $0x1f0] sm:$0xff] }
 0x232   : > { %4573 = vmatprep.subr.mxu1 %v3521_v43  ;;  %4503 = vmatpush1.msra.mxu0 %v3456_v44  ;;  %v3572_v5 = vld [vmem:[%s7108_s28 + $0x3f0] sm:$0xff]  ;;  %v3507_v6 = vld [vmem:[%s7108_s28 + $0x1e8] sm:$0xff]  ;;  %v3506_v8 = vld [vmem:[%s7108_s28 + $0x1e0] sm:$0xff] }
 0x233   : > { %4574 = vmatpush1.msra.mxu1 %v3520_v45  ;;  %4504 = vmatprep.subr.mxu0 %v3455_v46  ;;  %v3571_v7 = vld [vmem:[%s7108_s28 + $0x3e8] sm:$0xff]  ;;  %v3570_v9 = vld [vmem:[%s7108_s28 + $0x3e0] sm:$0xff]  ;;  %v3505_v10 = vld [vmem:[%s7108_s28 + $0x1d8] sm:$0xff] }
 0x234   : > { %4575 = vmatprep.subr.mxu1 %v3519_v47  ;;  %4505 = vmatpush1.msra.mxu0 %v3454_v48  ;;  %v3569_v11 = vld [vmem:[%s7108_s28 + $0x3d8] sm:$0xff]  ;;  %v3504_v12 = vld [vmem:[%s7108_s28 + $0x1d0] sm:$0xff]  ;;  %v3503_v14 = vld [vmem:[%s7108_s28 + $0x1c8] sm:$0xff] }
 0x235   : > { %4576 = vmatpush1.msra.mxu1 %v3518_v49  ;;  %4506 = vmatprep.subr.mxu0 %v3453_v50  ;;  %v3568_v13 = vld [vmem:[%s7108_s28 + $0x3d0] sm:$0xff]  ;;  %v3567_v15 = vld [vmem:[%s7108_s28 + $0x3c8] sm:$0xff]  ;;  %v3502_v16 = vld [vmem:[%s7108_s28 + $0x1c0] sm:$0xff] }
 0x236   : > { %4577 = vmatprep.subr.mxu1 %v3517_v51  ;;  %4507 = vmatpush1.msra.mxu0 %v3452_v52  ;;  %v3566_v17 = vld [vmem:[%s7108_s28 + $0x3c0] sm:$0xff]  ;;  %v3501_v18 = vld [vmem:[%s7108_s28 + $0x1b8] sm:$0xff]  ;;  %v3500_v20 = vld [vmem:[%s7108_s28 + $0x1b0] sm:$0xff] }
 0x237   : > { %4578 = vmatpush1.msra.mxu1 %v3516_v53  ;;  %4508 = vmatprep.subr.mxu0 %v3451_v54  ;;  %v3565_v19 = vld [vmem:[%s7108_s28 + $0x3b8] sm:$0xff]  ;;  %v3564_v21 = vld [vmem:[%s7108_s28 + $0x3b0] sm:$0xff]  ;;  %v3499_v22 = vld [vmem:[%s7108_s28 + $0x1a8] sm:$0xff] }
 0x238   : > { %4579 = vmatprep.subr.mxu1 %v3515_v55  ;;  %4509 = vmatpush1.msra.mxu0 %v3450_v56  ;;  %v3563_v23 = vld [vmem:[%s7108_s28 + $0x3a8] sm:$0xff]  ;;  %v3498_v24 = vld [vmem:[%s7108_s28 + $0x1a0] sm:$0xff]  ;;  %v3497_v26 = vld [vmem:[%s7108_s28 + $0x198] sm:$0xff] }
 0x239   : > { %4580 = vmatpush1.msra.mxu1 %v3514_v57  ;;  %4510 = vmatprep.subr.mxu0 %v3449_v58  ;;  %v3562_v25 = vld [vmem:[%s7108_s28 + $0x3a0] sm:$0xff]  ;;  %v3561_v27 = vld [vmem:[%s7108_s28 + $0x398] sm:$0xff]  ;;  %v3496_v28 = vld [vmem:[%s7108_s28 + $0x190] sm:$0xff] }
 0x23a   : > { %4581 = vmatprep.subr.mxu1 %v3513_v59  ;;  %4511 = vmatpush1.msra.mxu0 %v3448_v60  ;;  %v3560_v29 = vld [vmem:[%s7108_s28 + $0x390] sm:$0xff]  ;;  %v3495_v30 = vld [vmem:[%s7108_s28 + $0x188] sm:$0xff]  ;;  %v3494_v32 = vld [vmem:[%s7108_s28 + $0x180] sm:$0xff] }
 0x23b   : > { %4582 = vmatpush1.msra.mxu1 %v3512_v61  ;;  %4512 = vmatprep.subr.mxu0 %v3447_v62  ;;  %v3559_v31 = vld [vmem:[%s7108_s28 + $0x388] sm:$0xff]  ;;  %v3558_v33 = vld [vmem:[%s7108_s28 + $0x380] sm:$0xff]  ;;  %v3493_v34 = vld [vmem:[%s7108_s28 + $0x178] sm:$0xff] }
 0x23c   : > { %4583 = vmatprep.subr.mxu1 %v3511_v63  ;;  %4513 = vmatpush1.msra.mxu0 %v3446_v0  ;;  %v3557_v35 = vld [vmem:[%s7108_s28 + $0x378] sm:$0xff]  ;;  %v3492_v36 = vld [vmem:[%s7108_s28 + $0x170] sm:$0xff]  ;;  %v3491_v38 = vld [vmem:[%s7108_s28 + $0x168] sm:$0xff] }
 0x23d   : > { %4584 = vmatpush1.msra.mxu1 %v3510_v1  ;;  %4514 = vmatprep.subr.mxu0 %v3509_v2  ;;  %v3556_v37 = vld [vmem:[%s7108_s28 + $0x370] sm:$0xff]  ;;  %v3555_v39 = vld [vmem:[%s7108_s28 + $0x368] sm:$0xff]  ;;  %v3490_v40 = vld [vmem:[%s7108_s28 + $0x160] sm:$0xff] }
 0x23e   : > { %4585 = vmatprep.subr.mxu1 %v3573_v3  ;;  %4515 = vmatpush2.msra.mxu0 %v3508_v4  ;;  %v3554_v41 = vld [vmem:[%s7108_s28 + $0x360] sm:$0xff]  ;;  %v3489_v42 = vld [vmem:[%s7108_s28 + $0x158] sm:$0xff]  ;;  %v3488_v44 = vld [vmem:[%s7108_s28 + $0x150] sm:$0xff] }
 0x23f   : > { %4586 = vmatpush2.msra.mxu1 %v3572_v5  ;;  %4516 = vmatprep.subr.mxu0 %v3507_v6  ;;  %v3553_v43 = vld [vmem:[%s7108_s28 + $0x358] sm:$0xff]  ;;  %v3552_v45 = vld [vmem:[%s7108_s28 + $0x350] sm:$0xff]  ;;  %v3487_v46 = vld [vmem:[%s7108_s28 + $0x148] sm:$0xff] }
 0x240   : > { %4587 = vmatprep.subr.mxu1 %v3571_v7  ;;  %4517 = vmatpush2.msra.mxu0 %v3506_v8  ;;  %v3551_v47 = vld [vmem:[%s7108_s28 + $0x348] sm:$0xff]  ;;  %v3486_v48 = vld [vmem:[%s7108_s28 + $0x140] sm:$0xff]  ;;  %v3485_v50 = vld [vmem:[%s7108_s28 + $0x138] sm:$0xff] }
 0x241   : > { %4588 = vmatpush2.msra.mxu1 %v3570_v9  ;;  %4518 = vmatprep.subr.mxu0 %v3505_v10  ;;  %v3550_v49 = vld [vmem:[%s7108_s28 + $0x340] sm:$0xff]  ;;  %v3549_v51 = vld [vmem:[%s7108_s28 + $0x338] sm:$0xff]  ;;  %v3484_v52 = vld [vmem:[%s7108_s28 + $0x130] sm:$0xff] }
 0x242   : > { %4589 = vmatprep.subr.mxu1 %v3569_v11  ;;  %4519 = vmatpush2.msra.mxu0 %v3504_v12  ;;  %v3548_v53 = vld [vmem:[%s7108_s28 + $0x330] sm:$0xff]  ;;  %v3483_v54 = vld [vmem:[%s7108_s28 + $0x128] sm:$0xff]  ;;  %v3482_v56 = vld [vmem:[%s7108_s28 + $0x120] sm:$0xff] }
 0x243   : > { %4590 = vmatpush2.msra.mxu1 %v3568_v13  ;;  %4520 = vmatprep.subr.mxu0 %v3503_v14  ;;  %v3547_v55 = vld [vmem:[%s7108_s28 + $0x328] sm:$0xff]  ;;  %v3546_v57 = vld [vmem:[%s7108_s28 + $0x320] sm:$0xff]  ;;  %v3481_v58 = vld [vmem:[%s7108_s28 + $0x118] sm:$0xff] }
 0x244   : > { %4591 = vmatprep.subr.mxu1 %v3567_v15  ;;  %4521 = vmatpush2.msra.mxu0 %v3502_v16  ;;  %v3545_v59 = vld [vmem:[%s7108_s28 + $0x318] sm:$0xff]  ;;  %v3480_v60 = vld [vmem:[%s7108_s28 + $0x110] sm:$0xff]  ;;  %v3479_v62 = vld [vmem:[%s7108_s28 + $0x108] sm:$0xff] }
 0x245   : > { %4592 = vmatpush2.msra.mxu1 %v3566_v17  ;;  %4522 = vmatprep.subr.mxu0 %v3501_v18  ;;  %v3544_v61 = vld [vmem:[%s7108_s28 + $0x310] sm:$0xff]  ;;  %v3543_v63 = vld [vmem:[%s7108_s28 + $0x308] sm:$0xff]  ;;  %v3478_v0 = vld [vmem:[%s7108_s28 + $0x100] sm:$0xff] }
 0x246   : > { %4593 = vmatprep.subr.mxu1 %v3565_v19  ;;  %4523 = vmatpush2.msra.mxu0 %v3500_v20  ;;  %v3542_v1 = vld [vmem:[%s7108_s28 + $0x300] sm:$0xff]  ;;  %v3605_v3 = vld [vmem:[%s7108_s28 + $0x4f8] sm:$0xff]  ;;  %v3416_v5 = vld [vmem:[%s8278_s0 + $0x10] sm:$0xff] }
 0x247   : > { %4594 = vmatpush2.msra.mxu1 %v3564_v21  ;;  %4524 = vmatprep.subr.mxu0 %v3499_v22  ;;  %v3414_v2 = vld [vmem:[%s8278_s0] sm:$0xff]  ;;  %v3669_v4 = vld [vmem:[%s7108_s28 + $0x6f8] sm:$0xff]  ;;  %v3604_v6 = vld [vmem:[%s7108_s28 + $0x4f0] sm:$0xff] }
 0x248   : > { %4595 = vmatprep.subr.mxu1 %v3563_v23  ;;  %4525 = vmatpush2.msra.mxu0 %v3498_v24  ;;  %v3668_v7 = vld [vmem:[%s7108_s28 + $0x6f0] sm:$0xff]  ;;  %v3603_v8 = vld [vmem:[%s7108_s28 + $0x4e8] sm:$0xff]  ;;  %v3602_v10 = vld [vmem:[%s7108_s28 + $0x4e0] sm:$0xff] }
 0x249   : > { %4596 = vmatpush2.msra.mxu1 %v3562_v25  ;;  %4526 = vmatprep.subr.mxu0 %v3497_v26  ;;  %v3667_v9 = vld [vmem:[%s7108_s28 + $0x6e8] sm:$0xff]  ;;  %v3666_v11 = vld [vmem:[%s7108_s28 + $0x6e0] sm:$0xff]  ;;  %v3601_v12 = vld [vmem:[%s7108_s28 + $0x4d8] sm:$0xff] }
 0x24a   : > { %4597 = vmatprep.subr.mxu1 %v3561_v27  ;;  %4527 = vmatpush2.msra.mxu0 %v3496_v28  ;;  %v3665_v13 = vld [vmem:[%s7108_s28 + $0x6d8] sm:$0xff]  ;;  %v3600_v14 = vld [vmem:[%s7108_s28 + $0x4d0] sm:$0xff]  ;;  %v3599_v16 = vld [vmem:[%s7108_s28 + $0x4c8] sm:$0xff] }
 0x24b   : > { %4598 = vmatpush2.msra.mxu1 %v3560_v29  ;;  %4528 = vmatprep.subr.mxu0 %v3495_v30  ;;  %v3664_v15 = vld [vmem:[%s7108_s28 + $0x6d0] sm:$0xff]  ;;  %v3663_v17 = vld [vmem:[%s7108_s28 + $0x6c8] sm:$0xff]  ;;  %v3598_v18 = vld [vmem:[%s7108_s28 + $0x4c0] sm:$0xff] }
 0x24c   : > { %4599 = vmatprep.subr.mxu1 %v3559_v31  ;;  %4529 = vmatpush2.msra.mxu0 %v3494_v32  ;;  %v3662_v19 = vld [vmem:[%s7108_s28 + $0x6c0] sm:$0xff]  ;;  %v3597_v20 = vld [vmem:[%s7108_s28 + $0x4b8] sm:$0xff]  ;;  %v3596_v22 = vld [vmem:[%s7108_s28 + $0x4b0] sm:$0xff] }
 0x24d   : > { %4600 = vmatpush2.msra.mxu1 %v3558_v33  ;;  %4530 = vmatprep.subr.mxu0 %v3493_v34  ;;  %v3661_v21 = vld [vmem:[%s7108_s28 + $0x6b8] sm:$0xff]  ;;  %v3660_v23 = vld [vmem:[%s7108_s28 + $0x6b0] sm:$0xff]  ;;  %v3595_v24 = vld [vmem:[%s7108_s28 + $0x4a8] sm:$0xff] }
 0x24e   : > { %4601 = vmatprep.subr.mxu1 %v3557_v35  ;;  %4531 = vmatpush2.msra.mxu0 %v3492_v36  ;;  %v3659_v25 = vld [vmem:[%s7108_s28 + $0x6a8] sm:$0xff]  ;;  %v3594_v26 = vld [vmem:[%s7108_s28 + $0x4a0] sm:$0xff]  ;;  %v3593_v28 = vld [vmem:[%s7108_s28 + $0x498] sm:$0xff] }
 0x24f   : > { %4602 = vmatpush2.msra.mxu1 %v3556_v37  ;;  %4532 = vmatprep.subr.mxu0 %v3491_v38  ;;  %v3658_v27 = vld [vmem:[%s7108_s28 + $0x6a0] sm:$0xff]  ;;  %v3657_v29 = vld [vmem:[%s7108_s28 + $0x698] sm:$0xff]  ;;  %v3592_v30 = vld [vmem:[%s7108_s28 + $0x490] sm:$0xff] }
 0x250   : > { %4603 = vmatprep.subr.mxu1 %v3555_v39  ;;  %4533 = vmatpush2.msra.mxu0 %v3490_v40  ;;  %v3656_v31 = vld [vmem:[%s7108_s28 + $0x690] sm:$0xff]  ;;  %v3591_v32 = vld [vmem:[%s7108_s28 + $0x488] sm:$0xff]  ;;  %v3590_v34 = vld [vmem:[%s7108_s28 + $0x480] sm:$0xff] }
 0x251   : > { %4604 = vmatpush2.msra.mxu1 %v3554_v41  ;;  %4534 = vmatprep.subr.mxu0 %v3489_v42  ;;  %v3655_v33 = vld [vmem:[%s7108_s28 + $0x688] sm:$0xff]  ;;  %v3654_v35 = vld [vmem:[%s7108_s28 + $0x680] sm:$0xff]  ;;  %v3589_v36 = vld [vmem:[%s7108_s28 + $0x478] sm:$0xff] }
 0x252   : > { %4605 = vmatprep.subr.mxu1 %v3553_v43  ;;  %4535 = vmatpush2.msra.mxu0 %v3488_v44  ;;  %v3653_v37 = vld [vmem:[%s7108_s28 + $0x678] sm:$0xff]  ;;  %v3588_v38 = vld [vmem:[%s7108_s28 + $0x470] sm:$0xff]  ;;  %v3587_v40 = vld [vmem:[%s7108_s28 + $0x468] sm:$0xff] }
 0x253   : > { %4606 = vmatpush2.msra.mxu1 %v3552_v45  ;;  %4536 = vmatprep.subr.mxu0 %v3487_v46  ;;  %v3652_v39 = vld [vmem:[%s7108_s28 + $0x670] sm:$0xff]  ;;  %v3651_v41 = vld [vmem:[%s7108_s28 + $0x668] sm:$0xff]  ;;  %v3586_v42 = vld [vmem:[%s7108_s28 + $0x460] sm:$0xff] }
 0x254   : > { %4607 = vmatprep.subr.mxu1 %v3551_v47  ;;  %4537 = vmatpush2.msra.mxu0 %v3486_v48  ;;  %v3650_v43 = vld [vmem:[%s7108_s28 + $0x660] sm:$0xff]  ;;  %v3585_v44 = vld [vmem:[%s7108_s28 + $0x458] sm:$0xff]  ;;  %v3584_v46 = vld [vmem:[%s7108_s28 + $0x450] sm:$0xff] }
 0x255   : > { %4608 = vmatpush2.msra.mxu1 %v3550_v49  ;;  %4538 = vmatprep.subr.mxu0 %v3485_v50  ;;  %v3649_v45 = vld [vmem:[%s7108_s28 + $0x658] sm:$0xff]  ;;  %v3648_v47 = vld [vmem:[%s7108_s28 + $0x650] sm:$0xff]  ;;  %v3583_v48 = vld [vmem:[%s7108_s28 + $0x448] sm:$0xff] }
 0x256   : > { %4609 = vmatprep.subr.mxu1 %v3549_v51  ;;  %4539 = vmatpush2.msra.mxu0 %v3484_v52  ;;  %v3647_v49 = vld [vmem:[%s7108_s28 + $0x648] sm:$0xff]  ;;  %v3582_v50 = vld [vmem:[%s7108_s28 + $0x440] sm:$0xff]  ;;  %v3581_v52 = vld [vmem:[%s7108_s28 + $0x438] sm:$0xff] }
 0x257   : > { %4610 = vmatpush2.msra.mxu1 %v3548_v53  ;;  %4540 = vmatprep.subr.mxu0 %v3483_v54  ;;  %v3646_v51 = vld [vmem:[%s7108_s28 + $0x640] sm:$0xff]  ;;  %v3645_v53 = vld [vmem:[%s7108_s28 + $0x638] sm:$0xff]  ;;  %v3580_v54 = vld [vmem:[%s7108_s28 + $0x430] sm:$0xff] }
 0x258   : > { %4611 = vmatprep.subr.mxu1 %v3547_v55  ;;  %4541 = vmatpush2.msra.mxu0 %v3482_v56  ;;  %v3644_v55 = vld [vmem:[%s7108_s28 + $0x630] sm:$0xff]  ;;  %v3579_v56 = vld [vmem:[%s7108_s28 + $0x428] sm:$0xff] }
 0x259   : > { %4612 = vmatpush2.msra.mxu1 %v3546_v57  ;;  %4542 = vmatprep.subr.mxu0 %v3481_v58  ;;  %v3643_v57 = vld [vmem:[%s7108_s28 + $0x628] sm:$0xff]  ;;  %v3578_v58 = vld [vmem:[%s7108_s28 + $0x420] sm:$0xff] }
 0x25a   : > { %4613 = vmatprep.subr.mxu1 %v3545_v59  ;;  %4543 = vmatpush2.msra.mxu0 %v3480_v60  ;;  %v3642_v59 = vld [vmem:[%s7108_s28 + $0x620] sm:$0xff]  ;;  %v3577_v60 = vld [vmem:[%s7108_s28 + $0x418] sm:$0xff] }
 0x25b   : > { %4614 = vmatpush2.msra.mxu1 %v3544_v61  ;;  %4544 = vmatprep.subr.mxu0 %v3479_v62  ;;  %v3641_v61 = vld [vmem:[%s7108_s28 + $0x618] sm:$0xff]  ;;  %v3576_v62 = vld [vmem:[%s7108_s28 + $0x410] sm:$0xff] }
 0x25c   : > { %4615 = vmatprep.subr.mxu1 %v3543_v63  ;;  %4545 = vmatpush2.msra.mxu0 %v3478_v0  ;;  %v3640_v63 = vld [vmem:[%s7108_s28 + $0x610] sm:$0xff]  ;;  %v3575_v0 = vld [vmem:[%s7108_s28 + $0x408] sm:$0xff] }
 0x25d   : > { %4616 = vmatpush2.msra.mxu1 %v3542_v1  ;;  %4547 = vmatmul.mubr.f32.vlgmr.msra.gmra.mxu0 %v3414_v2  ;;  %v3639_v1 = vld [vmem:[%s7108_s28 + $0x608] sm:$0xff]  ;;  %v3574_v2 = vld [vmem:[%s7108_s28 + $0x400] sm:$0xff] }
 0x25e   : > { %4624 = vmatprep.subr.mxu0 %v3605_v3  ;;  %4695 = vmatprep.subr.mxu1 %v3669_v4  ;;  %v3638_v3 = vld [vmem:[%s7108_s28 + $0x600] sm:$0xff]  ;;  %v3637_v4 = vld [vmem:[%s7108_s28 + $0x5f8] sm:$0xff] }
 0x25f   : > { %4618 = vmatmul.mubr.f32.vlgmr.msra.gmra.mxu1 %v3416_v5  ;;  %4625 = vmatpush1.msra.mxu0 %v3604_v6  ;;  %v3701_v5 = vld [vmem:[%s7108_s28 + $0x7f8] sm:$0xff]  ;;  %v3636_v6 = vld [vmem:[%s7108_s28 + $0x5f0] sm:$0xff] }
 0x260   : > { %4696 = vmatpush1.msra.mxu1 %v3668_v7  ;;  %4626 = vmatprep.subr.mxu0 %v3603_v8  ;;  %v3700_v7 = vld [vmem:[%s7108_s28 + $0x7f0] sm:$0xff]  ;;  %v3635_v8 = vld [vmem:[%s7108_s28 + $0x5e8] sm:$0xff] }
 0x261   : > { %4697 = vmatprep.subr.mxu1 %v3667_v9  ;;  %4627 = vmatpush1.msra.mxu0 %v3602_v10  ;;  %v3699_v9 = vld [vmem:[%s7108_s28 + $0x7e8] sm:$0xff]  ;;  %v3634_v10 = vld [vmem:[%s7108_s28 + $0x5e0] sm:$0xff] }
 0x262   : > { %4698 = vmatpush1.msra.mxu1 %v3666_v11  ;;  %4628 = vmatprep.subr.mxu0 %v3601_v12  ;;  %v3698_v11 = vld [vmem:[%s7108_s28 + $0x7e0] sm:$0xff]  ;;  %v3633_v12 = vld [vmem:[%s7108_s28 + $0x5d8] sm:$0xff] }
 0x263   : > { %4699 = vmatprep.subr.mxu1 %v3665_v13  ;;  %4629 = vmatpush1.msra.mxu0 %v3600_v14  ;;  %v3697_v13 = vld [vmem:[%s7108_s28 + $0x7d8] sm:$0xff]  ;;  %v3632_v14 = vld [vmem:[%s7108_s28 + $0x5d0] sm:$0xff] }
 0x264   : > { %4700 = vmatpush1.msra.mxu1 %v3664_v15  ;;  %4630 = vmatprep.subr.mxu0 %v3599_v16  ;;  %v3696_v15 = vld [vmem:[%s7108_s28 + $0x7d0] sm:$0xff]  ;;  %v3631_v16 = vld [vmem:[%s7108_s28 + $0x5c8] sm:$0xff] }
 0x265   : > { %4701 = vmatprep.subr.mxu1 %v3663_v17  ;;  %4631 = vmatpush1.msra.mxu0 %v3598_v18  ;;  %v3695_v17 = vld [vmem:[%s7108_s28 + $0x7c8] sm:$0xff]  ;;  %v3630_v18 = vld [vmem:[%s7108_s28 + $0x5c0] sm:$0xff] }
 0x266   : > { %4702 = vmatpush1.msra.mxu1 %v3662_v19  ;;  %4632 = vmatprep.subr.mxu0 %v3597_v20  ;;  %v3694_v19 = vld [vmem:[%s7108_s28 + $0x7c0] sm:$0xff]  ;;  %v3629_v20 = vld [vmem:[%s7108_s28 + $0x5b8] sm:$0xff] }
 0x267   : > { %4703 = vmatprep.subr.mxu1 %v3661_v21  ;;  %4633 = vmatpush1.msra.mxu0 %v3596_v22  ;;  %v3693_v21 = vld [vmem:[%s7108_s28 + $0x7b8] sm:$0xff]  ;;  %v3628_v22 = vld [vmem:[%s7108_s28 + $0x5b0] sm:$0xff] }
 0x268   : > { %4704 = vmatpush1.msra.mxu1 %v3660_v23  ;;  %4634 = vmatprep.subr.mxu0 %v3595_v24  ;;  %v3692_v23 = vld [vmem:[%s7108_s28 + $0x7b0] sm:$0xff]  ;;  %v3627_v24 = vld [vmem:[%s7108_s28 + $0x5a8] sm:$0xff] }
 0x269   : > { %4705 = vmatprep.subr.mxu1 %v3659_v25  ;;  %4635 = vmatpush1.msra.mxu0 %v3594_v26  ;;  %v3691_v25 = vld [vmem:[%s7108_s28 + $0x7a8] sm:$0xff]  ;;  %v3626_v26 = vld [vmem:[%s7108_s28 + $0x5a0] sm:$0xff] }
 0x26a   : > { %4706 = vmatpush1.msra.mxu1 %v3658_v27  ;;  %4636 = vmatprep.subr.mxu0 %v3593_v28  ;;  %v3690_v27 = vld [vmem:[%s7108_s28 + $0x7a0] sm:$0xff]  ;;  %v3625_v28 = vld [vmem:[%s7108_s28 + $0x598] sm:$0xff] }
 0x26b   : > { %4707 = vmatprep.subr.mxu1 %v3657_v29  ;;  %4637 = vmatpush1.msra.mxu0 %v3592_v30  ;;  %v3689_v29 = vld [vmem:[%s7108_s28 + $0x798] sm:$0xff]  ;;  %v3624_v30 = vld [vmem:[%s7108_s28 + $0x590] sm:$0xff] }
 0x26c   : > { %4708 = vmatpush1.msra.mxu1 %v3656_v31  ;;  %4638 = vmatprep.subr.mxu0 %v3591_v32  ;;  %v3688_v31 = vld [vmem:[%s7108_s28 + $0x790] sm:$0xff]  ;;  %v3623_v32 = vld [vmem:[%s7108_s28 + $0x588] sm:$0xff] }
 0x26d   : > { %4709 = vmatprep.subr.mxu1 %v3655_v33  ;;  %4639 = vmatpush1.msra.mxu0 %v3590_v34  ;;  %v3687_v33 = vld [vmem:[%s7108_s28 + $0x788] sm:$0xff]  ;;  %v3622_v34 = vld [vmem:[%s7108_s28 + $0x580] sm:$0xff] }
 0x26e   : > { %4710 = vmatpush1.msra.mxu1 %v3654_v35  ;;  %4640 = vmatprep.subr.mxu0 %v3589_v36  ;;  %v3686_v35 = vld [vmem:[%s7108_s28 + $0x780] sm:$0xff]  ;;  %v3621_v36 = vld [vmem:[%s7108_s28 + $0x578] sm:$0xff] }
 0x26f   : > { %4711 = vmatprep.subr.mxu1 %v3653_v37  ;;  %4641 = vmatpush1.msra.mxu0 %v3588_v38  ;;  %v3685_v37 = vld [vmem:[%s7108_s28 + $0x778] sm:$0xff]  ;;  %v3620_v38 = vld [vmem:[%s7108_s28 + $0x570] sm:$0xff] }
 0x270   : > { %4712 = vmatpush1.msra.mxu1 %v3652_v39  ;;  %4642 = vmatprep.subr.mxu0 %v3587_v40  ;;  %v3684_v39 = vld [vmem:[%s7108_s28 + $0x770] sm:$0xff]  ;;  %v3619_v40 = vld [vmem:[%s7108_s28 + $0x568] sm:$0xff] }
 0x271   : > { %4713 = vmatprep.subr.mxu1 %v3651_v41  ;;  %4643 = vmatpush1.msra.mxu0 %v3586_v42  ;;  %v3683_v41 = vld [vmem:[%s7108_s28 + $0x768] sm:$0xff]  ;;  %v3618_v42 = vld [vmem:[%s7108_s28 + $0x560] sm:$0xff] }
 0x272   : > { %4714 = vmatpush1.msra.mxu1 %v3650_v43  ;;  %4644 = vmatprep.subr.mxu0 %v3585_v44  ;;  %v3682_v43 = vld [vmem:[%s7108_s28 + $0x760] sm:$0xff]  ;;  %v3617_v44 = vld [vmem:[%s7108_s28 + $0x558] sm:$0xff] }
 0x273   : > { %4715 = vmatprep.subr.mxu1 %v3649_v45  ;;  %4645 = vmatpush1.msra.mxu0 %v3584_v46  ;;  %v3681_v45 = vld [vmem:[%s7108_s28 + $0x758] sm:$0xff]  ;;  %v3616_v46 = vld [vmem:[%s7108_s28 + $0x550] sm:$0xff] }
 0x274   : > { %4716 = vmatpush1.msra.mxu1 %v3648_v47  ;;  %4646 = vmatprep.subr.mxu0 %v3583_v48  ;;  %v3680_v47 = vld [vmem:[%s7108_s28 + $0x750] sm:$0xff]  ;;  %v3615_v48 = vld [vmem:[%s7108_s28 + $0x548] sm:$0xff] }
 0x275   : > { %4717 = vmatprep.subr.mxu1 %v3647_v49  ;;  %4647 = vmatpush1.msra.mxu0 %v3582_v50  ;;  %v3679_v49 = vld [vmem:[%s7108_s28 + $0x748] sm:$0xff]  ;;  %v3614_v50 = vld [vmem:[%s7108_s28 + $0x540] sm:$0xff] }
 0x276   : > { %4718 = vmatpush1.msra.mxu1 %v3646_v51  ;;  %4648 = vmatprep.subr.mxu0 %v3581_v52  ;;  %v3678_v51 = vld [vmem:[%s7108_s28 + $0x740] sm:$0xff]  ;;  %v3613_v52 = vld [vmem:[%s7108_s28 + $0x538] sm:$0xff] }
 0x277   : > { %4719 = vmatprep.subr.mxu1 %v3645_v53  ;;  %4649 = vmatpush1.msra.mxu0 %v3580_v54  ;;  %v3677_v53 = vld [vmem:[%s7108_s28 + $0x738] sm:$0xff]  ;;  %v3612_v54 = vld [vmem:[%s7108_s28 + $0x530] sm:$0xff] }
 0x278   : > { %4720 = vmatpush1.msra.mxu1 %v3644_v55  ;;  %4650 = vmatprep.subr.mxu0 %v3579_v56  ;;  %v3676_v55 = vld [vmem:[%s7108_s28 + $0x730] sm:$0xff]  ;;  %v3611_v56 = vld [vmem:[%s7108_s28 + $0x528] sm:$0xff] }
 0x279   : > { %4721 = vmatprep.subr.mxu1 %v3643_v57  ;;  %4651 = vmatpush1.msra.mxu0 %v3578_v58  ;;  %v3675_v57 = vld [vmem:[%s7108_s28 + $0x728] sm:$0xff]  ;;  %v3610_v58 = vld [vmem:[%s7108_s28 + $0x520] sm:$0xff] }
 0x27a   : > { %4722 = vmatpush1.msra.mxu1 %v3642_v59  ;;  %4652 = vmatprep.subr.mxu0 %v3577_v60  ;;  %v3674_v59 = vld [vmem:[%s7108_s28 + $0x720] sm:$0xff]  ;;  %v3609_v60 = vld [vmem:[%s7108_s28 + $0x518] sm:$0xff] }
 0x27b   : > { %4723 = vmatprep.subr.mxu1 %v3641_v61  ;;  %4653 = vmatpush1.msra.mxu0 %v3576_v62  ;;  %v3673_v61 = vld [vmem:[%s7108_s28 + $0x718] sm:$0xff]  ;;  %v3608_v62 = vld [vmem:[%s7108_s28 + $0x510] sm:$0xff] }
 0x27c   : > { %4724 = vmatpush1.msra.mxu1 %v3640_v63  ;;  %4654 = vmatprep.subr.mxu0 %v3575_v0  ;;  %v3672_v63 = vld [vmem:[%s7108_s28 + $0x710] sm:$0xff]  ;;  %v3607_v0 = vld [vmem:[%s7108_s28 + $0x508] sm:$0xff] }
 0x27d   : > { %4725 = vmatprep.subr.mxu1 %v3639_v1  ;;  %4655 = vmatpush1.msra.mxu0 %v3574_v2  ;;  %v3671_v1 = vld [vmem:[%s7108_s28 + $0x708] sm:$0xff]  ;;  %v3606_v2 = vld [vmem:[%s7108_s28 + $0x500] sm:$0xff] }
 0x27e   : > { %4726 = vmatpush1.msra.mxu1 %v3638_v3  ;;  %4656 = vmatprep.subr.mxu0 %v3637_v4  ;;  %v3419_v3 = vld [vmem:[%s8278_s0 + $0x28] sm:$0xff]  ;;  %v3670_v4 = vld [vmem:[%s7108_s28 + $0x700] sm:$0xff] }
 0x27f   : > { %4727 = vmatprep.subr.mxu1 %v3701_v5  ;;  %4657 = vmatpush2.msra.mxu0 %v3636_v6  ;;  %v3418_v5 = vld [vmem:[%s8278_s0 + $0x20] sm:$0xff]  ;;  %v3421_v6 = vld [vmem:[%s8278_s0 + $0x38] sm:$0xff] }
 0x280   : > { %4728 = vmatpush2.msra.mxu1 %v3700_v7  ;;  %4658 = vmatprep.subr.mxu0 %v3635_v8  ;;  %v3733_v7 = vld [vmem:[%s7108_s28 + $0x8f8] sm:$0xff] }
 0x281   : > { %4729 = vmatprep.subr.mxu1 %v3699_v9  ;;  %4659 = vmatpush2.msra.mxu0 %v3634_v10  ;;  %v3797_v8 = vld [vmem:[%s7108_s28 + $0xaf8] sm:$0xff]  ;;  %v3420_v9 = vld [vmem:[%s8278_s0 + $0x30] sm:$0xff] }
 0x282   : > { %4730 = vmatpush2.msra.mxu1 %v3698_v11  ;;  %4660 = vmatprep.subr.mxu0 %v3633_v12  ;;  %v3732_v10 = vld [vmem:[%s7108_s28 + $0x8f0] sm:$0xff]  ;;  %v3731_v12 = vld [vmem:[%s7108_s28 + $0x8e8] sm:$0xff] }
 0x283   : > { %4731 = vmatprep.subr.mxu1 %v3697_v13  ;;  %4661 = vmatpush2.msra.mxu0 %v3632_v14  ;;  %v3796_v11 = vld [vmem:[%s7108_s28 + $0xaf0] sm:$0xff]  ;;  %v3795_v13 = vld [vmem:[%s7108_s28 + $0xae8] sm:$0xff]  ;;  %v3730_v14 = vld [vmem:[%s7108_s28 + $0x8e0] sm:$0xff] }
 0x284   : > { %4732 = vmatpush2.msra.mxu1 %v3696_v15  ;;  %4662 = vmatprep.subr.mxu0 %v3631_v16  ;;  %v3794_v15 = vld [vmem:[%s7108_s28 + $0xae0] sm:$0xff]  ;;  %v3729_v16 = vld [vmem:[%s7108_s28 + $0x8d8] sm:$0xff] }
 0x285   : > { %4733 = vmatprep.subr.mxu1 %v3695_v17  ;;  %4663 = vmatpush2.msra.mxu0 %v3630_v18  ;;  %v3793_v17 = vld [vmem:[%s7108_s28 + $0xad8] sm:$0xff]  ;;  %v3728_v18 = vld [vmem:[%s7108_s28 + $0x8d0] sm:$0xff] }
 0x286   : > { %4734 = vmatpush2.msra.mxu1 %v3694_v19  ;;  %4664 = vmatprep.subr.mxu0 %v3629_v20  ;;  %v3792_v19 = vld [vmem:[%s7108_s28 + $0xad0] sm:$0xff]  ;;  %v3727_v20 = vld [vmem:[%s7108_s28 + $0x8c8] sm:$0xff] }
 0x287   : > { %4735 = vmatprep.subr.mxu1 %v3693_v21  ;;  %4665 = vmatpush2.msra.mxu0 %v3628_v22  ;;  %v3791_v21 = vld [vmem:[%s7108_s28 + $0xac8] sm:$0xff]  ;;  %v3726_v22 = vld [vmem:[%s7108_s28 + $0x8c0] sm:$0xff] }
 0x288   : > { %4736 = vmatpush2.msra.mxu1 %v3692_v23  ;;  %4666 = vmatprep.subr.mxu0 %v3627_v24  ;;  %v3790_v23 = vld [vmem:[%s7108_s28 + $0xac0] sm:$0xff]  ;;  %v3725_v24 = vld [vmem:[%s7108_s28 + $0x8b8] sm:$0xff] }
 0x289   : > { %4737 = vmatprep.subr.mxu1 %v3691_v25  ;;  %4667 = vmatpush2.msra.mxu0 %v3626_v26  ;;  %v3789_v25 = vld [vmem:[%s7108_s28 + $0xab8] sm:$0xff]  ;;  %v3724_v26 = vld [vmem:[%s7108_s28 + $0x8b0] sm:$0xff] }
 0x28a   : > { %4738 = vmatpush2.msra.mxu1 %v3690_v27  ;;  %4668 = vmatprep.subr.mxu0 %v3625_v28  ;;  %v3788_v27 = vld [vmem:[%s7108_s28 + $0xab0] sm:$0xff]  ;;  %v3723_v28 = vld [vmem:[%s7108_s28 + $0x8a8] sm:$0xff] }
 0x28b   : > { %4739 = vmatprep.subr.mxu1 %v3689_v29  ;;  %4669 = vmatpush2.msra.mxu0 %v3624_v30  ;;  %v3787_v29 = vld [vmem:[%s7108_s28 + $0xaa8] sm:$0xff]  ;;  %v3722_v30 = vld [vmem:[%s7108_s28 + $0x8a0] sm:$0xff] }
 0x28c   : > { %4740 = vmatpush2.msra.mxu1 %v3688_v31  ;;  %4670 = vmatprep.subr.mxu0 %v3623_v32  ;;  %v3786_v31 = vld [vmem:[%s7108_s28 + $0xaa0] sm:$0xff]  ;;  %v3721_v32 = vld [vmem:[%s7108_s28 + $0x898] sm:$0xff] }
 0x28d   : > { %4741 = vmatprep.subr.mxu1 %v3687_v33  ;;  %4671 = vmatpush2.msra.mxu0 %v3622_v34  ;;  %v3785_v33 = vld [vmem:[%s7108_s28 + $0xa98] sm:$0xff]  ;;  %v3720_v34 = vld [vmem:[%s7108_s28 + $0x890] sm:$0xff] }
 0x28e   : > { %4742 = vmatpush2.msra.mxu1 %v3686_v35  ;;  %4672 = vmatprep.subr.mxu0 %v3621_v36  ;;  %v3784_v35 = vld [vmem:[%s7108_s28 + $0xa90] sm:$0xff]  ;;  %v3719_v36 = vld [vmem:[%s7108_s28 + $0x888] sm:$0xff] }
 0x28f   : > { %4743 = vmatprep.subr.mxu1 %v3685_v37  ;;  %4673 = vmatpush2.msra.mxu0 %v3620_v38  ;;  %v3783_v37 = vld [vmem:[%s7108_s28 + $0xa88] sm:$0xff]  ;;  %v3718_v38 = vld [vmem:[%s7108_s28 + $0x880] sm:$0xff] }
 0x290   : > { %4744 = vmatpush2.msra.mxu1 %v3684_v39  ;;  %4674 = vmatprep.subr.mxu0 %v3619_v40  ;;  %v3782_v39 = vld [vmem:[%s7108_s28 + $0xa80] sm:$0xff]  ;;  %v3717_v40 = vld [vmem:[%s7108_s28 + $0x878] sm:$0xff] }
 0x291   : > { %4745 = vmatprep.subr.mxu1 %v3683_v41  ;;  %4675 = vmatpush2.msra.mxu0 %v3618_v42  ;;  %v3781_v41 = vld [vmem:[%s7108_s28 + $0xa78] sm:$0xff]  ;;  %v3716_v42 = vld [vmem:[%s7108_s28 + $0x870] sm:$0xff] }
 0x292   : > { %4746 = vmatpush2.msra.mxu1 %v3682_v43  ;;  %4676 = vmatprep.subr.mxu0 %v3617_v44  ;;  %v3780_v43 = vld [vmem:[%s7108_s28 + $0xa70] sm:$0xff]  ;;  %v3715_v44 = vld [vmem:[%s7108_s28 + $0x868] sm:$0xff] }
 0x293   : > { %4747 = vmatprep.subr.mxu1 %v3681_v45  ;;  %4677 = vmatpush2.msra.mxu0 %v3616_v46  ;;  %v3779_v45 = vld [vmem:[%s7108_s28 + $0xa68] sm:$0xff]  ;;  %v3714_v46 = vld [vmem:[%s7108_s28 + $0x860] sm:$0xff] }
 0x294   : > { %4748 = vmatpush2.msra.mxu1 %v3680_v47  ;;  %4678 = vmatprep.subr.mxu0 %v3615_v48  ;;  %v3778_v47 = vld [vmem:[%s7108_s28 + $0xa60] sm:$0xff]  ;;  %v3713_v48 = vld [vmem:[%s7108_s28 + $0x858] sm:$0xff] }
 0x295   : > { %4749 = vmatprep.subr.mxu1 %v3679_v49  ;;  %4679 = vmatpush2.msra.mxu0 %v3614_v50  ;;  %v3777_v49 = vld [vmem:[%s7108_s28 + $0xa58] sm:$0xff]  ;;  %v3712_v50 = vld [vmem:[%s7108_s28 + $0x850] sm:$0xff] }
 0x296   : > { %4750 = vmatpush2.msra.mxu1 %v3678_v51  ;;  %4680 = vmatprep.subr.mxu0 %v3613_v52  ;;  %v3776_v51 = vld [vmem:[%s7108_s28 + $0xa50] sm:$0xff]  ;;  %v3711_v52 = vld [vmem:[%s7108_s28 + $0x848] sm:$0xff] }
 0x297   : > { %4751 = vmatprep.subr.mxu1 %v3677_v53  ;;  %4681 = vmatpush2.msra.mxu0 %v3612_v54  ;;  %v3775_v53 = vld [vmem:[%s7108_s28 + $0xa48] sm:$0xff]  ;;  %v3710_v54 = vld [vmem:[%s7108_s28 + $0x840] sm:$0xff] }
 0x298   : > { %4752 = vmatpush2.msra.mxu1 %v3676_v55  ;;  %4682 = vmatprep.subr.mxu0 %v3611_v56  ;;  %v3774_v55 = vld [vmem:[%s7108_s28 + $0xa40] sm:$0xff]  ;;  %v3709_v56 = vld [vmem:[%s7108_s28 + $0x838] sm:$0xff] }
 0x299   : > { %4753 = vmatprep.subr.mxu1 %v3675_v57  ;;  %4683 = vmatpush2.msra.mxu0 %v3610_v58  ;;  %v3773_v57 = vld [vmem:[%s7108_s28 + $0xa38] sm:$0xff]  ;;  %v3708_v58 = vld [vmem:[%s7108_s28 + $0x830] sm:$0xff] }
 0x29a   : > { %4754 = vmatpush2.msra.mxu1 %v3674_v59  ;;  %4684 = vmatprep.subr.mxu0 %v3609_v60  ;;  %v3772_v59 = vld [vmem:[%s7108_s28 + $0xa30] sm:$0xff]  ;;  %v3707_v60 = vld [vmem:[%s7108_s28 + $0x828] sm:$0xff] }
 0x29b   : > { %4755 = vmatprep.subr.mxu1 %v3673_v61  ;;  %4685 = vmatpush2.msra.mxu0 %v3608_v62  ;;  %v3771_v61 = vld [vmem:[%s7108_s28 + $0xa28] sm:$0xff]  ;;  %v3706_v62 = vld [vmem:[%s7108_s28 + $0x820] sm:$0xff] }
 0x29c   : > { %4756 = vmatpush2.msra.mxu1 %v3672_v63  ;;  %4686 = vmatprep.subr.mxu0 %v3607_v0  ;;  %v3770_v63 = vld [vmem:[%s7108_s28 + $0xa20] sm:$0xff]  ;;  %v3705_v0 = vld [vmem:[%s7108_s28 + $0x818] sm:$0xff] }
 0x29d   : > { %4757 = vmatprep.subr.mxu1 %v3671_v1  ;;  %4687 = vmatpush2.msra.mxu0 %v3606_v2  ;;  %v3769_v1 = vld [vmem:[%s7108_s28 + $0xa18] sm:$0xff]  ;;  %v3704_v2 = vld [vmem:[%s7108_s28 + $0x810] sm:$0xff] }
 0x29e   : > { %4688 = vmatprep.mubr.f32.mxu0 %v3419_v3  ;;  %4758 = vmatpush2.msra.mxu1 %v3670_v4  ;;  %v3768_v3 = vld [vmem:[%s7108_s28 + $0xa10] sm:$0xff]  ;;  %v3703_v4 = vld [vmem:[%s7108_s28 + $0x808] sm:$0xff] }
 0x29f   : > { %4689 = vmatmul.mubr.f32.vlgmr.msra.gmra.mxu0 %v3418_v5  ;;  %4759 = vmatprep.mubr.f32.mxu1 %v3421_v6  ;;  %v3767_v5 = vld [vmem:[%s7108_s28 + $0xa08] sm:$0xff]  ;;  %v3702_v6 = vld [vmem:[%s7108_s28 + $0x800] sm:$0xff] }
 0x2a0   : > { %4766 = vmatprep.subr.mxu0 %v3733_v7  ;;  %4837 = vmatprep.subr.mxu1 %v3797_v8  ;;  %v3766_v7 = vld [vmem:[%s7108_s28 + $0xa00] sm:$0xff]  ;;  %v3765_v8 = vld [vmem:[%s7108_s28 + $0x9f8] sm:$0xff] }
 0x2a1   : > { %4760 = vmatmul.mubr.f32.vlgmr.msra.gmra.mxu1 %v3420_v9  ;;  %4767 = vmatpush1.msra.mxu0 %v3732_v10  ;;  %v3829_v9 = vld [vmem:[%s7108_s28 + $0xbf8] sm:$0xff]  ;;  %v3764_v10 = vld [vmem:[%s7108_s28 + $0x9f0] sm:$0xff] }
 0x2a2   : > { %4838 = vmatpush1.msra.mxu1 %v3796_v11  ;;  %4768 = vmatprep.subr.mxu0 %v3731_v12  ;;  %v3828_v11 = vld [vmem:[%s7108_s28 + $0xbf0] sm:$0xff]  ;;  %v3763_v12 = vld [vmem:[%s7108_s28 + $0x9e8] sm:$0xff] }
 0x2a3   : > { %4839 = vmatprep.subr.mxu1 %v3795_v13  ;;  %4769 = vmatpush1.msra.mxu0 %v3730_v14  ;;  %v3827_v13 = vld [vmem:[%s7108_s28 + $0xbe8] sm:$0xff]  ;;  %v3762_v14 = vld [vmem:[%s7108_s28 + $0x9e0] sm:$0xff] }
 0x2a4   : > { %4840 = vmatpush1.msra.mxu1 %v3794_v15  ;;  %4770 = vmatprep.subr.mxu0 %v3729_v16  ;;  %v3826_v15 = vld [vmem:[%s7108_s28 + $0xbe0] sm:$0xff]  ;;  %v3761_v16 = vld [vmem:[%s7108_s28 + $0x9d8] sm:$0xff] }
 0x2a5   : > { %4841 = vmatprep.subr.mxu1 %v3793_v17  ;;  %4771 = vmatpush1.msra.mxu0 %v3728_v18  ;;  %v3825_v17 = vld [vmem:[%s7108_s28 + $0xbd8] sm:$0xff]  ;;  %v3760_v18 = vld [vmem:[%s7108_s28 + $0x9d0] sm:$0xff] }
 0x2a6   : > { %4842 = vmatpush1.msra.mxu1 %v3792_v19  ;;  %4772 = vmatprep.subr.mxu0 %v3727_v20  ;;  %v3824_v19 = vld [vmem:[%s7108_s28 + $0xbd0] sm:$0xff]  ;;  %v3759_v20 = vld [vmem:[%s7108_s28 + $0x9c8] sm:$0xff] }
 0x2a7   : > { %4843 = vmatprep.subr.mxu1 %v3791_v21  ;;  %4773 = vmatpush1.msra.mxu0 %v3726_v22  ;;  %v3823_v21 = vld [vmem:[%s7108_s28 + $0xbc8] sm:$0xff]  ;;  %v3758_v22 = vld [vmem:[%s7108_s28 + $0x9c0] sm:$0xff] }
 0x2a8   : > { %4844 = vmatpush1.msra.mxu1 %v3790_v23  ;;  %4774 = vmatprep.subr.mxu0 %v3725_v24  ;;  %v3822_v23 = vld [vmem:[%s7108_s28 + $0xbc0] sm:$0xff]  ;;  %v3757_v24 = vld [vmem:[%s7108_s28 + $0x9b8] sm:$0xff] }
 0x2a9   : > { %4845 = vmatprep.subr.mxu1 %v3789_v25  ;;  %4775 = vmatpush1.msra.mxu0 %v3724_v26  ;;  %v3821_v25 = vld [vmem:[%s7108_s28 + $0xbb8] sm:$0xff]  ;;  %v3756_v26 = vld [vmem:[%s7108_s28 + $0x9b0] sm:$0xff] }
 0x2aa   : > { %4846 = vmatpush1.msra.mxu1 %v3788_v27  ;;  %4776 = vmatprep.subr.mxu0 %v3723_v28  ;;  %v3820_v27 = vld [vmem:[%s7108_s28 + $0xbb0] sm:$0xff]  ;;  %v3755_v28 = vld [vmem:[%s7108_s28 + $0x9a8] sm:$0xff] }
 0x2ab   : > { %4847 = vmatprep.subr.mxu1 %v3787_v29  ;;  %4777 = vmatpush1.msra.mxu0 %v3722_v30  ;;  %v3819_v29 = vld [vmem:[%s7108_s28 + $0xba8] sm:$0xff]  ;;  %v3754_v30 = vld [vmem:[%s7108_s28 + $0x9a0] sm:$0xff] }
 0x2ac   : > { %4848 = vmatpush1.msra.mxu1 %v3786_v31  ;;  %4778 = vmatprep.subr.mxu0 %v3721_v32  ;;  %v3818_v31 = vld [vmem:[%s7108_s28 + $0xba0] sm:$0xff]  ;;  %v3753_v32 = vld [vmem:[%s7108_s28 + $0x998] sm:$0xff] }
 0x2ad   : > { %4849 = vmatprep.subr.mxu1 %v3785_v33  ;;  %4779 = vmatpush1.msra.mxu0 %v3720_v34  ;;  %v3817_v33 = vld [vmem:[%s7108_s28 + $0xb98] sm:$0xff]  ;;  %v3752_v34 = vld [vmem:[%s7108_s28 + $0x990] sm:$0xff] }
 0x2ae   : > { %4850 = vmatpush1.msra.mxu1 %v3784_v35  ;;  %4780 = vmatprep.subr.mxu0 %v3719_v36  ;;  %v3816_v35 = vld [vmem:[%s7108_s28 + $0xb90] sm:$0xff]  ;;  %v3751_v36 = vld [vmem:[%s7108_s28 + $0x988] sm:$0xff] }
 0x2af   : > { %4851 = vmatprep.subr.mxu1 %v3783_v37  ;;  %4781 = vmatpush1.msra.mxu0 %v3718_v38  ;;  %v3815_v37 = vld [vmem:[%s7108_s28 + $0xb88] sm:$0xff]  ;;  %v3750_v38 = vld [vmem:[%s7108_s28 + $0x980] sm:$0xff] }
 0x2b0   : > { %4852 = vmatpush1.msra.mxu1 %v3782_v39  ;;  %4782 = vmatprep.subr.mxu0 %v3717_v40  ;;  %v3814_v39 = vld [vmem:[%s7108_s28 + $0xb80] sm:$0xff]  ;;  %v3749_v40 = vld [vmem:[%s7108_s28 + $0x978] sm:$0xff] }
 0x2b1   : > { %4853 = vmatprep.subr.mxu1 %v3781_v41  ;;  %4783 = vmatpush1.msra.mxu0 %v3716_v42  ;;  %v3813_v41 = vld [vmem:[%s7108_s28 + $0xb78] sm:$0xff]  ;;  %v3748_v42 = vld [vmem:[%s7108_s28 + $0x970] sm:$0xff] }
 0x2b2   : > { %4854 = vmatpush1.msra.mxu1 %v3780_v43  ;;  %4784 = vmatprep.subr.mxu0 %v3715_v44  ;;  %v3812_v43 = vld [vmem:[%s7108_s28 + $0xb70] sm:$0xff]  ;;  %v3747_v44 = vld [vmem:[%s7108_s28 + $0x968] sm:$0xff] }
 0x2b3   : > { %4855 = vmatprep.subr.mxu1 %v3779_v45  ;;  %4785 = vmatpush1.msra.mxu0 %v3714_v46  ;;  %v3811_v45 = vld [vmem:[%s7108_s28 + $0xb68] sm:$0xff]  ;;  %v3746_v46 = vld [vmem:[%s7108_s28 + $0x960] sm:$0xff] }
 0x2b4   : > { %4856 = vmatpush1.msra.mxu1 %v3778_v47  ;;  %4786 = vmatprep.subr.mxu0 %v3713_v48  ;;  %v3810_v47 = vld [vmem:[%s7108_s28 + $0xb60] sm:$0xff]  ;;  %v3745_v48 = vld [vmem:[%s7108_s28 + $0x958] sm:$0xff] }
 0x2b5   : > { %4857 = vmatprep.subr.mxu1 %v3777_v49  ;;  %4787 = vmatpush1.msra.mxu0 %v3712_v50  ;;  %v3809_v49 = vld [vmem:[%s7108_s28 + $0xb58] sm:$0xff]  ;;  %v3744_v50 = vld [vmem:[%s7108_s28 + $0x950] sm:$0xff] }
 0x2b6   : > { %4858 = vmatpush1.msra.mxu1 %v3776_v51  ;;  %4788 = vmatprep.subr.mxu0 %v3711_v52  ;;  %v3808_v51 = vld [vmem:[%s7108_s28 + $0xb50] sm:$0xff]  ;;  %v3743_v52 = vld [vmem:[%s7108_s28 + $0x948] sm:$0xff] }
 0x2b7   : > { %4859 = vmatprep.subr.mxu1 %v3775_v53  ;;  %4789 = vmatpush1.msra.mxu0 %v3710_v54  ;;  %v3807_v53 = vld [vmem:[%s7108_s28 + $0xb48] sm:$0xff]  ;;  %v3742_v54 = vld [vmem:[%s7108_s28 + $0x940] sm:$0xff] }
 0x2b8   : > { %4860 = vmatpush1.msra.mxu1 %v3774_v55  ;;  %4790 = vmatprep.subr.mxu0 %v3709_v56  ;;  %v3806_v55 = vld [vmem:[%s7108_s28 + $0xb40] sm:$0xff]  ;;  %v3741_v56 = vld [vmem:[%s7108_s28 + $0x938] sm:$0xff] }
 0x2b9   : > { %4861 = vmatprep.subr.mxu1 %v3773_v57  ;;  %4791 = vmatpush1.msra.mxu0 %v3708_v58  ;;  %v3805_v57 = vld [vmem:[%s7108_s28 + $0xb38] sm:$0xff]  ;;  %v3740_v58 = vld [vmem:[%s7108_s28 + $0x930] sm:$0xff] }
 0x2ba   : > { %4862 = vmatpush1.msra.mxu1 %v3772_v59  ;;  %4792 = vmatprep.subr.mxu0 %v3707_v60  ;;  %v3804_v59 = vld [vmem:[%s7108_s28 + $0xb30] sm:$0xff]  ;;  %v3739_v60 = vld [vmem:[%s7108_s28 + $0x928] sm:$0xff] }
 0x2bb   : > { %4863 = vmatprep.subr.mxu1 %v3771_v61  ;;  %4793 = vmatpush1.msra.mxu0 %v3706_v62  ;;  %v3803_v61 = vld [vmem:[%s7108_s28 + $0xb28] sm:$0xff]  ;;  %v3738_v62 = vld [vmem:[%s7108_s28 + $0x920] sm:$0xff] }
 0x2bc   : > { %4864 = vmatpush1.msra.mxu1 %v3770_v63  ;;  %4794 = vmatprep.subr.mxu0 %v3705_v0  ;;  %v3802_v63 = vld [vmem:[%s7108_s28 + $0xb20] sm:$0xff]  ;;  %v3737_v0 = vld [vmem:[%s7108_s28 + $0x918] sm:$0xff] }
 0x2bd   : > { %4865 = vmatprep.subr.mxu1 %v3769_v1  ;;  %4795 = vmatpush1.msra.mxu0 %v3704_v2  ;;  %v3801_v1 = vld [vmem:[%s7108_s28 + $0xb18] sm:$0xff]  ;;  %v3736_v2 = vld [vmem:[%s7108_s28 + $0x910] sm:$0xff] }
 0x2be   : > { %4866 = vmatpush1.msra.mxu1 %v3768_v3  ;;  %4796 = vmatprep.subr.mxu0 %v3703_v4  ;;  %v3800_v3 = vld [vmem:[%s7108_s28 + $0xb10] sm:$0xff]  ;;  %v3735_v4 = vld [vmem:[%s7108_s28 + $0x908] sm:$0xff] }
 0x2bf   : > { %4867 = vmatprep.subr.mxu1 %v3767_v5  ;;  %4797 = vmatpush1.msra.mxu0 %v3702_v6  ;;  %v3799_v5 = vld [vmem:[%s7108_s28 + $0xb08] sm:$0xff]  ;;  %v3734_v6 = vld [vmem:[%s7108_s28 + $0x900] sm:$0xff] }
 0x2c0   : > { %4868 = vmatpush1.msra.mxu1 %v3766_v7  ;;  %4798 = vmatprep.subr.mxu0 %v3765_v8  ;;  %v3423_v7 = vld [vmem:[%s8278_s0 + $0x48] sm:$0xff]  ;;  %v3798_v8 = vld [vmem:[%s7108_s28 + $0xb00] sm:$0xff] }
 0x2c1   : > { %4869 = vmatprep.subr.mxu1 %v3829_v9  ;;  %4799 = vmatpush2.msra.mxu0 %v3764_v10  ;;  %v3422_v9 = vld [vmem:[%s8278_s0 + $0x40] sm:$0xff]  ;;  %v3425_v10 = vld [vmem:[%s8278_s0 + $0x58] sm:$0xff] }
 0x2c2   : > { %4870 = vmatpush2.msra.mxu1 %v3828_v11  ;;  %4800 = vmatprep.subr.mxu0 %v3763_v12  ;;  %v3861_v11 = vld [vmem:[%s7108_s28 + $0xcf8] sm:$0xff] }
 0x2c3   : > { %4871 = vmatprep.subr.mxu1 %v3827_v13  ;;  %4801 = vmatpush2.msra.mxu0 %v3762_v14  ;;  %v3925_v12 = vld [vmem:[%s7108_s28 + $0xef8] sm:$0xff]  ;;  %v3424_v13 = vld [vmem:[%s8278_s0 + $0x50] sm:$0xff] }
 0x2c4   : > { %4872 = vmatpush2.msra.mxu1 %v3826_v15  ;;  %4802 = vmatprep.subr.mxu0 %v3761_v16  ;;  %v3860_v14 = vld [vmem:[%s7108_s28 + $0xcf0] sm:$0xff]  ;;  %v3859_v16 = vld [vmem:[%s7108_s28 + $0xce8] sm:$0xff] }
 0x2c5   : > { %4873 = vmatprep.subr.mxu1 %v3825_v17  ;;  %4803 = vmatpush2.msra.mxu0 %v3760_v18  ;;  %v3924_v15 = vld [vmem:[%s7108_s28 + $0xef0] sm:$0xff]  ;;  %v3923_v17 = vld [vmem:[%s7108_s28 + $0xee8] sm:$0xff]  ;;  %v3858_v18 = vld [vmem:[%s7108_s28 + $0xce0] sm:$0xff] }
 0x2c6   : > { %4874 = vmatpush2.msra.mxu1 %v3824_v19  ;;  %4804 = vmatprep.subr.mxu0 %v3759_v20  ;;  %v3922_v19 = vld [vmem:[%s7108_s28 + $0xee0] sm:$0xff]  ;;  %v3857_v20 = vld [vmem:[%s7108_s28 + $0xcd8] sm:$0xff] }
 0x2c7   : > { %4875 = vmatprep.subr.mxu1 %v3823_v21  ;;  %4805 = vmatpush2.msra.mxu0 %v3758_v22  ;;  %v3921_v21 = vld [vmem:[%s7108_s28 + $0xed8] sm:$0xff]  ;;  %v3856_v22 = vld [vmem:[%s7108_s28 + $0xcd0] sm:$0xff] }
 0x2c8   : > { %4876 = vmatpush2.msra.mxu1 %v3822_v23  ;;  %4806 = vmatprep.subr.mxu0 %v3757_v24  ;;  %v3920_v23 = vld [vmem:[%s7108_s28 + $0xed0] sm:$0xff]  ;;  %v3855_v24 = vld [vmem:[%s7108_s28 + $0xcc8] sm:$0xff] }
 0x2c9   : > { %4877 = vmatprep.subr.mxu1 %v3821_v25  ;;  %4807 = vmatpush2.msra.mxu0 %v3756_v26  ;;  %v3919_v25 = vld [vmem:[%s7108_s28 + $0xec8] sm:$0xff]  ;;  %v3854_v26 = vld [vmem:[%s7108_s28 + $0xcc0] sm:$0xff] }
 0x2ca   : > { %4878 = vmatpush2.msra.mxu1 %v3820_v27  ;;  %4808 = vmatprep.subr.mxu0 %v3755_v28  ;;  %v3918_v27 = vld [vmem:[%s7108_s28 + $0xec0] sm:$0xff]  ;;  %v3853_v28 = vld [vmem:[%s7108_s28 + $0xcb8] sm:$0xff] }
 0x2cb   : > { %4879 = vmatprep.subr.mxu1 %v3819_v29  ;;  %4809 = vmatpush2.msra.mxu0 %v3754_v30  ;;  %v3917_v29 = vld [vmem:[%s7108_s28 + $0xeb8] sm:$0xff]  ;;  %v3852_v30 = vld [vmem:[%s7108_s28 + $0xcb0] sm:$0xff] }
 0x2cc   : > { %4880 = vmatpush2.msra.mxu1 %v3818_v31  ;;  %4810 = vmatprep.subr.mxu0 %v3753_v32  ;;  %v3916_v31 = vld [vmem:[%s7108_s28 + $0xeb0] sm:$0xff]  ;;  %v3851_v32 = vld [vmem:[%s7108_s28 + $0xca8] sm:$0xff] }
 0x2cd   : > { %4881 = vmatprep.subr.mxu1 %v3817_v33  ;;  %4811 = vmatpush2.msra.mxu0 %v3752_v34  ;;  %v3915_v33 = vld [vmem:[%s7108_s28 + $0xea8] sm:$0xff]  ;;  %v3850_v34 = vld [vmem:[%s7108_s28 + $0xca0] sm:$0xff] }
 0x2ce   : > { %4882 = vmatpush2.msra.mxu1 %v3816_v35  ;;  %4812 = vmatprep.subr.mxu0 %v3751_v36  ;;  %v3914_v35 = vld [vmem:[%s7108_s28 + $0xea0] sm:$0xff]  ;;  %v3849_v36 = vld [vmem:[%s7108_s28 + $0xc98] sm:$0xff] }
 0x2cf   : > { %4883 = vmatprep.subr.mxu1 %v3815_v37  ;;  %4813 = vmatpush2.msra.mxu0 %v3750_v38  ;;  %v3913_v37 = vld [vmem:[%s7108_s28 + $0xe98] sm:$0xff]  ;;  %v3848_v38 = vld [vmem:[%s7108_s28 + $0xc90] sm:$0xff] }
 0x2d0   : > { %4884 = vmatpush2.msra.mxu1 %v3814_v39  ;;  %4814 = vmatprep.subr.mxu0 %v3749_v40  ;;  %v3912_v39 = vld [vmem:[%s7108_s28 + $0xe90] sm:$0xff]  ;;  %v3847_v40 = vld [vmem:[%s7108_s28 + $0xc88] sm:$0xff] }
 0x2d1   : > { %4885 = vmatprep.subr.mxu1 %v3813_v41  ;;  %4815 = vmatpush2.msra.mxu0 %v3748_v42  ;;  %v3911_v41 = vld [vmem:[%s7108_s28 + $0xe88] sm:$0xff]  ;;  %v3846_v42 = vld [vmem:[%s7108_s28 + $0xc80] sm:$0xff] }
 0x2d2   : > { %4886 = vmatpush2.msra.mxu1 %v3812_v43  ;;  %4816 = vmatprep.subr.mxu0 %v3747_v44  ;;  %v3910_v43 = vld [vmem:[%s7108_s28 + $0xe80] sm:$0xff]  ;;  %v3845_v44 = vld [vmem:[%s7108_s28 + $0xc78] sm:$0xff] }
 0x2d3   : > { %4887 = vmatprep.subr.mxu1 %v3811_v45  ;;  %4817 = vmatpush2.msra.mxu0 %v3746_v46  ;;  %v3909_v45 = vld [vmem:[%s7108_s28 + $0xe78] sm:$0xff]  ;;  %v3844_v46 = vld [vmem:[%s7108_s28 + $0xc70] sm:$0xff] }
 0x2d4   : > { %4888 = vmatpush2.msra.mxu1 %v3810_v47  ;;  %4818 = vmatprep.subr.mxu0 %v3745_v48  ;;  %v3908_v47 = vld [vmem:[%s7108_s28 + $0xe70] sm:$0xff]  ;;  %v3843_v48 = vld [vmem:[%s7108_s28 + $0xc68] sm:$0xff] }
 0x2d5   : > { %4889 = vmatprep.subr.mxu1 %v3809_v49  ;;  %4819 = vmatpush2.msra.mxu0 %v3744_v50  ;;  %v3907_v49 = vld [vmem:[%s7108_s28 + $0xe68] sm:$0xff]  ;;  %v3842_v50 = vld [vmem:[%s7108_s28 + $0xc60] sm:$0xff] }
 0x2d6   : > { %4890 = vmatpush2.msra.mxu1 %v3808_v51  ;;  %4820 = vmatprep.subr.mxu0 %v3743_v52  ;;  %v3906_v51 = vld [vmem:[%s7108_s28 + $0xe60] sm:$0xff]  ;;  %v3841_v52 = vld [vmem:[%s7108_s28 + $0xc58] sm:$0xff] }
 0x2d7   : > { %4891 = vmatprep.subr.mxu1 %v3807_v53  ;;  %4821 = vmatpush2.msra.mxu0 %v3742_v54  ;;  %v3905_v53 = vld [vmem:[%s7108_s28 + $0xe58] sm:$0xff]  ;;  %v3840_v54 = vld [vmem:[%s7108_s28 + $0xc50] sm:$0xff] }
 0x2d8   : > { %4892 = vmatpush2.msra.mxu1 %v3806_v55  ;;  %4822 = vmatprep.subr.mxu0 %v3741_v56  ;;  %v3904_v55 = vld [vmem:[%s7108_s28 + $0xe50] sm:$0xff]  ;;  %v3839_v56 = vld [vmem:[%s7108_s28 + $0xc48] sm:$0xff] }
 0x2d9   : > { %4893 = vmatprep.subr.mxu1 %v3805_v57  ;;  %4823 = vmatpush2.msra.mxu0 %v3740_v58  ;;  %v3903_v57 = vld [vmem:[%s7108_s28 + $0xe48] sm:$0xff]  ;;  %v3838_v58 = vld [vmem:[%s7108_s28 + $0xc40] sm:$0xff] }
 0x2da   : > { %4894 = vmatpush2.msra.mxu1 %v3804_v59  ;;  %4824 = vmatprep.subr.mxu0 %v3739_v60  ;;  %v3902_v59 = vld [vmem:[%s7108_s28 + $0xe40] sm:$0xff]  ;;  %v3837_v60 = vld [vmem:[%s7108_s28 + $0xc38] sm:$0xff] }
 0x2db   : > { %4895 = vmatprep.subr.mxu1 %v3803_v61  ;;  %4825 = vmatpush2.msra.mxu0 %v3738_v62  ;;  %v3901_v61 = vld [vmem:[%s7108_s28 + $0xe38] sm:$0xff]  ;;  %v3836_v62 = vld [vmem:[%s7108_s28 + $0xc30] sm:$0xff] }
 0x2dc   : > { %4896 = vmatpush2.msra.mxu1 %v3802_v63  ;;  %4826 = vmatprep.subr.mxu0 %v3737_v0  ;;  %v3900_v63 = vld [vmem:[%s7108_s28 + $0xe30] sm:$0xff]  ;;  %v3835_v0 = vld [vmem:[%s7108_s28 + $0xc28] sm:$0xff] }
 0x2dd   : > { %4897 = vmatprep.subr.mxu1 %v3801_v1  ;;  %4827 = vmatpush2.msra.mxu0 %v3736_v2  ;;  %v3899_v1 = vld [vmem:[%s7108_s28 + $0xe28] sm:$0xff]  ;;  %v3834_v2 = vld [vmem:[%s7108_s28 + $0xc20] sm:$0xff] }
 0x2de   : > { %4898 = vmatpush2.msra.mxu1 %v3800_v3  ;;  %4828 = vmatprep.subr.mxu0 %v3735_v4  ;;  %v3898_v3 = vld [vmem:[%s7108_s28 + $0xe20] sm:$0xff]  ;;  %v3833_v4 = vld [vmem:[%s7108_s28 + $0xc18] sm:$0xff] }
 0x2df   : > { %4899 = vmatprep.subr.mxu1 %v3799_v5  ;;  %4829 = vmatpush2.msra.mxu0 %v3734_v6  ;;  %v3897_v5 = vld [vmem:[%s7108_s28 + $0xe18] sm:$0xff]  ;;  %v3832_v6 = vld [vmem:[%s7108_s28 + $0xc10] sm:$0xff] }
 0x2e0   : > { %4830 = vmatprep.mubr.f32.mxu0 %v3423_v7  ;;  %4900 = vmatpush2.msra.mxu1 %v3798_v8  ;;  %v3896_v7 = vld [vmem:[%s7108_s28 + $0xe10] sm:$0xff]  ;;  %v3831_v8 = vld [vmem:[%s7108_s28 + $0xc08] sm:$0xff] }
 0x2e1   : > { %4831 = vmatmul.mubr.f32.vlgmr.msra.gmra.mxu0 %v3422_v9  ;;  %4901 = vmatprep.mubr.f32.mxu1 %v3425_v10  ;;  %v3895_v9 = vld [vmem:[%s7108_s28 + $0xe08] sm:$0xff]  ;;  %v3830_v10 = vld [vmem:[%s7108_s28 + $0xc00] sm:$0xff] }
 0x2e2   : > { %4908 = vmatprep.subr.mxu0 %v3861_v11  ;;  %4979 = vmatprep.subr.mxu1 %v3925_v12  ;;  %v3894_v11 = vld [vmem:[%s7108_s28 + $0xe00] sm:$0xff]  ;;  %v3893_v12 = vld [vmem:[%s7108_s28 + $0xdf8] sm:$0xff] }
 0x2e3   : > { %4902 = vmatmul.mubr.f32.vlgmr.msra.gmra.mxu1 %v3424_v13  ;;  %4909 = vmatpush1.msra.mxu0 %v3860_v14  ;;  %v3957_v13 = vld [vmem:[%s7108_s28 + $0xff8] sm:$0xff]  ;;  %v3892_v14 = vld [vmem:[%s7108_s28 + $0xdf0] sm:$0xff] }
 0x2e4   : > { %4980 = vmatpush1.msra.mxu1 %v3924_v15  ;;  %4910 = vmatprep.subr.mxu0 %v3859_v16  ;;  %v3956_v15 = vld [vmem:[%s7108_s28 + $0xff0] sm:$0xff]  ;;  %v3891_v16 = vld [vmem:[%s7108_s28 + $0xde8] sm:$0xff] }
 0x2e5   : > { %4981 = vmatprep.subr.mxu1 %v3923_v17  ;;  %4911 = vmatpush1.msra.mxu0 %v3858_v18  ;;  %v3955_v17 = vld [vmem:[%s7108_s28 + $0xfe8] sm:$0xff]  ;;  %v3890_v18 = vld [vmem:[%s7108_s28 + $0xde0] sm:$0xff] }
 0x2e6   : > { %4982 = vmatpush1.msra.mxu1 %v3922_v19  ;;  %4912 = vmatprep.subr.mxu0 %v3857_v20  ;;  %v3954_v19 = vld [vmem:[%s7108_s28 + $0xfe0] sm:$0xff]  ;;  %v3889_v20 = vld [vmem:[%s7108_s28 + $0xdd8] sm:$0xff] }
 0x2e7   : > { %4983 = vmatprep.subr.mxu1 %v3921_v21  ;;  %4913 = vmatpush1.msra.mxu0 %v3856_v22  ;;  %v3953_v21 = vld [vmem:[%s7108_s28 + $0xfd8] sm:$0xff]  ;;  %v3888_v22 = vld [vmem:[%s7108_s28 + $0xdd0] sm:$0xff] }
 0x2e8   : > { %4984 = vmatpush1.msra.mxu1 %v3920_v23  ;;  %4914 = vmatprep.subr.mxu0 %v3855_v24  ;;  %v3952_v23 = vld [vmem:[%s7108_s28 + $0xfd0] sm:$0xff]  ;;  %v3887_v24 = vld [vmem:[%s7108_s28 + $0xdc8] sm:$0xff] }
 0x2e9   : > { %4985 = vmatprep.subr.mxu1 %v3919_v25  ;;  %4915 = vmatpush1.msra.mxu0 %v3854_v26  ;;  %v3951_v25 = vld [vmem:[%s7108_s28 + $0xfc8] sm:$0xff]  ;;  %v3886_v26 = vld [vmem:[%s7108_s28 + $0xdc0] sm:$0xff] }
 0x2ea   : > { %4986 = vmatpush1.msra.mxu1 %v3918_v27  ;;  %4916 = vmatprep.subr.mxu0 %v3853_v28  ;;  %v3950_v27 = vld [vmem:[%s7108_s28 + $0xfc0] sm:$0xff]  ;;  %v3885_v28 = vld [vmem:[%s7108_s28 + $0xdb8] sm:$0xff] }
 0x2eb   : > { %4987 = vmatprep.subr.mxu1 %v3917_v29  ;;  %4917 = vmatpush1.msra.mxu0 %v3852_v30  ;;  %v3949_v29 = vld [vmem:[%s7108_s28 + $0xfb8] sm:$0xff]  ;;  %v3884_v30 = vld [vmem:[%s7108_s28 + $0xdb0] sm:$0xff] }
 0x2ec   : > { %4988 = vmatpush1.msra.mxu1 %v3916_v31  ;;  %4918 = vmatprep.subr.mxu0 %v3851_v32  ;;  %v3948_v31 = vld [vmem:[%s7108_s28 + $0xfb0] sm:$0xff]  ;;  %v3883_v32 = vld [vmem:[%s7108_s28 + $0xda8] sm:$0xff] }
 0x2ed   : > { %4989 = vmatprep.subr.mxu1 %v3915_v33  ;;  %4919 = vmatpush1.msra.mxu0 %v3850_v34  ;;  %v3947_v33 = vld [vmem:[%s7108_s28 + $0xfa8] sm:$0xff]  ;;  %v3882_v34 = vld [vmem:[%s7108_s28 + $0xda0] sm:$0xff] }
 0x2ee   : > { %4990 = vmatpush1.msra.mxu1 %v3914_v35  ;;  %4920 = vmatprep.subr.mxu0 %v3849_v36  ;;  %v3946_v35 = vld [vmem:[%s7108_s28 + $0xfa0] sm:$0xff]  ;;  %v3881_v36 = vld [vmem:[%s7108_s28 + $0xd98] sm:$0xff] }
 0x2ef   : > { %4991 = vmatprep.subr.mxu1 %v3913_v37  ;;  %4921 = vmatpush1.msra.mxu0 %v3848_v38  ;;  %v3945_v37 = vld [vmem:[%s7108_s28 + $0xf98] sm:$0xff]  ;;  %v3880_v38 = vld [vmem:[%s7108_s28 + $0xd90] sm:$0xff] }
 0x2f0   : > { %4992 = vmatpush1.msra.mxu1 %v3912_v39  ;;  %4922 = vmatprep.subr.mxu0 %v3847_v40  ;;  %v3944_v39 = vld [vmem:[%s7108_s28 + $0xf90] sm:$0xff]  ;;  %v3879_v40 = vld [vmem:[%s7108_s28 + $0xd88] sm:$0xff] }
 0x2f1   : > { %4993 = vmatprep.subr.mxu1 %v3911_v41  ;;  %4923 = vmatpush1.msra.mxu0 %v3846_v42  ;;  %v3943_v41 = vld [vmem:[%s7108_s28 + $0xf88] sm:$0xff]  ;;  %v3878_v42 = vld [vmem:[%s7108_s28 + $0xd80] sm:$0xff] }
 0x2f2   : > { %4994 = vmatpush1.msra.mxu1 %v3910_v43  ;;  %4924 = vmatprep.subr.mxu0 %v3845_v44  ;;  %v3942_v43 = vld [vmem:[%s7108_s28 + $0xf80] sm:$0xff]  ;;  %v3877_v44 = vld [vmem:[%s7108_s28 + $0xd78] sm:$0xff] }
 0x2f3   : > { %4995 = vmatprep.subr.mxu1 %v3909_v45  ;;  %4925 = vmatpush1.msra.mxu0 %v3844_v46  ;;  %v3941_v45 = vld [vmem:[%s7108_s28 + $0xf78] sm:$0xff]  ;;  %v3876_v46 = vld [vmem:[%s7108_s28 + $0xd70] sm:$0xff] }
 0x2f4   : > { %4996 = vmatpush1.msra.mxu1 %v3908_v47  ;;  %4926 = vmatprep.subr.mxu0 %v3843_v48  ;;  %v3940_v47 = vld [vmem:[%s7108_s28 + $0xf70] sm:$0xff]  ;;  %v3875_v48 = vld [vmem:[%s7108_s28 + $0xd68] sm:$0xff] }
 0x2f5   : > { %4997 = vmatprep.subr.mxu1 %v3907_v49  ;;  %4927 = vmatpush1.msra.mxu0 %v3842_v50  ;;  %v3939_v49 = vld [vmem:[%s7108_s28 + $0xf68] sm:$0xff]  ;;  %v3874_v50 = vld [vmem:[%s7108_s28 + $0xd60] sm:$0xff] }
 0x2f6   : > { %4998 = vmatpush1.msra.mxu1 %v3906_v51  ;;  %4928 = vmatprep.subr.mxu0 %v3841_v52  ;;  %v3938_v51 = vld [vmem:[%s7108_s28 + $0xf60] sm:$0xff]  ;;  %v3873_v52 = vld [vmem:[%s7108_s28 + $0xd58] sm:$0xff] }
 0x2f7   : > { %4999 = vmatprep.subr.mxu1 %v3905_v53  ;;  %4929 = vmatpush1.msra.mxu0 %v3840_v54  ;;  %v3937_v53 = vld [vmem:[%s7108_s28 + $0xf58] sm:$0xff]  ;;  %v3872_v54 = vld [vmem:[%s7108_s28 + $0xd50] sm:$0xff] }
 0x2f8   : > { %5000 = vmatpush1.msra.mxu1 %v3904_v55  ;;  %4930 = vmatprep.subr.mxu0 %v3839_v56  ;;  %v3936_v55 = vld [vmem:[%s7108_s28 + $0xf50] sm:$0xff]  ;;  %v3871_v56 = vld [vmem:[%s7108_s28 + $0xd48] sm:$0xff] }
 0x2f9   : > { %5001 = vmatprep.subr.mxu1 %v3903_v57  ;;  %4931 = vmatpush1.msra.mxu0 %v3838_v58  ;;  %v3935_v57 = vld [vmem:[%s7108_s28 + $0xf48] sm:$0xff]  ;;  %v3870_v58 = vld [vmem:[%s7108_s28 + $0xd40] sm:$0xff] }
 0x2fa   : > { %5002 = vmatpush1.msra.mxu1 %v3902_v59  ;;  %4932 = vmatprep.subr.mxu0 %v3837_v60  ;;  %v3934_v59 = vld [vmem:[%s7108_s28 + $0xf40] sm:$0xff]  ;;  %v3869_v60 = vld [vmem:[%s7108_s28 + $0xd38] sm:$0xff] }
 0x2fb   : > { %5003 = vmatprep.subr.mxu1 %v3901_v61  ;;  %4933 = vmatpush1.msra.mxu0 %v3836_v62  ;;  %v3933_v61 = vld [vmem:[%s7108_s28 + $0xf38] sm:$0xff]  ;;  %v3868_v62 = vld [vmem:[%s7108_s28 + $0xd30] sm:$0xff] }
 0x2fc   : > { %5004 = vmatpush1.msra.mxu1 %v3900_v63  ;;  %4934 = vmatprep.subr.mxu0 %v3835_v0  ;;  %v3932_v63 = vld [vmem:[%s7108_s28 + $0xf30] sm:$0xff]  ;;  %v3867_v0 = vld [vmem:[%s7108_s28 + $0xd28] sm:$0xff] }
 0x2fd   : > { %5005 = vmatprep.subr.mxu1 %v3899_v1  ;;  %4935 = vmatpush1.msra.mxu0 %v3834_v2  ;;  %v3931_v1 = vld [vmem:[%s7108_s28 + $0xf28] sm:$0xff]  ;;  %v3866_v2 = vld [vmem:[%s7108_s28 + $0xd20] sm:$0xff] }
 0x2fe   : > { %5006 = vmatpush1.msra.mxu1 %v3898_v3  ;;  %4936 = vmatprep.subr.mxu0 %v3833_v4  ;;  %v3930_v3 = vld [vmem:[%s7108_s28 + $0xf20] sm:$0xff]  ;;  %v3865_v4 = vld [vmem:[%s7108_s28 + $0xd18] sm:$0xff] }
 0x2ff   : > { %5007 = vmatprep.subr.mxu1 %v3897_v5  ;;  %4937 = vmatpush1.msra.mxu0 %v3832_v6  ;;  %v3929_v5 = vld [vmem:[%s7108_s28 + $0xf18] sm:$0xff]  ;;  %v3864_v6 = vld [vmem:[%s7108_s28 + $0xd10] sm:$0xff] }
 0x300   : > { %5008 = vmatpush1.msra.mxu1 %v3896_v7  ;;  %4938 = vmatprep.subr.mxu0 %v3831_v8  ;;  %v3928_v7 = vld [vmem:[%s7108_s28 + $0xf10] sm:$0xff]  ;;  %v3863_v8 = vld [vmem:[%s7108_s28 + $0xd08] sm:$0xff] }
 0x301   : > { %5009 = vmatprep.subr.mxu1 %v3895_v9  ;;  %4939 = vmatpush1.msra.mxu0 %v3830_v10  ;;  %v3927_v9 = vld [vmem:[%s7108_s28 + $0xf08] sm:$0xff]  ;;  %v3862_v10 = vld [vmem:[%s7108_s28 + $0xd00] sm:$0xff] }
 0x302   : > { %5010 = vmatpush1.msra.mxu1 %v3894_v11  ;;  %4940 = vmatprep.subr.mxu0 %v3893_v12  ;;  %v3427_v11 = vld [vmem:[%s8278_s0 + $0x68] sm:$0xff]  ;;  %v3926_v12 = vld [vmem:[%s7108_s28 + $0xf00] sm:$0xff] }
 0x303   : > { %5011 = vmatprep.subr.mxu1 %v3957_v13  ;;  %4941 = vmatpush2.msra.mxu0 %v3892_v14  ;;  %v3426_v13 = vld [vmem:[%s8278_s0 + $0x60] sm:$0xff]  ;;  %v3429_v14 = vld [vmem:[%s8278_s0 + $0x78] sm:$0xff] }
 0x304   : > { %5012 = vmatpush2.msra.mxu1 %v3956_v15  ;;  %4942 = vmatprep.subr.mxu0 %v3891_v16  ;;  %v3989_v15 = vld [vmem:[%s7108_s28 + $0x10f8] sm:$0xff] }
 0x305   : > { %5013 = vmatprep.subr.mxu1 %v3955_v17  ;;  %4943 = vmatpush2.msra.mxu0 %v3890_v18  ;;  %v4053_v16 = vld [vmem:[%s7108_s28 + $0x12f8] sm:$0xff]  ;;  %v3428_v17 = vld [vmem:[%s8278_s0 + $0x70] sm:$0xff] }
 0x306   : > { %5014 = vmatpush2.msra.mxu1 %v3954_v19  ;;  %4944 = vmatprep.subr.mxu0 %v3889_v20  ;;  %v3988_v18 = vld [vmem:[%s7108_s28 + $0x10f0] sm:$0xff]  ;;  %v3987_v20 = vld [vmem:[%s7108_s28 + $0x10e8] sm:$0xff] }
 0x307   : > { %5015 = vmatprep.subr.mxu1 %v3953_v21  ;;  %4945 = vmatpush2.msra.mxu0 %v3888_v22  ;;  %v4052_v19 = vld [vmem:[%s7108_s28 + $0x12f0] sm:$0xff]  ;;  %v4051_v21 = vld [vmem:[%s7108_s28 + $0x12e8] sm:$0xff]  ;;  %v3986_v22 = vld [vmem:[%s7108_s28 + $0x10e0] sm:$0xff] }
 0x308   : > { %5016 = vmatpush2.msra.mxu1 %v3952_v23  ;;  %4946 = vmatprep.subr.mxu0 %v3887_v24  ;;  %v4050_v23 = vld [vmem:[%s7108_s28 + $0x12e0] sm:$0xff]  ;;  %v3985_v24 = vld [vmem:[%s7108_s28 + $0x10d8] sm:$0xff] }
 0x309   : > { %5017 = vmatprep.subr.mxu1 %v3951_v25  ;;  %4947 = vmatpush2.msra.mxu0 %v3886_v26  ;;  %v4049_v25 = vld [vmem:[%s7108_s28 + $0x12d8] sm:$0xff]  ;;  %v3984_v26 = vld [vmem:[%s7108_s28 + $0x10d0] sm:$0xff] }
 0x30a   : > { %5018 = vmatpush2.msra.mxu1 %v3950_v27  ;;  %4948 = vmatprep.subr.mxu0 %v3885_v28  ;;  %v4048_v27 = vld [vmem:[%s7108_s28 + $0x12d0] sm:$0xff]  ;;  %v3983_v28 = vld [vmem:[%s7108_s28 + $0x10c8] sm:$0xff] }
 0x30b   : > { %5019 = vmatprep.subr.mxu1 %v3949_v29  ;;  %4949 = vmatpush2.msra.mxu0 %v3884_v30  ;;  %v4047_v29 = vld [vmem:[%s7108_s28 + $0x12c8] sm:$0xff]  ;;  %v3982_v30 = vld [vmem:[%s7108_s28 + $0x10c0] sm:$0xff] }
 0x30c   : > { %5020 = vmatpush2.msra.mxu1 %v3948_v31  ;;  %4950 = vmatprep.subr.mxu0 %v3883_v32  ;;  %v4046_v31 = vld [vmem:[%s7108_s28 + $0x12c0] sm:$0xff]  ;;  %v3981_v32 = vld [vmem:[%s7108_s28 + $0x10b8] sm:$0xff] }
 0x30d   : > { %5021 = vmatprep.subr.mxu1 %v3947_v33  ;;  %4951 = vmatpush2.msra.mxu0 %v3882_v34  ;;  %v4045_v33 = vld [vmem:[%s7108_s28 + $0x12b8] sm:$0xff]  ;;  %v3980_v34 = vld [vmem:[%s7108_s28 + $0x10b0] sm:$0xff] }
 0x30e   : > { %5022 = vmatpush2.msra.mxu1 %v3946_v35  ;;  %4952 = vmatprep.subr.mxu0 %v3881_v36  ;;  %v4044_v35 = vld [vmem:[%s7108_s28 + $0x12b0] sm:$0xff]  ;;  %v3979_v36 = vld [vmem:[%s7108_s28 + $0x10a8] sm:$0xff] }
 0x30f   : > { %5023 = vmatprep.subr.mxu1 %v3945_v37  ;;  %4953 = vmatpush2.msra.mxu0 %v3880_v38  ;;  %v4043_v37 = vld [vmem:[%s7108_s28 + $0x12a8] sm:$0xff]  ;;  %v3978_v38 = vld [vmem:[%s7108_s28 + $0x10a0] sm:$0xff] }
 0x310   : > { %5024 = vmatpush2.msra.mxu1 %v3944_v39  ;;  %4954 = vmatprep.subr.mxu0 %v3879_v40  ;;  %v4042_v39 = vld [vmem:[%s7108_s28 + $0x12a0] sm:$0xff]  ;;  %v3977_v40 = vld [vmem:[%s7108_s28 + $0x1098] sm:$0xff] }
 0x311   : > { %5025 = vmatprep.subr.mxu1 %v3943_v41  ;;  %4955 = vmatpush2.msra.mxu0 %v3878_v42  ;;  %v4041_v41 = vld [vmem:[%s7108_s28 + $0x1298] sm:$0xff]  ;;  %v3976_v42 = vld [vmem:[%s7108_s28 + $0x1090] sm:$0xff] }
 0x312   : > { %5026 = vmatpush2.msra.mxu1 %v3942_v43  ;;  %4956 = vmatprep.subr.mxu0 %v3877_v44  ;;  %v4040_v43 = vld [vmem:[%s7108_s28 + $0x1290] sm:$0xff]  ;;  %v3975_v44 = vld [vmem:[%s7108_s28 + $0x1088] sm:$0xff] }
 0x313   : > { %5027 = vmatprep.subr.mxu1 %v3941_v45  ;;  %4957 = vmatpush2.msra.mxu0 %v3876_v46  ;;  %v4039_v45 = vld [vmem:[%s7108_s28 + $0x1288] sm:$0xff]  ;;  %v3974_v46 = vld [vmem:[%s7108_s28 + $0x1080] sm:$0xff] }
 0x314   : > { %5028 = vmatpush2.msra.mxu1 %v3940_v47  ;;  %4958 = vmatprep.subr.mxu0 %v3875_v48  ;;  %v4038_v47 = vld [vmem:[%s7108_s28 + $0x1280] sm:$0xff]  ;;  %v3973_v48 = vld [vmem:[%s7108_s28 + $0x1078] sm:$0xff] }
 0x315   : > { %5029 = vmatprep.subr.mxu1 %v3939_v49  ;;  %4959 = vmatpush2.msra.mxu0 %v3874_v50  ;;  %v4037_v49 = vld [vmem:[%s7108_s28 + $0x1278] sm:$0xff]  ;;  %v3972_v50 = vld [vmem:[%s7108_s28 + $0x1070] sm:$0xff] }
 0x316   : > { %5030 = vmatpush2.msra.mxu1 %v3938_v51  ;;  %4960 = vmatprep.subr.mxu0 %v3873_v52  ;;  %v4036_v51 = vld [vmem:[%s7108_s28 + $0x1270] sm:$0xff]  ;;  %v3971_v52 = vld [vmem:[%s7108_s28 + $0x1068] sm:$0xff] }
 0x317   : > { %5031 = vmatprep.subr.mxu1 %v3937_v53  ;;  %4961 = vmatpush2.msra.mxu0 %v3872_v54  ;;  %v4035_v53 = vld [vmem:[%s7108_s28 + $0x1268] sm:$0xff]  ;;  %v3970_v54 = vld [vmem:[%s7108_s28 + $0x1060] sm:$0xff] }
 0x318   : > { %5032 = vmatpush2.msra.mxu1 %v3936_v55  ;;  %4962 = vmatprep.subr.mxu0 %v3871_v56  ;;  %v4034_v55 = vld [vmem:[%s7108_s28 + $0x1260] sm:$0xff]  ;;  %v3969_v56 = vld [vmem:[%s7108_s28 + $0x1058] sm:$0xff] }
 0x319   : > { %5033 = vmatprep.subr.mxu1 %v3935_v57  ;;  %4963 = vmatpush2.msra.mxu0 %v3870_v58  ;;  %v4033_v57 = vld [vmem:[%s7108_s28 + $0x1258] sm:$0xff]  ;;  %v3968_v58 = vld [vmem:[%s7108_s28 + $0x1050] sm:$0xff] }
 0x31a   : > { %5034 = vmatpush2.msra.mxu1 %v3934_v59  ;;  %4964 = vmatprep.subr.mxu0 %v3869_v60  ;;  %v4032_v59 = vld [vmem:[%s7108_s28 + $0x1250] sm:$0xff]  ;;  %v3967_v60 = vld [vmem:[%s7108_s28 + $0x1048] sm:$0xff] }
 0x31b   : > { %5035 = vmatprep.subr.mxu1 %v3933_v61  ;;  %4965 = vmatpush2.msra.mxu0 %v3868_v62  ;;  %v4031_v61 = vld [vmem:[%s7108_s28 + $0x1248] sm:$0xff]  ;;  %v3966_v62 = vld [vmem:[%s7108_s28 + $0x1040] sm:$0xff] }
 0x31c   : > { %5036 = vmatpush2.msra.mxu1 %v3932_v63  ;;  %4966 = vmatprep.subr.mxu0 %v3867_v0  ;;  %v4030_v63 = vld [vmem:[%s7108_s28 + $0x1240] sm:$0xff]  ;;  %v3965_v0 = vld [vmem:[%s7108_s28 + $0x1038] sm:$0xff] }
 0x31d   : > { %5037 = vmatprep.subr.mxu1 %v3931_v1  ;;  %4967 = vmatpush2.msra.mxu0 %v3866_v2  ;;  %v4029_v1 = vld [vmem:[%s7108_s28 + $0x1238] sm:$0xff]  ;;  %v3964_v2 = vld [vmem:[%s7108_s28 + $0x1030] sm:$0xff] }
 0x31e   : > { %5038 = vmatpush2.msra.mxu1 %v3930_v3  ;;  %4968 = vmatprep.subr.mxu0 %v3865_v4  ;;  %v4028_v3 = vld [vmem:[%s7108_s28 + $0x1230] sm:$0xff]  ;;  %v3963_v4 = vld [vmem:[%s7108_s28 + $0x1028] sm:$0xff] }
 0x31f   : > { %5039 = vmatprep.subr.mxu1 %v3929_v5  ;;  %4969 = vmatpush2.msra.mxu0 %v3864_v6  ;;  %v4027_v5 = vld [vmem:[%s7108_s28 + $0x1228] sm:$0xff]  ;;  %v3962_v6 = vld [vmem:[%s7108_s28 + $0x1020] sm:$0xff] }
 0x320   : > { %5040 = vmatpush2.msra.mxu1 %v3928_v7  ;;  %4970 = vmatprep.subr.mxu0 %v3863_v8  ;;  %v4026_v7 = vld [vmem:[%s7108_s28 + $0x1220] sm:$0xff]  ;;  %v3961_v8 = vld [vmem:[%s7108_s28 + $0x1018] sm:$0xff] }
 0x321   : > { %5041 = vmatprep.subr.mxu1 %v3927_v9  ;;  %4971 = vmatpush2.msra.mxu0 %v3862_v10  ;;  %v4025_v9 = vld [vmem:[%s7108_s28 + $0x1218] sm:$0xff]  ;;  %v3960_v10 = vld [vmem:[%s7108_s28 + $0x1010] sm:$0xff] }
 0x322   : > { %4972 = vmatprep.mubr.f32.mxu0 %v3427_v11  ;;  %5042 = vmatpush2.msra.mxu1 %v3926_v12  ;;  %v4024_v11 = vld [vmem:[%s7108_s28 + $0x1210] sm:$0xff]  ;;  %v3959_v12 = vld [vmem:[%s7108_s28 + $0x1008] sm:$0xff] }
 0x323   : > { %4973 = vmatmul.mubr.f32.vlgmr.msra.gmra.mxu0 %v3426_v13  ;;  %5043 = vmatprep.mubr.f32.mxu1 %v3429_v14  ;;  %v4023_v13 = vld [vmem:[%s7108_s28 + $0x1208] sm:$0xff]  ;;  %v3958_v14 = vld [vmem:[%s7108_s28 + $0x1000] sm:$0xff] }
 0x324   : > { %5050 = vmatprep.subr.mxu0 %v3989_v15  ;;  %5121 = vmatprep.subr.mxu1 %v4053_v16  ;;  %v4022_v15 = vld [vmem:[%s7108_s28 + $0x1200] sm:$0xff]  ;;  %v4021_v16 = vld [vmem:[%s7108_s28 + $0x11f8] sm:$0xff] }
 0x325   : > { %5044 = vmatmul.mubr.f32.vlgmr.msra.gmra.mxu1 %v3428_v17  ;;  %5051 = vmatpush1.msra.mxu0 %v3988_v18  ;;  %v4085_v17 = vld [vmem:[%s7108_s28 + $0x13f8] sm:$0xff]  ;;  %v4020_v18 = vld [vmem:[%s7108_s28 + $0x11f0] sm:$0xff] }
 0x326   : > { %5122 = vmatpush1.msra.mxu1 %v4052_v19  ;;  %5052 = vmatprep.subr.mxu0 %v3987_v20  ;;  %v4084_v19 = vld [vmem:[%s7108_s28 + $0x13f0] sm:$0xff]  ;;  %v4019_v20 = vld [vmem:[%s7108_s28 + $0x11e8] sm:$0xff] }
 0x327   : > { %5123 = vmatprep.subr.mxu1 %v4051_v21  ;;  %5053 = vmatpush1.msra.mxu0 %v3986_v22  ;;  %v4083_v21 = vld [vmem:[%s7108_s28 + $0x13e8] sm:$0xff]  ;;  %v4018_v22 = vld [vmem:[%s7108_s28 + $0x11e0] sm:$0xff] }
 0x328   : > { %5124 = vmatpush1.msra.mxu1 %v4050_v23  ;;  %5054 = vmatprep.subr.mxu0 %v3985_v24  ;;  %v4082_v23 = vld [vmem:[%s7108_s28 + $0x13e0] sm:$0xff]  ;;  %v4017_v24 = vld [vmem:[%s7108_s28 + $0x11d8] sm:$0xff] }
 0x329   : > { %5125 = vmatprep.subr.mxu1 %v4049_v25  ;;  %5055 = vmatpush1.msra.mxu0 %v3984_v26  ;;  %v4081_v25 = vld [vmem:[%s7108_s28 + $0x13d8] sm:$0xff]  ;;  %v4016_v26 = vld [vmem:[%s7108_s28 + $0x11d0] sm:$0xff] }
 0x32a   : > { %5126 = vmatpush1.msra.mxu1 %v4048_v27  ;;  %5056 = vmatprep.subr.mxu0 %v3983_v28  ;;  %v4080_v27 = vld [vmem:[%s7108_s28 + $0x13d0] sm:$0xff]  ;;  %v4015_v28 = vld [vmem:[%s7108_s28 + $0x11c8] sm:$0xff] }
 0x32b   : > { %5127 = vmatprep.subr.mxu1 %v4047_v29  ;;  %5057 = vmatpush1.msra.mxu0 %v3982_v30  ;;  %v4079_v29 = vld [vmem:[%s7108_s28 + $0x13c8] sm:$0xff]  ;;  %v4014_v30 = vld [vmem:[%s7108_s28 + $0x11c0] sm:$0xff] }
 0x32c   : > { %5128 = vmatpush1.msra.mxu1 %v4046_v31  ;;  %5058 = vmatprep.subr.mxu0 %v3981_v32  ;;  %v4078_v31 = vld [vmem:[%s7108_s28 + $0x13c0] sm:$0xff]  ;;  %v4013_v32 = vld [vmem:[%s7108_s28 + $0x11b8] sm:$0xff] }
 0x32d   : > { %5129 = vmatprep.subr.mxu1 %v4045_v33  ;;  %5059 = vmatpush1.msra.mxu0 %v3980_v34  ;;  %v4077_v33 = vld [vmem:[%s7108_s28 + $0x13b8] sm:$0xff]  ;;  %v4012_v34 = vld [vmem:[%s7108_s28 + $0x11b0] sm:$0xff] }
 0x32e   : > { %5130 = vmatpush1.msra.mxu1 %v4044_v35  ;;  %5060 = vmatprep.subr.mxu0 %v3979_v36  ;;  %v4076_v35 = vld [vmem:[%s7108_s28 + $0x13b0] sm:$0xff]  ;;  %v4011_v36 = vld [vmem:[%s7108_s28 + $0x11a8] sm:$0xff] }
 0x32f   : > { %5131 = vmatprep.subr.mxu1 %v4043_v37  ;;  %5061 = vmatpush1.msra.mxu0 %v3978_v38  ;;  %v4075_v37 = vld [vmem:[%s7108_s28 + $0x13a8] sm:$0xff]  ;;  %v4010_v38 = vld [vmem:[%s7108_s28 + $0x11a0] sm:$0xff] }
 0x330   : > { %5132 = vmatpush1.msra.mxu1 %v4042_v39  ;;  %5062 = vmatprep.subr.mxu0 %v3977_v40  ;;  %v4074_v39 = vld [vmem:[%s7108_s28 + $0x13a0] sm:$0xff]  ;;  %v4009_v40 = vld [vmem:[%s7108_s28 + $0x1198] sm:$0xff] }
 0x331   : > { %5133 = vmatprep.subr.mxu1 %v4041_v41  ;;  %5063 = vmatpush1.msra.mxu0 %v3976_v42  ;;  %v4073_v41 = vld [vmem:[%s7108_s28 + $0x1398] sm:$0xff]  ;;  %v4008_v42 = vld [vmem:[%s7108_s28 + $0x1190] sm:$0xff] }
 0x332   : > { %5134 = vmatpush1.msra.mxu1 %v4040_v43  ;;  %5064 = vmatprep.subr.mxu0 %v3975_v44  ;;  %v4072_v43 = vld [vmem:[%s7108_s28 + $0x1390] sm:$0xff]  ;;  %v4007_v44 = vld [vmem:[%s7108_s28 + $0x1188] sm:$0xff] }
 0x333   : > { %5135 = vmatprep.subr.mxu1 %v4039_v45  ;;  %5065 = vmatpush1.msra.mxu0 %v3974_v46  ;;  %v4071_v45 = vld [vmem:[%s7108_s28 + $0x1388] sm:$0xff]  ;;  %v4006_v46 = vld [vmem:[%s7108_s28 + $0x1180] sm:$0xff] }
 0x334   : > { %5136 = vmatpush1.msra.mxu1 %v4038_v47  ;;  %5066 = vmatprep.subr.mxu0 %v3973_v48  ;;  %v4070_v47 = vld [vmem:[%s7108_s28 + $0x1380] sm:$0xff]  ;;  %v4005_v48 = vld [vmem:[%s7108_s28 + $0x1178] sm:$0xff] }
 0x335   : > { %5137 = vmatprep.subr.mxu1 %v4037_v49  ;;  %5067 = vmatpush1.msra.mxu0 %v3972_v50  ;;  %v4069_v49 = vld [vmem:[%s7108_s28 + $0x1378] sm:$0xff]  ;;  %v4004_v50 = vld [vmem:[%s7108_s28 + $0x1170] sm:$0xff] }
 0x336   : > { %5138 = vmatpush1.msra.mxu1 %v4036_v51  ;;  %5068 = vmatprep.subr.mxu0 %v3971_v52  ;;  %v4068_v51 = vld [vmem:[%s7108_s28 + $0x1370] sm:$0xff]  ;;  %v4003_v52 = vld [vmem:[%s7108_s28 + $0x1168] sm:$0xff] }
 0x337   : > { %5139 = vmatprep.subr.mxu1 %v4035_v53  ;;  %5069 = vmatpush1.msra.mxu0 %v3970_v54  ;;  %v4067_v53 = vld [vmem:[%s7108_s28 + $0x1368] sm:$0xff]  ;;  %v4002_v54 = vld [vmem:[%s7108_s28 + $0x1160] sm:$0xff] }
 0x338   : > { %5140 = vmatpush1.msra.mxu1 %v4034_v55  ;;  %5070 = vmatprep.subr.mxu0 %v3969_v56  ;;  %v4066_v55 = vld [vmem:[%s7108_s28 + $0x1360] sm:$0xff]  ;;  %v4001_v56 = vld [vmem:[%s7108_s28 + $0x1158] sm:$0xff] }
 0x339   : > { %5141 = vmatprep.subr.mxu1 %v4033_v57  ;;  %5071 = vmatpush1.msra.mxu0 %v3968_v58  ;;  %v4065_v57 = vld [vmem:[%s7108_s28 + $0x1358] sm:$0xff]  ;;  %v4000_v58 = vld [vmem:[%s7108_s28 + $0x1150] sm:$0xff] }
 0x33a   : > { %5142 = vmatpush1.msra.mxu1 %v4032_v59  ;;  %5072 = vmatprep.subr.mxu0 %v3967_v60  ;;  %v4064_v59 = vld [vmem:[%s7108_s28 + $0x1350] sm:$0xff]  ;;  %v3999_v60 = vld [vmem:[%s7108_s28 + $0x1148] sm:$0xff] }
 0x33b   : > { %5143 = vmatprep.subr.mxu1 %v4031_v61  ;;  %5073 = vmatpush1.msra.mxu0 %v3966_v62  ;;  %v4063_v61 = vld [vmem:[%s7108_s28 + $0x1348] sm:$0xff]  ;;  %v3998_v62 = vld [vmem:[%s7108_s28 + $0x1140] sm:$0xff] }
 0x33c   : > { %5144 = vmatpush1.msra.mxu1 %v4030_v63  ;;  %5074 = vmatprep.subr.mxu0 %v3965_v0  ;;  %v4062_v63 = vld [vmem:[%s7108_s28 + $0x1340] sm:$0xff]  ;;  %v3997_v0 = vld [vmem:[%s7108_s28 + $0x1138] sm:$0xff] }
 0x33d   : > { %5145 = vmatprep.subr.mxu1 %v4029_v1  ;;  %5075 = vmatpush1.msra.mxu0 %v3964_v2  ;;  %v4061_v1 = vld [vmem:[%s7108_s28 + $0x1338] sm:$0xff]  ;;  %v3996_v2 = vld [vmem:[%s7108_s28 + $0x1130] sm:$0xff] }
 0x33e   : > { %5146 = vmatpush1.msra.mxu1 %v4028_v3  ;;  %5076 = vmatprep.subr.mxu0 %v3963_v4  ;;  %v4060_v3 = vld [vmem:[%s7108_s28 + $0x1330] sm:$0xff]  ;;  %v3995_v4 = vld [vmem:[%s7108_s28 + $0x1128] sm:$0xff] }
 0x33f   : > { %5147 = vmatprep.subr.mxu1 %v4027_v5  ;;  %5077 = vmatpush1.msra.mxu0 %v3962_v6  ;;  %v4059_v5 = vld [vmem:[%s7108_s28 + $0x1328] sm:$0xff]  ;;  %v3994_v6 = vld [vmem:[%s7108_s28 + $0x1120] sm:$0xff] }
 0x340   : > { %5148 = vmatpush1.msra.mxu1 %v4026_v7  ;;  %5078 = vmatprep.subr.mxu0 %v3961_v8  ;;  %v4058_v7 = vld [vmem:[%s7108_s28 + $0x1320] sm:$0xff]  ;;  %v3993_v8 = vld [vmem:[%s7108_s28 + $0x1118] sm:$0xff] }
 0x341   : > { %5149 = vmatprep.subr.mxu1 %v4025_v9  ;;  %5079 = vmatpush1.msra.mxu0 %v3960_v10  ;;  %v4057_v9 = vld [vmem:[%s7108_s28 + $0x1318] sm:$0xff]  ;;  %v3992_v10 = vld [vmem:[%s7108_s28 + $0x1110] sm:$0xff] }
 0x342   : > { %5150 = vmatpush1.msra.mxu1 %v4024_v11  ;;  %5080 = vmatprep.subr.mxu0 %v3959_v12  ;;  %v4056_v11 = vld [vmem:[%s7108_s28 + $0x1310] sm:$0xff]  ;;  %v3991_v12 = vld [vmem:[%s7108_s28 + $0x1108] sm:$0xff] }
 0x343   : > { %5151 = vmatprep.subr.mxu1 %v4023_v13  ;;  %5081 = vmatpush1.msra.mxu0 %v3958_v14  ;;  %v4055_v13 = vld [vmem:[%s7108_s28 + $0x1308] sm:$0xff]  ;;  %v3990_v14 = vld [vmem:[%s7108_s28 + $0x1100] sm:$0xff] }
 0x344   : > { %5152 = vmatpush1.msra.mxu1 %v4022_v15  ;;  %5082 = vmatprep.subr.mxu0 %v4021_v16  ;;  %v3431_v15 = vld [vmem:[%s8278_s0 + $0x88] sm:$0xff]  ;;  %v4054_v16 = vld [vmem:[%s7108_s28 + $0x1300] sm:$0xff] }
 0x345   : > { %5153 = vmatprep.subr.mxu1 %v4085_v17  ;;  %5083 = vmatpush2.msra.mxu0 %v4020_v18  ;;  %v3430_v17 = vld [vmem:[%s8278_s0 + $0x80] sm:$0xff]  ;;  %v3433_v18 = vld [vmem:[%s8278_s0 + $0x98] sm:$0xff] }
 0x346   : > { %5154 = vmatpush2.msra.mxu1 %v4084_v19  ;;  %5084 = vmatprep.subr.mxu0 %v4019_v20  ;;  %v4117_v19 = vld [vmem:[%s7108_s28 + $0x14f8] sm:$0xff] }
 0x347   : > { %5155 = vmatprep.subr.mxu1 %v4083_v21  ;;  %5085 = vmatpush2.msra.mxu0 %v4018_v22  ;;  %v4181_v20 = vld [vmem:[%s7108_s28 + $0x16f8] sm:$0xff]  ;;  %v3432_v21 = vld [vmem:[%s8278_s0 + $0x90] sm:$0xff] }
 0x348   : > { %5156 = vmatpush2.msra.mxu1 %v4082_v23  ;;  %5086 = vmatprep.subr.mxu0 %v4017_v24  ;;  %v4116_v22 = vld [vmem:[%s7108_s28 + $0x14f0] sm:$0xff]  ;;  %v4115_v24 = vld [vmem:[%s7108_s28 + $0x14e8] sm:$0xff] }
 0x349   : > { %5157 = vmatprep.subr.mxu1 %v4081_v25  ;;  %5087 = vmatpush2.msra.mxu0 %v4016_v26  ;;  %v4180_v23 = vld [vmem:[%s7108_s28 + $0x16f0] sm:$0xff]  ;;  %v4179_v25 = vld [vmem:[%s7108_s28 + $0x16e8] sm:$0xff]  ;;  %v4114_v26 = vld [vmem:[%s7108_s28 + $0x14e0] sm:$0xff] }
 0x34a   : > { %5158 = vmatpush2.msra.mxu1 %v4080_v27  ;;  %5088 = vmatprep.subr.mxu0 %v4015_v28  ;;  %v4178_v27 = vld [vmem:[%s7108_s28 + $0x16e0] sm:$0xff]  ;;  %v4113_v28 = vld [vmem:[%s7108_s28 + $0x14d8] sm:$0xff] }
 0x34b   : > { %5159 = vmatprep.subr.mxu1 %v4079_v29  ;;  %5089 = vmatpush2.msra.mxu0 %v4014_v30  ;;  %v4177_v29 = vld [vmem:[%s7108_s28 + $0x16d8] sm:$0xff]  ;;  %v4112_v30 = vld [vmem:[%s7108_s28 + $0x14d0] sm:$0xff] }
 0x34c   : > { %5160 = vmatpush2.msra.mxu1 %v4078_v31  ;;  %5090 = vmatprep.subr.mxu0 %v4013_v32  ;;  %v4176_v31 = vld [vmem:[%s7108_s28 + $0x16d0] sm:$0xff]  ;;  %v4111_v32 = vld [vmem:[%s7108_s28 + $0x14c8] sm:$0xff] }
 0x34d   : > { %5161 = vmatprep.subr.mxu1 %v4077_v33  ;;  %5091 = vmatpush2.msra.mxu0 %v4012_v34  ;;  %v4175_v33 = vld [vmem:[%s7108_s28 + $0x16c8] sm:$0xff]  ;;  %v4110_v34 = vld [vmem:[%s7108_s28 + $0x14c0] sm:$0xff] }
 0x34e   : > { %5162 = vmatpush2.msra.mxu1 %v4076_v35  ;;  %5092 = vmatprep.subr.mxu0 %v4011_v36  ;;  %v4174_v35 = vld [vmem:[%s7108_s28 + $0x16c0] sm:$0xff]  ;;  %v4109_v36 = vld [vmem:[%s7108_s28 + $0x14b8] sm:$0xff] }
 0x34f   : > { %5163 = vmatprep.subr.mxu1 %v4075_v37  ;;  %5093 = vmatpush2.msra.mxu0 %v4010_v38  ;;  %v4173_v37 = vld [vmem:[%s7108_s28 + $0x16b8] sm:$0xff]  ;;  %v4108_v38 = vld [vmem:[%s7108_s28 + $0x14b0] sm:$0xff] }
 0x350   : > { %5164 = vmatpush2.msra.mxu1 %v4074_v39  ;;  %5094 = vmatprep.subr.mxu0 %v4009_v40  ;;  %v4172_v39 = vld [vmem:[%s7108_s28 + $0x16b0] sm:$0xff]  ;;  %v4107_v40 = vld [vmem:[%s7108_s28 + $0x14a8] sm:$0xff] }
 0x351   : > { %5165 = vmatprep.subr.mxu1 %v4073_v41  ;;  %5095 = vmatpush2.msra.mxu0 %v4008_v42  ;;  %v4171_v41 = vld [vmem:[%s7108_s28 + $0x16a8] sm:$0xff]  ;;  %v4106_v42 = vld [vmem:[%s7108_s28 + $0x14a0] sm:$0xff] }
 0x352   : > { %5166 = vmatpush2.msra.mxu1 %v4072_v43  ;;  %5096 = vmatprep.subr.mxu0 %v4007_v44  ;;  %v4170_v43 = vld [vmem:[%s7108_s28 + $0x16a0] sm:$0xff]  ;;  %v4105_v44 = vld [vmem:[%s7108_s28 + $0x1498] sm:$0xff] }
 0x353   : > { %5167 = vmatprep.subr.mxu1 %v4071_v45  ;;  %5097 = vmatpush2.msra.mxu0 %v4006_v46  ;;  %v4169_v45 = vld [vmem:[%s7108_s28 + $0x1698] sm:$0xff]  ;;  %v4104_v46 = vld [vmem:[%s7108_s28 + $0x1490] sm:$0xff] }
 0x354   : > { %5168 = vmatpush2.msra.mxu1 %v4070_v47  ;;  %5098 = vmatprep.subr.mxu0 %v4005_v48  ;;  %v4168_v47 = vld [vmem:[%s7108_s28 + $0x1690] sm:$0xff]  ;;  %v4103_v48 = vld [vmem:[%s7108_s28 + $0x1488] sm:$0xff] }
 0x355   : > { %5169 = vmatprep.subr.mxu1 %v4069_v49  ;;  %5099 = vmatpush2.msra.mxu0 %v4004_v50  ;;  %v4167_v49 = vld [vmem:[%s7108_s28 + $0x1688] sm:$0xff]  ;;  %v4102_v50 = vld [vmem:[%s7108_s28 + $0x1480] sm:$0xff] }
 0x356   : > { %5170 = vmatpush2.msra.mxu1 %v4068_v51  ;;  %5100 = vmatprep.subr.mxu0 %v4003_v52  ;;  %v4166_v51 = vld [vmem:[%s7108_s28 + $0x1680] sm:$0xff]  ;;  %v4101_v52 = vld [vmem:[%s7108_s28 + $0x1478] sm:$0xff] }
 0x357   : > { %5171 = vmatprep.subr.mxu1 %v4067_v53  ;;  %5101 = vmatpush2.msra.mxu0 %v4002_v54  ;;  %v4165_v53 = vld [vmem:[%s7108_s28 + $0x1678] sm:$0xff]  ;;  %v4100_v54 = vld [vmem:[%s7108_s28 + $0x1470] sm:$0xff] }
 0x358   : > { %5172 = vmatpush2.msra.mxu1 %v4066_v55  ;;  %5102 = vmatprep.subr.mxu0 %v4001_v56  ;;  %v4164_v55 = vld [vmem:[%s7108_s28 + $0x1670] sm:$0xff]  ;;  %v4099_v56 = vld [vmem:[%s7108_s28 + $0x1468] sm:$0xff] }
 0x359   : > { %5173 = vmatprep.subr.mxu1 %v4065_v57  ;;  %5103 = vmatpush2.msra.mxu0 %v4000_v58  ;;  %v4163_v57 = vld [vmem:[%s7108_s28 + $0x1668] sm:$0xff]  ;;  %v4098_v58 = vld [vmem:[%s7108_s28 + $0x1460] sm:$0xff] }
 0x35a   : > { %5174 = vmatpush2.msra.mxu1 %v4064_v59  ;;  %5104 = vmatprep.subr.mxu0 %v3999_v60  ;;  %v4162_v59 = vld [vmem:[%s7108_s28 + $0x1660] sm:$0xff]  ;;  %v4097_v60 = vld [vmem:[%s7108_s28 + $0x1458] sm:$0xff] }
 0x35b   : > { %5175 = vmatprep.subr.mxu1 %v4063_v61  ;;  %5105 = vmatpush2.msra.mxu0 %v3998_v62  ;;  %v4161_v61 = vld [vmem:[%s7108_s28 + $0x1658] sm:$0xff]  ;;  %v4096_v62 = vld [vmem:[%s7108_s28 + $0x1450] sm:$0xff] }
 0x35c   : > { %5176 = vmatpush2.msra.mxu1 %v4062_v63  ;;  %5106 = vmatprep.subr.mxu0 %v3997_v0  ;;  %v4160_v63 = vld [vmem:[%s7108_s28 + $0x1650] sm:$0xff]  ;;  %v4095_v0 = vld [vmem:[%s7108_s28 + $0x1448] sm:$0xff] }
 0x35d   : > { %5177 = vmatprep.subr.mxu1 %v4061_v1  ;;  %5107 = vmatpush2.msra.mxu0 %v3996_v2  ;;  %v4159_v1 = vld [vmem:[%s7108_s28 + $0x1648] sm:$0xff]  ;;  %v4094_v2 = vld [vmem:[%s7108_s28 + $0x1440] sm:$0xff] }
 0x35e   : > { %5178 = vmatpush2.msra.mxu1 %v4060_v3  ;;  %5108 = vmatprep.subr.mxu0 %v3995_v4  ;;  %v4158_v3 = vld [vmem:[%s7108_s28 + $0x1640] sm:$0xff]  ;;  %v4093_v4 = vld [vmem:[%s7108_s28 + $0x1438] sm:$0xff] }
 0x35f   : > { %5179 = vmatprep.subr.mxu1 %v4059_v5  ;;  %5109 = vmatpush2.msra.mxu0 %v3994_v6  ;;  %v4157_v5 = vld [vmem:[%s7108_s28 + $0x1638] sm:$0xff]  ;;  %v4092_v6 = vld [vmem:[%s7108_s28 + $0x1430] sm:$0xff] }
 0x360   : > { %5180 = vmatpush2.msra.mxu1 %v4058_v7  ;;  %5110 = vmatprep.subr.mxu0 %v3993_v8  ;;  %v4156_v7 = vld [vmem:[%s7108_s28 + $0x1630] sm:$0xff]  ;;  %v4091_v8 = vld [vmem:[%s7108_s28 + $0x1428] sm:$0xff] }
 0x361   : > { %5181 = vmatprep.subr.mxu1 %v4057_v9  ;;  %5111 = vmatpush2.msra.mxu0 %v3992_v10  ;;  %v4155_v9 = vld [vmem:[%s7108_s28 + $0x1628] sm:$0xff]  ;;  %v4090_v10 = vld [vmem:[%s7108_s28 + $0x1420] sm:$0xff] }
 0x362   : > { %5182 = vmatpush2.msra.mxu1 %v4056_v11  ;;  %5112 = vmatprep.subr.mxu0 %v3991_v12  ;;  %v4154_v11 = vld [vmem:[%s7108_s28 + $0x1620] sm:$0xff]  ;;  %v4089_v12 = vld [vmem:[%s7108_s28 + $0x1418] sm:$0xff] }
 0x363   : > { %5183 = vmatprep.subr.mxu1 %v4055_v13  ;;  %5113 = vmatpush2.msra.mxu0 %v3990_v14  ;;  %v4153_v13 = vld [vmem:[%s7108_s28 + $0x1618] sm:$0xff]  ;;  %v4088_v14 = vld [vmem:[%s7108_s28 + $0x1410] sm:$0xff] }
 0x364   : > { %5114 = vmatprep.mubr.f32.mxu0 %v3431_v15  ;;  %5184 = vmatpush2.msra.mxu1 %v4054_v16  ;;  %v4152_v15 = vld [vmem:[%s7108_s28 + $0x1610] sm:$0xff]  ;;  %v4087_v16 = vld [vmem:[%s7108_s28 + $0x1408] sm:$0xff] }
 0x365   : > { %5115 = vmatmul.mubr.f32.vlgmr.msra.gmra.mxu0 %v3430_v17  ;;  %5185 = vmatprep.mubr.f32.mxu1 %v3433_v18  ;;  %v4151_v17 = vld [vmem:[%s7108_s28 + $0x1608] sm:$0xff]  ;;  %v4086_v18 = vld [vmem:[%s7108_s28 + $0x1400] sm:$0xff] }
 0x366   : > { %5192 = vmatprep.subr.mxu0 %v4117_v19  ;;  %5263 = vmatprep.subr.mxu1 %v4181_v20  ;;  %v4150_v19 = vld [vmem:[%s7108_s28 + $0x1600] sm:$0xff]  ;;  %v4149_v20 = vld [vmem:[%s7108_s28 + $0x15f8] sm:$0xff] }
 0x367   : > { %5186 = vmatmul.mubr.f32.vlgmr.msra.gmra.mxu1 %v3432_v21  ;;  %5193 = vmatpush1.msra.mxu0 %v4116_v22  ;;  %v4213_v21 = vld [vmem:[%s7108_s28 + $0x17f8] sm:$0xff]  ;;  %v4148_v22 = vld [vmem:[%s7108_s28 + $0x15f0] sm:$0xff] }
 0x368   : > { %5264 = vmatpush1.msra.mxu1 %v4180_v23  ;;  %5194 = vmatprep.subr.mxu0 %v4115_v24  ;;  %v4212_v23 = vld [vmem:[%s7108_s28 + $0x17f0] sm:$0xff]  ;;  %v4147_v24 = vld [vmem:[%s7108_s28 + $0x15e8] sm:$0xff] }
 0x369   : > { %5265 = vmatprep.subr.mxu1 %v4179_v25  ;;  %5195 = vmatpush1.msra.mxu0 %v4114_v26  ;;  %v4211_v25 = vld [vmem:[%s7108_s28 + $0x17e8] sm:$0xff]  ;;  %v4146_v26 = vld [vmem:[%s7108_s28 + $0x15e0] sm:$0xff] }
 0x36a   : > { %5266 = vmatpush1.msra.mxu1 %v4178_v27  ;;  %5196 = vmatprep.subr.mxu0 %v4113_v28  ;;  %v4210_v27 = vld [vmem:[%s7108_s28 + $0x17e0] sm:$0xff]  ;;  %v4145_v28 = vld [vmem:[%s7108_s28 + $0x15d8] sm:$0xff] }
 0x36b   : > { %5267 = vmatprep.subr.mxu1 %v4177_v29  ;;  %5197 = vmatpush1.msra.mxu0 %v4112_v30  ;;  %v4209_v29 = vld [vmem:[%s7108_s28 + $0x17d8] sm:$0xff]  ;;  %v4144_v30 = vld [vmem:[%s7108_s28 + $0x15d0] sm:$0xff] }
 0x36c   : > { %5268 = vmatpush1.msra.mxu1 %v4176_v31  ;;  %5198 = vmatprep.subr.mxu0 %v4111_v32  ;;  %v4208_v31 = vld [vmem:[%s7108_s28 + $0x17d0] sm:$0xff]  ;;  %v4143_v32 = vld [vmem:[%s7108_s28 + $0x15c8] sm:$0xff] }
 0x36d   : > { %5269 = vmatprep.subr.mxu1 %v4175_v33  ;;  %5199 = vmatpush1.msra.mxu0 %v4110_v34  ;;  %v4207_v33 = vld [vmem:[%s7108_s28 + $0x17c8] sm:$0xff]  ;;  %v4142_v34 = vld [vmem:[%s7108_s28 + $0x15c0] sm:$0xff] }
 0x36e   : > { %5270 = vmatpush1.msra.mxu1 %v4174_v35  ;;  %5200 = vmatprep.subr.mxu0 %v4109_v36  ;;  %v4206_v35 = vld [vmem:[%s7108_s28 + $0x17c0] sm:$0xff]  ;;  %v4141_v36 = vld [vmem:[%s7108_s28 + $0x15b8] sm:$0xff] }
 0x36f   : > { %5271 = vmatprep.subr.mxu1 %v4173_v37  ;;  %5201 = vmatpush1.msra.mxu0 %v4108_v38  ;;  %v4205_v37 = vld [vmem:[%s7108_s28 + $0x17b8] sm:$0xff]  ;;  %v4140_v38 = vld [vmem:[%s7108_s28 + $0x15b0] sm:$0xff] }
 0x370   : > { %5272 = vmatpush1.msra.mxu1 %v4172_v39  ;;  %5202 = vmatprep.subr.mxu0 %v4107_v40  ;;  %v4204_v39 = vld [vmem:[%s7108_s28 + $0x17b0] sm:$0xff]  ;;  %v4139_v40 = vld [vmem:[%s7108_s28 + $0x15a8] sm:$0xff] }
 0x371   : > { %5273 = vmatprep.subr.mxu1 %v4171_v41  ;;  %5203 = vmatpush1.msra.mxu0 %v4106_v42  ;;  %v4203_v41 = vld [vmem:[%s7108_s28 + $0x17a8] sm:$0xff]  ;;  %v4138_v42 = vld [vmem:[%s7108_s28 + $0x15a0] sm:$0xff] }
 0x372   : > { %5274 = vmatpush1.msra.mxu1 %v4170_v43  ;;  %5204 = vmatprep.subr.mxu0 %v4105_v44  ;;  %v4202_v43 = vld [vmem:[%s7108_s28 + $0x17a0] sm:$0xff]  ;;  %v4137_v44 = vld [vmem:[%s7108_s28 + $0x1598] sm:$0xff] }
 0x373   : > { %5275 = vmatprep.subr.mxu1 %v4169_v45  ;;  %5205 = vmatpush1.msra.mxu0 %v4104_v46  ;;  %v4201_v45 = vld [vmem:[%s7108_s28 + $0x1798] sm:$0xff]  ;;  %v4136_v46 = vld [vmem:[%s7108_s28 + $0x1590] sm:$0xff] }
 0x374   : > { %5276 = vmatpush1.msra.mxu1 %v4168_v47  ;;  %5206 = vmatprep.subr.mxu0 %v4103_v48  ;;  %v4200_v47 = vld [vmem:[%s7108_s28 + $0x1790] sm:$0xff]  ;;  %v4135_v48 = vld [vmem:[%s7108_s28 + $0x1588] sm:$0xff] }
 0x375   : > { %5277 = vmatprep.subr.mxu1 %v4167_v49  ;;  %5207 = vmatpush1.msra.mxu0 %v4102_v50  ;;  %v4199_v49 = vld [vmem:[%s7108_s28 + $0x1788] sm:$0xff]  ;;  %v4134_v50 = vld [vmem:[%s7108_s28 + $0x1580] sm:$0xff] }
 0x376   : > { %5278 = vmatpush1.msra.mxu1 %v4166_v51  ;;  %5208 = vmatprep.subr.mxu0 %v4101_v52  ;;  %v4198_v51 = vld [vmem:[%s7108_s28 + $0x1780] sm:$0xff]  ;;  %v4133_v52 = vld [vmem:[%s7108_s28 + $0x1578] sm:$0xff] }
 0x377   : > { %5279 = vmatprep.subr.mxu1 %v4165_v53  ;;  %5209 = vmatpush1.msra.mxu0 %v4100_v54  ;;  %v4197_v53 = vld [vmem:[%s7108_s28 + $0x1778] sm:$0xff]  ;;  %v4132_v54 = vld [vmem:[%s7108_s28 + $0x1570] sm:$0xff] }
 0x378   : > { %5280 = vmatpush1.msra.mxu1 %v4164_v55  ;;  %5210 = vmatprep.subr.mxu0 %v4099_v56  ;;  %v4196_v55 = vld [vmem:[%s7108_s28 + $0x1770] sm:$0xff]  ;;  %v4131_v56 = vld [vmem:[%s7108_s28 + $0x1568] sm:$0xff] }
 0x379   : > { %5281 = vmatprep.subr.mxu1 %v4163_v57  ;;  %5211 = vmatpush1.msra.mxu0 %v4098_v58  ;;  %v4195_v57 = vld [vmem:[%s7108_s28 + $0x1768] sm:$0xff]  ;;  %v4130_v58 = vld [vmem:[%s7108_s28 + $0x1560] sm:$0xff] }
 0x37a   : > { %5282 = vmatpush1.msra.mxu1 %v4162_v59  ;;  %5212 = vmatprep.subr.mxu0 %v4097_v60  ;;  %v4194_v59 = vld [vmem:[%s7108_s28 + $0x1760] sm:$0xff]  ;;  %v4129_v60 = vld [vmem:[%s7108_s28 + $0x1558] sm:$0xff] }
 0x37b   : > { %5283 = vmatprep.subr.mxu1 %v4161_v61  ;;  %5213 = vmatpush1.msra.mxu0 %v4096_v62  ;;  %v4193_v61 = vld [vmem:[%s7108_s28 + $0x1758] sm:$0xff]  ;;  %v4128_v62 = vld [vmem:[%s7108_s28 + $0x1550] sm:$0xff] }
 0x37c   : > { %5284 = vmatpush1.msra.mxu1 %v4160_v63  ;;  %5214 = vmatprep.subr.mxu0 %v4095_v0  ;;  %v4192_v63 = vld [vmem:[%s7108_s28 + $0x1750] sm:$0xff]  ;;  %v4127_v0 = vld [vmem:[%s7108_s28 + $0x1548] sm:$0xff] }
 0x37d   : > { %5285 = vmatprep.subr.mxu1 %v4159_v1  ;;  %5215 = vmatpush1.msra.mxu0 %v4094_v2  ;;  %v4191_v1 = vld [vmem:[%s7108_s28 + $0x1748] sm:$0xff]  ;;  %v4126_v2 = vld [vmem:[%s7108_s28 + $0x1540] sm:$0xff] }
 0x37e   : > { %5286 = vmatpush1.msra.mxu1 %v4158_v3  ;;  %5216 = vmatprep.subr.mxu0 %v4093_v4  ;;  %v4190_v3 = vld [vmem:[%s7108_s28 + $0x1740] sm:$0xff]  ;;  %v4125_v4 = vld [vmem:[%s7108_s28 + $0x1538] sm:$0xff] }
 0x37f   : > { %5287 = vmatprep.subr.mxu1 %v4157_v5  ;;  %5217 = vmatpush1.msra.mxu0 %v4092_v6  ;;  %v4189_v5 = vld [vmem:[%s7108_s28 + $0x1738] sm:$0xff]  ;;  %v4124_v6 = vld [vmem:[%s7108_s28 + $0x1530] sm:$0xff] }
 0x380   : > { %5288 = vmatpush1.msra.mxu1 %v4156_v7  ;;  %5218 = vmatprep.subr.mxu0 %v4091_v8  ;;  %v4188_v7 = vld [vmem:[%s7108_s28 + $0x1730] sm:$0xff]  ;;  %v4123_v8 = vld [vmem:[%s7108_s28 + $0x1528] sm:$0xff] }
 0x381   : > { %5289 = vmatprep.subr.mxu1 %v4155_v9  ;;  %5219 = vmatpush1.msra.mxu0 %v4090_v10  ;;  %v4187_v9 = vld [vmem:[%s7108_s28 + $0x1728] sm:$0xff]  ;;  %v4122_v10 = vld [vmem:[%s7108_s28 + $0x1520] sm:$0xff] }
 0x382   : > { %5290 = vmatpush1.msra.mxu1 %v4154_v11  ;;  %5220 = vmatprep.subr.mxu0 %v4089_v12  ;;  %v4186_v11 = vld [vmem:[%s7108_s28 + $0x1720] sm:$0xff]  ;;  %v4121_v12 = vld [vmem:[%s7108_s28 + $0x1518] sm:$0xff] }
 0x383   : > { %5291 = vmatprep.subr.mxu1 %v4153_v13  ;;  %5221 = vmatpush1.msra.mxu0 %v4088_v14  ;;  %v4185_v13 = vld [vmem:[%s7108_s28 + $0x1718] sm:$0xff]  ;;  %v4120_v14 = vld [vmem:[%s7108_s28 + $0x1510] sm:$0xff] }
 0x384   : > { %5292 = vmatpush1.msra.mxu1 %v4152_v15  ;;  %5222 = vmatprep.subr.mxu0 %v4087_v16  ;;  %v4184_v15 = vld [vmem:[%s7108_s28 + $0x1710] sm:$0xff]  ;;  %v4119_v16 = vld [vmem:[%s7108_s28 + $0x1508] sm:$0xff] }
 0x385   : > { %5293 = vmatprep.subr.mxu1 %v4151_v17  ;;  %5223 = vmatpush1.msra.mxu0 %v4086_v18  ;;  %v4183_v17 = vld [vmem:[%s7108_s28 + $0x1708] sm:$0xff]  ;;  %v4118_v18 = vld [vmem:[%s7108_s28 + $0x1500] sm:$0xff] }
 0x386   : > { %5294 = vmatpush1.msra.mxu1 %v4150_v19  ;;  %5224 = vmatprep.subr.mxu0 %v4149_v20  ;;  %v3435_v19 = vld [vmem:[%s8278_s0 + $0xa8] sm:$0xff]  ;;  %v4182_v20 = vld [vmem:[%s7108_s28 + $0x1700] sm:$0xff] }
 0x387   : > { %5295 = vmatprep.subr.mxu1 %v4213_v21  ;;  %5225 = vmatpush2.msra.mxu0 %v4148_v22  ;;  %v3434_v21 = vld [vmem:[%s8278_s0 + $0xa0] sm:$0xff]  ;;  %v3437_v22 = vld [vmem:[%s8278_s0 + $0xb8] sm:$0xff] }
 0x388   : > { %5296 = vmatpush2.msra.mxu1 %v4212_v23  ;;  %5226 = vmatprep.subr.mxu0 %v4147_v24  ;;  %v4245_v23 = vld [vmem:[%s7108_s28 + $0x18f8] sm:$0xff] }
 0x389   : > { %5297 = vmatprep.subr.mxu1 %v4211_v25  ;;  %5227 = vmatpush2.msra.mxu0 %v4146_v26  ;;  %v4309_v24 = vld [vmem:[%s7108_s28 + $0x1af8] sm:$0xff]  ;;  %v3436_v25 = vld [vmem:[%s8278_s0 + $0xb0] sm:$0xff] }
 0x38a   : > { %5298 = vmatpush2.msra.mxu1 %v4210_v27  ;;  %5228 = vmatprep.subr.mxu0 %v4145_v28  ;;  %v4244_v26 = vld [vmem:[%s7108_s28 + $0x18f0] sm:$0xff]  ;;  %v4243_v28 = vld [vmem:[%s7108_s28 + $0x18e8] sm:$0xff] }
 0x38b   : > { %5299 = vmatprep.subr.mxu1 %v4209_v29  ;;  %5229 = vmatpush2.msra.mxu0 %v4144_v30  ;;  %v4308_v27 = vld [vmem:[%s7108_s28 + $0x1af0] sm:$0xff]  ;;  %v4307_v29 = vld [vmem:[%s7108_s28 + $0x1ae8] sm:$0xff]  ;;  %v4242_v30 = vld [vmem:[%s7108_s28 + $0x18e0] sm:$0xff] }
 0x38c   : > { %5300 = vmatpush2.msra.mxu1 %v4208_v31  ;;  %5230 = vmatprep.subr.mxu0 %v4143_v32  ;;  %v4306_v31 = vld [vmem:[%s7108_s28 + $0x1ae0] sm:$0xff]  ;;  %v4241_v32 = vld [vmem:[%s7108_s28 + $0x18d8] sm:$0xff] }
 0x38d   : > { %5301 = vmatprep.subr.mxu1 %v4207_v33  ;;  %5231 = vmatpush2.msra.mxu0 %v4142_v34  ;;  %v4305_v33 = vld [vmem:[%s7108_s28 + $0x1ad8] sm:$0xff]  ;;  %v4240_v34 = vld [vmem:[%s7108_s28 + $0x18d0] sm:$0xff] }
 0x38e   : > { %5302 = vmatpush2.msra.mxu1 %v4206_v35  ;;  %5232 = vmatprep.subr.mxu0 %v4141_v36  ;;  %v4304_v35 = vld [vmem:[%s7108_s28 + $0x1ad0] sm:$0xff]  ;;  %v4239_v36 = vld [vmem:[%s7108_s28 + $0x18c8] sm:$0xff] }
 0x38f   : > { %5303 = vmatprep.subr.mxu1 %v4205_v37  ;;  %5233 = vmatpush2.msra.mxu0 %v4140_v38  ;;  %v4303_v37 = vld [vmem:[%s7108_s28 + $0x1ac8] sm:$0xff]  ;;  %v4238_v38 = vld [vmem:[%s7108_s28 + $0x18c0] sm:$0xff] }
 0x390   : > { %5304 = vmatpush2.msra.mxu1 %v4204_v39  ;;  %5234 = vmatprep.subr.mxu0 %v4139_v40  ;;  %v4302_v39 = vld [vmem:[%s7108_s28 + $0x1ac0] sm:$0xff]  ;;  %v4237_v40 = vld [vmem:[%s7108_s28 + $0x18b8] sm:$0xff] }
 0x391   : > { %5305 = vmatprep.subr.mxu1 %v4203_v41  ;;  %5235 = vmatpush2.msra.mxu0 %v4138_v42  ;;  %v4301_v41 = vld [vmem:[%s7108_s28 + $0x1ab8] sm:$0xff]  ;;  %v4236_v42 = vld [vmem:[%s7108_s28 + $0x18b0] sm:$0xff] }
 0x392   : > { %5306 = vmatpush2.msra.mxu1 %v4202_v43  ;;  %5236 = vmatprep.subr.mxu0 %v4137_v44  ;;  %v4300_v43 = vld [vmem:[%s7108_s28 + $0x1ab0] sm:$0xff]  ;;  %v4235_v44 = vld [vmem:[%s7108_s28 + $0x18a8] sm:$0xff] }
 0x393   : > { %5307 = vmatprep.subr.mxu1 %v4201_v45  ;;  %5237 = vmatpush2.msra.mxu0 %v4136_v46  ;;  %v4299_v45 = vld [vmem:[%s7108_s28 + $0x1aa8] sm:$0xff]  ;;  %v4234_v46 = vld [vmem:[%s7108_s28 + $0x18a0] sm:$0xff] }
 0x394   : > { %5308 = vmatpush2.msra.mxu1 %v4200_v47  ;;  %5238 = vmatprep.subr.mxu0 %v4135_v48  ;;  %v4298_v47 = vld [vmem:[%s7108_s28 + $0x1aa0] sm:$0xff]  ;;  %v4233_v48 = vld [vmem:[%s7108_s28 + $0x1898] sm:$0xff] }
 0x395   : > { %5309 = vmatprep.subr.mxu1 %v4199_v49  ;;  %5239 = vmatpush2.msra.mxu0 %v4134_v50  ;;  %v4297_v49 = vld [vmem:[%s7108_s28 + $0x1a98] sm:$0xff]  ;;  %v4232_v50 = vld [vmem:[%s7108_s28 + $0x1890] sm:$0xff] }
 0x396   : > { %5310 = vmatpush2.msra.mxu1 %v4198_v51  ;;  %5240 = vmatprep.subr.mxu0 %v4133_v52  ;;  %v4296_v51 = vld [vmem:[%s7108_s28 + $0x1a90] sm:$0xff]  ;;  %v4231_v52 = vld [vmem:[%s7108_s28 + $0x1888] sm:$0xff] }
 0x397   : > { %5311 = vmatprep.subr.mxu1 %v4197_v53  ;;  %5241 = vmatpush2.msra.mxu0 %v4132_v54  ;;  %v4295_v53 = vld [vmem:[%s7108_s28 + $0x1a88] sm:$0xff]  ;;  %v4230_v54 = vld [vmem:[%s7108_s28 + $0x1880] sm:$0xff] }
 0x398   : > { %5312 = vmatpush2.msra.mxu1 %v4196_v55  ;;  %5242 = vmatprep.subr.mxu0 %v4131_v56  ;;  %v4294_v55 = vld [vmem:[%s7108_s28 + $0x1a80] sm:$0xff]  ;;  %v4229_v56 = vld [vmem:[%s7108_s28 + $0x1878] sm:$0xff] }
 0x399   : > { %5313 = vmatprep.subr.mxu1 %v4195_v57  ;;  %5243 = vmatpush2.msra.mxu0 %v4130_v58  ;;  %v4293_v57 = vld [vmem:[%s7108_s28 + $0x1a78] sm:$0xff]  ;;  %v4228_v58 = vld [vmem:[%s7108_s28 + $0x1870] sm:$0xff] }
 0x39a   : > { %5314 = vmatpush2.msra.mxu1 %v4194_v59  ;;  %5244 = vmatprep.subr.mxu0 %v4129_v60  ;;  %v4292_v59 = vld [vmem:[%s7108_s28 + $0x1a70] sm:$0xff]  ;;  %v4227_v60 = vld [vmem:[%s7108_s28 + $0x1868] sm:$0xff] }
 0x39b   : > { %5315 = vmatprep.subr.mxu1 %v4193_v61  ;;  %5245 = vmatpush2.msra.mxu0 %v4128_v62  ;;  %v4291_v61 = vld [vmem:[%s7108_s28 + $0x1a68] sm:$0xff]  ;;  %v4226_v62 = vld [vmem:[%s7108_s28 + $0x1860] sm:$0xff] }
 0x39c   : > { %5316 = vmatpush2.msra.mxu1 %v4192_v63  ;;  %5246 = vmatprep.subr.mxu0 %v4127_v0  ;;  %v4290_v63 = vld [vmem:[%s7108_s28 + $0x1a60] sm:$0xff]  ;;  %v4225_v0 = vld [vmem:[%s7108_s28 + $0x1858] sm:$0xff] }
 0x39d   : > { %5317 = vmatprep.subr.mxu1 %v4191_v1  ;;  %5247 = vmatpush2.msra.mxu0 %v4126_v2  ;;  %v4289_v1 = vld [vmem:[%s7108_s28 + $0x1a58] sm:$0xff]  ;;  %v4224_v2 = vld [vmem:[%s7108_s28 + $0x1850] sm:$0xff] }
 0x39e   : > { %5318 = vmatpush2.msra.mxu1 %v4190_v3  ;;  %5248 = vmatprep.subr.mxu0 %v4125_v4  ;;  %v4288_v3 = vld [vmem:[%s7108_s28 + $0x1a50] sm:$0xff]  ;;  %v4223_v4 = vld [vmem:[%s7108_s28 + $0x1848] sm:$0xff] }
 0x39f   : > { %5319 = vmatprep.subr.mxu1 %v4189_v5  ;;  %5249 = vmatpush2.msra.mxu0 %v4124_v6  ;;  %v4287_v5 = vld [vmem:[%s7108_s28 + $0x1a48] sm:$0xff]  ;;  %v4222_v6 = vld [vmem:[%s7108_s28 + $0x1840] sm:$0xff] }
 0x3a0   : > { %5320 = vmatpush2.msra.mxu1 %v4188_v7  ;;  %5250 = vmatprep.subr.mxu0 %v4123_v8  ;;  %v4286_v7 = vld [vmem:[%s7108_s28 + $0x1a40] sm:$0xff]  ;;  %v4221_v8 = vld [vmem:[%s7108_s28 + $0x1838] sm:$0xff] }
 0x3a1   : > { %5321 = vmatprep.subr.mxu1 %v4187_v9  ;;  %5251 = vmatpush2.msra.mxu0 %v4122_v10  ;;  %v4285_v9 = vld [vmem:[%s7108_s28 + $0x1a38] sm:$0xff]  ;;  %v4220_v10 = vld [vmem:[%s7108_s28 + $0x1830] sm:$0xff] }
 0x3a2   : > { %5322 = vmatpush2.msra.mxu1 %v4186_v11  ;;  %5252 = vmatprep.subr.mxu0 %v4121_v12  ;;  %v4284_v11 = vld [vmem:[%s7108_s28 + $0x1a30] sm:$0xff]  ;;  %v4219_v12 = vld [vmem:[%s7108_s28 + $0x1828] sm:$0xff] }
 0x3a3   : > { %5323 = vmatprep.subr.mxu1 %v4185_v13  ;;  %5253 = vmatpush2.msra.mxu0 %v4120_v14  ;;  %v4283_v13 = vld [vmem:[%s7108_s28 + $0x1a28] sm:$0xff]  ;;  %v4218_v14 = vld [vmem:[%s7108_s28 + $0x1820] sm:$0xff] }
 0x3a4   : > { %5324 = vmatpush2.msra.mxu1 %v4184_v15  ;;  %5254 = vmatprep.subr.mxu0 %v4119_v16  ;;  %v4282_v15 = vld [vmem:[%s7108_s28 + $0x1a20] sm:$0xff]  ;;  %v4217_v16 = vld [vmem:[%s7108_s28 + $0x1818] sm:$0xff] }
 0x3a5   : > { %5325 = vmatprep.subr.mxu1 %v4183_v17  ;;  %5255 = vmatpush2.msra.mxu0 %v4118_v18  ;;  %v4281_v17 = vld [vmem:[%s7108_s28 + $0x1a18] sm:$0xff]  ;;  %v4216_v18 = vld [vmem:[%s7108_s28 + $0x1810] sm:$0xff] }
 0x3a6   : > { %5256 = vmatprep.mubr.f32.mxu0 %v3435_v19  ;;  %5326 = vmatpush2.msra.mxu1 %v4182_v20  ;;  %v4280_v19 = vld [vmem:[%s7108_s28 + $0x1a10] sm:$0xff]  ;;  %v4215_v20 = vld [vmem:[%s7108_s28 + $0x1808] sm:$0xff] }
 0x3a7   : > { %5257 = vmatmul.mubr.f32.vlgmr.msra.gmra.mxu0 %v3434_v21  ;;  %5327 = vmatprep.mubr.f32.mxu1 %v3437_v22  ;;  %v4279_v21 = vld [vmem:[%s7108_s28 + $0x1a08] sm:$0xff]  ;;  %v4214_v22 = vld [vmem:[%s7108_s28 + $0x1800] sm:$0xff] }
 0x3a8   : > { %5334 = vmatprep.subr.mxu0 %v4245_v23  ;;  %5405 = vmatprep.subr.mxu1 %v4309_v24  ;;  %v4278_v23 = vld [vmem:[%s7108_s28 + $0x1a00] sm:$0xff]  ;;  %v4277_v24 = vld [vmem:[%s7108_s28 + $0x19f8] sm:$0xff] }
 0x3a9   : > { %5328 = vmatmul.mubr.f32.vlgmr.msra.gmra.mxu1 %v3436_v25  ;;  %5335 = vmatpush1.msra.mxu0 %v4244_v26  ;;  %v4341_v25 = vld [vmem:[%s7108_s28 + $0x1bf8] sm:$0xff]  ;;  %v4276_v26 = vld [vmem:[%s7108_s28 + $0x19f0] sm:$0xff] }
 0x3aa   : > { %5406 = vmatpush1.msra.mxu1 %v4308_v27  ;;  %5336 = vmatprep.subr.mxu0 %v4243_v28  ;;  %v4340_v27 = vld [vmem:[%s7108_s28 + $0x1bf0] sm:$0xff]  ;;  %v4275_v28 = vld [vmem:[%s7108_s28 + $0x19e8] sm:$0xff] }
 0x3ab   : > { %5407 = vmatprep.subr.mxu1 %v4307_v29  ;;  %5337 = vmatpush1.msra.mxu0 %v4242_v30  ;;  %v4339_v29 = vld [vmem:[%s7108_s28 + $0x1be8] sm:$0xff]  ;;  %v4274_v30 = vld [vmem:[%s7108_s28 + $0x19e0] sm:$0xff] }
 0x3ac   : > { %5408 = vmatpush1.msra.mxu1 %v4306_v31  ;;  %5338 = vmatprep.subr.mxu0 %v4241_v32  ;;  %v4338_v31 = vld [vmem:[%s7108_s28 + $0x1be0] sm:$0xff]  ;;  %v4273_v32 = vld [vmem:[%s7108_s28 + $0x19d8] sm:$0xff] }
 0x3ad   : > { %5409 = vmatprep.subr.mxu1 %v4305_v33  ;;  %5339 = vmatpush1.msra.mxu0 %v4240_v34  ;;  %v4337_v33 = vld [vmem:[%s7108_s28 + $0x1bd8] sm:$0xff]  ;;  %v4272_v34 = vld [vmem:[%s7108_s28 + $0x19d0] sm:$0xff] }
 0x3ae   : > { %5410 = vmatpush1.msra.mxu1 %v4304_v35  ;;  %5340 = vmatprep.subr.mxu0 %v4239_v36  ;;  %v4336_v35 = vld [vmem:[%s7108_s28 + $0x1bd0] sm:$0xff]  ;;  %v4271_v36 = vld [vmem:[%s7108_s28 + $0x19c8] sm:$0xff] }
 0x3af   : > { %5411 = vmatprep.subr.mxu1 %v4303_v37  ;;  %5341 = vmatpush1.msra.mxu0 %v4238_v38  ;;  %v4335_v37 = vld [vmem:[%s7108_s28 + $0x1bc8] sm:$0xff]  ;;  %v4270_v38 = vld [vmem:[%s7108_s28 + $0x19c0] sm:$0xff] }
 0x3b0   : > { %5412 = vmatpush1.msra.mxu1 %v4302_v39  ;;  %5342 = vmatprep.subr.mxu0 %v4237_v40  ;;  %v4334_v39 = vld [vmem:[%s7108_s28 + $0x1bc0] sm:$0xff]  ;;  %v4269_v40 = vld [vmem:[%s7108_s28 + $0x19b8] sm:$0xff] }
 0x3b1   : > { %5413 = vmatprep.subr.mxu1 %v4301_v41  ;;  %5343 = vmatpush1.msra.mxu0 %v4236_v42  ;;  %v4333_v41 = vld [vmem:[%s7108_s28 + $0x1bb8] sm:$0xff]  ;;  %v4268_v42 = vld [vmem:[%s7108_s28 + $0x19b0] sm:$0xff] }
 0x3b2   : > { %5414 = vmatpush1.msra.mxu1 %v4300_v43  ;;  %5344 = vmatprep.subr.mxu0 %v4235_v44  ;;  %v4332_v43 = vld [vmem:[%s7108_s28 + $0x1bb0] sm:$0xff]  ;;  %v4267_v44 = vld [vmem:[%s7108_s28 + $0x19a8] sm:$0xff] }
 0x3b3   : > { %5415 = vmatprep.subr.mxu1 %v4299_v45  ;;  %5345 = vmatpush1.msra.mxu0 %v4234_v46  ;;  %v4331_v45 = vld [vmem:[%s7108_s28 + $0x1ba8] sm:$0xff]  ;;  %v4266_v46 = vld [vmem:[%s7108_s28 + $0x19a0] sm:$0xff] }
 0x3b4   : > { %5416 = vmatpush1.msra.mxu1 %v4298_v47  ;;  %5346 = vmatprep.subr.mxu0 %v4233_v48  ;;  %v4330_v47 = vld [vmem:[%s7108_s28 + $0x1ba0] sm:$0xff]  ;;  %v4265_v48 = vld [vmem:[%s7108_s28 + $0x1998] sm:$0xff] }
 0x3b5   : > { %5417 = vmatprep.subr.mxu1 %v4297_v49  ;;  %5347 = vmatpush1.msra.mxu0 %v4232_v50  ;;  %v4329_v49 = vld [vmem:[%s7108_s28 + $0x1b98] sm:$0xff]  ;;  %v4264_v50 = vld [vmem:[%s7108_s28 + $0x1990] sm:$0xff] }
 0x3b6   : > { %5418 = vmatpush1.msra.mxu1 %v4296_v51  ;;  %5348 = vmatprep.subr.mxu0 %v4231_v52  ;;  %v4328_v51 = vld [vmem:[%s7108_s28 + $0x1b90] sm:$0xff]  ;;  %v4263_v52 = vld [vmem:[%s7108_s28 + $0x1988] sm:$0xff] }
 0x3b7   : > { %5419 = vmatprep.subr.mxu1 %v4295_v53  ;;  %5349 = vmatpush1.msra.mxu0 %v4230_v54  ;;  %v4327_v53 = vld [vmem:[%s7108_s28 + $0x1b88] sm:$0xff]  ;;  %v4262_v54 = vld [vmem:[%s7108_s28 + $0x1980] sm:$0xff] }
 0x3b8   : > { %5420 = vmatpush1.msra.mxu1 %v4294_v55  ;;  %5350 = vmatprep.subr.mxu0 %v4229_v56  ;;  %v4326_v55 = vld [vmem:[%s7108_s28 + $0x1b80] sm:$0xff]  ;;  %v4261_v56 = vld [vmem:[%s7108_s28 + $0x1978] sm:$0xff] }
 0x3b9   : > { %5421 = vmatprep.subr.mxu1 %v4293_v57  ;;  %5351 = vmatpush1.msra.mxu0 %v4228_v58  ;;  %v4325_v57 = vld [vmem:[%s7108_s28 + $0x1b78] sm:$0xff]  ;;  %v4260_v58 = vld [vmem:[%s7108_s28 + $0x1970] sm:$0xff] }
 0x3ba   : > { %5422 = vmatpush1.msra.mxu1 %v4292_v59  ;;  %5352 = vmatprep.subr.mxu0 %v4227_v60  ;;  %v4324_v59 = vld [vmem:[%s7108_s28 + $0x1b70] sm:$0xff]  ;;  %v4259_v60 = vld [vmem:[%s7108_s28 + $0x1968] sm:$0xff] }
 0x3bb   : > { %5423 = vmatprep.subr.mxu1 %v4291_v61  ;;  %5353 = vmatpush1.msra.mxu0 %v4226_v62  ;;  %v4323_v61 = vld [vmem:[%s7108_s28 + $0x1b68] sm:$0xff]  ;;  %v4258_v62 = vld [vmem:[%s7108_s28 + $0x1960] sm:$0xff] }
 0x3bc   : > { %5424 = vmatpush1.msra.mxu1 %v4290_v63  ;;  %5354 = vmatprep.subr.mxu0 %v4225_v0  ;;  %v4322_v63 = vld [vmem:[%s7108_s28 + $0x1b60] sm:$0xff]  ;;  %v4257_v0 = vld [vmem:[%s7108_s28 + $0x1958] sm:$0xff] }
 0x3bd   : > { %5425 = vmatprep.subr.mxu1 %v4289_v1  ;;  %5355 = vmatpush1.msra.mxu0 %v4224_v2  ;;  %v4321_v1 = vld [vmem:[%s7108_s28 + $0x1b58] sm:$0xff]  ;;  %v4256_v2 = vld [vmem:[%s7108_s28 + $0x1950] sm:$0xff] }
 0x3be   : > { %5426 = vmatpush1.msra.mxu1 %v4288_v3  ;;  %5356 = vmatprep.subr.mxu0 %v4223_v4  ;;  %v4320_v3 = vld [vmem:[%s7108_s28 + $0x1b50] sm:$0xff]  ;;  %v4255_v4 = vld [vmem:[%s7108_s28 + $0x1948] sm:$0xff] }
 0x3bf   : > { %5427 = vmatprep.subr.mxu1 %v4287_v5  ;;  %5357 = vmatpush1.msra.mxu0 %v4222_v6  ;;  %v4319_v5 = vld [vmem:[%s7108_s28 + $0x1b48] sm:$0xff]  ;;  %v4254_v6 = vld [vmem:[%s7108_s28 + $0x1940] sm:$0xff] }
 0x3c0   : > { %5428 = vmatpush1.msra.mxu1 %v4286_v7  ;;  %5358 = vmatprep.subr.mxu0 %v4221_v8  ;;  %v4318_v7 = vld [vmem:[%s7108_s28 + $0x1b40] sm:$0xff]  ;;  %v4253_v8 = vld [vmem:[%s7108_s28 + $0x1938] sm:$0xff] }
 0x3c1   : > { %5429 = vmatprep.subr.mxu1 %v4285_v9  ;;  %5359 = vmatpush1.msra.mxu0 %v4220_v10  ;;  %v4317_v9 = vld [vmem:[%s7108_s28 + $0x1b38] sm:$0xff]  ;;  %v4252_v10 = vld [vmem:[%s7108_s28 + $0x1930] sm:$0xff] }
 0x3c2   : > { %5430 = vmatpush1.msra.mxu1 %v4284_v11  ;;  %5360 = vmatprep.subr.mxu0 %v4219_v12  ;;  %v4316_v11 = vld [vmem:[%s7108_s28 + $0x1b30] sm:$0xff]  ;;  %v4251_v12 = vld [vmem:[%s7108_s28 + $0x1928] sm:$0xff] }
 0x3c3   : > { %5431 = vmatprep.subr.mxu1 %v4283_v13  ;;  %5361 = vmatpush1.msra.mxu0 %v4218_v14  ;;  %v4315_v13 = vld [vmem:[%s7108_s28 + $0x1b28] sm:$0xff]  ;;  %v4250_v14 = vld [vmem:[%s7108_s28 + $0x1920] sm:$0xff] }
 0x3c4   : > { %5432 = vmatpush1.msra.mxu1 %v4282_v15  ;;  %5362 = vmatprep.subr.mxu0 %v4217_v16  ;;  %v4314_v15 = vld [vmem:[%s7108_s28 + $0x1b20] sm:$0xff]  ;;  %v4249_v16 = vld [vmem:[%s7108_s28 + $0x1918] sm:$0xff] }
 0x3c5   : > { %5433 = vmatprep.subr.mxu1 %v4281_v17  ;;  %5363 = vmatpush1.msra.mxu0 %v4216_v18  ;;  %v4313_v17 = vld [vmem:[%s7108_s28 + $0x1b18] sm:$0xff]  ;;  %v4248_v18 = vld [vmem:[%s7108_s28 + $0x1910] sm:$0xff] }
 0x3c6   : > { %5434 = vmatpush1.msra.mxu1 %v4280_v19  ;;  %5364 = vmatprep.subr.mxu0 %v4215_v20  ;;  %v4312_v19 = vld [vmem:[%s7108_s28 + $0x1b10] sm:$0xff]  ;;  %v4247_v20 = vld [vmem:[%s7108_s28 + $0x1908] sm:$0xff] }
 0x3c7   : > { %5435 = vmatprep.subr.mxu1 %v4279_v21  ;;  %5365 = vmatpush1.msra.mxu0 %v4214_v22  ;;  %v4311_v21 = vld [vmem:[%s7108_s28 + $0x1b08] sm:$0xff]  ;;  %v4246_v22 = vld [vmem:[%s7108_s28 + $0x1900] sm:$0xff] }
 0x3c8   : > { %5436 = vmatpush1.msra.mxu1 %v4278_v23  ;;  %5366 = vmatprep.subr.mxu0 %v4277_v24  ;;  %v3439_v23 = vld [vmem:[%s8278_s0 + $0xc8] sm:$0xff]  ;;  %v4310_v24 = vld [vmem:[%s7108_s28 + $0x1b00] sm:$0xff] }
 0x3c9   : > { %5437 = vmatprep.subr.mxu1 %v4341_v25  ;;  %5367 = vmatpush2.msra.mxu0 %v4276_v26  ;;  %v3438_v25 = vld [vmem:[%s8278_s0 + $0xc0] sm:$0xff]  ;;  %v3441_v26 = vld [vmem:[%s8278_s0 + $0xd8] sm:$0xff] }
 0x3ca   : > { %5438 = vmatpush2.msra.mxu1 %v4340_v27  ;;  %5368 = vmatprep.subr.mxu0 %v4275_v28  ;;  %v4373_v27 = vld [vmem:[%s7108_s28 + $0x1cf8] sm:$0xff] }
 0x3cb   : > { %5439 = vmatprep.subr.mxu1 %v4339_v29  ;;  %5369 = vmatpush2.msra.mxu0 %v4274_v30  ;;  %v4437_v28 = vld [vmem:[%s7108_s28 + $0x1ef8] sm:$0xff]  ;;  %v3440_v29 = vld [vmem:[%s8278_s0 + $0xd0] sm:$0xff] }
 0x3cc   : > { %5440 = vmatpush2.msra.mxu1 %v4338_v31  ;;  %5370 = vmatprep.subr.mxu0 %v4273_v32  ;;  %v4372_v30 = vld [vmem:[%s7108_s28 + $0x1cf0] sm:$0xff]  ;;  %v4371_v32 = vld [vmem:[%s7108_s28 + $0x1ce8] sm:$0xff] }
 0x3cd   : > { %5441 = vmatprep.subr.mxu1 %v4337_v33  ;;  %5371 = vmatpush2.msra.mxu0 %v4272_v34  ;;  %v4436_v31 = vld [vmem:[%s7108_s28 + $0x1ef0] sm:$0xff]  ;;  %v4435_v33 = vld [vmem:[%s7108_s28 + $0x1ee8] sm:$0xff]  ;;  %v4370_v34 = vld [vmem:[%s7108_s28 + $0x1ce0] sm:$0xff] }
 0x3ce   : > { %5442 = vmatpush2.msra.mxu1 %v4336_v35  ;;  %5372 = vmatprep.subr.mxu0 %v4271_v36  ;;  %v4434_v35 = vld [vmem:[%s7108_s28 + $0x1ee0] sm:$0xff]  ;;  %v4369_v36 = vld [vmem:[%s7108_s28 + $0x1cd8] sm:$0xff] }
 0x3cf   : > { %5443 = vmatprep.subr.mxu1 %v4335_v37  ;;  %5373 = vmatpush2.msra.mxu0 %v4270_v38  ;;  %v4433_v37 = vld [vmem:[%s7108_s28 + $0x1ed8] sm:$0xff]  ;;  %v4368_v38 = vld [vmem:[%s7108_s28 + $0x1cd0] sm:$0xff] }
 0x3d0   : > { %5444 = vmatpush2.msra.mxu1 %v4334_v39  ;;  %5374 = vmatprep.subr.mxu0 %v4269_v40  ;;  %v4432_v39 = vld [vmem:[%s7108_s28 + $0x1ed0] sm:$0xff]  ;;  %v4367_v40 = vld [vmem:[%s7108_s28 + $0x1cc8] sm:$0xff] }
 0x3d1   : > { %5445 = vmatprep.subr.mxu1 %v4333_v41  ;;  %5375 = vmatpush2.msra.mxu0 %v4268_v42  ;;  %v4431_v41 = vld [vmem:[%s7108_s28 + $0x1ec8] sm:$0xff]  ;;  %v4366_v42 = vld [vmem:[%s7108_s28 + $0x1cc0] sm:$0xff] }
 0x3d2   : > { %5446 = vmatpush2.msra.mxu1 %v4332_v43  ;;  %5376 = vmatprep.subr.mxu0 %v4267_v44  ;;  %v4430_v43 = vld [vmem:[%s7108_s28 + $0x1ec0] sm:$0xff]  ;;  %v4365_v44 = vld [vmem:[%s7108_s28 + $0x1cb8] sm:$0xff] }
 0x3d3   : > { %5447 = vmatprep.subr.mxu1 %v4331_v45  ;;  %5377 = vmatpush2.msra.mxu0 %v4266_v46  ;;  %v4429_v45 = vld [vmem:[%s7108_s28 + $0x1eb8] sm:$0xff]  ;;  %v4364_v46 = vld [vmem:[%s7108_s28 + $0x1cb0] sm:$0xff] }
 0x3d4   : > { %5448 = vmatpush2.msra.mxu1 %v4330_v47  ;;  %5378 = vmatprep.subr.mxu0 %v4265_v48  ;;  %v4428_v47 = vld [vmem:[%s7108_s28 + $0x1eb0] sm:$0xff]  ;;  %v4363_v48 = vld [vmem:[%s7108_s28 + $0x1ca8] sm:$0xff] }
 0x3d5   : > { %5449 = vmatprep.subr.mxu1 %v4329_v49  ;;  %5379 = vmatpush2.msra.mxu0 %v4264_v50  ;;  %v4427_v49 = vld [vmem:[%s7108_s28 + $0x1ea8] sm:$0xff]  ;;  %v4362_v50 = vld [vmem:[%s7108_s28 + $0x1ca0] sm:$0xff] }
 0x3d6   : > { %5450 = vmatpush2.msra.mxu1 %v4328_v51  ;;  %5380 = vmatprep.subr.mxu0 %v4263_v52  ;;  %v4426_v51 = vld [vmem:[%s7108_s28 + $0x1ea0] sm:$0xff]  ;;  %v4361_v52 = vld [vmem:[%s7108_s28 + $0x1c98] sm:$0xff] }
 0x3d7   : > { %5451 = vmatprep.subr.mxu1 %v4327_v53  ;;  %5381 = vmatpush2.msra.mxu0 %v4262_v54  ;;  %v4425_v53 = vld [vmem:[%s7108_s28 + $0x1e98] sm:$0xff]  ;;  %v4360_v54 = vld [vmem:[%s7108_s28 + $0x1c90] sm:$0xff] }
 0x3d8   : > { %5452 = vmatpush2.msra.mxu1 %v4326_v55  ;;  %5382 = vmatprep.subr.mxu0 %v4261_v56  ;;  %v4424_v55 = vld [vmem:[%s7108_s28 + $0x1e90] sm:$0xff]  ;;  %v4359_v56 = vld [vmem:[%s7108_s28 + $0x1c88] sm:$0xff] }
 0x3d9   : > { %5453 = vmatprep.subr.mxu1 %v4325_v57  ;;  %5383 = vmatpush2.msra.mxu0 %v4260_v58  ;;  %v4423_v57 = vld [vmem:[%s7108_s28 + $0x1e88] sm:$0xff]  ;;  %v4358_v58 = vld [vmem:[%s7108_s28 + $0x1c80] sm:$0xff] }
 0x3da   : > { %5454 = vmatpush2.msra.mxu1 %v4324_v59  ;;  %5384 = vmatprep.subr.mxu0 %v4259_v60  ;;  %v4422_v59 = vld [vmem:[%s7108_s28 + $0x1e80] sm:$0xff]  ;;  %v4357_v60 = vld [vmem:[%s7108_s28 + $0x1c78] sm:$0xff] }
 0x3db   : > { %5455 = vmatprep.subr.mxu1 %v4323_v61  ;;  %5385 = vmatpush2.msra.mxu0 %v4258_v62  ;;  %v4421_v61 = vld [vmem:[%s7108_s28 + $0x1e78] sm:$0xff]  ;;  %v4356_v62 = vld [vmem:[%s7108_s28 + $0x1c70] sm:$0xff] }
 0x3dc   : > { %5456 = vmatpush2.msra.mxu1 %v4322_v63  ;;  %5386 = vmatprep.subr.mxu0 %v4257_v0  ;;  %v4420_v63 = vld [vmem:[%s7108_s28 + $0x1e70] sm:$0xff]  ;;  %v4355_v0 = vld [vmem:[%s7108_s28 + $0x1c68] sm:$0xff] }
 0x3dd   : > { %5457 = vmatprep.subr.mxu1 %v4321_v1  ;;  %5387 = vmatpush2.msra.mxu0 %v4256_v2  ;;  %v4419_v1 = vld [vmem:[%s7108_s28 + $0x1e68] sm:$0xff]  ;;  %v4354_v2 = vld [vmem:[%s7108_s28 + $0x1c60] sm:$0xff] }
 0x3de   : > { %5458 = vmatpush2.msra.mxu1 %v4320_v3  ;;  %5388 = vmatprep.subr.mxu0 %v4255_v4  ;;  %v4418_v3 = vld [vmem:[%s7108_s28 + $0x1e60] sm:$0xff]  ;;  %v4353_v4 = vld [vmem:[%s7108_s28 + $0x1c58] sm:$0xff] }
 0x3df   : > { %5459 = vmatprep.subr.mxu1 %v4319_v5  ;;  %5389 = vmatpush2.msra.mxu0 %v4254_v6  ;;  %v4417_v5 = vld [vmem:[%s7108_s28 + $0x1e58] sm:$0xff]  ;;  %v4352_v6 = vld [vmem:[%s7108_s28 + $0x1c50] sm:$0xff] }
 0x3e0   : > { %5460 = vmatpush2.msra.mxu1 %v4318_v7  ;;  %5390 = vmatprep.subr.mxu0 %v4253_v8  ;;  %v4416_v7 = vld [vmem:[%s7108_s28 + $0x1e50] sm:$0xff]  ;;  %v4351_v8 = vld [vmem:[%s7108_s28 + $0x1c48] sm:$0xff] }
 0x3e1   : > { %5461 = vmatprep.subr.mxu1 %v4317_v9  ;;  %5391 = vmatpush2.msra.mxu0 %v4252_v10  ;;  %v4415_v9 = vld [vmem:[%s7108_s28 + $0x1e48] sm:$0xff]  ;;  %v4350_v10 = vld [vmem:[%s7108_s28 + $0x1c40] sm:$0xff] }
 0x3e2   : > { %5462 = vmatpush2.msra.mxu1 %v4316_v11  ;;  %5392 = vmatprep.subr.mxu0 %v4251_v12  ;;  %v4414_v11 = vld [vmem:[%s7108_s28 + $0x1e40] sm:$0xff]  ;;  %v4349_v12 = vld [vmem:[%s7108_s28 + $0x1c38] sm:$0xff] }
 0x3e3   : > { %5463 = vmatprep.subr.mxu1 %v4315_v13  ;;  %5393 = vmatpush2.msra.mxu0 %v4250_v14  ;;  %v4413_v13 = vld [vmem:[%s7108_s28 + $0x1e38] sm:$0xff]  ;;  %v4348_v14 = vld [vmem:[%s7108_s28 + $0x1c30] sm:$0xff] }
 0x3e4   : > { %5464 = vmatpush2.msra.mxu1 %v4314_v15  ;;  %5394 = vmatprep.subr.mxu0 %v4249_v16  ;;  %v4412_v15 = vld [vmem:[%s7108_s28 + $0x1e30] sm:$0xff]  ;;  %v4347_v16 = vld [vmem:[%s7108_s28 + $0x1c28] sm:$0xff] }
 0x3e5   : > { %5465 = vmatprep.subr.mxu1 %v4313_v17  ;;  %5395 = vmatpush2.msra.mxu0 %v4248_v18  ;;  %v4411_v17 = vld [vmem:[%s7108_s28 + $0x1e28] sm:$0xff]  ;;  %v4346_v18 = vld [vmem:[%s7108_s28 + $0x1c20] sm:$0xff] }
 0x3e6   : > { %5466 = vmatpush2.msra.mxu1 %v4312_v19  ;;  %5396 = vmatprep.subr.mxu0 %v4247_v20  ;;  %v4410_v19 = vld [vmem:[%s7108_s28 + $0x1e20] sm:$0xff]  ;;  %v4345_v20 = vld [vmem:[%s7108_s28 + $0x1c18] sm:$0xff] }
 0x3e7   : > { %5467 = vmatprep.subr.mxu1 %v4311_v21  ;;  %5397 = vmatpush2.msra.mxu0 %v4246_v22  ;;  %v4409_v21 = vld [vmem:[%s7108_s28 + $0x1e18] sm:$0xff]  ;;  %v4344_v22 = vld [vmem:[%s7108_s28 + $0x1c10] sm:$0xff] }
 0x3e8   : > { %5398 = vmatprep.mubr.f32.mxu0 %v3439_v23  ;;  %5468 = vmatpush2.msra.mxu1 %v4310_v24  ;;  %v4408_v23 = vld [vmem:[%s7108_s28 + $0x1e10] sm:$0xff]  ;;  %v4343_v24 = vld [vmem:[%s7108_s28 + $0x1c08] sm:$0xff] }
 0x3e9   : > { %5399 = vmatmul.mubr.f32.vlgmr.msra.gmra.mxu0 %v3438_v25  ;;  %5469 = vmatprep.mubr.f32.mxu1 %v3441_v26  ;;  %v4407_v25 = vld [vmem:[%s7108_s28 + $0x1e08] sm:$0xff]  ;;  %v4342_v26 = vld [vmem:[%s7108_s28 + $0x1c00] sm:$0xff] }
 0x3ea   : > { %5476 = vmatprep.subr.mxu0 %v4373_v27  ;;  %5547 = vmatprep.subr.mxu1 %v4437_v28  ;;  %v4406_v27 = vld [vmem:[%s7108_s28 + $0x1e00] sm:$0xff]  ;;  %v4405_v28 = vld [vmem:[%s7108_s28 + $0x1df8] sm:$0xff] }
 0x3eb   : > { %5470 = vmatmul.mubr.f32.vlgmr.msra.gmra.mxu1 %v3440_v29  ;;  %5477 = vmatpush1.msra.mxu0 %v4372_v30  ;;  %v4469_v29 = vld [vmem:[%s7108_s28 + $0x1ff8] sm:$0xff]  ;;  %v4404_v30 = vld [vmem:[%s7108_s28 + $0x1df0] sm:$0xff] }
 0x3ec   : > { %5548 = vmatpush1.msra.mxu1 %v4436_v31  ;;  %5478 = vmatprep.subr.mxu0 %v4371_v32  ;;  %v4468_v31 = vld [vmem:[%s7108_s28 + $0x1ff0] sm:$0xff]  ;;  %v4403_v32 = vld [vmem:[%s7108_s28 + $0x1de8] sm:$0xff] }
 0x3ed   : > { %5549 = vmatprep.subr.mxu1 %v4435_v33  ;;  %5479 = vmatpush1.msra.mxu0 %v4370_v34  ;;  %v4467_v33 = vld [vmem:[%s7108_s28 + $0x1fe8] sm:$0xff]  ;;  %v4402_v34 = vld [vmem:[%s7108_s28 + $0x1de0] sm:$0xff] }
 0x3ee   : > { %5550 = vmatpush1.msra.mxu1 %v4434_v35  ;;  %5480 = vmatprep.subr.mxu0 %v4369_v36  ;;  %v4466_v35 = vld [vmem:[%s7108_s28 + $0x1fe0] sm:$0xff]  ;;  %v4401_v36 = vld [vmem:[%s7108_s28 + $0x1dd8] sm:$0xff] }
 0x3ef   : > { %5551 = vmatprep.subr.mxu1 %v4433_v37  ;;  %5481 = vmatpush1.msra.mxu0 %v4368_v38  ;;  %v4465_v37 = vld [vmem:[%s7108_s28 + $0x1fd8] sm:$0xff]  ;;  %v4400_v38 = vld [vmem:[%s7108_s28 + $0x1dd0] sm:$0xff] }
 0x3f0   : > { %5552 = vmatpush1.msra.mxu1 %v4432_v39  ;;  %5482 = vmatprep.subr.mxu0 %v4367_v40  ;;  %v4464_v39 = vld [vmem:[%s7108_s28 + $0x1fd0] sm:$0xff]  ;;  %v4399_v40 = vld [vmem:[%s7108_s28 + $0x1dc8] sm:$0xff] }
 0x3f1   : > { %5553 = vmatprep.subr.mxu1 %v4431_v41  ;;  %5483 = vmatpush1.msra.mxu0 %v4366_v42  ;;  %v4463_v41 = vld [vmem:[%s7108_s28 + $0x1fc8] sm:$0xff]  ;;  %v4398_v42 = vld [vmem:[%s7108_s28 + $0x1dc0] sm:$0xff] }
 0x3f2   : > { %5554 = vmatpush1.msra.mxu1 %v4430_v43  ;;  %5484 = vmatprep.subr.mxu0 %v4365_v44  ;;  %v4462_v43 = vld [vmem:[%s7108_s28 + $0x1fc0] sm:$0xff]  ;;  %v4397_v44 = vld [vmem:[%s7108_s28 + $0x1db8] sm:$0xff] }
 0x3f3   : > { %5555 = vmatprep.subr.mxu1 %v4429_v45  ;;  %5485 = vmatpush1.msra.mxu0 %v4364_v46  ;;  %v4461_v45 = vld [vmem:[%s7108_s28 + $0x1fb8] sm:$0xff]  ;;  %v4396_v46 = vld [vmem:[%s7108_s28 + $0x1db0] sm:$0xff] }
 0x3f4   : > { %5556 = vmatpush1.msra.mxu1 %v4428_v47  ;;  %5486 = vmatprep.subr.mxu0 %v4363_v48  ;;  %v4460_v47 = vld [vmem:[%s7108_s28 + $0x1fb0] sm:$0xff]  ;;  %v4395_v48 = vld [vmem:[%s7108_s28 + $0x1da8] sm:$0xff] }
 0x3f5   : > { %5557 = vmatprep.subr.mxu1 %v4427_v49  ;;  %5487 = vmatpush1.msra.mxu0 %v4362_v50  ;;  %v4459_v49 = vld [vmem:[%s7108_s28 + $0x1fa8] sm:$0xff]  ;;  %v4394_v50 = vld [vmem:[%s7108_s28 + $0x1da0] sm:$0xff] }
 0x3f6   : > { %5558 = vmatpush1.msra.mxu1 %v4426_v51  ;;  %5488 = vmatprep.subr.mxu0 %v4361_v52  ;;  %v4458_v51 = vld [vmem:[%s7108_s28 + $0x1fa0] sm:$0xff]  ;;  %v4393_v52 = vld [vmem:[%s7108_s28 + $0x1d98] sm:$0xff] }
 0x3f7   : > { %5559 = vmatprep.subr.mxu1 %v4425_v53  ;;  %5489 = vmatpush1.msra.mxu0 %v4360_v54  ;;  %v4457_v53 = vld [vmem:[%s7108_s28 + $0x1f98] sm:$0xff]  ;;  %v4392_v54 = vld [vmem:[%s7108_s28 + $0x1d90] sm:$0xff] }
 0x3f8   : > { %5560 = vmatpush1.msra.mxu1 %v4424_v55  ;;  %5490 = vmatprep.subr.mxu0 %v4359_v56  ;;  %v4456_v55 = vld [vmem:[%s7108_s28 + $0x1f90] sm:$0xff]  ;;  %v4391_v56 = vld [vmem:[%s7108_s28 + $0x1d88] sm:$0xff] }
 0x3f9   : > { %5561 = vmatprep.subr.mxu1 %v4423_v57  ;;  %5491 = vmatpush1.msra.mxu0 %v4358_v58  ;;  %v4455_v57 = vld [vmem:[%s7108_s28 + $0x1f88] sm:$0xff]  ;;  %v4390_v58 = vld [vmem:[%s7108_s28 + $0x1d80] sm:$0xff] }
 0x3fa   : > { %5562 = vmatpush1.msra.mxu1 %v4422_v59  ;;  %5492 = vmatprep.subr.mxu0 %v4357_v60  ;;  %v4454_v59 = vld [vmem:[%s7108_s28 + $0x1f80] sm:$0xff]  ;;  %v4389_v60 = vld [vmem:[%s7108_s28 + $0x1d78] sm:$0xff] }
 0x3fb   : > { %5563 = vmatprep.subr.mxu1 %v4421_v61  ;;  %5493 = vmatpush1.msra.mxu0 %v4356_v62  ;;  %v4453_v61 = vld [vmem:[%s7108_s28 + $0x1f78] sm:$0xff]  ;;  %v4388_v62 = vld [vmem:[%s7108_s28 + $0x1d70] sm:$0xff] }
 0x3fc   : > { %5564 = vmatpush1.msra.mxu1 %v4420_v63  ;;  %5494 = vmatprep.subr.mxu0 %v4355_v0  ;;  %v4452_v63 = vld [vmem:[%s7108_s28 + $0x1f70] sm:$0xff]  ;;  %v4387_v0 = vld [vmem:[%s7108_s28 + $0x1d68] sm:$0xff] }
 0x3fd   : > { %5565 = vmatprep.subr.mxu1 %v4419_v1  ;;  %5495 = vmatpush1.msra.mxu0 %v4354_v2  ;;  %v4451_v1 = vld [vmem:[%s7108_s28 + $0x1f68] sm:$0xff]  ;;  %v4386_v2 = vld [vmem:[%s7108_s28 + $0x1d60] sm:$0xff] }
 0x3fe   : > { %5566 = vmatpush1.msra.mxu1 %v4418_v3  ;;  %5496 = vmatprep.subr.mxu0 %v4353_v4  ;;  %v4450_v3 = vld [vmem:[%s7108_s28 + $0x1f60] sm:$0xff]  ;;  %v4385_v4 = vld [vmem:[%s7108_s28 + $0x1d58] sm:$0xff] }
 0x3ff   : > { %5567 = vmatprep.subr.mxu1 %v4417_v5  ;;  %5497 = vmatpush1.msra.mxu0 %v4352_v6  ;;  %v4449_v5 = vld [vmem:[%s7108_s28 + $0x1f58] sm:$0xff]  ;;  %v4384_v6 = vld [vmem:[%s7108_s28 + $0x1d50] sm:$0xff] }
 0x400   : > { %5568 = vmatpush1.msra.mxu1 %v4416_v7  ;;  %5498 = vmatprep.subr.mxu0 %v4351_v8  ;;  %v4448_v7 = vld [vmem:[%s7108_s28 + $0x1f50] sm:$0xff]  ;;  %v4383_v8 = vld [vmem:[%s7108_s28 + $0x1d48] sm:$0xff] }
 0x401   : > { %5569 = vmatprep.subr.mxu1 %v4415_v9  ;;  %5499 = vmatpush1.msra.mxu0 %v4350_v10  ;;  %v4447_v9 = vld [vmem:[%s7108_s28 + $0x1f48] sm:$0xff]  ;;  %v4382_v10 = vld [vmem:[%s7108_s28 + $0x1d40] sm:$0xff] }
 0x402   : > { %5570 = vmatpush1.msra.mxu1 %v4414_v11  ;;  %5500 = vmatprep.subr.mxu0 %v4349_v12  ;;  %v4446_v11 = vld [vmem:[%s7108_s28 + $0x1f40] sm:$0xff]  ;;  %v4381_v12 = vld [vmem:[%s7108_s28 + $0x1d38] sm:$0xff] }
 0x403   : > { %5571 = vmatprep.subr.mxu1 %v4413_v13  ;;  %5501 = vmatpush1.msra.mxu0 %v4348_v14  ;;  %v4445_v13 = vld [vmem:[%s7108_s28 + $0x1f38] sm:$0xff]  ;;  %v4380_v14 = vld [vmem:[%s7108_s28 + $0x1d30] sm:$0xff] }
 0x404   : > { %5572 = vmatpush1.msra.mxu1 %v4412_v15  ;;  %5502 = vmatprep.subr.mxu0 %v4347_v16  ;;  %v4444_v15 = vld [vmem:[%s7108_s28 + $0x1f30] sm:$0xff]  ;;  %v4379_v16 = vld [vmem:[%s7108_s28 + $0x1d28] sm:$0xff] }
 0x405   : > { %5573 = vmatprep.subr.mxu1 %v4411_v17  ;;  %5503 = vmatpush1.msra.mxu0 %v4346_v18  ;;  %v4443_v17 = vld [vmem:[%s7108_s28 + $0x1f28] sm:$0xff]  ;;  %v4378_v18 = vld [vmem:[%s7108_s28 + $0x1d20] sm:$0xff] }
 0x406   : > { %5574 = vmatpush1.msra.mxu1 %v4410_v19  ;;  %5504 = vmatprep.subr.mxu0 %v4345_v20  ;;  %v4442_v19 = vld [vmem:[%s7108_s28 + $0x1f20] sm:$0xff]  ;;  %v4377_v20 = vld [vmem:[%s7108_s28 + $0x1d18] sm:$0xff] }
 0x407   : > { %5575 = vmatprep.subr.mxu1 %v4409_v21  ;;  %5505 = vmatpush1.msra.mxu0 %v4344_v22  ;;  %v4441_v21 = vld [vmem:[%s7108_s28 + $0x1f18] sm:$0xff]  ;;  %v4376_v22 = vld [vmem:[%s7108_s28 + $0x1d10] sm:$0xff] }
 0x408   : > { %5576 = vmatpush1.msra.mxu1 %v4408_v23  ;;  %5506 = vmatprep.subr.mxu0 %v4343_v24  ;;  %v4440_v23 = vld [vmem:[%s7108_s28 + $0x1f10] sm:$0xff]  ;;  %v4375_v24 = vld [vmem:[%s7108_s28 + $0x1d08] sm:$0xff] }
 0x409   : > { %5577 = vmatprep.subr.mxu1 %v4407_v25  ;;  %5507 = vmatpush1.msra.mxu0 %v4342_v26  ;;  %v4439_v25 = vld [vmem:[%s7108_s28 + $0x1f08] sm:$0xff]  ;;  %v4374_v26 = vld [vmem:[%s7108_s28 + $0x1d00] sm:$0xff] }
 0x40a   : > { %5578 = vmatpush1.msra.mxu1 %v4406_v27  ;;  %5508 = vmatprep.subr.mxu0 %v4405_v28  ;;  %v3443_v27 = vld [vmem:[%s8278_s0 + $0xe8] sm:$0xff]  ;;  %v4438_v28 = vld [vmem:[%s7108_s28 + $0x1f00] sm:$0xff]  ;;  %s5834_s28 = sshll.u32 %s5823_s21, 1 }
 0x40b   : > { %5579 = vmatprep.subr.mxu1 %v4469_v29  ;;  %5509 = vmatpush2.msra.mxu0 %v4404_v30  ;;  %v3445_v29 = vld [vmem:[%s8278_s0 + $0xf8] sm:$0xff]  ;;  %v3442_v30 = vld [vmem:[%s8278_s0 + $0xe0] sm:$0xff]  ;;  %p3394_p10 = scmp.lt.s32.totalorder %s5834_s28, 3 }
 0x40c   : > { %5580 = vmatpush2.msra.mxu1 %v4468_v31  ;;  %5510 = vmatprep.subr.mxu0 %v4403_v32  ;;  %v3444_v31 = vld [vmem:[%s8278_s0 + $0xf0] sm:$0xff]  ;;  %v4472_v32 = vlaneseq }
 0x40d   : > { %5581 = vmatprep.subr.mxu1 %v4467_v33  ;;  %5511 = vmatpush2.msra.mxu0 %v4402_v34  ;;  %s8295_s28 = smov (!%p3394_p10, %s5834_s28), 3 }
 0x40e   : > { %5582 = vmatpush2.msra.mxu1 %v4466_v35  ;;  %5512 = vmatprep.subr.mxu0 %v4401_v36  ;;  %v8228_v33 = vshrl.u32 %v4472_v32, 7  ;;  %s3396_s8 = scalar_lea.vmem %s8280_s2, %s8295_s28  ;;  %s3401_s9 = scalar_lea.vmem %s8281_s3, %s8295_s28 }
 0x40f   : > { %5583 = vmatprep.subr.mxu1 %v4465_v37  ;;  %5513 = vmatpush2.msra.mxu0 %v4400_v38  ;;  %v4470_v35 = vld [vmem:[%s3396_s8] sm:$0x3]  ;;  %v4548_v37 = vpop.f32.mrf.mxu0  ;;  %s3406_s12 = scalar_lea.vmem %s8282_s4, %s8295_s28  ;;  %s5838_s13 = sshll.u32 %s8295_s28, 3 }
 0x410   : > { %5584 = vmatpush2.msra.mxu1 %v4464_v39  ;;  %5514 = vmatprep.subr.mxu0 %v4399_v40  ;;  %v8235_v34 = vsub.s32 0, %v8228_v33  ;;  %v8238_v36 = vsub.s32 1, %v8228_v33  ;;  %v4619_v40 = vpop.f32.mrf.mxu1  ;;  %vm5626_vm1 = vcmp.lt.s32.totalorder %v8228_v33, 2  ;;  %s3412_s16 = scalar_lea.vmem %s8283_s5, %s5838_s13 }
 0x411   : > { %5585 = vmatprep.subr.mxu1 %v4463_v41  ;;  %5515 = vmatpush2.msra.mxu0 %v4398_v42  ;;  %v4550_v41 = vpop.f32.mrf.mxu0 }
 0x412   : > { %5586 = vmatpush2.msra.mxu1 %v4462_v43  ;;  %5516 = vmatprep.subr.mxu0 %v4397_v44  ;;  %v4475_v38 = vrot.slane %v4470_v35, %v8235_v34  ;;  %v4479_v39 = vrot.slane %v4470_v35, %v8238_v36 }
 0x413   : > { %5587 = vmatprep.subr.mxu1 %v4461_v45  ;;  %5517 = vmatpush2.msra.mxu0 %v4396_v46  ;;  %v4690_v43 = vpop.f32.mrf.mxu0  ;;  %v4621_v45 = vpop.f32.mrf.mxu1 }
 0x414   : > { %5588 = vmatpush2.msra.mxu1 %v4460_v47  ;;  %5518 = vmatprep.subr.mxu0 %v4395_v48  ;;  %v4549_v42 = vadd.f32 %v4548_v37, %v4475_v38  ;;  %v4551_v44 = vadd.f32 %v4550_v41, %v4479_v39 }
 0x415   : > { %5589 = vmatprep.subr.mxu1 %v4459_v49  ;;  %5519 = vmatpush2.msra.mxu0 %v4394_v50  ;;  %v4761_v47 = vpop.f32.mrf.mxu1  ;;  %v4692_v48 = vpop.f32.mrf.mxu0 }
 0x416   : > { %5590 = vmatpush2.msra.mxu1 %v4458_v51  ;;  %5520 = vmatprep.subr.mxu0 %v4393_v52  ;;  %v4620_v46 = vadd.f32 %v4619_v40, %v4549_v42  ;;  %v4622_v49 = vadd.f32 %v4621_v45, %v4551_v44 }
 0x417   : > { %5591 = vmatprep.subr.mxu1 %v4457_v53  ;;  %5521 = vmatpush2.msra.mxu0 %v4392_v54  ;;  %v4832_v51 = vpop.f32.mrf.mxu0  ;;  %v4763_v53 = vpop.f32.mrf.mxu1 }
 0x418   : > { %5592 = vmatpush2.msra.mxu1 %v4456_v55  ;;  %5522 = vmatprep.subr.mxu0 %v4391_v56  ;;  %v4691_v50 = vadd.f32 %v4690_v43, %v4620_v46  ;;  %v4693_v52 = vadd.f32 %v4692_v48, %v4622_v49 }
 0x419   : > { %5593 = vmatprep.subr.mxu1 %v4455_v57  ;;  %5523 = vmatpush2.msra.mxu0 %v4390_v58  ;;  %v4903_v55 = vpop.f32.mrf.mxu1  ;;  %v4834_v56 = vpop.f32.mrf.mxu0 }
 0x41a   : > { %5594 = vmatpush2.msra.mxu1 %v4454_v59  ;;  %5524 = vmatprep.subr.mxu0 %v4389_v60  ;;  %v4762_v54 = vadd.f32 %v4761_v47, %v4691_v50  ;;  %v4764_v57 = vadd.f32 %v4763_v53, %v4693_v52 }
 0x41b   : > { %5595 = vmatprep.subr.mxu1 %v4453_v61  ;;  %5525 = vmatpush2.msra.mxu0 %v4388_v62  ;;  %v4974_v59 = vpop.f32.mrf.mxu0  ;;  %v4905_v61 = vpop.f32.mrf.mxu1 }
 0x41c   : > { %5596 = vmatpush2.msra.mxu1 %v4452_v63  ;;  %5526 = vmatprep.subr.mxu0 %v4387_v0  ;;  %v4833_v58 = vadd.f32 %v4832_v51, %v4762_v54  ;;  %v4835_v60 = vadd.f32 %v4834_v56, %v4764_v57 }
 0x41d   : > { %5597 = vmatprep.subr.mxu1 %v4451_v1  ;;  %5527 = vmatpush2.msra.mxu0 %v4386_v2  ;;  %v5045_v63 = vpop.f32.mrf.mxu1  ;;  %v4976_v0 = vpop.f32.mrf.mxu0 }
 0x41e   : > { %5598 = vmatpush2.msra.mxu1 %v4450_v3  ;;  %5528 = vmatprep.subr.mxu0 %v4385_v4  ;;  %v4904_v62 = vadd.f32 %v4903_v55, %v4833_v58  ;;  %v4906_v1 = vadd.f32 %v4905_v61, %v4835_v60 }
 0x41f   : > { %5599 = vmatprep.subr.mxu1 %v4449_v5  ;;  %5529 = vmatpush2.msra.mxu0 %v4384_v6  ;;  %v5047_v5 = vpop.f32.mrf.mxu1 }
 0x420   : > { %5600 = vmatpush2.msra.mxu1 %v4448_v7  ;;  %5530 = vmatprep.subr.mxu0 %v4383_v8  ;;  %v4975_v2 = vadd.f32 %v4974_v59, %v4904_v62  ;;  %v4977_v4 = vadd.f32 %v4976_v0, %v4906_v1 }
 0x421   : > { %5601 = vmatprep.subr.mxu1 %v4447_v9  ;;  %5531 = vmatpush2.msra.mxu0 %v4382_v10 }
 0x422   : > { %5602 = vmatpush2.msra.mxu1 %v4446_v11  ;;  %5532 = vmatprep.subr.mxu0 %v4381_v12  ;;  %v5046_v6 = vadd.f32 %v5045_v63, %v4975_v2  ;;  %v5048_v9 = vadd.f32 %v5047_v5, %v4977_v4 }
 0x423   : > { %5603 = vmatprep.subr.mxu1 %v4445_v13  ;;  %5533 = vmatpush2.msra.mxu0 %v4380_v14 }
 0x424   : > { %5604 = vmatpush2.msra.mxu1 %v4444_v15  ;;  %5534 = vmatprep.subr.mxu0 %v4379_v16 }
 0x425   : > { %5605 = vmatprep.subr.mxu1 %v4443_v17  ;;  %5535 = vmatpush2.msra.mxu0 %v4378_v18  ;;  %v5116_v3 = vpop.f32.mrf.mxu0 }
 0x426   : > { %5606 = vmatpush2.msra.mxu1 %v4442_v19  ;;  %5536 = vmatprep.subr.mxu0 %v4377_v20  ;;  %v5117_v10 = vadd.f32 %v5116_v3, %v5046_v6 }
 0x427   : > { %5607 = vmatprep.subr.mxu1 %v4441_v21  ;;  %5537 = vmatpush2.msra.mxu0 %v4376_v22  ;;  %v5187_v7 = vpop.f32.mrf.mxu1  ;;  %v5118_v8 = vpop.f32.mrf.mxu0 }
 0x428   : > { %5608 = vmatpush2.msra.mxu1 %v4440_v23  ;;  %5538 = vmatprep.subr.mxu0 %v4375_v24  ;;  %v5119_v12 = vadd.f32 %v5118_v8, %v5048_v9  ;;  %v5188_v14 = vadd.f32 %v5187_v7, %v5117_v10 }
 0x429   : > { %5609 = vmatprep.subr.mxu1 %v4439_v25  ;;  %5539 = vmatpush2.msra.mxu0 %v4374_v26  ;;  %v5189_v13 = vpop.f32.mrf.mxu1 }
 0x42a   : > { %5540 = vmatprep.mubr.f32.mxu0 %v3443_v27  ;;  %5610 = vmatpush2.msra.mxu1 %v4438_v28  ;;  %v5190_v17 = vadd.f32 %v5189_v13, %v5119_v12 }
 0x42b   : > { %5611 = vmatprep.mubr.f32.mxu1 %v3445_v29  ;;  %5541 = vmatmul.mubr.f32.vlgmr.msra.gmra.mxu0 %v3442_v30 }
 0x42c   : > { %5612 = vmatmul.mubr.f32.vlgmr.msra.gmra.mxu1 %v3444_v31 }
 0x467   : > { %v5258_v11 = vpop.f32.mrf.mxu0 }
 0x468   : > { %v5259_v18 = vadd.f32 %v5258_v11, %v5188_v14 }
 0x469   : > { %v5329_v15 = vpop.f32.mrf.mxu1  ;;  %v5260_v16 = vpop.f32.mrf.mxu0 }
 0x46a   : > { %v5261_v20 = vadd.f32 %v5260_v16, %v5190_v17  ;;  %v5330_v22 = vadd.f32 %v5329_v15, %v5259_v18 }
 0x46b   : > { %v5331_v21 = vpop.f32.mrf.mxu1 }
 0x46c   : > { %v5332_v25 = vadd.f32 %v5331_v21, %v5261_v20  ;;  %v5959_v20 = vmov 1966171168  }
 0x46d   : > { %v5672_v21 = vunpack.c.l.s4 %v5959_v20 }
 0x4a9   : > { %v5400_v19 = vpop.f32.mrf.mxu0 }
 0x4aa   : > { %v5401_v26 = vadd.f32 %v5400_v19, %v5330_v22  ;;  %v5673_v22 = vunpack.c.0.s8 %v5672_v21 }
 0x4ab   : > { %v5471_v23 = vpop.f32.mrf.mxu1  ;;  %v5402_v24 = vpop.f32.mrf.mxu0 }
 0x4ac   : > { %v5403_v27 = vadd.f32 %v5402_v24, %v5332_v25  ;;  %v5472_v29 = vadd.f32 %v5471_v23, %v5401_v26  ;;  %v5676_v24 = vsub.s32 %v5673_v22, %v8228_v33 }
 0x4ad   : > { %v5473_v28 = vpop.f32.mrf.mxu1 }
 0x4ae   : > { %v5474_v32 = vadd.f32 %v5473_v28, %v5403_v27  ;;  %v5663_v28 = vld [vmem:[%s3401_s9] sm:$0x3] }
 0x4eb   : > { %v5542_v30 = vpop.f32.mrf.mxu0 }
 0x4ec   : > { %v5613_v31 = vpop.f32.mrf.mxu1  ;;  %v5543_v35 = vadd.f32 %v5542_v30, %v5472_v29  ;;  %v5700_v30 = vld [vmem:[%s3406_s12] sm:$0x3] }
 0x4ed   : > { %v5544_v37 = vpop.f32.mrf.mxu0 }
 0x4ee   : > { %v5614_v38 = vadd.f32 %v5613_v31, %v5543_v35  ;;  %v5545_v39 = vadd.f32 %v5544_v37, %v5474_v32  ;;  %v5615_v40 = vpop.f32.mrf.mxu1  ;;  %v5705_v32 = vrot.slane %v5700_v30, %v8235_v34  ;;  %v5709_v35 = vrot.slane %v5700_v30, %v8238_v36 }
 0x4f0   : > { %vm5618_vm0 = vcmp.ge.f32.partialorder %v5614_v38, 0.0  ;;  %v5620_v41 = vmul.f32 0.2, %v5614_v38  ;;  %v5616_v42 = vadd.f32 %v5615_v40, %v5545_v39 }
 0x4f2   : > { %v5622_v43 = vsel %vm5618_vm0, %v5614_v38, %v5620_v41  ;;  %vm5619_vm2 = vcmp.ge.f32.partialorder %v5616_v42, 0.0  ;;  %v5621_v44 = vmul.f32 0.2, %v5616_v42 }
 0x4f3   : > { %v5627_v45 = vsel %vm5626_vm1, %v5622_v43, 0.0 }
 0x4f4   : > { %v5629_v46 = vrot.slane %v5627_v45, 4  ;;  %v5623_v47 = vsel %vm5619_vm2, %v5616_v42, %v5621_v44 }
 0x4f5   : > { %v5628_v48 = vsel %vm5626_vm1, %v5623_v47, 0.0 }
 0x4f6   : > { %v5630_v49 = vadd.f32 %v5629_v46, %v5627_v45  ;;  %v5635_v50 = vrot.slane %v5628_v48, 4 }
 0x4f8   : > { %v5631_v51 = vrot.slane %v5630_v49, 2  ;;  %v5636_v52 = vadd.f32 %v5635_v50, %v5628_v48 }
 0x4fa   : > { %v5632_v53 = vadd.f32 %v5631_v51, %v5630_v49  ;;  %v5637_v54 = vrot.slane %v5636_v52, 2 }
 0x4fc   : > { %v5633_v55 = vrot.slane %v5632_v53, 1  ;;  %v5638_v56 = vadd.f32 %v5637_v54, %v5636_v52 }
 0x4fe   : > { %v5634_v57 = vadd.f32 %v5633_v55, %v5632_v53  ;;  %v5639_v58 = vrot.slane %v5638_v56, 1 }
 0x500   : > { %v5641_v59 = vmul.f32 0.5, %v5634_v57  ;;  %v5640_v60 = vadd.f32 %v5639_v58, %v5638_v56 }
 0x502   : > { %v5643_v61 = vsub.f32 %v5622_v43, %v5641_v59  ;;  %v5642_v62 = vmul.f32 0.5, %v5640_v60 }
 0x504   : > { %v5645_v63 = vsel %vm5626_vm1, %v5643_v61, 0.0  ;;  %v5644_v0 = vsub.f32 %v5623_v47, %v5642_v62 }
 0x505   : > { %v5647_v1 = vmul.f32 %v5645_v63, %v5645_v63 }
 0x506   : > { %v5646_v2 = vsel %vm5626_vm1, %v5644_v0, 0.0 }
 0x507   : > { %v5649_v3 = vrot.slane %v5647_v1, 4  ;;  %v5648_v4 = vmul.f32 %v5646_v2, %v5646_v2 }
 0x509   : > { %v5650_v5 = vadd.f32 %v5649_v3, %v5647_v1  ;;  %v5655_v6 = vrot.slane %v5648_v4, 4 }
 0x50b   : > { %v5651_v7 = vrot.slane %v5650_v5, 2  ;;  %v5656_v8 = vadd.f32 %v5655_v6, %v5648_v4 }
 0x50d   : > { %v5652_v9 = vadd.f32 %v5651_v7, %v5650_v5  ;;  %v5657_v10 = vrot.slane %v5656_v8, 2 }
 0x50f   : > { %v5653_v11 = vrot.slane %v5652_v9, 1  ;;  %v5658_v12 = vadd.f32 %v5657_v10, %v5656_v8 }
 0x511   : > { %v5654_v13 = vadd.f32 %v5653_v11, %v5652_v9  ;;  %v5659_v14 = vrot.slane %v5658_v12, 1 }
 0x513   : > { %v5661_v15 = vmul.f32 0.5, %v5654_v13  ;;  %v5660_v16 = vadd.f32 %v5659_v14, %v5658_v12 }
 0x515   : > { %v5664_v17 = vadd.f32 1e-05, %v5661_v15  ;;  %v5662_v18 = vmul.f32 0.5, %v5660_v16 }
 0x517   : > { %v5665_v19 = vadd.f32 1e-05, %v5662_v18  ;;  %5899 = vrsqrt.f32 %v5664_v17 }
 0x519   : > { %5901 = vrsqrt.f32 %v5665_v19 }
 0x524   : > { %v5900_v23 = vpop.eup %5899 }
 0x526   : > { %v5902_v25 = vpop.eup %5901 }
 0x527   : > { %v5670_v26 = vcombine.low %v5900_v23, %v5902_v25 }
 0x529   : > { %v5677_v27 = vrot.slane %v5670_v26, %v5676_v24 }
 0x52b   : > { %v5684_v29 = vrot.slane %v5677_v27, %v5676_v24 }
 0x52d   : > { %v5686_v31 = vmul.f32 %v5684_v29, %v5663_v28 }
 0x52f   : > { %v5691_v33 = vrot.slane %v5686_v31, %v8235_v34  ;;  %v5695_v37 = vrot.slane %v5686_v31, %v8238_v36 }
 0x531   : > { %v5698_v38 = vmul.f32 %v5691_v33, %v5643_v61  ;;  %v5699_v39 = vmul.f32 %v5695_v37, %v5644_v0 }
 0x533   : > { %v5712_v40 = vadd.f32 %v5705_v32, %v5698_v38  ;;  %v5713_v41 = vadd.f32 %v5709_v35, %v5699_v39 }
 0x535   : > { %5714 = vst [vmem:[%s3412_s16] sm:$0xff] %v5712_v40  ;;  %5715 = vst [vmem:[%s3412_s16 + $0x8] sm:$0xff] %v5713_v41 }
 0x536 PF: > { %p12_p11 = scmp.ge.s32.totalorder %s6007_s22, 4   ;;  %s8289_s18 = smov %s5937_s19 }
 0x537   : > { %s8290_s19 = smov %s6016_s25  ;;  %s8291_s20 = smov %s6007_s22 }
 0x538   :  { %14 = sbr.rel (!%p12_p11) target bundleno = 2 (0x2), region = 134 }

</bundles_post_ra>
